<compile_context>
chip_gen: v7x
topology: tpu7x:2x2x1
jax: 0.10.0
libtpu: 0.0.40
codegen_flags: <defaults>
</compile_context>

<pallas_src>
import functools

import numpy as np
import jax
import jax.numpy as jnp
from jax.experimental import pallas as pl
from jax.experimental.pallas import tpu as pltpu


# --------------------------------------------------------------------------- #
# Host-side constant builders (numpy, static shapes)
# --------------------------------------------------------------------------- #
def _interp_matrix_1d(lin):
    """1-D linear-interpolation matrix, scale_factor=2, align_corners=True."""
    lout = 2 * lin
    m = np.zeros((lout, lin), dtype=np.float32)
    if lin == 1:
        m[:, 0] = 1.0
        return m
    scale = (lin - 1) / (lout - 1)
    for i in range(lout):
        src = i * scale
        f = min(int(np.floor(src)), lin - 1)
        c = min(f + 1, lin - 1)
        w = src - f
        m[i, f] += 1.0 - w
        m[i, c] += w
    return m


def _upsample_matrix(d, h, w):
    """(d*h*w, D*H*W) matrix M with  up(x)[c, P] = sum_p x[c, p] * M[p, P]."""
    md, mh, mw = _interp_matrix_1d(d), _interp_matrix_1d(h), _interp_matrix_1d(w)
    up = np.kron(md, np.kron(mh, mw))        # (D*H*W, d*h*w)
    return np.ascontiguousarray(up.T)        # (d*h*w, D*H*W)


def _boundary_masks(D, H, W, ccat):
    """(27, ccat, R) 0/1 masks implementing padding=1 for the flattened layout."""
    R = D * H * W
    p = np.arange(R)
    dd, hh, ww = p // (H * W), (p // W) % H, p % W
    masks = np.empty((27, R), np.float32)
    t = 0
    for kd in (-1, 0, 1):
        for kh in (-1, 0, 1):
            for kw in (-1, 0, 1):
                m = np.ones(R, dtype=bool)
                if kd == -1: m &= dd >= 1
                if kd == +1: m &= dd <= D - 2
                if kh == -1: m &= hh >= 1
                if kh == +1: m &= hh <= H - 2
                if kw == -1: m &= ww >= 1
                if kw == +1: m &= ww <= W - 2
                masks[t] = m.astype(np.float32)
                t += 1
    return np.ascontiguousarray(np.broadcast_to(masks[:, None, :], (27, ccat, R)))


# --------------------------------------------------------------------------- #
# Weight packing (wrapper-side, traced under jit)
# --------------------------------------------------------------------------- #
def _pack_conv3(w, ci_total):
    """(co, ci, 3,3,3) -> (co, 27*ci_total); tap-major (kd,kh,kw), then channel.

    Channels are zero-padded to ci_total so every conv uses the same K layout.
    """
    co, ci = w.shape[:2]
    if ci < ci_total:
        w = jnp.pad(w, ((0, 0), (0, ci_total - ci), (0, 0), (0, 0), (0, 0)))
    return jnp.transpose(w, (0, 2, 3, 4, 1)).reshape(co, 27 * ci_total)


def _pack_conv1_as_center_tap(ws, ci_total):
    """(co, ci) 1x1x1 weights placed at the centre tap (t=13) of a 27*ci_total row."""
    co, ci = ws.shape
    out = jnp.zeros((co, 27 * ci_total), ws.dtype)
    return out.at[:, 13 * ci_total:13 * ci_total + ci].set(ws)


# --------------------------------------------------------------------------- #
# Fused kernel: upsample + concat + 4x conv3x3x3 (+ 2 folded 1x1x1 skips)
# --------------------------------------------------------------------------- #
def _combination_kernel(xl_ref, xh_ref, up_ref, mask_ref,
                        w1_ref, b1_ref, w2_ref, b2_ref,
                        w3_ref, b3_ref, w4_ref, b4_ref,
                        o_ref, xstage_ref, im2col_ref,
                        *, D, H, W, cl, ch, padl):
    R = D * H * W
    ccat = cl + ch
    bf = jnp.bfloat16

    # Zero only the halo columns.  Masked taps read (then zero via the 0-mask)
    # these columns; keeping them finite guarantees 0 * halo == 0 (no stale
    # NaN/Inf from previous kernels).
    xstage_ref[:, :padl] = jnp.zeros((ccat, padl), bf)
    xstage_ref[:, padl + R:] = jnp.zeros((ccat, padl), bf)

    # ---- fused trilinear upsample on the MXU: (ch, r) @ (r, R) -------------
    xh_up = jnp.dot(xh_ref[0], up_ref[...], preferred_element_type=jnp.float32)

    # ---- concat([x_low, up(x_high)], channel) staged once as bf16 ----------
    xstage_ref[:, padl:padl + R] = jnp.concatenate(
        [xl_ref[0], xh_up], axis=0).astype(bf)

    taps = [(kd, kh, kw) for kd in (-1, 0, 1) for kh in (-1, 0, 1) for kw in (-1, 0, 1)]

    def build_im2col():
        # 27 shifted, boundary-masked copies of the staged activation.
        # Shifts are static lane offsets read directly from the ref; the 0/1
        # masks fold the padding=1 semantics into the copy, so the single big
        # matmul needs no per-tap selects or accumulator adds.
        for t, (kd, kh, kw) in enumerate(taps):
            start = padl + kd * H * W + kh * W + kw
            chunk = xstage_ref[:, start:start + R]
            if (kd, kh, kw) != (0, 0, 0):          # centre tap mask is all-ones
                chunk = chunk * mask_ref[t]
            im2col_ref[t * ccat:(t + 1) * ccat, :] = chunk

    def conv(w_ref, b_ref):
        # One K-stacked MXU matmul: (cout, 27*ccat) @ (27*ccat, R), f32 accum.
        build_im2col()
        return jnp.dot(w_ref[...], im2col_ref[...],
                       preferred_element_type=jnp.float32) + b_ref[...]

    def stage(act_f32):
        # Re-stage a (cl, R) activation; pad channels to ccat with zeros so the
        # store stays a full 16-row packed-bf16 tile at an aligned lane offset.
        xstage_ref[:, padl:padl + R] = jnp.concatenate(
            [act_f32, jnp.zeros((ccat - cl, R), jnp.float32)], axis=0).astype(bf)

    # ---- residual unit 1 (1x1x1 skip conv folded into rows cl:2cl of w1) ----
    y = conv(w1_ref, b1_ref)                       # (2*cl, R)
    a, s1 = jnp.maximum(y[:cl], 0.0), y[cl:]
    stage(a)
    o1 = jnp.maximum(conv(w2_ref, b2_ref) + s1, 0.0)

    # ---- residual unit 2 (skip folded into w3) ------------------------------
    stage(o1)
    y = conv(w3_ref, b3_ref)                       # (2*cl, R)
    c, s2 = jnp.maximum(y[:cl], 0.0), y[cl:]
    stage(c)
    o2 = jnp.maximum(conv(w4_ref, b4_ref) + s2, 0.0)

    o_ref[0] = o2.astype(o_ref.dtype)


def _const_spec(shape):
    nd = len(shape)
    return pl.BlockSpec(shape, lambda n: (0,) * nd)


# --------------------------------------------------------------------------- #
# Parameters + forward pass
# --------------------------------------------------------------------------- #
def init_params(key, low_channels, high_channels):
    """Weights for the (assumed) ResFourLayerConvBlock, PyTorch-style shapes."""
    cin = low_channels + high_channels
    cl = low_channels
    ks = jax.random.split(key, 6)

    def conv3(k, ci, co):
        return 0.05 * jax.random.normal(k, (co, ci, 3, 3, 3), jnp.float32)

    def conv1(k, ci, co):
        return 0.05 * jax.random.normal(k, (co, ci), jnp.float32)

    def zeros(c):
        return jnp.zeros((c,), jnp.float32)

    return {
        "w11": conv3(ks[0], cin, cl), "b11": zeros(cl),
        "w12": conv3(ks[1], cl, cl),  "b12": zeros(cl),
        "ws1": conv1(ks[2], cin, cl), "bs1": zeros(cl),
        "w21": conv3(ks[3], cl, cl),  "b21": zeros(cl),
        "w22": conv3(ks[4], cl, cl),  "b22": zeros(cl),
        "ws2": conv1(ks[5], cl, cl),  "bs2": zeros(cl),
    }


def combination_module(params, x_low, x_high):
    """x_low: (N, C_low, D, H, W); x_high: (N, C_high, D/2, H/2, W/2) -> (N, C_low, D, H, W)."""
    N, cl, D, H, W = x_low.shape
    _, ch, d, h, w = x_high.shape
    assert (D, H, W) == (2 * d, 2 * h, 2 * w)
    R = D * H * W
    r = d * h * w
    ccat = cl + ch
    # halo width rounded up to a lane multiple so the interior starts lane-aligned
    padl = max(128, -(-(H * W + W + 1) // 128) * 128)
    bf = jnp.bfloat16

    # inputs: flatten spatial onto the lane axis (channels-first, NCDHW order)
    xl = x_low.reshape(N, cl, R)                               # f32 (concat/epilogue in f32)
    xh = x_high.reshape(N, ch, r).astype(bf)                   # only used as an MXU operand

    # host-side constants
    up_mat = jnp.asarray(_upsample_matrix(d, h, w), bf)        # (r, R)
    masks = jnp.asarray(_boundary_masks(D, H, W, ccat), bf)    # (27, ccat, R)

    # K-stacked weights (tap-major, channel-padded to ccat), skips folded into M
    w1 = jnp.concatenate([_pack_conv3(params["w11"], ccat),
                          _pack_conv1_as_center_tap(params["ws1"], ccat)], 0).astype(bf)
    b1 = jnp.concatenate([params["b11"], params["bs1"]])[:, None]
    w2 = _pack_conv3(params["w12"], ccat).astype(bf)
    b2 = params["b12"][:, None]
    w3 = jnp.concatenate([_pack_conv3(params["w21"], ccat),
                          _pack_conv1_as_center_tap(params["ws2"], ccat)], 0).astype(bf)
    b3 = jnp.concatenate([params["b21"], params["bs2"]])[:, None]
    w4 = _pack_conv3(params["w22"], ccat).astype(bf)
    b4 = params["b22"][:, None]

    consts = [up_mat, masks, w1, b1, w2, b2, w3, b3, w4, b4]

    kernel = functools.partial(_combination_kernel,
                               D=D, H=H, W=W, cl=cl, ch=ch, padl=padl)

    in_specs = [
        pl.BlockSpec((1, cl, R), lambda n: (n, 0, 0)),
        pl.BlockSpec((1, ch, r), lambda n: (n, 0, 0)),
    ] + [_const_spec(a.shape) for a in consts]

    out = pl.pallas_call(
        kernel,
        out_shape=jax.ShapeDtypeStruct((N, cl, R), jnp.float32),
        grid=(N,),
        in_specs=in_specs,
        out_specs=pl.BlockSpec((1, cl, R), lambda n: (n, 0, 0)),
        scratch_shapes=[
            pltpu.VMEM((ccat, R + 2 * padl), bf),      # halo'd bf16 staging buffer
            pltpu.VMEM((27 * ccat, R), bf),            # K-stacked im2col buffer
        ],
        compiler_params=pltpu.CompilerParams(
            dimension_semantics=("parallel",),         # 2 TCs on v7x with N=2
            vmem_limit_bytes=32 * 1024 * 1024,
        ),
    )(xl, xh, *consts)

    # (N, C_low, R) is already NCDHW order -> reshape only, no transpose.
    return out.reshape(N, cl, D, H, W)


# --------------------------------------------------------------------------- #
if __name__ == "__main__":
    key = jax.random.PRNGKey(0)
    k_low, k_high, k_params = jax.random.split(key, 3)

    low_channels, high_channels = 8, 8
    # x_low:  (N, C_low,  D,   H,   W)   -- PyTorch NCDHW convention
    # x_high: (N, C_high, D/2, H/2, W/2)
    x_low = jax.random.normal(k_low, (2, low_channels, 8, 8, 8), jnp.float32)
    x_high = jax.random.normal(k_high, (2, high_channels, 4, 4, 4), jnp.float32)

    params = init_params(k_params, low_channels, high_channels)

    out = jax.jit(functools.partial(combination_module, params))(x_low, x_high)
    out = jax.block_until_ready(out)

    assert out.shape == (2, low_channels, 8, 8, 8), out.shape
    assert out.dtype == jnp.float32
    assert bool(jnp.isfinite(out).all())
    print("KERNEL_OK")
</pallas_src>

<mosaic_0001>
module attributes {stable_mosaic.version = 11 : i64} {
  func.func @_combination_kernel(%arg0: i32, %arg1: memref<1x8x512xf32, #tpu.memory_space<vmem>>, %arg2: memref<1x8x64xbf16, #tpu.memory_space<vmem>>, %arg3: memref<64x512xbf16, #tpu.memory_space<vmem>>, %arg4: memref<27x16x512xbf16, #tpu.memory_space<vmem>>, %arg5: memref<16x432xbf16, #tpu.memory_space<vmem>>, %arg6: memref<16x1xf32, #tpu.memory_space<vmem>>, %arg7: memref<8x432xbf16, #tpu.memory_space<vmem>>, %arg8: memref<8x1xf32, #tpu.memory_space<vmem>>, %arg9: memref<16x432xbf16, #tpu.memory_space<vmem>>, %arg10: memref<16x1xf32, #tpu.memory_space<vmem>>, %arg11: memref<8x432xbf16, #tpu.memory_space<vmem>>, %arg12: memref<8x1xf32, #tpu.memory_space<vmem>>, %arg13: memref<1x8x512xf32, #tpu.memory_space<vmem>>, %arg14: memref<16x768xbf16, #tpu.memory_space<vmem>>, %arg15: memref<432x512xbf16, #tpu.memory_space<vmem>>) attributes {dimension_semantics = [#tpu.dimension_semantics<parallel>], iteration_bounds = array<i64: 2>, scalar_prefetch = 0 : i64, scratch_operands = 2 : i64, tpu.core_type = #tpu.core_type<tc>, window_params = [{transform_indices = @transform_0, window_bounds = array<i64: 1, 8, 512>}, {transform_indices = @transform_1, window_bounds = array<i64: 1, 8, 64>}, {pipeline_mode = #tpu.pipeline_mode<synchronous>, transform_indices = @transform_2, window_bounds = array<i64: 64, 512>}, {pipeline_mode = #tpu.pipeline_mode<synchronous>, transform_indices = @transform_3, window_bounds = array<i64: 27, 16, 512>}, {pipeline_mode = #tpu.pipeline_mode<synchronous>, transform_indices = @transform_4, window_bounds = array<i64: 16, 432>}, {pipeline_mode = #tpu.pipeline_mode<synchronous>, transform_indices = @transform_5, window_bounds = array<i64: 16, 1>}, {pipeline_mode = #tpu.pipeline_mode<synchronous>, transform_indices = @transform_6, window_bounds = array<i64: 8, 432>}, {pipeline_mode = #tpu.pipeline_mode<synchronous>, transform_indices = @transform_7, window_bounds = array<i64: 8, 1>}, {pipeline_mode = #tpu.pipeline_mode<synchronous>, transform_indices = @transform_8, window_bounds = array<i64: 16, 432>}, {pipeline_mode = #tpu.pipeline_mode<synchronous>, transform_indices = @transform_9, window_bounds = array<i64: 16, 1>}, {pipeline_mode = #tpu.pipeline_mode<synchronous>, transform_indices = @transform_10, window_bounds = array<i64: 8, 432>}, {pipeline_mode = #tpu.pipeline_mode<synchronous>, transform_indices = @transform_11, window_bounds = array<i64: 8, 1>}, {transform_indices = @transform_12, window_bounds = array<i64: 1, 8, 512>}]} {
    %cst = arith.constant 0.000000e+00 : bf16
    %0 = vector.broadcast %cst : bf16 to vector<16x128xbf16>
    %c0 = arith.constant 0 : index
    %c0_0 = arith.constant 0 : index
    %1 = vector.load %arg14[%c0, %c0_0] : memref<16x768xbf16, #tpu.memory_space<vmem>>, vector<16x128xbf16>
    tpu.vector_store %arg14[%c0, %c0_0], %0 {strides = array<i32>} : memref<16x768xbf16, #tpu.memory_space<vmem>>, vector<16x128xbf16>,
    %cst_1 = arith.constant 0.000000e+00 : bf16
    %2 = vector.broadcast %cst_1 : bf16 to vector<16x128xbf16>
    %c0_2 = arith.constant 0 : index
    %c640 = arith.constant 640 : index
    %3 = vector.load %arg14[%c0_2, %c640] : memref<16x768xbf16, #tpu.memory_space<vmem>>, vector<16x128xbf16>
    tpu.vector_store %arg14[%c0_2, %c640], %2 {strides = array<i32>} : memref<16x768xbf16, #tpu.memory_space<vmem>>, vector<16x128xbf16>,
    %c0_3 = arith.constant 0 : index
    %c0_4 = arith.constant 0 : index
    %c0_5 = arith.constant 0 : index
    %4 = vector.load %arg2[%c0_3, %c0_4, %c0_5] : memref<1x8x64xbf16, #tpu.memory_space<vmem>>, vector<1x8x64xbf16>
    %5 = vector.shape_cast %4 : vector<1x8x64xbf16> to vector<8x64xbf16>
    %c0_6 = arith.constant 0 : index
    %c0_7 = arith.constant 0 : index
    %6 = vector.load %arg3[%c0_6, %c0_7] : memref<64x512xbf16, #tpu.memory_space<vmem>>, vector<64x512xbf16>
    %cst_8 = arith.constant dense<0.000000e+00> : vector<8x512xf32>
    %7 = tpu.matmul %5, %6, %cst_8 {dimension_numbers = #tpu.dot_dimension_numbers<[1], [0], [0], [1], [0, 0, 1, 1], [], []>} : vector<8x64xbf16>, vector<64x512xbf16>, vector<8x512xf32> -> vector<8x512xf32>
    %c0_9 = arith.constant 0 : index
    %c0_10 = arith.constant 0 : index
    %c0_11 = arith.constant 0 : index
    %8 = vector.load %arg1[%c0_9, %c0_10, %c0_11] : memref<1x8x512xf32, #tpu.memory_space<vmem>>, vector<1x8x512xf32>
    %9 = vector.shape_cast %8 : vector<1x8x512xf32> to vector<8x512xf32>
    %10 = tpu.concatenate %9, %7 in 0 : vector<8x512xf32>, vector<8x512xf32> -> vector<16x512xf32>
    %11 = arith.truncf %10 : vector<16x512xf32> to vector<16x512xbf16>
    %c0_12 = arith.constant 0 : index
    %c128 = arith.constant 128 : index
    %12 = vector.load %arg14[%c0_12, %c128] : memref<16x768xbf16, #tpu.memory_space<vmem>>, vector<16x512xbf16>
    tpu.vector_store %arg14[%c0_12, %c128], %11 {strides = array<i32>} : memref<16x768xbf16, #tpu.memory_space<vmem>>, vector<16x512xbf16>,
    %c0_13 = arith.constant 0 : index
    %c55 = arith.constant 55 : index
    %13 = vector.load %arg14[%c0_13, %c55] : memref<16x768xbf16, #tpu.memory_space<vmem>>, vector<16x512xbf16>
    %c0_14 = arith.constant 0 : index
    %c0_15 = arith.constant 0 : index
    %c0_16 = arith.constant 0 : index
    %14 = vector.load %arg4[%c0_14, %c0_15, %c0_16] : memref<27x16x512xbf16, #tpu.memory_space<vmem>>, vector<1x16x512xbf16>
    %15 = vector.shape_cast %14 : vector<1x16x512xbf16> to vector<16x512xbf16>
    %16 = arith.mulf %13, %15 : vector<16x512xbf16>
    %c0_17 = arith.constant 0 : index
    %c0_18 = arith.constant 0 : index
    %17 = vector.load %arg15[%c0_17, %c0_18] : memref<432x512xbf16, #tpu.memory_space<vmem>>, vector<16x512xbf16>
    tpu.vector_store %arg15[%c0_17, %c0_18], %16 {strides = array<i32>} : memref<432x512xbf16, #tpu.memory_space<vmem>>, vector<16x512xbf16>,
    %c0_19 = arith.constant 0 : index
    %c56 = arith.constant 56 : index
    %18 = vector.load %arg14[%c0_19, %c56] : memref<16x768xbf16, #tpu.memory_space<vmem>>, vector<16x512xbf16>
    %c1 = arith.constant 1 : index
    %c0_20 = arith.constant 0 : index
    %c0_21 = arith.constant 0 : index
    %19 = vector.load %arg4[%c1, %c0_20, %c0_21] : memref<27x16x512xbf16, #tpu.memory_space<vmem>>, vector<1x16x512xbf16>
    %20 = vector.shape_cast %19 : vector<1x16x512xbf16> to vector<16x512xbf16>
    %21 = arith.mulf %18, %20 : vector<16x512xbf16>
    %c16 = arith.constant 16 : index
    %c0_22 = arith.constant 0 : index
    %22 = vector.load %arg15[%c16, %c0_22] : memref<432x512xbf16, #tpu.memory_space<vmem>>, vector<16x512xbf16>
    tpu.vector_store %arg15[%c16, %c0_22], %21 {strides = array<i32>} : memref<432x512xbf16, #tpu.memory_space<vmem>>, vector<16x512xbf16>,
    %c0_23 = arith.constant 0 : index
    %c57 = arith.constant 57 : index
    %23 = vector.load %arg14[%c0_23, %c57] : memref<16x768xbf16, #tpu.memory_space<vmem>>, vector<16x512xbf16>
    %c2 = arith.constant 2 : index
    %c0_24 = arith.constant 0 : index
    %c0_25 = arith.constant 0 : index
    %24 = vector.load %arg4[%c2, %c0_24, %c0_25] : memref<27x16x512xbf16, #tpu.memory_space<vmem>>, vector<1x16x512xbf16>
    %25 = vector.shape_cast %24 : vector<1x16x512xbf16> to vector<16x512xbf16>
    %26 = arith.mulf %23, %25 : vector<16x512xbf16>
    %c32 = arith.constant 32 : index
    %c0_26 = arith.constant 0 : index
    %27 = vector.load %arg15[%c32, %c0_26] : memref<432x512xbf16, #tpu.memory_space<vmem>>, vector<16x512xbf16>
    tpu.vector_store %arg15[%c32, %c0_26], %26 {strides = array<i32>} : memref<432x512xbf16, #tpu.memory_space<vmem>>, vector<16x512xbf16>,
    %c0_27 = arith.constant 0 : index
    %c63 = arith.constant 63 : index
    %28 = vector.load %arg14[%c0_27, %c63] : memref<16x768xbf16, #tpu.memory_space<vmem>>, vector<16x512xbf16>
    %c3 = arith.constant 3 : index
    %c0_28 = arith.constant 0 : index
    %c0_29 = arith.constant 0 : index
    %29 = vector.load %arg4[%c3, %c0_28, %c0_29] : memref<27x16x512xbf16, #tpu.memory_space<vmem>>, vector<1x16x512xbf16>
    %30 = vector.shape_cast %29 : vector<1x16x512xbf16> to vector<16x512xbf16>
    %31 = arith.mulf %28, %30 : vector<16x512xbf16>
    %c48 = arith.constant 48 : index
    %c0_30 = arith.constant 0 : index
    %32 = vector.load %arg15[%c48, %c0_30] : memref<432x512xbf16, #tpu.memory_space<vmem>>, vector<16x512xbf16>
    tpu.vector_store %arg15[%c48, %c0_30], %31 {strides = array<i32>} : memref<432x512xbf16, #tpu.memory_space<vmem>>, vector<16x512xbf16>,
    %c0_31 = arith.constant 0 : index
    %c64 = arith.constant 64 : index
    %33 = vector.load %arg14[%c0_31, %c64] : memref<16x768xbf16, #tpu.memory_space<vmem>>, vector<16x512xbf16>
    %c4 = arith.constant 4 : index
    %c0_32 = arith.constant 0 : index
    %c0_33 = arith.constant 0 : index
    %34 = vector.load %arg4[%c4, %c0_32, %c0_33] : memref<27x16x512xbf16, #tpu.memory_space<vmem>>, vector<1x16x512xbf16>
    %35 = vector.shape_cast %34 : vector<1x16x512xbf16> to vector<16x512xbf16>
    %36 = arith.mulf %33, %35 : vector<16x512xbf16>
    %c64_34 = arith.constant 64 : index
    %c0_35 = arith.constant 0 : index
    %37 = vector.load %arg15[%c64_34, %c0_35] : memref<432x512xbf16, #tpu.memory_space<vmem>>, vector<16x512xbf16>
    tpu.vector_store %arg15[%c64_34, %c0_35], %36 {strides = array<i32>} : memref<432x512xbf16, #tpu.memory_space<vmem>>, vector<16x512xbf16>,
    %c0_36 = arith.constant 0 : index
    %c65 = arith.constant 65 : index
    %38 = vector.load %arg14[%c0_36, %c65] : memref<16x768xbf16, #tpu.memory_space<vmem>>, vector<16x512xbf16>
    %c5 = arith.constant 5 : index
    %c0_37 = arith.constant 0 : index
    %c0_38 = arith.constant 0 : index
    %39 = vector.load %arg4[%c5, %c0_37, %c0_38] : memref<27x16x512xbf16, #tpu.memory_space<vmem>>, vector<1x16x512xbf16>
    %40 = vector.shape_cast %39 : vector<1x16x512xbf16> to vector<16x512xbf16>
    %41 = arith.mulf %38, %40 : vector<16x512xbf16>
    %c80 = arith.constant 80 : index
    %c0_39 = arith.constant 0 : index
    %42 = vector.load %arg15[%c80, %c0_39] : memref<432x512xbf16, #tpu.memory_space<vmem>>, vector<16x512xbf16>
    tpu.vector_store %arg15[%c80, %c0_39], %41 {strides = array<i32>} : memref<432x512xbf16, #tpu.memory_space<vmem>>, vector<16x512xbf16>,
    %c0_40 = arith.constant 0 : index
    %c71 = arith.constant 71 : index
    %43 = vector.load %arg14[%c0_40, %c71] : memref<16x768xbf16, #tpu.memory_space<vmem>>, vector<16x512xbf16>
    %c6 = arith.constant 6 : index
    %c0_41 = arith.constant 0 : index
    %c0_42 = arith.constant 0 : index
    %44 = vector.load %arg4[%c6, %c0_41, %c0_42] : memref<27x16x512xbf16, #tpu.memory_space<vmem>>, vector<1x16x512xbf16>
    %45 = vector.shape_cast %44 : vector<1x16x512xbf16> to vector<16x512xbf16>
    %46 = arith.mulf %43, %45 : vector<16x512xbf16>
    %c96 = arith.constant 96 : index
    %c0_43 = arith.constant 0 : index
    %47 = vector.load %arg15[%c96, %c0_43] : memref<432x512xbf16, #tpu.memory_space<vmem>>, vector<16x512xbf16>
    tpu.vector_store %arg15[%c96, %c0_43], %46 {strides = array<i32>} : memref<432x512xbf16, #tpu.memory_space<vmem>>, vector<16x512xbf16>,
    %c0_44 = arith.constant 0 : index
    %c72 = arith.constant 72 : index
    %48 = vector.load %arg14[%c0_44, %c72] : memref<16x768xbf16, #tpu.memory_space<vmem>>, vector<16x512xbf16>
    %c7 = arith.constant 7 : index
    %c0_45 = arith.constant 0 : index
    %c0_46 = arith.constant 0 : index
    %49 = vector.load %arg4[%c7, %c0_45, %c0_46] : memref<27x16x512xbf16, #tpu.memory_space<vmem>>, vector<1x16x512xbf16>
    %50 = vector.shape_cast %49 : vector<1x16x512xbf16> to vector<16x512xbf16>
    %51 = arith.mulf %48, %50 : vector<16x512xbf16>
    %c112 = arith.constant 112 : index
    %c0_47 = arith.constant 0 : index
    %52 = vector.load %arg15[%c112, %c0_47] : memref<432x512xbf16, #tpu.memory_space<vmem>>, vector<16x512xbf16>
    tpu.vector_store %arg15[%c112, %c0_47], %51 {strides = array<i32>} : memref<432x512xbf16, #tpu.memory_space<vmem>>, vector<16x512xbf16>,
    %c0_48 = arith.constant 0 : index
    %c73 = arith.constant 73 : index
    %53 = vector.load %arg14[%c0_48, %c73] : memref<16x768xbf16, #tpu.memory_space<vmem>>, vector<16x512xbf16>
    %c8 = arith.constant 8 : index
    %c0_49 = arith.constant 0 : index
    %c0_50 = arith.constant 0 : index
    %54 = vector.load %arg4[%c8, %c0_49, %c0_50] : memref<27x16x512xbf16, #tpu.memory_space<vmem>>, vector<1x16x512xbf16>
    %55 = vector.shape_cast %54 : vector<1x16x512xbf16> to vector<16x512xbf16>
    %56 = arith.mulf %53, %55 : vector<16x512xbf16>
    %c128_51 = arith.constant 128 : index
    %c0_52 = arith.constant 0 : index
    %57 = vector.load %arg15[%c128_51, %c0_52] : memref<432x512xbf16, #tpu.memory_space<vmem>>, vector<16x512xbf16>
    tpu.vector_store %arg15[%c128_51, %c0_52], %56 {strides = array<i32>} : memref<432x512xbf16, #tpu.memory_space<vmem>>, vector<16x512xbf16>,
    %c0_53 = arith.constant 0 : index
    %c119 = arith.constant 119 : index
    %58 = vector.load %arg14[%c0_53, %c119] : memref<16x768xbf16, #tpu.memory_space<vmem>>, vector<16x512xbf16>
    %c9 = arith.constant 9 : index
    %c0_54 = arith.constant 0 : index
    %c0_55 = arith.constant 0 : index
    %59 = vector.load %arg4[%c9, %c0_54, %c0_55] : memref<27x16x512xbf16, #tpu.memory_space<vmem>>, vector<1x16x512xbf16>
    %60 = vector.shape_cast %59 : vector<1x16x512xbf16> to vector<16x512xbf16>
    %61 = arith.mulf %58, %60 : vector<16x512xbf16>
    %c144 = arith.constant 144 : index
    %c0_56 = arith.constant 0 : index
    %62 = vector.load %arg15[%c144, %c0_56] : memref<432x512xbf16, #tpu.memory_space<vmem>>, vector<16x512xbf16>
    tpu.vector_store %arg15[%c144, %c0_56], %61 {strides = array<i32>} : memref<432x512xbf16, #tpu.memory_space<vmem>>, vector<16x512xbf16>,
    %c0_57 = arith.constant 0 : index
    %c120 = arith.constant 120 : index
    %63 = vector.load %arg14[%c0_57, %c120] : memref<16x768xbf16, #tpu.memory_space<vmem>>, vector<16x512xbf16>
    %c10 = arith.constant 10 : index
    %c0_58 = arith.constant 0 : index
    %c0_59 = arith.constant 0 : index
    %64 = vector.load %arg4[%c10, %c0_58, %c0_59] : memref<27x16x512xbf16, #tpu.memory_space<vmem>>, vector<1x16x512xbf16>
    %65 = vector.shape_cast %64 : vector<1x16x512xbf16> to vector<16x512xbf16>
    %66 = arith.mulf %63, %65 : vector<16x512xbf16>
    %c160 = arith.constant 160 : index
    %c0_60 = arith.constant 0 : index
    %67 = vector.load %arg15[%c160, %c0_60] : memref<432x512xbf16, #tpu.memory_space<vmem>>, vector<16x512xbf16>
    tpu.vector_store %arg15[%c160, %c0_60], %66 {strides = array<i32>} : memref<432x512xbf16, #tpu.memory_space<vmem>>, vector<16x512xbf16>,
    %c0_61 = arith.constant 0 : index
    %c121 = arith.constant 121 : index
    %68 = vector.load %arg14[%c0_61, %c121] : memref<16x768xbf16, #tpu.memory_space<vmem>>, vector<16x512xbf16>
    %c11 = arith.constant 11 : index
    %c0_62 = arith.constant 0 : index
    %c0_63 = arith.constant 0 : index
    %69 = vector.load %arg4[%c11, %c0_62, %c0_63] : memref<27x16x512xbf16, #tpu.memory_space<vmem>>, vector<1x16x512xbf16>
    %70 = vector.shape_cast %69 : vector<1x16x512xbf16> to vector<16x512xbf16>
    %71 = arith.mulf %68, %70 : vector<16x512xbf16>
    %c176 = arith.constant 176 : index
    %c0_64 = arith.constant 0 : index
    %72 = vector.load %arg15[%c176, %c0_64] : memref<432x512xbf16, #tpu.memory_space<vmem>>, vector<16x512xbf16>
    tpu.vector_store %arg15[%c176, %c0_64], %71 {strides = array<i32>} : memref<432x512xbf16, #tpu.memory_space<vmem>>, vector<16x512xbf16>,
    %c0_65 = arith.constant 0 : index
    %c127 = arith.constant 127 : index
    %73 = vector.load %arg14[%c0_65, %c127] : memref<16x768xbf16, #tpu.memory_space<vmem>>, vector<16x512xbf16>
    %c12 = arith.constant 12 : index
    %c0_66 = arith.constant 0 : index
    %c0_67 = arith.constant 0 : index
    %74 = vector.load %arg4[%c12, %c0_66, %c0_67] : memref<27x16x512xbf16, #tpu.memory_space<vmem>>, vector<1x16x512xbf16>
    %75 = vector.shape_cast %74 : vector<1x16x512xbf16> to vector<16x512xbf16>
    %76 = arith.mulf %73, %75 : vector<16x512xbf16>
    %c192 = arith.constant 192 : index
    %c0_68 = arith.constant 0 : index
    %77 = vector.load %arg15[%c192, %c0_68] : memref<432x512xbf16, #tpu.memory_space<vmem>>, vector<16x512xbf16>
    tpu.vector_store %arg15[%c192, %c0_68], %76 {strides = array<i32>} : memref<432x512xbf16, #tpu.memory_space<vmem>>, vector<16x512xbf16>,
    %c0_69 = arith.constant 0 : index
    %c128_70 = arith.constant 128 : index
    %78 = vector.load %arg14[%c0_69, %c128_70] : memref<16x768xbf16, #tpu.memory_space<vmem>>, vector<16x512xbf16>
    %c208 = arith.constant 208 : index
    %c0_71 = arith.constant 0 : index
    %79 = vector.load %arg15[%c208, %c0_71] : memref<432x512xbf16, #tpu.memory_space<vmem>>, vector<16x512xbf16>
    tpu.vector_store %arg15[%c208, %c0_71], %78 {strides = array<i32>} : memref<432x512xbf16, #tpu.memory_space<vmem>>, vector<16x512xbf16>,
    %c0_72 = arith.constant 0 : index
    %c129 = arith.constant 129 : index
    %80 = vector.load %arg14[%c0_72, %c129] : memref<16x768xbf16, #tpu.memory_space<vmem>>, vector<16x512xbf16>
    %c14 = arith.constant 14 : index
    %c0_73 = arith.constant 0 : index
    %c0_74 = arith.constant 0 : index
    %81 = vector.load %arg4[%c14, %c0_73, %c0_74] : memref<27x16x512xbf16, #tpu.memory_space<vmem>>, vector<1x16x512xbf16>
    %82 = vector.shape_cast %81 : vector<1x16x512xbf16> to vector<16x512xbf16>
    %83 = arith.mulf %80, %82 : vector<16x512xbf16>
    %c224 = arith.constant 224 : index
    %c0_75 = arith.constant 0 : index
    %84 = vector.load %arg15[%c224, %c0_75] : memref<432x512xbf16, #tpu.memory_space<vmem>>, vector<16x512xbf16>
    tpu.vector_store %arg15[%c224, %c0_75], %83 {strides = array<i32>} : memref<432x512xbf16, #tpu.memory_space<vmem>>, vector<16x512xbf16>,
    %c0_76 = arith.constant 0 : index
    %c135 = arith.constant 135 : index
    %85 = vector.load %arg14[%c0_76, %c135] : memref<16x768xbf16, #tpu.memory_space<vmem>>, vector<16x512xbf16>
    %c15 = arith.constant 15 : index
    %c0_77 = arith.constant 0 : index
    %c0_78 = arith.constant 0 : index
    %86 = vector.load %arg4[%c15, %c0_77, %c0_78] : memref<27x16x512xbf16, #tpu.memory_space<vmem>>, vector<1x16x512xbf16>
    %87 = vector.shape_cast %86 : vector<1x16x512xbf16> to vector<16x512xbf16>
    %88 = arith.mulf %85, %87 : vector<16x512xbf16>
    %c240 = arith.constant 240 : index
    %c0_79 = arith.constant 0 : index
    %89 = vector.load %arg15[%c240, %c0_79] : memref<432x512xbf16, #tpu.memory_space<vmem>>, vector<16x512xbf16>
    tpu.vector_store %arg15[%c240, %c0_79], %88 {strides = array<i32>} : memref<432x512xbf16, #tpu.memory_space<vmem>>, vector<16x512xbf16>,
    %c0_80 = arith.constant 0 : index
    %c136 = arith.constant 136 : index
    %90 = vector.load %arg14[%c0_80, %c136] : memref<16x768xbf16, #tpu.memory_space<vmem>>, vector<16x512xbf16>
    %c16_81 = arith.constant 16 : index
    %c0_82 = arith.constant 0 : index
    %c0_83 = arith.constant 0 : index
    %91 = vector.load %arg4[%c16_81, %c0_82, %c0_83] : memref<27x16x512xbf16, #tpu.memory_space<vmem>>, vector<1x16x512xbf16>
    %92 = vector.shape_cast %91 : vector<1x16x512xbf16> to vector<16x512xbf16>
    %93 = arith.mulf %90, %92 : vector<16x512xbf16>
    %c256 = arith.constant 256 : index
    %c0_84 = arith.constant 0 : index
    %94 = vector.load %arg15[%c256, %c0_84] : memref<432x512xbf16, #tpu.memory_space<vmem>>, vector<16x512xbf16>
    tpu.vector_store %arg15[%c256, %c0_84], %93 {strides = array<i32>} : memref<432x512xbf16, #tpu.memory_space<vmem>>, vector<16x512xbf16>,
    %c0_85 = arith.constant 0 : index
    %c137 = arith.constant 137 : index
    %95 = vector.load %arg14[%c0_85, %c137] : memref<16x768xbf16, #tpu.memory_space<vmem>>, vector<16x512xbf16>
    %c17 = arith.constant 17 : index
    %c0_86 = arith.constant 0 : index
    %c0_87 = arith.constant 0 : index
    %96 = vector.load %arg4[%c17, %c0_86, %c0_87] : memref<27x16x512xbf16, #tpu.memory_space<vmem>>, vector<1x16x512xbf16>
    %97 = vector.shape_cast %96 : vector<1x16x512xbf16> to vector<16x512xbf16>
    %98 = arith.mulf %95, %97 : vector<16x512xbf16>
    %c272 = arith.constant 272 : index
    %c0_88 = arith.constant 0 : index
    %99 = vector.load %arg15[%c272, %c0_88] : memref<432x512xbf16, #tpu.memory_space<vmem>>, vector<16x512xbf16>
    tpu.vector_store %arg15[%c272, %c0_88], %98 {strides = array<i32>} : memref<432x512xbf16, #tpu.memory_space<vmem>>, vector<16x512xbf16>,
    %c0_89 = arith.constant 0 : index
    %c183 = arith.constant 183 : index
    %100 = vector.load %arg14[%c0_89, %c183] : memref<16x768xbf16, #tpu.memory_space<vmem>>, vector<16x512xbf16>
    %c18 = arith.constant 18 : index
    %c0_90 = arith.constant 0 : index
    %c0_91 = arith.constant 0 : index
    %101 = vector.load %arg4[%c18, %c0_90, %c0_91] : memref<27x16x512xbf16, #tpu.memory_space<vmem>>, vector<1x16x512xbf16>
    %102 = vector.shape_cast %101 : vector<1x16x512xbf16> to vector<16x512xbf16>
    %103 = arith.mulf %100, %102 : vector<16x512xbf16>
    %c288 = arith.constant 288 : index
    %c0_92 = arith.constant 0 : index
    %104 = vector.load %arg15[%c288, %c0_92] : memref<432x512xbf16, #tpu.memory_space<vmem>>, vector<16x512xbf16>
    tpu.vector_store %arg15[%c288, %c0_92], %103 {strides = array<i32>} : memref<432x512xbf16, #tpu.memory_space<vmem>>, vector<16x512xbf16>,
    %c0_93 = arith.constant 0 : index
    %c184 = arith.constant 184 : index
    %105 = vector.load %arg14[%c0_93, %c184] : memref<16x768xbf16, #tpu.memory_space<vmem>>, vector<16x512xbf16>
    %c19 = arith.constant 19 : index
    %c0_94 = arith.constant 0 : index
    %c0_95 = arith.constant 0 : index
    %106 = vector.load %arg4[%c19, %c0_94, %c0_95] : memref<27x16x512xbf16, #tpu.memory_space<vmem>>, vector<1x16x512xbf16>
    %107 = vector.shape_cast %106 : vector<1x16x512xbf16> to vector<16x512xbf16>
    %108 = arith.mulf %105, %107 : vector<16x512xbf16>
    %c304 = arith.constant 304 : index
    %c0_96 = arith.constant 0 : index
    %109 = vector.load %arg15[%c304, %c0_96] : memref<432x512xbf16, #tpu.memory_space<vmem>>, vector<16x512xbf16>
    tpu.vector_store %arg15[%c304, %c0_96], %108 {strides = array<i32>} : memref<432x512xbf16, #tpu.memory_space<vmem>>, vector<16x512xbf16>,
    %c0_97 = arith.constant 0 : index
    %c185 = arith.constant 185 : index
    %110 = vector.load %arg14[%c0_97, %c185] : memref<16x768xbf16, #tpu.memory_space<vmem>>, vector<16x512xbf16>
    %c20 = arith.constant 20 : index
    %c0_98 = arith.constant 0 : index
    %c0_99 = arith.constant 0 : index
    %111 = vector.load %arg4[%c20, %c0_98, %c0_99] : memref<27x16x512xbf16, #tpu.memory_space<vmem>>, vector<1x16x512xbf16>
    %112 = vector.shape_cast %111 : vector<1x16x512xbf16> to vector<16x512xbf16>
    %113 = arith.mulf %110, %112 : vector<16x512xbf16>
    %c320 = arith.constant 320 : index
    %c0_100 = arith.constant 0 : index
    %114 = vector.load %arg15[%c320, %c0_100] : memref<432x512xbf16, #tpu.memory_space<vmem>>, vector<16x512xbf16>
    tpu.vector_store %arg15[%c320, %c0_100], %113 {strides = array<i32>} : memref<432x512xbf16, #tpu.memory_space<vmem>>, vector<16x512xbf16>,
    %c0_101 = arith.constant 0 : index
    %c191 = arith.constant 191 : index
    %115 = vector.load %arg14[%c0_101, %c191] : memref<16x768xbf16, #tpu.memory_space<vmem>>, vector<16x512xbf16>
    %c21 = arith.constant 21 : index
    %c0_102 = arith.constant 0 : index
    %c0_103 = arith.constant 0 : index
    %116 = vector.load %arg4[%c21, %c0_102, %c0_103] : memref<27x16x512xbf16, #tpu.memory_space<vmem>>, vector<1x16x512xbf16>
    %117 = vector.shape_cast %116 : vector<1x16x512xbf16> to vector<16x512xbf16>
    %118 = arith.mulf %115, %117 : vector<16x512xbf16>
    %c336 = arith.constant 336 : index
    %c0_104 = arith.constant 0 : index
    %119 = vector.load %arg15[%c336, %c0_104] : memref<432x512xbf16, #tpu.memory_space<vmem>>, vector<16x512xbf16>
    tpu.vector_store %arg15[%c336, %c0_104], %118 {strides = array<i32>} : memref<432x512xbf16, #tpu.memory_space<vmem>>, vector<16x512xbf16>,
    %c0_105 = arith.constant 0 : index
    %c192_106 = arith.constant 192 : index
    %120 = vector.load %arg14[%c0_105, %c192_106] : memref<16x768xbf16, #tpu.memory_space<vmem>>, vector<16x512xbf16>
    %c22 = arith.constant 22 : index
    %c0_107 = arith.constant 0 : index
    %c0_108 = arith.constant 0 : index
    %121 = vector.load %arg4[%c22, %c0_107, %c0_108] : memref<27x16x512xbf16, #tpu.memory_space<vmem>>, vector<1x16x512xbf16>
    %122 = vector.shape_cast %121 : vector<1x16x512xbf16> to vector<16x512xbf16>
    %123 = arith.mulf %120, %122 : vector<16x512xbf16>
    %c352 = arith.constant 352 : index
    %c0_109 = arith.constant 0 : index
    %124 = vector.load %arg15[%c352, %c0_109] : memref<432x512xbf16, #tpu.memory_space<vmem>>, vector<16x512xbf16>
    tpu.vector_store %arg15[%c352, %c0_109], %123 {strides = array<i32>} : memref<432x512xbf16, #tpu.memory_space<vmem>>, vector<16x512xbf16>,
    %c0_110 = arith.constant 0 : index
    %c193 = arith.constant 193 : index
    %125 = vector.load %arg14[%c0_110, %c193] : memref<16x768xbf16, #tpu.memory_space<vmem>>, vector<16x512xbf16>
    %c23 = arith.constant 23 : index
    %c0_111 = arith.constant 0 : index
    %c0_112 = arith.constant 0 : index
    %126 = vector.load %arg4[%c23, %c0_111, %c0_112] : memref<27x16x512xbf16, #tpu.memory_space<vmem>>, vector<1x16x512xbf16>
    %127 = vector.shape_cast %126 : vector<1x16x512xbf16> to vector<16x512xbf16>
    %128 = arith.mulf %125, %127 : vector<16x512xbf16>
    %c368 = arith.constant 368 : index
    %c0_113 = arith.constant 0 : index
    %129 = vector.load %arg15[%c368, %c0_113] : memref<432x512xbf16, #tpu.memory_space<vmem>>, vector<16x512xbf16>
    tpu.vector_store %arg15[%c368, %c0_113], %128 {strides = array<i32>} : memref<432x512xbf16, #tpu.memory_space<vmem>>, vector<16x512xbf16>,
    %c0_114 = arith.constant 0 : index
    %c199 = arith.constant 199 : index
    %130 = vector.load %arg14[%c0_114, %c199] : memref<16x768xbf16, #tpu.memory_space<vmem>>, vector<16x512xbf16>
    %c24 = arith.constant 24 : index
    %c0_115 = arith.constant 0 : index
    %c0_116 = arith.constant 0 : index
    %131 = vector.load %arg4[%c24, %c0_115, %c0_116] : memref<27x16x512xbf16, #tpu.memory_space<vmem>>, vector<1x16x512xbf16>
    %132 = vector.shape_cast %131 : vector<1x16x512xbf16> to vector<16x512xbf16>
    %133 = arith.mulf %130, %132 : vector<16x512xbf16>
    %c384 = arith.constant 384 : index
    %c0_117 = arith.constant 0 : index
    %134 = vector.load %arg15[%c384, %c0_117] : memref<432x512xbf16, #tpu.memory_space<vmem>>, vector<16x512xbf16>
    tpu.vector_store %arg15[%c384, %c0_117], %133 {strides = array<i32>} : memref<432x512xbf16, #tpu.memory_space<vmem>>, vector<16x512xbf16>,
    %c0_118 = arith.constant 0 : index
    %c200 = arith.constant 200 : index
    %135 = vector.load %arg14[%c0_118, %c200] : memref<16x768xbf16, #tpu.memory_space<vmem>>, vector<16x512xbf16>
    %c25 = arith.constant 25 : index
    %c0_119 = arith.constant 0 : index
    %c0_120 = arith.constant 0 : index
    %136 = vector.load %arg4[%c25, %c0_119, %c0_120] : memref<27x16x512xbf16, #tpu.memory_space<vmem>>, vector<1x16x512xbf16>
    %137 = vector.shape_cast %136 : vector<1x16x512xbf16> to vector<16x512xbf16>
    %138 = arith.mulf %135, %137 : vector<16x512xbf16>
    %c400 = arith.constant 400 : index
    %c0_121 = arith.constant 0 : index
    %139 = vector.load %arg15[%c400, %c0_121] : memref<432x512xbf16, #tpu.memory_space<vmem>>, vector<16x512xbf16>
    tpu.vector_store %arg15[%c400, %c0_121], %138 {strides = array<i32>} : memref<432x512xbf16, #tpu.memory_space<vmem>>, vector<16x512xbf16>,
    %c0_122 = arith.constant 0 : index
    %c201 = arith.constant 201 : index
    %140 = vector.load %arg14[%c0_122, %c201] : memref<16x768xbf16, #tpu.memory_space<vmem>>, vector<16x512xbf16>
    %c26 = arith.constant 26 : index
    %c0_123 = arith.constant 0 : index
    %c0_124 = arith.constant 0 : index
    %141 = vector.load %arg4[%c26, %c0_123, %c0_124] : memref<27x16x512xbf16, #tpu.memory_space<vmem>>, vector<1x16x512xbf16>
    %142 = vector.shape_cast %141 : vector<1x16x512xbf16> to vector<16x512xbf16>
    %143 = arith.mulf %140, %142 : vector<16x512xbf16>
    %c416 = arith.constant 416 : index
    %c0_125 = arith.constant 0 : index
    %144 = vector.load %arg15[%c416, %c0_125] : memref<432x512xbf16, #tpu.memory_space<vmem>>, vector<16x512xbf16>
    tpu.vector_store %arg15[%c416, %c0_125], %143 {strides = array<i32>} : memref<432x512xbf16, #tpu.memory_space<vmem>>, vector<16x512xbf16>,
    %c0_126 = arith.constant 0 : index
    %c0_127 = arith.constant 0 : index
    %145 = vector.load %arg5[%c0_126, %c0_127] : memref<16x432xbf16, #tpu.memory_space<vmem>>, vector<16x432xbf16>
    %c0_128 = arith.constant 0 : index
    %c0_129 = arith.constant 0 : index
    %146 = vector.load %arg15[%c0_128, %c0_129] : memref<432x512xbf16, #tpu.memory_space<vmem>>, vector<432x512xbf16>
    %cst_130 = arith.constant dense<0.000000e+00> : vector<16x512xf32>
    %147 = tpu.matmul %145, %146, %cst_130 {dimension_numbers = #tpu.dot_dimension_numbers<[1], [0], [0], [1], [0, 0, 1, 1], [], []>} : vector<16x432xbf16>, vector<432x512xbf16>, vector<16x512xf32> -> vector<16x512xf32>
    %c0_131 = arith.constant 0 : index
    %c0_132 = arith.constant 0 : index
    %148 = vector.load %arg6[%c0_131, %c0_132] : memref<16x1xf32, #tpu.memory_space<vmem>>, vector<16x1xf32>
    %149 = vector.broadcast %148 : vector<16x1xf32> to vector<16x512xf32>
    %150 = arith.addf %147, %149 : vector<16x512xf32>
    %151 = vector.extract_strided_slice %150 {offsets = [0, 0], sizes = [8, 512], strides = [1, 1]} : vector<16x512xf32> to vector<8x512xf32>
    %cst_133 = arith.constant 0.000000e+00 : f32
    %152 = vector.broadcast %cst_133 : f32 to vector<8x512xf32>
    %153 = arith.maximumf %151, %152 : vector<8x512xf32>
    %154 = vector.extract_strided_slice %150 {offsets = [8, 0], sizes = [8, 512], strides = [1, 1]} : vector<16x512xf32> to vector<8x512xf32>
    %cst_134 = arith.constant 0.000000e+00 : f32
    %155 = vector.broadcast %cst_134 : f32 to vector<8x512xf32>
    %156 = tpu.concatenate %153, %155 in 0 : vector<8x512xf32>, vector<8x512xf32> -> vector<16x512xf32>
    %157 = arith.truncf %156 : vector<16x512xf32> to vector<16x512xbf16>
    %c0_135 = arith.constant 0 : index
    %c128_136 = arith.constant 128 : index
    %158 = vector.load %arg14[%c0_135, %c128_136] : memref<16x768xbf16, #tpu.memory_space<vmem>>, vector<16x512xbf16>
    tpu.vector_store %arg14[%c0_135, %c128_136], %157 {strides = array<i32>} : memref<16x768xbf16, #tpu.memory_space<vmem>>, vector<16x512xbf16>,
    %c0_137 = arith.constant 0 : index
    %c55_138 = arith.constant 55 : index
    %159 = vector.load %arg14[%c0_137, %c55_138] : memref<16x768xbf16, #tpu.memory_space<vmem>>, vector<16x512xbf16>
    %c0_139 = arith.constant 0 : index
    %c0_140 = arith.constant 0 : index
    %c0_141 = arith.constant 0 : index
    %160 = vector.load %arg4[%c0_139, %c0_140, %c0_141] : memref<27x16x512xbf16, #tpu.memory_space<vmem>>, vector<1x16x512xbf16>
    %161 = vector.shape_cast %160 : vector<1x16x512xbf16> to vector<16x512xbf16>
    %162 = arith.mulf %159, %161 : vector<16x512xbf16>
    %c0_142 = arith.constant 0 : index
    %c0_143 = arith.constant 0 : index
    %163 = vector.load %arg15[%c0_142, %c0_143] : memref<432x512xbf16, #tpu.memory_space<vmem>>, vector<16x512xbf16>
    tpu.vector_store %arg15[%c0_142, %c0_143], %162 {strides = array<i32>} : memref<432x512xbf16, #tpu.memory_space<vmem>>, vector<16x512xbf16>,
    %c0_144 = arith.constant 0 : index
    %c56_145 = arith.constant 56 : index
    %164 = vector.load %arg14[%c0_144, %c56_145] : memref<16x768xbf16, #tpu.memory_space<vmem>>, vector<16x512xbf16>
    %c1_146 = arith.constant 1 : index
    %c0_147 = arith.constant 0 : index
    %c0_148 = arith.constant 0 : index
    %165 = vector.load %arg4[%c1_146, %c0_147, %c0_148] : memref<27x16x512xbf16, #tpu.memory_space<vmem>>, vector<1x16x512xbf16>
    %166 = vector.shape_cast %165 : vector<1x16x512xbf16> to vector<16x512xbf16>
    %167 = arith.mulf %164, %166 : vector<16x512xbf16>
    %c16_149 = arith.constant 16 : index
    %c0_150 = arith.constant 0 : index
    %168 = vector.load %arg15[%c16_149, %c0_150] : memref<432x512xbf16, #tpu.memory_space<vmem>>, vector<16x512xbf16>
    tpu.vector_store %arg15[%c16_149, %c0_150], %167 {strides = array<i32>} : memref<432x512xbf16, #tpu.memory_space<vmem>>, vector<16x512xbf16>,
    %c0_151 = arith.constant 0 : index
    %c57_152 = arith.constant 57 : index
    %169 = vector.load %arg14[%c0_151, %c57_152] : memref<16x768xbf16, #tpu.memory_space<vmem>>, vector<16x512xbf16>
    %c2_153 = arith.constant 2 : index
    %c0_154 = arith.constant 0 : index
    %c0_155 = arith.constant 0 : index
    %170 = vector.load %arg4[%c2_153, %c0_154, %c0_155] : memref<27x16x512xbf16, #tpu.memory_space<vmem>>, vector<1x16x512xbf16>
    %171 = vector.shape_cast %170 : vector<1x16x512xbf16> to vector<16x512xbf16>
    %172 = arith.mulf %169, %171 : vector<16x512xbf16>
    %c32_156 = arith.constant 32 : index
    %c0_157 = arith.constant 0 : index
    %173 = vector.load %arg15[%c32_156, %c0_157] : memref<432x512xbf16, #tpu.memory_space<vmem>>, vector<16x512xbf16>
    tpu.vector_store %arg15[%c32_156, %c0_157], %172 {strides = array<i32>} : memref<432x512xbf16, #tpu.memory_space<vmem>>, vector<16x512xbf16>,
    %c0_158 = arith.constant 0 : index
    %c63_159 = arith.constant 63 : index
    %174 = vector.load %arg14[%c0_158, %c63_159] : memref<16x768xbf16, #tpu.memory_space<vmem>>, vector<16x512xbf16>
    %c3_160 = arith.constant 3 : index
    %c0_161 = arith.constant 0 : index
    %c0_162 = arith.constant 0 : index
    %175 = vector.load %arg4[%c3_160, %c0_161, %c0_162] : memref<27x16x512xbf16, #tpu.memory_space<vmem>>, vector<1x16x512xbf16>
    %176 = vector.shape_cast %175 : vector<1x16x512xbf16> to vector<16x512xbf16>
    %177 = arith.mulf %174, %176 : vector<16x512xbf16>
    %c48_163 = arith.constant 48 : index
    %c0_164 = arith.constant 0 : index
    %178 = vector.load %arg15[%c48_163, %c0_164] : memref<432x512xbf16, #tpu.memory_space<vmem>>, vector<16x512xbf16>
    tpu.vector_store %arg15[%c48_163, %c0_164], %177 {strides = array<i32>} : memref<432x512xbf16, #tpu.memory_space<vmem>>, vector<16x512xbf16>,
    %c0_165 = arith.constant 0 : index
    %c64_166 = arith.constant 64 : index
    %179 = vector.load %arg14[%c0_165, %c64_166] : memref<16x768xbf16, #tpu.memory_space<vmem>>, vector<16x512xbf16>
    %c4_167 = arith.constant 4 : index
    %c0_168 = arith.constant 0 : index
    %c0_169 = arith.constant 0 : index
    %180 = vector.load %arg4[%c4_167, %c0_168, %c0_169] : memref<27x16x512xbf16, #tpu.memory_space<vmem>>, vector<1x16x512xbf16>
    %181 = vector.shape_cast %180 : vector<1x16x512xbf16> to vector<16x512xbf16>
    %182 = arith.mulf %179, %181 : vector<16x512xbf16>
    %c64_170 = arith.constant 64 : index
    %c0_171 = arith.constant 0 : index
    %183 = vector.load %arg15[%c64_170, %c0_171] : memref<432x512xbf16, #tpu.memory_space<vmem>>, vector<16x512xbf16>
    tpu.vector_store %arg15[%c64_170, %c0_171], %182 {strides = array<i32>} : memref<432x512xbf16, #tpu.memory_space<vmem>>, vector<16x512xbf16>,
    %c0_172 = arith.constant 0 : index
    %c65_173 = arith.constant 65 : index
    %184 = vector.load %arg14[%c0_172, %c65_173] : memref<16x768xbf16, #tpu.memory_space<vmem>>, vector<16x512xbf16>
    %c5_174 = arith.constant 5 : index
    %c0_175 = arith.constant 0 : index
    %c0_176 = arith.constant 0 : index
    %185 = vector.load %arg4[%c5_174, %c0_175, %c0_176] : memref<27x16x512xbf16, #tpu.memory_space<vmem>>, vector<1x16x512xbf16>
    %186 = vector.shape_cast %185 : vector<1x16x512xbf16> to vector<16x512xbf16>
    %187 = arith.mulf %184, %186 : vector<16x512xbf16>
    %c80_177 = arith.constant 80 : index
    %c0_178 = arith.constant 0 : index
    %188 = vector.load %arg15[%c80_177, %c0_178] : memref<432x512xbf16, #tpu.memory_space<vmem>>, vector<16x512xbf16>
    tpu.vector_store %arg15[%c80_177, %c0_178], %187 {strides = array<i32>} : memref<432x512xbf16, #tpu.memory_space<vmem>>, vector<16x512xbf16>,
    %c0_179 = arith.constant 0 : index
    %c71_180 = arith.constant 71 : index
    %189 = vector.load %arg14[%c0_179, %c71_180] : memref<16x768xbf16, #tpu.memory_space<vmem>>, vector<16x512xbf16>
    %c6_181 = arith.constant 6 : index
    %c0_182 = arith.constant 0 : index
    %c0_183 = arith.constant 0 : index
    %190 = vector.load %arg4[%c6_181, %c0_182, %c0_183] : memref<27x16x512xbf16, #tpu.memory_space<vmem>>, vector<1x16x512xbf16>
    %191 = vector.shape_cast %190 : vector<1x16x512xbf16> to vector<16x512xbf16>
    %192 = arith.mulf %189, %191 : vector<16x512xbf16>
    %c96_184 = arith.constant 96 : index
    %c0_185 = arith.constant 0 : index
    %193 = vector.load %arg15[%c96_184, %c0_185] : memref<432x512xbf16, #tpu.memory_space<vmem>>, vector<16x512xbf16>
    tpu.vector_store %arg15[%c96_184, %c0_185], %192 {strides = array<i32>} : memref<432x512xbf16, #tpu.memory_space<vmem>>, vector<16x512xbf16>,
    %c0_186 = arith.constant 0 : index
    %c72_187 = arith.constant 72 : index
    %194 = vector.load %arg14[%c0_186, %c72_187] : memref<16x768xbf16, #tpu.memory_space<vmem>>, vector<16x512xbf16>
    %c7_188 = arith.constant 7 : index
    %c0_189 = arith.constant 0 : index
    %c0_190 = arith.constant 0 : index
    %195 = vector.load %arg4[%c7_188, %c0_189, %c0_190] : memref<27x16x512xbf16, #tpu.memory_space<vmem>>, vector<1x16x512xbf16>
    %196 = vector.shape_cast %195 : vector<1x16x512xbf16> to vector<16x512xbf16>
    %197 = arith.mulf %194, %196 : vector<16x512xbf16>
    %c112_191 = arith.constant 112 : index
    %c0_192 = arith.constant 0 : index
    %198 = vector.load %arg15[%c112_191, %c0_192] : memref<432x512xbf16, #tpu.memory_space<vmem>>, vector<16x512xbf16>
    tpu.vector_store %arg15[%c112_191, %c0_192], %197 {strides = array<i32>} : memref<432x512xbf16, #tpu.memory_space<vmem>>, vector<16x512xbf16>,
    %c0_193 = arith.constant 0 : index
    %c73_194 = arith.constant 73 : index
    %199 = vector.load %arg14[%c0_193, %c73_194] : memref<16x768xbf16, #tpu.memory_space<vmem>>, vector<16x512xbf16>
    %c8_195 = arith.constant 8 : index
    %c0_196 = arith.constant 0 : index
    %c0_197 = arith.constant 0 : index
    %200 = vector.load %arg4[%c8_195, %c0_196, %c0_197] : memref<27x16x512xbf16, #tpu.memory_space<vmem>>, vector<1x16x512xbf16>
    %201 = vector.shape_cast %200 : vector<1x16x512xbf16> to vector<16x512xbf16>
    %202 = arith.mulf %199, %201 : vector<16x512xbf16>
    %c128_198 = arith.constant 128 : index
    %c0_199 = arith.constant 0 : index
    %203 = vector.load %arg15[%c128_198, %c0_199] : memref<432x512xbf16, #tpu.memory_space<vmem>>, vector<16x512xbf16>
    tpu.vector_store %arg15[%c128_198, %c0_199], %202 {strides = array<i32>} : memref<432x512xbf16, #tpu.memory_space<vmem>>, vector<16x512xbf16>,
    %c0_200 = arith.constant 0 : index
    %c119_201 = arith.constant 119 : index
    %204 = vector.load %arg14[%c0_200, %c119_201] : memref<16x768xbf16, #tpu.memory_space<vmem>>, vector<16x512xbf16>
    %c9_202 = arith.constant 9 : index
    %c0_203 = arith.constant 0 : index
    %c0_204 = arith.constant 0 : index
    %205 = vector.load %arg4[%c9_202, %c0_203, %c0_204] : memref<27x16x512xbf16, #tpu.memory_space<vmem>>, vector<1x16x512xbf16>
    %206 = vector.shape_cast %205 : vector<1x16x512xbf16> to vector<16x512xbf16>
    %207 = arith.mulf %204, %206 : vector<16x512xbf16>
    %c144_205 = arith.constant 144 : index
    %c0_206 = arith.constant 0 : index
    %208 = vector.load %arg15[%c144_205, %c0_206] : memref<432x512xbf16, #tpu.memory_space<vmem>>, vector<16x512xbf16>
    tpu.vector_store %arg15[%c144_205, %c0_206], %207 {strides = array<i32>} : memref<432x512xbf16, #tpu.memory_space<vmem>>, vector<16x512xbf16>,
    %c0_207 = arith.constant 0 : index
    %c120_208 = arith.constant 120 : index
    %209 = vector.load %arg14[%c0_207, %c120_208] : memref<16x768xbf16, #tpu.memory_space<vmem>>, vector<16x512xbf16>
    %c10_209 = arith.constant 10 : index
    %c0_210 = arith.constant 0 : index
    %c0_211 = arith.constant 0 : index
    %210 = vector.load %arg4[%c10_209, %c0_210, %c0_211] : memref<27x16x512xbf16, #tpu.memory_space<vmem>>, vector<1x16x512xbf16>
    %211 = vector.shape_cast %210 : vector<1x16x512xbf16> to vector<16x512xbf16>
    %212 = arith.mulf %209, %211 : vector<16x512xbf16>
    %c160_212 = arith.constant 160 : index
    %c0_213 = arith.constant 0 : index
    %213 = vector.load %arg15[%c160_212, %c0_213] : memref<432x512xbf16, #tpu.memory_space<vmem>>, vector<16x512xbf16>
    tpu.vector_store %arg15[%c160_212, %c0_213], %212 {strides = array<i32>} : memref<432x512xbf16, #tpu.memory_space<vmem>>, vector<16x512xbf16>,
    %c0_214 = arith.constant 0 : index
    %c121_215 = arith.constant 121 : index
    %214 = vector.load %arg14[%c0_214, %c121_215] : memref<16x768xbf16, #tpu.memory_space<vmem>>, vector<16x512xbf16>
    %c11_216 = arith.constant 11 : index
    %c0_217 = arith.constant 0 : index
    %c0_218 = arith.constant 0 : index
    %215 = vector.load %arg4[%c11_216, %c0_217, %c0_218] : memref<27x16x512xbf16, #tpu.memory_space<vmem>>, vector<1x16x512xbf16>
    %216 = vector.shape_cast %215 : vector<1x16x512xbf16> to vector<16x512xbf16>
    %217 = arith.mulf %214, %216 : vector<16x512xbf16>
    %c176_219 = arith.constant 176 : index
    %c0_220 = arith.constant 0 : index
    %218 = vector.load %arg15[%c176_219, %c0_220] : memref<432x512xbf16, #tpu.memory_space<vmem>>, vector<16x512xbf16>
    tpu.vector_store %arg15[%c176_219, %c0_220], %217 {strides = array<i32>} : memref<432x512xbf16, #tpu.memory_space<vmem>>, vector<16x512xbf16>,
    %c0_221 = arith.constant 0 : index
    %c127_222 = arith.constant 127 : index
    %219 = vector.load %arg14[%c0_221, %c127_222] : memref<16x768xbf16, #tpu.memory_space<vmem>>, vector<16x512xbf16>
    %c12_223 = arith.constant 12 : index
    %c0_224 = arith.constant 0 : index
    %c0_225 = arith.constant 0 : index
    %220 = vector.load %arg4[%c12_223, %c0_224, %c0_225] : memref<27x16x512xbf16, #tpu.memory_space<vmem>>, vector<1x16x512xbf16>
    %221 = vector.shape_cast %220 : vector<1x16x512xbf16> to vector<16x512xbf16>
    %222 = arith.mulf %219, %221 : vector<16x512xbf16>
    %c192_226 = arith.constant 192 : index
    %c0_227 = arith.constant 0 : index
    %223 = vector.load %arg15[%c192_226, %c0_227] : memref<432x512xbf16, #tpu.memory_space<vmem>>, vector<16x512xbf16>
    tpu.vector_store %arg15[%c192_226, %c0_227], %222 {strides = array<i32>} : memref<432x512xbf16, #tpu.memory_space<vmem>>, vector<16x512xbf16>,
    %c0_228 = arith.constant 0 : index
    %c128_229 = arith.constant 128 : index
    %224 = vector.load %arg14[%c0_228, %c128_229] : memref<16x768xbf16, #tpu.memory_space<vmem>>, vector<16x512xbf16>
    %c208_230 = arith.constant 208 : index
    %c0_231 = arith.constant 0 : index
    %225 = vector.load %arg15[%c208_230, %c0_231] : memref<432x512xbf16, #tpu.memory_space<vmem>>, vector<16x512xbf16>
    tpu.vector_store %arg15[%c208_230, %c0_231], %224 {strides = array<i32>} : memref<432x512xbf16, #tpu.memory_space<vmem>>, vector<16x512xbf16>,
    %c0_232 = arith.constant 0 : index
    %c129_233 = arith.constant 129 : index
    %226 = vector.load %arg14[%c0_232, %c129_233] : memref<16x768xbf16, #tpu.memory_space<vmem>>, vector<16x512xbf16>
    %c14_234 = arith.constant 14 : index
    %c0_235 = arith.constant 0 : index
    %c0_236 = arith.constant 0 : index
    %227 = vector.load %arg4[%c14_234, %c0_235, %c0_236] : memref<27x16x512xbf16, #tpu.memory_space<vmem>>, vector<1x16x512xbf16>
    %228 = vector.shape_cast %227 : vector<1x16x512xbf16> to vector<16x512xbf16>
    %229 = arith.mulf %226, %228 : vector<16x512xbf16>
    %c224_237 = arith.constant 224 : index
    %c0_238 = arith.constant 0 : index
    %230 = vector.load %arg15[%c224_237, %c0_238] : memref<432x512xbf16, #tpu.memory_space<vmem>>, vector<16x512xbf16>
    tpu.vector_store %arg15[%c224_237, %c0_238], %229 {strides = array<i32>} : memref<432x512xbf16, #tpu.memory_space<vmem>>, vector<16x512xbf16>,
    %c0_239 = arith.constant 0 : index
    %c135_240 = arith.constant 135 : index
    %231 = vector.load %arg14[%c0_239, %c135_240] : memref<16x768xbf16, #tpu.memory_space<vmem>>, vector<16x512xbf16>
    %c15_241 = arith.constant 15 : index
    %c0_242 = arith.constant 0 : index
    %c0_243 = arith.constant 0 : index
    %232 = vector.load %arg4[%c15_241, %c0_242, %c0_243] : memref<27x16x512xbf16, #tpu.memory_space<vmem>>, vector<1x16x512xbf16>
    %233 = vector.shape_cast %232 : vector<1x16x512xbf16> to vector<16x512xbf16>
    %234 = arith.mulf %231, %233 : vector<16x512xbf16>
    %c240_244 = arith.constant 240 : index
    %c0_245 = arith.constant 0 : index
    %235 = vector.load %arg15[%c240_244, %c0_245] : memref<432x512xbf16, #tpu.memory_space<vmem>>, vector<16x512xbf16>
    tpu.vector_store %arg15[%c240_244, %c0_245], %234 {strides = array<i32>} : memref<432x512xbf16, #tpu.memory_space<vmem>>, vector<16x512xbf16>,
    %c0_246 = arith.constant 0 : index
    %c136_247 = arith.constant 136 : index
    %236 = vector.load %arg14[%c0_246, %c136_247] : memref<16x768xbf16, #tpu.memory_space<vmem>>, vector<16x512xbf16>
    %c16_248 = arith.constant 16 : index
    %c0_249 = arith.constant 0 : index
    %c0_250 = arith.constant 0 : index
    %237 = vector.load %arg4[%c16_248, %c0_249, %c0_250] : memref<27x16x512xbf16, #tpu.memory_space<vmem>>, vector<1x16x512xbf16>
    %238 = vector.shape_cast %237 : vector<1x16x512xbf16> to vector<16x512xbf16>
    %239 = arith.mulf %236, %238 : vector<16x512xbf16>
    %c256_251 = arith.constant 256 : index
    %c0_252 = arith.constant 0 : index
    %240 = vector.load %arg15[%c256_251, %c0_252] : memref<432x512xbf16, #tpu.memory_space<vmem>>, vector<16x512xbf16>
    tpu.vector_store %arg15[%c256_251, %c0_252], %239 {strides = array<i32>} : memref<432x512xbf16, #tpu.memory_space<vmem>>, vector<16x512xbf16>,
    %c0_253 = arith.constant 0 : index
    %c137_254 = arith.constant 137 : index
    %241 = vector.load %arg14[%c0_253, %c137_254] : memref<16x768xbf16, #tpu.memory_space<vmem>>, vector<16x512xbf16>
    %c17_255 = arith.constant 17 : index
    %c0_256 = arith.constant 0 : index
    %c0_257 = arith.constant 0 : index
    %242 = vector.load %arg4[%c17_255, %c0_256, %c0_257] : memref<27x16x512xbf16, #tpu.memory_space<vmem>>, vector<1x16x512xbf16>
    %243 = vector.shape_cast %242 : vector<1x16x512xbf16> to vector<16x512xbf16>
    %244 = arith.mulf %241, %243 : vector<16x512xbf16>
    %c272_258 = arith.constant 272 : index
    %c0_259 = arith.constant 0 : index
    %245 = vector.load %arg15[%c272_258, %c0_259] : memref<432x512xbf16, #tpu.memory_space<vmem>>, vector<16x512xbf16>
    tpu.vector_store %arg15[%c272_258, %c0_259], %244 {strides = array<i32>} : memref<432x512xbf16, #tpu.memory_space<vmem>>, vector<16x512xbf16>,
    %c0_260 = arith.constant 0 : index
    %c183_261 = arith.constant 183 : index
    %246 = vector.load %arg14[%c0_260, %c183_261] : memref<16x768xbf16, #tpu.memory_space<vmem>>, vector<16x512xbf16>
    %c18_262 = arith.constant 18 : index
    %c0_263 = arith.constant 0 : index
    %c0_264 = arith.constant 0 : index
    %247 = vector.load %arg4[%c18_262, %c0_263, %c0_264] : memref<27x16x512xbf16, #tpu.memory_space<vmem>>, vector<1x16x512xbf16>
    %248 = vector.shape_cast %247 : vector<1x16x512xbf16> to vector<16x512xbf16>
    %249 = arith.mulf %246, %248 : vector<16x512xbf16>
    %c288_265 = arith.constant 288 : index
    %c0_266 = arith.constant 0 : index
    %250 = vector.load %arg15[%c288_265, %c0_266] : memref<432x512xbf16, #tpu.memory_space<vmem>>, vector<16x512xbf16>
    tpu.vector_store %arg15[%c288_265, %c0_266], %249 {strides = array<i32>} : memref<432x512xbf16, #tpu.memory_space<vmem>>, vector<16x512xbf16>,
    %c0_267 = arith.constant 0 : index
    %c184_268 = arith.constant 184 : index
    %251 = vector.load %arg14[%c0_267, %c184_268] : memref<16x768xbf16, #tpu.memory_space<vmem>>, vector<16x512xbf16>
    %c19_269 = arith.constant 19 : index
    %c0_270 = arith.constant 0 : index
    %c0_271 = arith.constant 0 : index
    %252 = vector.load %arg4[%c19_269, %c0_270, %c0_271] : memref<27x16x512xbf16, #tpu.memory_space<vmem>>, vector<1x16x512xbf16>
    %253 = vector.shape_cast %252 : vector<1x16x512xbf16> to vector<16x512xbf16>
    %254 = arith.mulf %251, %253 : vector<16x512xbf16>
    %c304_272 = arith.constant 304 : index
    %c0_273 = arith.constant 0 : index
    %255 = vector.load %arg15[%c304_272, %c0_273] : memref<432x512xbf16, #tpu.memory_space<vmem>>, vector<16x512xbf16>
    tpu.vector_store %arg15[%c304_272, %c0_273], %254 {strides = array<i32>} : memref<432x512xbf16, #tpu.memory_space<vmem>>, vector<16x512xbf16>,
    %c0_274 = arith.constant 0 : index
    %c185_275 = arith.constant 185 : index
    %256 = vector.load %arg14[%c0_274, %c185_275] : memref<16x768xbf16, #tpu.memory_space<vmem>>, vector<16x512xbf16>
    %c20_276 = arith.constant 20 : index
    %c0_277 = arith.constant 0 : index
    %c0_278 = arith.constant 0 : index
    %257 = vector.load %arg4[%c20_276, %c0_277, %c0_278] : memref<27x16x512xbf16, #tpu.memory_space<vmem>>, vector<1x16x512xbf16>
    %258 = vector.shape_cast %257 : vector<1x16x512xbf16> to vector<16x512xbf16>
    %259 = arith.mulf %256, %258 : vector<16x512xbf16>
    %c320_279 = arith.constant 320 : index
    %c0_280 = arith.constant 0 : index
    %260 = vector.load %arg15[%c320_279, %c0_280] : memref<432x512xbf16, #tpu.memory_space<vmem>>, vector<16x512xbf16>
    tpu.vector_store %arg15[%c320_279, %c0_280], %259 {strides = array<i32>} : memref<432x512xbf16, #tpu.memory_space<vmem>>, vector<16x512xbf16>,
    %c0_281 = arith.constant 0 : index
    %c191_282 = arith.constant 191 : index
    %261 = vector.load %arg14[%c0_281, %c191_282] : memref<16x768xbf16, #tpu.memory_space<vmem>>, vector<16x512xbf16>
    %c21_283 = arith.constant 21 : index
    %c0_284 = arith.constant 0 : index
    %c0_285 = arith.constant 0 : index
    %262 = vector.load %arg4[%c21_283, %c0_284, %c0_285] : memref<27x16x512xbf16, #tpu.memory_space<vmem>>, vector<1x16x512xbf16>
    %263 = vector.shape_cast %262 : vector<1x16x512xbf16> to vector<16x512xbf16>
    %264 = arith.mulf %261, %263 : vector<16x512xbf16>
    %c336_286 = arith.constant 336 : index
    %c0_287 = arith.constant 0 : index
    %265 = vector.load %arg15[%c336_286, %c0_287] : memref<432x512xbf16, #tpu.memory_space<vmem>>, vector<16x512xbf16>
    tpu.vector_store %arg15[%c336_286, %c0_287], %264 {strides = array<i32>} : memref<432x512xbf16, #tpu.memory_space<vmem>>, vector<16x512xbf16>,
    %c0_288 = arith.constant 0 : index
    %c192_289 = arith.constant 192 : index
    %266 = vector.load %arg14[%c0_288, %c192_289] : memref<16x768xbf16, #tpu.memory_space<vmem>>, vector<16x512xbf16>
    %c22_290 = arith.constant 22 : index
    %c0_291 = arith.constant 0 : index
    %c0_292 = arith.constant 0 : index
    %267 = vector.load %arg4[%c22_290, %c0_291, %c0_292] : memref<27x16x512xbf16, #tpu.memory_space<vmem>>, vector<1x16x512xbf16>
    %268 = vector.shape_cast %267 : vector<1x16x512xbf16> to vector<16x512xbf16>
    %269 = arith.mulf %266, %268 : vector<16x512xbf16>
    %c352_293 = arith.constant 352 : index
    %c0_294 = arith.constant 0 : index
    %270 = vector.load %arg15[%c352_293, %c0_294] : memref<432x512xbf16, #tpu.memory_space<vmem>>, vector<16x512xbf16>
    tpu.vector_store %arg15[%c352_293, %c0_294], %269 {strides = array<i32>} : memref<432x512xbf16, #tpu.memory_space<vmem>>, vector<16x512xbf16>,
    %c0_295 = arith.constant 0 : index
    %c193_296 = arith.constant 193 : index
    %271 = vector.load %arg14[%c0_295, %c193_296] : memref<16x768xbf16, #tpu.memory_space<vmem>>, vector<16x512xbf16>
    %c23_297 = arith.constant 23 : index
    %c0_298 = arith.constant 0 : index
    %c0_299 = arith.constant 0 : index
    %272 = vector.load %arg4[%c23_297, %c0_298, %c0_299] : memref<27x16x512xbf16, #tpu.memory_space<vmem>>, vector<1x16x512xbf16>
    %273 = vector.shape_cast %272 : vector<1x16x512xbf16> to vector<16x512xbf16>
    %274 = arith.mulf %271, %273 : vector<16x512xbf16>
    %c368_300 = arith.constant 368 : index
    %c0_301 = arith.constant 0 : index
    %275 = vector.load %arg15[%c368_300, %c0_301] : memref<432x512xbf16, #tpu.memory_space<vmem>>, vector<16x512xbf16>
    tpu.vector_store %arg15[%c368_300, %c0_301], %274 {strides = array<i32>} : memref<432x512xbf16, #tpu.memory_space<vmem>>, vector<16x512xbf16>,
    %c0_302 = arith.constant 0 : index
    %c199_303 = arith.constant 199 : index
    %276 = vector.load %arg14[%c0_302, %c199_303] : memref<16x768xbf16, #tpu.memory_space<vmem>>, vector<16x512xbf16>
    %c24_304 = arith.constant 24 : index
    %c0_305 = arith.constant 0 : index
    %c0_306 = arith.constant 0 : index
    %277 = vector.load %arg4[%c24_304, %c0_305, %c0_306] : memref<27x16x512xbf16, #tpu.memory_space<vmem>>, vector<1x16x512xbf16>
    %278 = vector.shape_cast %277 : vector<1x16x512xbf16> to vector<16x512xbf16>
    %279 = arith.mulf %276, %278 : vector<16x512xbf16>
    %c384_307 = arith.constant 384 : index
    %c0_308 = arith.constant 0 : index
    %280 = vector.load %arg15[%c384_307, %c0_308] : memref<432x512xbf16, #tpu.memory_space<vmem>>, vector<16x512xbf16>
    tpu.vector_store %arg15[%c384_307, %c0_308], %279 {strides = array<i32>} : memref<432x512xbf16, #tpu.memory_space<vmem>>, vector<16x512xbf16>,
    %c0_309 = arith.constant 0 : index
    %c200_310 = arith.constant 200 : index
    %281 = vector.load %arg14[%c0_309, %c200_310] : memref<16x768xbf16, #tpu.memory_space<vmem>>, vector<16x512xbf16>
    %c25_311 = arith.constant 25 : index
    %c0_312 = arith.constant 0 : index
    %c0_313 = arith.constant 0 : index
    %282 = vector.load %arg4[%c25_311, %c0_312, %c0_313] : memref<27x16x512xbf16, #tpu.memory_space<vmem>>, vector<1x16x512xbf16>
    %283 = vector.shape_cast %282 : vector<1x16x512xbf16> to vector<16x512xbf16>
    %284 = arith.mulf %281, %283 : vector<16x512xbf16>
    %c400_314 = arith.constant 400 : index
    %c0_315 = arith.constant 0 : index
    %285 = vector.load %arg15[%c400_314, %c0_315] : memref<432x512xbf16, #tpu.memory_space<vmem>>, vector<16x512xbf16>
    tpu.vector_store %arg15[%c400_314, %c0_315], %284 {strides = array<i32>} : memref<432x512xbf16, #tpu.memory_space<vmem>>, vector<16x512xbf16>,
    %c0_316 = arith.constant 0 : index
    %c201_317 = arith.constant 201 : index
    %286 = vector.load %arg14[%c0_316, %c201_317] : memref<16x768xbf16, #tpu.memory_space<vmem>>, vector<16x512xbf16>
    %c26_318 = arith.constant 26 : index
    %c0_319 = arith.constant 0 : index
    %c0_320 = arith.constant 0 : index
    %287 = vector.load %arg4[%c26_318, %c0_319, %c0_320] : memref<27x16x512xbf16, #tpu.memory_space<vmem>>, vector<1x16x512xbf16>
    %288 = vector.shape_cast %287 : vector<1x16x512xbf16> to vector<16x512xbf16>
    %289 = arith.mulf %286, %288 : vector<16x512xbf16>
    %c416_321 = arith.constant 416 : index
    %c0_322 = arith.constant 0 : index
    %290 = vector.load %arg15[%c416_321, %c0_322] : memref<432x512xbf16, #tpu.memory_space<vmem>>, vector<16x512xbf16>
    tpu.vector_store %arg15[%c416_321, %c0_322], %289 {strides = array<i32>} : memref<432x512xbf16, #tpu.memory_space<vmem>>, vector<16x512xbf16>,
    %c0_323 = arith.constant 0 : index
    %c0_324 = arith.constant 0 : index
    %291 = vector.load %arg7[%c0_323, %c0_324] : memref<8x432xbf16, #tpu.memory_space<vmem>>, vector<8x432xbf16>
    %c0_325 = arith.constant 0 : index
    %c0_326 = arith.constant 0 : index
    %292 = vector.load %arg15[%c0_325, %c0_326] : memref<432x512xbf16, #tpu.memory_space<vmem>>, vector<432x512xbf16>
    %cst_327 = arith.constant dense<0.000000e+00> : vector<8x512xf32>
    %293 = tpu.matmul %291, %292, %cst_327 {dimension_numbers = #tpu.dot_dimension_numbers<[1], [0], [0], [1], [0, 0, 1, 1], [], []>} : vector<8x432xbf16>, vector<432x512xbf16>, vector<8x512xf32> -> vector<8x512xf32>
    %c0_328 = arith.constant 0 : index
    %c0_329 = arith.constant 0 : index
    %294 = vector.load %arg8[%c0_328, %c0_329] : memref<8x1xf32, #tpu.memory_space<vmem>>, vector<8x1xf32>
    %295 = vector.broadcast %294 : vector<8x1xf32> to vector<8x512xf32>
    %296 = arith.addf %293, %295 : vector<8x512xf32>
    %297 = arith.addf %296, %154 : vector<8x512xf32>
    %cst_330 = arith.constant 0.000000e+00 : f32
    %298 = vector.broadcast %cst_330 : f32 to vector<8x512xf32>
    %299 = arith.maximumf %297, %298 : vector<8x512xf32>
    %cst_331 = arith.constant 0.000000e+00 : f32
    %300 = vector.broadcast %cst_331 : f32 to vector<8x512xf32>
    %301 = tpu.concatenate %299, %300 in 0 : vector<8x512xf32>, vector<8x512xf32> -> vector<16x512xf32>
    %302 = arith.truncf %301 : vector<16x512xf32> to vector<16x512xbf16>
    %c0_332 = arith.constant 0 : index
    %c128_333 = arith.constant 128 : index
    %303 = vector.load %arg14[%c0_332, %c128_333] : memref<16x768xbf16, #tpu.memory_space<vmem>>, vector<16x512xbf16>
    tpu.vector_store %arg14[%c0_332, %c128_333], %302 {strides = array<i32>} : memref<16x768xbf16, #tpu.memory_space<vmem>>, vector<16x512xbf16>,
    %c0_334 = arith.constant 0 : index
    %c55_335 = arith.constant 55 : index
    %304 = vector.load %arg14[%c0_334, %c55_335] : memref<16x768xbf16, #tpu.memory_space<vmem>>, vector<16x512xbf16>
    %c0_336 = arith.constant 0 : index
    %c0_337 = arith.constant 0 : index
    %c0_338 = arith.constant 0 : index
    %305 = vector.load %arg4[%c0_336, %c0_337, %c0_338] : memref<27x16x512xbf16, #tpu.memory_space<vmem>>, vector<1x16x512xbf16>
    %306 = vector.shape_cast %305 : vector<1x16x512xbf16> to vector<16x512xbf16>
    %307 = arith.mulf %304, %306 : vector<16x512xbf16>
    %c0_339 = arith.constant 0 : index
    %c0_340 = arith.constant 0 : index
    %308 = vector.load %arg15[%c0_339, %c0_340] : memref<432x512xbf16, #tpu.memory_space<vmem>>, vector<16x512xbf16>
    tpu.vector_store %arg15[%c0_339, %c0_340], %307 {strides = array<i32>} : memref<432x512xbf16, #tpu.memory_space<vmem>>, vector<16x512xbf16>,
    %c0_341 = arith.constant 0 : index
    %c56_342 = arith.constant 56 : index
    %309 = vector.load %arg14[%c0_341, %c56_342] : memref<16x768xbf16, #tpu.memory_space<vmem>>, vector<16x512xbf16>
    %c1_343 = arith.constant 1 : index
    %c0_344 = arith.constant 0 : index
    %c0_345 = arith.constant 0 : index
    %310 = vector.load %arg4[%c1_343, %c0_344, %c0_345] : memref<27x16x512xbf16, #tpu.memory_space<vmem>>, vector<1x16x512xbf16>
    %311 = vector.shape_cast %310 : vector<1x16x512xbf16> to vector<16x512xbf16>
    %312 = arith.mulf %309, %311 : vector<16x512xbf16>
    %c16_346 = arith.constant 16 : index
    %c0_347 = arith.constant 0 : index
    %313 = vector.load %arg15[%c16_346, %c0_347] : memref<432x512xbf16, #tpu.memory_space<vmem>>, vector<16x512xbf16>
    tpu.vector_store %arg15[%c16_346, %c0_347], %312 {strides = array<i32>} : memref<432x512xbf16, #tpu.memory_space<vmem>>, vector<16x512xbf16>,
    %c0_348 = arith.constant 0 : index
    %c57_349 = arith.constant 57 : index
    %314 = vector.load %arg14[%c0_348, %c57_349] : memref<16x768xbf16, #tpu.memory_space<vmem>>, vector<16x512xbf16>
    %c2_350 = arith.constant 2 : index
    %c0_351 = arith.constant 0 : index
    %c0_352 = arith.constant 0 : index
    %315 = vector.load %arg4[%c2_350, %c0_351, %c0_352] : memref<27x16x512xbf16, #tpu.memory_space<vmem>>, vector<1x16x512xbf16>
    %316 = vector.shape_cast %315 : vector<1x16x512xbf16> to vector<16x512xbf16>
    %317 = arith.mulf %314, %316 : vector<16x512xbf16>
    %c32_353 = arith.constant 32 : index
    %c0_354 = arith.constant 0 : index
    %318 = vector.load %arg15[%c32_353, %c0_354] : memref<432x512xbf16, #tpu.memory_space<vmem>>, vector<16x512xbf16>
    tpu.vector_store %arg15[%c32_353, %c0_354], %317 {strides = array<i32>} : memref<432x512xbf16, #tpu.memory_space<vmem>>, vector<16x512xbf16>,
    %c0_355 = arith.constant 0 : index
    %c63_356 = arith.constant 63 : index
    %319 = vector.load %arg14[%c0_355, %c63_356] : memref<16x768xbf16, #tpu.memory_space<vmem>>, vector<16x512xbf16>
    %c3_357 = arith.constant 3 : index
    %c0_358 = arith.constant 0 : index
    %c0_359 = arith.constant 0 : index
    %320 = vector.load %arg4[%c3_357, %c0_358, %c0_359] : memref<27x16x512xbf16, #tpu.memory_space<vmem>>, vector<1x16x512xbf16>
    %321 = vector.shape_cast %320 : vector<1x16x512xbf16> to vector<16x512xbf16>
    %322 = arith.mulf %319, %321 : vector<16x512xbf16>
    %c48_360 = arith.constant 48 : index
    %c0_361 = arith.constant 0 : index
    %323 = vector.load %arg15[%c48_360, %c0_361] : memref<432x512xbf16, #tpu.memory_space<vmem>>, vector<16x512xbf16>
    tpu.vector_store %arg15[%c48_360, %c0_361], %322 {strides = array<i32>} : memref<432x512xbf16, #tpu.memory_space<vmem>>, vector<16x512xbf16>,
    %c0_362 = arith.constant 0 : index
    %c64_363 = arith.constant 64 : index
    %324 = vector.load %arg14[%c0_362, %c64_363] : memref<16x768xbf16, #tpu.memory_space<vmem>>, vector<16x512xbf16>
    %c4_364 = arith.constant 4 : index
    %c0_365 = arith.constant 0 : index
    %c0_366 = arith.constant 0 : index
    %325 = vector.load %arg4[%c4_364, %c0_365, %c0_366] : memref<27x16x512xbf16, #tpu.memory_space<vmem>>, vector<1x16x512xbf16>
    %326 = vector.shape_cast %325 : vector<1x16x512xbf16> to vector<16x512xbf16>
    %327 = arith.mulf %324, %326 : vector<16x512xbf16>
    %c64_367 = arith.constant 64 : index
    %c0_368 = arith.constant 0 : index
    %328 = vector.load %arg15[%c64_367, %c0_368] : memref<432x512xbf16, #tpu.memory_space<vmem>>, vector<16x512xbf16>
    tpu.vector_store %arg15[%c64_367, %c0_368], %327 {strides = array<i32>} : memref<432x512xbf16, #tpu.memory_space<vmem>>, vector<16x512xbf16>,
    %c0_369 = arith.constant 0 : index
    %c65_370 = arith.constant 65 : index
    %329 = vector.load %arg14[%c0_369, %c65_370] : memref<16x768xbf16, #tpu.memory_space<vmem>>, vector<16x512xbf16>
    %c5_371 = arith.constant 5 : index
    %c0_372 = arith.constant 0 : index
    %c0_373 = arith.constant 0 : index
    %330 = vector.load %arg4[%c5_371, %c0_372, %c0_373] : memref<27x16x512xbf16, #tpu.memory_space<vmem>>, vector<1x16x512xbf16>
    %331 = vector.shape_cast %330 : vector<1x16x512xbf16> to vector<16x512xbf16>
    %332 = arith.mulf %329, %331 : vector<16x512xbf16>
    %c80_374 = arith.constant 80 : index
    %c0_375 = arith.constant 0 : index
    %333 = vector.load %arg15[%c80_374, %c0_375] : memref<432x512xbf16, #tpu.memory_space<vmem>>, vector<16x512xbf16>
    tpu.vector_store %arg15[%c80_374, %c0_375], %332 {strides = array<i32>} : memref<432x512xbf16, #tpu.memory_space<vmem>>, vector<16x512xbf16>,
    %c0_376 = arith.constant 0 : index
    %c71_377 = arith.constant 71 : index
    %334 = vector.load %arg14[%c0_376, %c71_377] : memref<16x768xbf16, #tpu.memory_space<vmem>>, vector<16x512xbf16>
    %c6_378 = arith.constant 6 : index
    %c0_379 = arith.constant 0 : index
    %c0_380 = arith.constant 0 : index
    %335 = vector.load %arg4[%c6_378, %c0_379, %c0_380] : memref<27x16x512xbf16, #tpu.memory_space<vmem>>, vector<1x16x512xbf16>
    %336 = vector.shape_cast %335 : vector<1x16x512xbf16> to vector<16x512xbf16>
    %337 = arith.mulf %334, %336 : vector<16x512xbf16>
    %c96_381 = arith.constant 96 : index
    %c0_382 = arith.constant 0 : index
    %338 = vector.load %arg15[%c96_381, %c0_382] : memref<432x512xbf16, #tpu.memory_space<vmem>>, vector<16x512xbf16>
    tpu.vector_store %arg15[%c96_381, %c0_382], %337 {strides = array<i32>} : memref<432x512xbf16, #tpu.memory_space<vmem>>, vector<16x512xbf16>,
    %c0_383 = arith.constant 0 : index
    %c72_384 = arith.constant 72 : index
    %339 = vector.load %arg14[%c0_383, %c72_384] : memref<16x768xbf16, #tpu.memory_space<vmem>>, vector<16x512xbf16>
    %c7_385 = arith.constant 7 : index
    %c0_386 = arith.constant 0 : index
    %c0_387 = arith.constant 0 : index
    %340 = vector.load %arg4[%c7_385, %c0_386, %c0_387] : memref<27x16x512xbf16, #tpu.memory_space<vmem>>, vector<1x16x512xbf16>
    %341 = vector.shape_cast %340 : vector<1x16x512xbf16> to vector<16x512xbf16>
    %342 = arith.mulf %339, %341 : vector<16x512xbf16>
    %c112_388 = arith.constant 112 : index
    %c0_389 = arith.constant 0 : index
    %343 = vector.load %arg15[%c112_388, %c0_389] : memref<432x512xbf16, #tpu.memory_space<vmem>>, vector<16x512xbf16>
    tpu.vector_store %arg15[%c112_388, %c0_389], %342 {strides = array<i32>} : memref<432x512xbf16, #tpu.memory_space<vmem>>, vector<16x512xbf16>,
    %c0_390 = arith.constant 0 : index
    %c73_391 = arith.constant 73 : index
    %344 = vector.load %arg14[%c0_390, %c73_391] : memref<16x768xbf16, #tpu.memory_space<vmem>>, vector<16x512xbf16>
    %c8_392 = arith.constant 8 : index
    %c0_393 = arith.constant 0 : index
    %c0_394 = arith.constant 0 : index
    %345 = vector.load %arg4[%c8_392, %c0_393, %c0_394] : memref<27x16x512xbf16, #tpu.memory_space<vmem>>, vector<1x16x512xbf16>
    %346 = vector.shape_cast %345 : vector<1x16x512xbf16> to vector<16x512xbf16>
    %347 = arith.mulf %344, %346 : vector<16x512xbf16>
    %c128_395 = arith.constant 128 : index
    %c0_396 = arith.constant 0 : index
    %348 = vector.load %arg15[%c128_395, %c0_396] : memref<432x512xbf16, #tpu.memory_space<vmem>>, vector<16x512xbf16>
    tpu.vector_store %arg15[%c128_395, %c0_396], %347 {strides = array<i32>} : memref<432x512xbf16, #tpu.memory_space<vmem>>, vector<16x512xbf16>,
    %c0_397 = arith.constant 0 : index
    %c119_398 = arith.constant 119 : index
    %349 = vector.load %arg14[%c0_397, %c119_398] : memref<16x768xbf16, #tpu.memory_space<vmem>>, vector<16x512xbf16>
    %c9_399 = arith.constant 9 : index
    %c0_400 = arith.constant 0 : index
    %c0_401 = arith.constant 0 : index
    %350 = vector.load %arg4[%c9_399, %c0_400, %c0_401] : memref<27x16x512xbf16, #tpu.memory_space<vmem>>, vector<1x16x512xbf16>
    %351 = vector.shape_cast %350 : vector<1x16x512xbf16> to vector<16x512xbf16>
    %352 = arith.mulf %349, %351 : vector<16x512xbf16>
    %c144_402 = arith.constant 144 : index
    %c0_403 = arith.constant 0 : index
    %353 = vector.load %arg15[%c144_402, %c0_403] : memref<432x512xbf16, #tpu.memory_space<vmem>>, vector<16x512xbf16>
    tpu.vector_store %arg15[%c144_402, %c0_403], %352 {strides = array<i32>} : memref<432x512xbf16, #tpu.memory_space<vmem>>, vector<16x512xbf16>,
    %c0_404 = arith.constant 0 : index
    %c120_405 = arith.constant 120 : index
    %354 = vector.load %arg14[%c0_404, %c120_405] : memref<16x768xbf16, #tpu.memory_space<vmem>>, vector<16x512xbf16>
    %c10_406 = arith.constant 10 : index
    %c0_407 = arith.constant 0 : index
    %c0_408 = arith.constant 0 : index
    %355 = vector.load %arg4[%c10_406, %c0_407, %c0_408] : memref<27x16x512xbf16, #tpu.memory_space<vmem>>, vector<1x16x512xbf16>
    %356 = vector.shape_cast %355 : vector<1x16x512xbf16> to vector<16x512xbf16>
    %357 = arith.mulf %354, %356 : vector<16x512xbf16>
    %c160_409 = arith.constant 160 : index
    %c0_410 = arith.constant 0 : index
    %358 = vector.load %arg15[%c160_409, %c0_410] : memref<432x512xbf16, #tpu.memory_space<vmem>>, vector<16x512xbf16>
    tpu.vector_store %arg15[%c160_409, %c0_410], %357 {strides = array<i32>} : memref<432x512xbf16, #tpu.memory_space<vmem>>, vector<16x512xbf16>,
    %c0_411 = arith.constant 0 : index
    %c121_412 = arith.constant 121 : index
    %359 = vector.load %arg14[%c0_411, %c121_412] : memref<16x768xbf16, #tpu.memory_space<vmem>>, vector<16x512xbf16>
    %c11_413 = arith.constant 11 : index
    %c0_414 = arith.constant 0 : index
    %c0_415 = arith.constant 0 : index
    %360 = vector.load %arg4[%c11_413, %c0_414, %c0_415] : memref<27x16x512xbf16, #tpu.memory_space<vmem>>, vector<1x16x512xbf16>
    %361 = vector.shape_cast %360 : vector<1x16x512xbf16> to vector<16x512xbf16>
    %362 = arith.mulf %359, %361 : vector<16x512xbf16>
    %c176_416 = arith.constant 176 : index
    %c0_417 = arith.constant 0 : index
    %363 = vector.load %arg15[%c176_416, %c0_417] : memref<432x512xbf16, #tpu.memory_space<vmem>>, vector<16x512xbf16>
    tpu.vector_store %arg15[%c176_416, %c0_417], %362 {strides = array<i32>} : memref<432x512xbf16, #tpu.memory_space<vmem>>, vector<16x512xbf16>,
    %c0_418 = arith.constant 0 : index
    %c127_419 = arith.constant 127 : index
    %364 = vector.load %arg14[%c0_418, %c127_419] : memref<16x768xbf16, #tpu.memory_space<vmem>>, vector<16x512xbf16>
    %c12_420 = arith.constant 12 : index
    %c0_421 = arith.constant 0 : index
    %c0_422 = arith.constant 0 : index
    %365 = vector.load %arg4[%c12_420, %c0_421, %c0_422] : memref<27x16x512xbf16, #tpu.memory_space<vmem>>, vector<1x16x512xbf16>
    %366 = vector.shape_cast %365 : vector<1x16x512xbf16> to vector<16x512xbf16>
    %367 = arith.mulf %364, %366 : vector<16x512xbf16>
    %c192_423 = arith.constant 192 : index
    %c0_424 = arith.constant 0 : index
    %368 = vector.load %arg15[%c192_423, %c0_424] : memref<432x512xbf16, #tpu.memory_space<vmem>>, vector<16x512xbf16>
    tpu.vector_store %arg15[%c192_423, %c0_424], %367 {strides = array<i32>} : memref<432x512xbf16, #tpu.memory_space<vmem>>, vector<16x512xbf16>,
    %c0_425 = arith.constant 0 : index
    %c128_426 = arith.constant 128 : index
    %369 = vector.load %arg14[%c0_425, %c128_426] : memref<16x768xbf16, #tpu.memory_space<vmem>>, vector<16x512xbf16>
    %c208_427 = arith.constant 208 : index
    %c0_428 = arith.constant 0 : index
    %370 = vector.load %arg15[%c208_427, %c0_428] : memref<432x512xbf16, #tpu.memory_space<vmem>>, vector<16x512xbf16>
    tpu.vector_store %arg15[%c208_427, %c0_428], %369 {strides = array<i32>} : memref<432x512xbf16, #tpu.memory_space<vmem>>, vector<16x512xbf16>,
    %c0_429 = arith.constant 0 : index
    %c129_430 = arith.constant 129 : index
    %371 = vector.load %arg14[%c0_429, %c129_430] : memref<16x768xbf16, #tpu.memory_space<vmem>>, vector<16x512xbf16>
    %c14_431 = arith.constant 14 : index
    %c0_432 = arith.constant 0 : index
    %c0_433 = arith.constant 0 : index
    %372 = vector.load %arg4[%c14_431, %c0_432, %c0_433] : memref<27x16x512xbf16, #tpu.memory_space<vmem>>, vector<1x16x512xbf16>
    %373 = vector.shape_cast %372 : vector<1x16x512xbf16> to vector<16x512xbf16>
    %374 = arith.mulf %371, %373 : vector<16x512xbf16>
    %c224_434 = arith.constant 224 : index
    %c0_435 = arith.constant 0 : index
    %375 = vector.load %arg15[%c224_434, %c0_435] : memref<432x512xbf16, #tpu.memory_space<vmem>>, vector<16x512xbf16>
    tpu.vector_store %arg15[%c224_434, %c0_435], %374 {strides = array<i32>} : memref<432x512xbf16, #tpu.memory_space<vmem>>, vector<16x512xbf16>,
    %c0_436 = arith.constant 0 : index
    %c135_437 = arith.constant 135 : index
    %376 = vector.load %arg14[%c0_436, %c135_437] : memref<16x768xbf16, #tpu.memory_space<vmem>>, vector<16x512xbf16>
    %c15_438 = arith.constant 15 : index
    %c0_439 = arith.constant 0 : index
    %c0_440 = arith.constant 0 : index
    %377 = vector.load %arg4[%c15_438, %c0_439, %c0_440] : memref<27x16x512xbf16, #tpu.memory_space<vmem>>, vector<1x16x512xbf16>
    %378 = vector.shape_cast %377 : vector<1x16x512xbf16> to vector<16x512xbf16>
    %379 = arith.mulf %376, %378 : vector<16x512xbf16>
    %c240_441 = arith.constant 240 : index
    %c0_442 = arith.constant 0 : index
    %380 = vector.load %arg15[%c240_441, %c0_442] : memref<432x512xbf16, #tpu.memory_space<vmem>>, vector<16x512xbf16>
    tpu.vector_store %arg15[%c240_441, %c0_442], %379 {strides = array<i32>} : memref<432x512xbf16, #tpu.memory_space<vmem>>, vector<16x512xbf16>,
    %c0_443 = arith.constant 0 : index
    %c136_444 = arith.constant 136 : index
    %381 = vector.load %arg14[%c0_443, %c136_444] : memref<16x768xbf16, #tpu.memory_space<vmem>>, vector<16x512xbf16>
    %c16_445 = arith.constant 16 : index
    %c0_446 = arith.constant 0 : index
    %c0_447 = arith.constant 0 : index
    %382 = vector.load %arg4[%c16_445, %c0_446, %c0_447] : memref<27x16x512xbf16, #tpu.memory_space<vmem>>, vector<1x16x512xbf16>
    %383 = vector.shape_cast %382 : vector<1x16x512xbf16> to vector<16x512xbf16>
    %384 = arith.mulf %381, %383 : vector<16x512xbf16>
    %c256_448 = arith.constant 256 : index
    %c0_449 = arith.constant 0 : index
    %385 = vector.load %arg15[%c256_448, %c0_449] : memref<432x512xbf16, #tpu.memory_space<vmem>>, vector<16x512xbf16>
    tpu.vector_store %arg15[%c256_448, %c0_449], %384 {strides = array<i32>} : memref<432x512xbf16, #tpu.memory_space<vmem>>, vector<16x512xbf16>,
    %c0_450 = arith.constant 0 : index
    %c137_451 = arith.constant 137 : index
    %386 = vector.load %arg14[%c0_450, %c137_451] : memref<16x768xbf16, #tpu.memory_space<vmem>>, vector<16x512xbf16>
    %c17_452 = arith.constant 17 : index
    %c0_453 = arith.constant 0 : index
    %c0_454 = arith.constant 0 : index
    %387 = vector.load %arg4[%c17_452, %c0_453, %c0_454] : memref<27x16x512xbf16, #tpu.memory_space<vmem>>, vector<1x16x512xbf16>
    %388 = vector.shape_cast %387 : vector<1x16x512xbf16> to vector<16x512xbf16>
    %389 = arith.mulf %386, %388 : vector<16x512xbf16>
    %c272_455 = arith.constant 272 : index
    %c0_456 = arith.constant 0 : index
    %390 = vector.load %arg15[%c272_455, %c0_456] : memref<432x512xbf16, #tpu.memory_space<vmem>>, vector<16x512xbf16>
    tpu.vector_store %arg15[%c272_455, %c0_456], %389 {strides = array<i32>} : memref<432x512xbf16, #tpu.memory_space<vmem>>, vector<16x512xbf16>,
    %c0_457 = arith.constant 0 : index
    %c183_458 = arith.constant 183 : index
    %391 = vector.load %arg14[%c0_457, %c183_458] : memref<16x768xbf16, #tpu.memory_space<vmem>>, vector<16x512xbf16>
    %c18_459 = arith.constant 18 : index
    %c0_460 = arith.constant 0 : index
    %c0_461 = arith.constant 0 : index
    %392 = vector.load %arg4[%c18_459, %c0_460, %c0_461] : memref<27x16x512xbf16, #tpu.memory_space<vmem>>, vector<1x16x512xbf16>
    %393 = vector.shape_cast %392 : vector<1x16x512xbf16> to vector<16x512xbf16>
    %394 = arith.mulf %391, %393 : vector<16x512xbf16>
    %c288_462 = arith.constant 288 : index
    %c0_463 = arith.constant 0 : index
    %395 = vector.load %arg15[%c288_462, %c0_463] : memref<432x512xbf16, #tpu.memory_space<vmem>>, vector<16x512xbf16>
    tpu.vector_store %arg15[%c288_462, %c0_463], %394 {strides = array<i32>} : memref<432x512xbf16, #tpu.memory_space<vmem>>, vector<16x512xbf16>,
    %c0_464 = arith.constant 0 : index
    %c184_465 = arith.constant 184 : index
    %396 = vector.load %arg14[%c0_464, %c184_465] : memref<16x768xbf16, #tpu.memory_space<vmem>>, vector<16x512xbf16>
    %c19_466 = arith.constant 19 : index
    %c0_467 = arith.constant 0 : index
    %c0_468 = arith.constant 0 : index
    %397 = vector.load %arg4[%c19_466, %c0_467, %c0_468] : memref<27x16x512xbf16, #tpu.memory_space<vmem>>, vector<1x16x512xbf16>
    %398 = vector.shape_cast %397 : vector<1x16x512xbf16> to vector<16x512xbf16>
    %399 = arith.mulf %396, %398 : vector<16x512xbf16>
    %c304_469 = arith.constant 304 : index
    %c0_470 = arith.constant 0 : index
    %400 = vector.load %arg15[%c304_469, %c0_470] : memref<432x512xbf16, #tpu.memory_space<vmem>>, vector<16x512xbf16>
    tpu.vector_store %arg15[%c304_469, %c0_470], %399 {strides = array<i32>} : memref<432x512xbf16, #tpu.memory_space<vmem>>, vector<16x512xbf16>,
    %c0_471 = arith.constant 0 : index
    %c185_472 = arith.constant 185 : index
    %401 = vector.load %arg14[%c0_471, %c185_472] : memref<16x768xbf16, #tpu.memory_space<vmem>>, vector<16x512xbf16>
    %c20_473 = arith.constant 20 : index
    %c0_474 = arith.constant 0 : index
    %c0_475 = arith.constant 0 : index
    %402 = vector.load %arg4[%c20_473, %c0_474, %c0_475] : memref<27x16x512xbf16, #tpu.memory_space<vmem>>, vector<1x16x512xbf16>
    %403 = vector.shape_cast %402 : vector<1x16x512xbf16> to vector<16x512xbf16>
    %404 = arith.mulf %401, %403 : vector<16x512xbf16>
    %c320_476 = arith.constant 320 : index
    %c0_477 = arith.constant 0 : index
    %405 = vector.load %arg15[%c320_476, %c0_477] : memref<432x512xbf16, #tpu.memory_space<vmem>>, vector<16x512xbf16>
    tpu.vector_store %arg15[%c320_476, %c0_477], %404 {strides = array<i32>} : memref<432x512xbf16, #tpu.memory_space<vmem>>, vector<16x512xbf16>,
    %c0_478 = arith.constant 0 : index
    %c191_479 = arith.constant 191 : index
    %406 = vector.load %arg14[%c0_478, %c191_479] : memref<16x768xbf16, #tpu.memory_space<vmem>>, vector<16x512xbf16>
    %c21_480 = arith.constant 21 : index
    %c0_481 = arith.constant 0 : index
    %c0_482 = arith.constant 0 : index
    %407 = vector.load %arg4[%c21_480, %c0_481, %c0_482] : memref<27x16x512xbf16, #tpu.memory_space<vmem>>, vector<1x16x512xbf16>
    %408 = vector.shape_cast %407 : vector<1x16x512xbf16> to vector<16x512xbf16>
    %409 = arith.mulf %406, %408 : vector<16x512xbf16>
    %c336_483 = arith.constant 336 : index
    %c0_484 = arith.constant 0 : index
    %410 = vector.load %arg15[%c336_483, %c0_484] : memref<432x512xbf16, #tpu.memory_space<vmem>>, vector<16x512xbf16>
    tpu.vector_store %arg15[%c336_483, %c0_484], %409 {strides = array<i32>} : memref<432x512xbf16, #tpu.memory_space<vmem>>, vector<16x512xbf16>,
    %c0_485 = arith.constant 0 : index
    %c192_486 = arith.constant 192 : index
    %411 = vector.load %arg14[%c0_485, %c192_486] : memref<16x768xbf16, #tpu.memory_space<vmem>>, vector<16x512xbf16>
    %c22_487 = arith.constant 22 : index
    %c0_488 = arith.constant 0 : index
    %c0_489 = arith.constant 0 : index
    %412 = vector.load %arg4[%c22_487, %c0_488, %c0_489] : memref<27x16x512xbf16, #tpu.memory_space<vmem>>, vector<1x16x512xbf16>
    %413 = vector.shape_cast %412 : vector<1x16x512xbf16> to vector<16x512xbf16>
    %414 = arith.mulf %411, %413 : vector<16x512xbf16>
    %c352_490 = arith.constant 352 : index
    %c0_491 = arith.constant 0 : index
    %415 = vector.load %arg15[%c352_490, %c0_491] : memref<432x512xbf16, #tpu.memory_space<vmem>>, vector<16x512xbf16>
    tpu.vector_store %arg15[%c352_490, %c0_491], %414 {strides = array<i32>} : memref<432x512xbf16, #tpu.memory_space<vmem>>, vector<16x512xbf16>,
    %c0_492 = arith.constant 0 : index
    %c193_493 = arith.constant 193 : index
    %416 = vector.load %arg14[%c0_492, %c193_493] : memref<16x768xbf16, #tpu.memory_space<vmem>>, vector<16x512xbf16>
    %c23_494 = arith.constant 23 : index
    %c0_495 = arith.constant 0 : index
    %c0_496 = arith.constant 0 : index
    %417 = vector.load %arg4[%c23_494, %c0_495, %c0_496] : memref<27x16x512xbf16, #tpu.memory_space<vmem>>, vector<1x16x512xbf16>
    %418 = vector.shape_cast %417 : vector<1x16x512xbf16> to vector<16x512xbf16>
    %419 = arith.mulf %416, %418 : vector<16x512xbf16>
    %c368_497 = arith.constant 368 : index
    %c0_498 = arith.constant 0 : index
    %420 = vector.load %arg15[%c368_497, %c0_498] : memref<432x512xbf16, #tpu.memory_space<vmem>>, vector<16x512xbf16>
    tpu.vector_store %arg15[%c368_497, %c0_498], %419 {strides = array<i32>} : memref<432x512xbf16, #tpu.memory_space<vmem>>, vector<16x512xbf16>,
    %c0_499 = arith.constant 0 : index
    %c199_500 = arith.constant 199 : index
    %421 = vector.load %arg14[%c0_499, %c199_500] : memref<16x768xbf16, #tpu.memory_space<vmem>>, vector<16x512xbf16>
    %c24_501 = arith.constant 24 : index
    %c0_502 = arith.constant 0 : index
    %c0_503 = arith.constant 0 : index
    %422 = vector.load %arg4[%c24_501, %c0_502, %c0_503] : memref<27x16x512xbf16, #tpu.memory_space<vmem>>, vector<1x16x512xbf16>
    %423 = vector.shape_cast %422 : vector<1x16x512xbf16> to vector<16x512xbf16>
    %424 = arith.mulf %421, %423 : vector<16x512xbf16>
    %c384_504 = arith.constant 384 : index
    %c0_505 = arith.constant 0 : index
    %425 = vector.load %arg15[%c384_504, %c0_505] : memref<432x512xbf16, #tpu.memory_space<vmem>>, vector<16x512xbf16>
    tpu.vector_store %arg15[%c384_504, %c0_505], %424 {strides = array<i32>} : memref<432x512xbf16, #tpu.memory_space<vmem>>, vector<16x512xbf16>,
    %c0_506 = arith.constant 0 : index
    %c200_507 = arith.constant 200 : index
    %426 = vector.load %arg14[%c0_506, %c200_507] : memref<16x768xbf16, #tpu.memory_space<vmem>>, vector<16x512xbf16>
    %c25_508 = arith.constant 25 : index
    %c0_509 = arith.constant 0 : index
    %c0_510 = arith.constant 0 : index
    %427 = vector.load %arg4[%c25_508, %c0_509, %c0_510] : memref<27x16x512xbf16, #tpu.memory_space<vmem>>, vector<1x16x512xbf16>
    %428 = vector.shape_cast %427 : vector<1x16x512xbf16> to vector<16x512xbf16>
    %429 = arith.mulf %426, %428 : vector<16x512xbf16>
    %c400_511 = arith.constant 400 : index
    %c0_512 = arith.constant 0 : index
    %430 = vector.load %arg15[%c400_511, %c0_512] : memref<432x512xbf16, #tpu.memory_space<vmem>>, vector<16x512xbf16>
    tpu.vector_store %arg15[%c400_511, %c0_512], %429 {strides = array<i32>} : memref<432x512xbf16, #tpu.memory_space<vmem>>, vector<16x512xbf16>,
    %c0_513 = arith.constant 0 : index
    %c201_514 = arith.constant 201 : index
    %431 = vector.load %arg14[%c0_513, %c201_514] : memref<16x768xbf16, #tpu.memory_space<vmem>>, vector<16x512xbf16>
    %c26_515 = arith.constant 26 : index
    %c0_516 = arith.constant 0 : index
    %c0_517 = arith.constant 0 : index
    %432 = vector.load %arg4[%c26_515, %c0_516, %c0_517] : memref<27x16x512xbf16, #tpu.memory_space<vmem>>, vector<1x16x512xbf16>
    %433 = vector.shape_cast %432 : vector<1x16x512xbf16> to vector<16x512xbf16>
    %434 = arith.mulf %431, %433 : vector<16x512xbf16>
    %c416_518 = arith.constant 416 : index
    %c0_519 = arith.constant 0 : index
    %435 = vector.load %arg15[%c416_518, %c0_519] : memref<432x512xbf16, #tpu.memory_space<vmem>>, vector<16x512xbf16>
    tpu.vector_store %arg15[%c416_518, %c0_519], %434 {strides = array<i32>} : memref<432x512xbf16, #tpu.memory_space<vmem>>, vector<16x512xbf16>,
    %c0_520 = arith.constant 0 : index
    %c0_521 = arith.constant 0 : index
    %436 = vector.load %arg9[%c0_520, %c0_521] : memref<16x432xbf16, #tpu.memory_space<vmem>>, vector<16x432xbf16>
    %c0_522 = arith.constant 0 : index
    %c0_523 = arith.constant 0 : index
    %437 = vector.load %arg15[%c0_522, %c0_523] : memref<432x512xbf16, #tpu.memory_space<vmem>>, vector<432x512xbf16>
    %cst_524 = arith.constant dense<0.000000e+00> : vector<16x512xf32>
    %438 = tpu.matmul %436, %437, %cst_524 {dimension_numbers = #tpu.dot_dimension_numbers<[1], [0], [0], [1], [0, 0, 1, 1], [], []>} : vector<16x432xbf16>, vector<432x512xbf16>, vector<16x512xf32> -> vector<16x512xf32>
    %c0_525 = arith.constant 0 : index
    %c0_526 = arith.constant 0 : index
    %439 = vector.load %arg10[%c0_525, %c0_526] : memref<16x1xf32, #tpu.memory_space<vmem>>, vector<16x1xf32>
    %440 = vector.broadcast %439 : vector<16x1xf32> to vector<16x512xf32>
    %441 = arith.addf %438, %440 : vector<16x512xf32>
    %442 = vector.extract_strided_slice %441 {offsets = [0, 0], sizes = [8, 512], strides = [1, 1]} : vector<16x512xf32> to vector<8x512xf32>
    %cst_527 = arith.constant 0.000000e+00 : f32
    %443 = vector.broadcast %cst_527 : f32 to vector<8x512xf32>
    %444 = arith.maximumf %442, %443 : vector<8x512xf32>
    %445 = vector.extract_strided_slice %441 {offsets = [8, 0], sizes = [8, 512], strides = [1, 1]} : vector<16x512xf32> to vector<8x512xf32>
    %cst_528 = arith.constant 0.000000e+00 : f32
    %446 = vector.broadcast %cst_528 : f32 to vector<8x512xf32>
    %447 = tpu.concatenate %444, %446 in 0 : vector<8x512xf32>, vector<8x512xf32> -> vector<16x512xf32>
    %448 = arith.truncf %447 : vector<16x512xf32> to vector<16x512xbf16>
    %c0_529 = arith.constant 0 : index
    %c128_530 = arith.constant 128 : index
    %449 = vector.load %arg14[%c0_529, %c128_530] : memref<16x768xbf16, #tpu.memory_space<vmem>>, vector<16x512xbf16>
    tpu.vector_store %arg14[%c0_529, %c128_530], %448 {strides = array<i32>} : memref<16x768xbf16, #tpu.memory_space<vmem>>, vector<16x512xbf16>,
    %c0_531 = arith.constant 0 : index
    %c55_532 = arith.constant 55 : index
    %450 = vector.load %arg14[%c0_531, %c55_532] : memref<16x768xbf16, #tpu.memory_space<vmem>>, vector<16x512xbf16>
    %c0_533 = arith.constant 0 : index
    %c0_534 = arith.constant 0 : index
    %c0_535 = arith.constant 0 : index
    %451 = vector.load %arg4[%c0_533, %c0_534, %c0_535] : memref<27x16x512xbf16, #tpu.memory_space<vmem>>, vector<1x16x512xbf16>
    %452 = vector.shape_cast %451 : vector<1x16x512xbf16> to vector<16x512xbf16>
    %453 = arith.mulf %450, %452 : vector<16x512xbf16>
    %c0_536 = arith.constant 0 : index
    %c0_537 = arith.constant 0 : index
    %454 = vector.load %arg15[%c0_536, %c0_537] : memref<432x512xbf16, #tpu.memory_space<vmem>>, vector<16x512xbf16>
    tpu.vector_store %arg15[%c0_536, %c0_537], %453 {strides = array<i32>} : memref<432x512xbf16, #tpu.memory_space<vmem>>, vector<16x512xbf16>,
    %c0_538 = arith.constant 0 : index
    %c56_539 = arith.constant 56 : index
    %455 = vector.load %arg14[%c0_538, %c56_539] : memref<16x768xbf16, #tpu.memory_space<vmem>>, vector<16x512xbf16>
    %c1_540 = arith.constant 1 : index
    %c0_541 = arith.constant 0 : index
    %c0_542 = arith.constant 0 : index
    %456 = vector.load %arg4[%c1_540, %c0_541, %c0_542] : memref<27x16x512xbf16, #tpu.memory_space<vmem>>, vector<1x16x512xbf16>
    %457 = vector.shape_cast %456 : vector<1x16x512xbf16> to vector<16x512xbf16>
    %458 = arith.mulf %455, %457 : vector<16x512xbf16>
    %c16_543 = arith.constant 16 : index
    %c0_544 = arith.constant 0 : index
    %459 = vector.load %arg15[%c16_543, %c0_544] : memref<432x512xbf16, #tpu.memory_space<vmem>>, vector<16x512xbf16>
    tpu.vector_store %arg15[%c16_543, %c0_544], %458 {strides = array<i32>} : memref<432x512xbf16, #tpu.memory_space<vmem>>, vector<16x512xbf16>,
    %c0_545 = arith.constant 0 : index
    %c57_546 = arith.constant 57 : index
    %460 = vector.load %arg14[%c0_545, %c57_546] : memref<16x768xbf16, #tpu.memory_space<vmem>>, vector<16x512xbf16>
    %c2_547 = arith.constant 2 : index
    %c0_548 = arith.constant 0 : index
    %c0_549 = arith.constant 0 : index
    %461 = vector.load %arg4[%c2_547, %c0_548, %c0_549] : memref<27x16x512xbf16, #tpu.memory_space<vmem>>, vector<1x16x512xbf16>
    %462 = vector.shape_cast %461 : vector<1x16x512xbf16> to vector<16x512xbf16>
    %463 = arith.mulf %460, %462 : vector<16x512xbf16>
    %c32_550 = arith.constant 32 : index
    %c0_551 = arith.constant 0 : index
    %464 = vector.load %arg15[%c32_550, %c0_551] : memref<432x512xbf16, #tpu.memory_space<vmem>>, vector<16x512xbf16>
    tpu.vector_store %arg15[%c32_550, %c0_551], %463 {strides = array<i32>} : memref<432x512xbf16, #tpu.memory_space<vmem>>, vector<16x512xbf16>,
    %c0_552 = arith.constant 0 : index
    %c63_553 = arith.constant 63 : index
    %465 = vector.load %arg14[%c0_552, %c63_553] : memref<16x768xbf16, #tpu.memory_space<vmem>>, vector<16x512xbf16>
    %c3_554 = arith.constant 3 : index
    %c0_555 = arith.constant 0 : index
    %c0_556 = arith.constant 0 : index
    %466 = vector.load %arg4[%c3_554, %c0_555, %c0_556] : memref<27x16x512xbf16, #tpu.memory_space<vmem>>, vector<1x16x512xbf16>
    %467 = vector.shape_cast %466 : vector<1x16x512xbf16> to vector<16x512xbf16>
    %468 = arith.mulf %465, %467 : vector<16x512xbf16>
    %c48_557 = arith.constant 48 : index
    %c0_558 = arith.constant 0 : index
    %469 = vector.load %arg15[%c48_557, %c0_558] : memref<432x512xbf16, #tpu.memory_space<vmem>>, vector<16x512xbf16>
    tpu.vector_store %arg15[%c48_557, %c0_558], %468 {strides = array<i32>} : memref<432x512xbf16, #tpu.memory_space<vmem>>, vector<16x512xbf16>,
    %c0_559 = arith.constant 0 : index
    %c64_560 = arith.constant 64 : index
    %470 = vector.load %arg14[%c0_559, %c64_560] : memref<16x768xbf16, #tpu.memory_space<vmem>>, vector<16x512xbf16>
    %c4_561 = arith.constant 4 : index
    %c0_562 = arith.constant 0 : index
    %c0_563 = arith.constant 0 : index
    %471 = vector.load %arg4[%c4_561, %c0_562, %c0_563] : memref<27x16x512xbf16, #tpu.memory_space<vmem>>, vector<1x16x512xbf16>
    %472 = vector.shape_cast %471 : vector<1x16x512xbf16> to vector<16x512xbf16>
    %473 = arith.mulf %470, %472 : vector<16x512xbf16>
    %c64_564 = arith.constant 64 : index
    %c0_565 = arith.constant 0 : index
    %474 = vector.load %arg15[%c64_564, %c0_565] : memref<432x512xbf16, #tpu.memory_space<vmem>>, vector<16x512xbf16>
    tpu.vector_store %arg15[%c64_564, %c0_565], %473 {strides = array<i32>} : memref<432x512xbf16, #tpu.memory_space<vmem>>, vector<16x512xbf16>,
    %c0_566 = arith.constant 0 : index
    %c65_567 = arith.constant 65 : index
    %475 = vector.load %arg14[%c0_566, %c65_567] : memref<16x768xbf16, #tpu.memory_space<vmem>>, vector<16x512xbf16>
    %c5_568 = arith.constant 5 : index
    %c0_569 = arith.constant 0 : index
    %c0_570 = arith.constant 0 : index
    %476 = vector.load %arg4[%c5_568, %c0_569, %c0_570] : memref<27x16x512xbf16, #tpu.memory_space<vmem>>, vector<1x16x512xbf16>
    %477 = vector.shape_cast %476 : vector<1x16x512xbf16> to vector<16x512xbf16>
    %478 = arith.mulf %475, %477 : vector<16x512xbf16>
    %c80_571 = arith.constant 80 : index
    %c0_572 = arith.constant 0 : index
    %479 = vector.load %arg15[%c80_571, %c0_572] : memref<432x512xbf16, #tpu.memory_space<vmem>>, vector<16x512xbf16>
    tpu.vector_store %arg15[%c80_571, %c0_572], %478 {strides = array<i32>} : memref<432x512xbf16, #tpu.memory_space<vmem>>, vector<16x512xbf16>,
    %c0_573 = arith.constant 0 : index
    %c71_574 = arith.constant 71 : index
    %480 = vector.load %arg14[%c0_573, %c71_574] : memref<16x768xbf16, #tpu.memory_space<vmem>>, vector<16x512xbf16>
    %c6_575 = arith.constant 6 : index
    %c0_576 = arith.constant 0 : index
    %c0_577 = arith.constant 0 : index
    %481 = vector.load %arg4[%c6_575, %c0_576, %c0_577] : memref<27x16x512xbf16, #tpu.memory_space<vmem>>, vector<1x16x512xbf16>
    %482 = vector.shape_cast %481 : vector<1x16x512xbf16> to vector<16x512xbf16>
    %483 = arith.mulf %480, %482 : vector<16x512xbf16>
    %c96_578 = arith.constant 96 : index
    %c0_579 = arith.constant 0 : index
    %484 = vector.load %arg15[%c96_578, %c0_579] : memref<432x512xbf16, #tpu.memory_space<vmem>>, vector<16x512xbf16>
    tpu.vector_store %arg15[%c96_578, %c0_579], %483 {strides = array<i32>} : memref<432x512xbf16, #tpu.memory_space<vmem>>, vector<16x512xbf16>,
    %c0_580 = arith.constant 0 : index
    %c72_581 = arith.constant 72 : index
    %485 = vector.load %arg14[%c0_580, %c72_581] : memref<16x768xbf16, #tpu.memory_space<vmem>>, vector<16x512xbf16>
    %c7_582 = arith.constant 7 : index
    %c0_583 = arith.constant 0 : index
    %c0_584 = arith.constant 0 : index
    %486 = vector.load %arg4[%c7_582, %c0_583, %c0_584] : memref<27x16x512xbf16, #tpu.memory_space<vmem>>, vector<1x16x512xbf16>
    %487 = vector.shape_cast %486 : vector<1x16x512xbf16> to vector<16x512xbf16>
    %488 = arith.mulf %485, %487 : vector<16x512xbf16>
    %c112_585 = arith.constant 112 : index
    %c0_586 = arith.constant 0 : index
    %489 = vector.load %arg15[%c112_585, %c0_586] : memref<432x512xbf16, #tpu.memory_space<vmem>>, vector<16x512xbf16>
    tpu.vector_store %arg15[%c112_585, %c0_586], %488 {strides = array<i32>} : memref<432x512xbf16, #tpu.memory_space<vmem>>, vector<16x512xbf16>,
    %c0_587 = arith.constant 0 : index
    %c73_588 = arith.constant 73 : index
    %490 = vector.load %arg14[%c0_587, %c73_588] : memref<16x768xbf16, #tpu.memory_space<vmem>>, vector<16x512xbf16>
    %c8_589 = arith.constant 8 : index
    %c0_590 = arith.constant 0 : index
    %c0_591 = arith.constant 0 : index
    %491 = vector.load %arg4[%c8_589, %c0_590, %c0_591] : memref<27x16x512xbf16, #tpu.memory_space<vmem>>, vector<1x16x512xbf16>
    %492 = vector.shape_cast %491 : vector<1x16x512xbf16> to vector<16x512xbf16>
    %493 = arith.mulf %490, %492 : vector<16x512xbf16>
    %c128_592 = arith.constant 128 : index
    %c0_593 = arith.constant 0 : index
    %494 = vector.load %arg15[%c128_592, %c0_593] : memref<432x512xbf16, #tpu.memory_space<vmem>>, vector<16x512xbf16>
    tpu.vector_store %arg15[%c128_592, %c0_593], %493 {strides = array<i32>} : memref<432x512xbf16, #tpu.memory_space<vmem>>, vector<16x512xbf16>,
    %c0_594 = arith.constant 0 : index
    %c119_595 = arith.constant 119 : index
    %495 = vector.load %arg14[%c0_594, %c119_595] : memref<16x768xbf16, #tpu.memory_space<vmem>>, vector<16x512xbf16>
    %c9_596 = arith.constant 9 : index
    %c0_597 = arith.constant 0 : index
    %c0_598 = arith.constant 0 : index
    %496 = vector.load %arg4[%c9_596, %c0_597, %c0_598] : memref<27x16x512xbf16, #tpu.memory_space<vmem>>, vector<1x16x512xbf16>
    %497 = vector.shape_cast %496 : vector<1x16x512xbf16> to vector<16x512xbf16>
    %498 = arith.mulf %495, %497 : vector<16x512xbf16>
    %c144_599 = arith.constant 144 : index
    %c0_600 = arith.constant 0 : index
    %499 = vector.load %arg15[%c144_599, %c0_600] : memref<432x512xbf16, #tpu.memory_space<vmem>>, vector<16x512xbf16>
    tpu.vector_store %arg15[%c144_599, %c0_600], %498 {strides = array<i32>} : memref<432x512xbf16, #tpu.memory_space<vmem>>, vector<16x512xbf16>,
    %c0_601 = arith.constant 0 : index
    %c120_602 = arith.constant 120 : index
    %500 = vector.load %arg14[%c0_601, %c120_602] : memref<16x768xbf16, #tpu.memory_space<vmem>>, vector<16x512xbf16>
    %c10_603 = arith.constant 10 : index
    %c0_604 = arith.constant 0 : index
    %c0_605 = arith.constant 0 : index
    %501 = vector.load %arg4[%c10_603, %c0_604, %c0_605] : memref<27x16x512xbf16, #tpu.memory_space<vmem>>, vector<1x16x512xbf16>
    %502 = vector.shape_cast %501 : vector<1x16x512xbf16> to vector<16x512xbf16>
    %503 = arith.mulf %500, %502 : vector<16x512xbf16>
    %c160_606 = arith.constant 160 : index
    %c0_607 = arith.constant 0 : index
    %504 = vector.load %arg15[%c160_606, %c0_607] : memref<432x512xbf16, #tpu.memory_space<vmem>>, vector<16x512xbf16>
    tpu.vector_store %arg15[%c160_606, %c0_607], %503 {strides = array<i32>} : memref<432x512xbf16, #tpu.memory_space<vmem>>, vector<16x512xbf16>,
    %c0_608 = arith.constant 0 : index
    %c121_609 = arith.constant 121 : index
    %505 = vector.load %arg14[%c0_608, %c121_609] : memref<16x768xbf16, #tpu.memory_space<vmem>>, vector<16x512xbf16>
    %c11_610 = arith.constant 11 : index
    %c0_611 = arith.constant 0 : index
    %c0_612 = arith.constant 0 : index
    %506 = vector.load %arg4[%c11_610, %c0_611, %c0_612] : memref<27x16x512xbf16, #tpu.memory_space<vmem>>, vector<1x16x512xbf16>
    %507 = vector.shape_cast %506 : vector<1x16x512xbf16> to vector<16x512xbf16>
    %508 = arith.mulf %505, %507 : vector<16x512xbf16>
    %c176_613 = arith.constant 176 : index
    %c0_614 = arith.constant 0 : index
    %509 = vector.load %arg15[%c176_613, %c0_614] : memref<432x512xbf16, #tpu.memory_space<vmem>>, vector<16x512xbf16>
    tpu.vector_store %arg15[%c176_613, %c0_614], %508 {strides = array<i32>} : memref<432x512xbf16, #tpu.memory_space<vmem>>, vector<16x512xbf16>,
    %c0_615 = arith.constant 0 : index
    %c127_616 = arith.constant 127 : index
    %510 = vector.load %arg14[%c0_615, %c127_616] : memref<16x768xbf16, #tpu.memory_space<vmem>>, vector<16x512xbf16>
    %c12_617 = arith.constant 12 : index
    %c0_618 = arith.constant 0 : index
    %c0_619 = arith.constant 0 : index
    %511 = vector.load %arg4[%c12_617, %c0_618, %c0_619] : memref<27x16x512xbf16, #tpu.memory_space<vmem>>, vector<1x16x512xbf16>
    %512 = vector.shape_cast %511 : vector<1x16x512xbf16> to vector<16x512xbf16>
    %513 = arith.mulf %510, %512 : vector<16x512xbf16>
    %c192_620 = arith.constant 192 : index
    %c0_621 = arith.constant 0 : index
    %514 = vector.load %arg15[%c192_620, %c0_621] : memref<432x512xbf16, #tpu.memory_space<vmem>>, vector<16x512xbf16>
    tpu.vector_store %arg15[%c192_620, %c0_621], %513 {strides = array<i32>} : memref<432x512xbf16, #tpu.memory_space<vmem>>, vector<16x512xbf16>,
    %c0_622 = arith.constant 0 : index
    %c128_623 = arith.constant 128 : index
    %515 = vector.load %arg14[%c0_622, %c128_623] : memref<16x768xbf16, #tpu.memory_space<vmem>>, vector<16x512xbf16>
    %c208_624 = arith.constant 208 : index
    %c0_625 = arith.constant 0 : index
    %516 = vector.load %arg15[%c208_624, %c0_625] : memref<432x512xbf16, #tpu.memory_space<vmem>>, vector<16x512xbf16>
    tpu.vector_store %arg15[%c208_624, %c0_625], %515 {strides = array<i32>} : memref<432x512xbf16, #tpu.memory_space<vmem>>, vector<16x512xbf16>,
    %c0_626 = arith.constant 0 : index
    %c129_627 = arith.constant 129 : index
    %517 = vector.load %arg14[%c0_626, %c129_627] : memref<16x768xbf16, #tpu.memory_space<vmem>>, vector<16x512xbf16>
    %c14_628 = arith.constant 14 : index
    %c0_629 = arith.constant 0 : index
    %c0_630 = arith.constant 0 : index
    %518 = vector.load %arg4[%c14_628, %c0_629, %c0_630] : memref<27x16x512xbf16, #tpu.memory_space<vmem>>, vector<1x16x512xbf16>
    %519 = vector.shape_cast %518 : vector<1x16x512xbf16> to vector<16x512xbf16>
    %520 = arith.mulf %517, %519 : vector<16x512xbf16>
    %c224_631 = arith.constant 224 : index
    %c0_632 = arith.constant 0 : index
    %521 = vector.load %arg15[%c224_631, %c0_632] : memref<432x512xbf16, #tpu.memory_space<vmem>>, vector<16x512xbf16>
    tpu.vector_store %arg15[%c224_631, %c0_632], %520 {strides = array<i32>} : memref<432x512xbf16, #tpu.memory_space<vmem>>, vector<16x512xbf16>,
    %c0_633 = arith.constant 0 : index
    %c135_634 = arith.constant 135 : index
    %522 = vector.load %arg14[%c0_633, %c135_634] : memref<16x768xbf16, #tpu.memory_space<vmem>>, vector<16x512xbf16>
    %c15_635 = arith.constant 15 : index
    %c0_636 = arith.constant 0 : index
    %c0_637 = arith.constant 0 : index
    %523 = vector.load %arg4[%c15_635, %c0_636, %c0_637] : memref<27x16x512xbf16, #tpu.memory_space<vmem>>, vector<1x16x512xbf16>
    %524 = vector.shape_cast %523 : vector<1x16x512xbf16> to vector<16x512xbf16>
    %525 = arith.mulf %522, %524 : vector<16x512xbf16>
    %c240_638 = arith.constant 240 : index
    %c0_639 = arith.constant 0 : index
    %526 = vector.load %arg15[%c240_638, %c0_639] : memref<432x512xbf16, #tpu.memory_space<vmem>>, vector<16x512xbf16>
    tpu.vector_store %arg15[%c240_638, %c0_639], %525 {strides = array<i32>} : memref<432x512xbf16, #tpu.memory_space<vmem>>, vector<16x512xbf16>,
    %c0_640 = arith.constant 0 : index
    %c136_641 = arith.constant 136 : index
    %527 = vector.load %arg14[%c0_640, %c136_641] : memref<16x768xbf16, #tpu.memory_space<vmem>>, vector<16x512xbf16>
    %c16_642 = arith.constant 16 : index
    %c0_643 = arith.constant 0 : index
    %c0_644 = arith.constant 0 : index
    %528 = vector.load %arg4[%c16_642, %c0_643, %c0_644] : memref<27x16x512xbf16, #tpu.memory_space<vmem>>, vector<1x16x512xbf16>
    %529 = vector.shape_cast %528 : vector<1x16x512xbf16> to vector<16x512xbf16>
    %530 = arith.mulf %527, %529 : vector<16x512xbf16>
    %c256_645 = arith.constant 256 : index
    %c0_646 = arith.constant 0 : index
    %531 = vector.load %arg15[%c256_645, %c0_646] : memref<432x512xbf16, #tpu.memory_space<vmem>>, vector<16x512xbf16>
    tpu.vector_store %arg15[%c256_645, %c0_646], %530 {strides = array<i32>} : memref<432x512xbf16, #tpu.memory_space<vmem>>, vector<16x512xbf16>,
    %c0_647 = arith.constant 0 : index
    %c137_648 = arith.constant 137 : index
    %532 = vector.load %arg14[%c0_647, %c137_648] : memref<16x768xbf16, #tpu.memory_space<vmem>>, vector<16x512xbf16>
    %c17_649 = arith.constant 17 : index
    %c0_650 = arith.constant 0 : index
    %c0_651 = arith.constant 0 : index
    %533 = vector.load %arg4[%c17_649, %c0_650, %c0_651] : memref<27x16x512xbf16, #tpu.memory_space<vmem>>, vector<1x16x512xbf16>
    %534 = vector.shape_cast %533 : vector<1x16x512xbf16> to vector<16x512xbf16>
    %535 = arith.mulf %532, %534 : vector<16x512xbf16>
    %c272_652 = arith.constant 272 : index
    %c0_653 = arith.constant 0 : index
    %536 = vector.load %arg15[%c272_652, %c0_653] : memref<432x512xbf16, #tpu.memory_space<vmem>>, vector<16x512xbf16>
    tpu.vector_store %arg15[%c272_652, %c0_653], %535 {strides = array<i32>} : memref<432x512xbf16, #tpu.memory_space<vmem>>, vector<16x512xbf16>,
    %c0_654 = arith.constant 0 : index
    %c183_655 = arith.constant 183 : index
    %537 = vector.load %arg14[%c0_654, %c183_655] : memref<16x768xbf16, #tpu.memory_space<vmem>>, vector<16x512xbf16>
    %c18_656 = arith.constant 18 : index
    %c0_657 = arith.constant 0 : index
    %c0_658 = arith.constant 0 : index
    %538 = vector.load %arg4[%c18_656, %c0_657, %c0_658] : memref<27x16x512xbf16, #tpu.memory_space<vmem>>, vector<1x16x512xbf16>
    %539 = vector.shape_cast %538 : vector<1x16x512xbf16> to vector<16x512xbf16>
    %540 = arith.mulf %537, %539 : vector<16x512xbf16>
    %c288_659 = arith.constant 288 : index
    %c0_660 = arith.constant 0 : index
    %541 = vector.load %arg15[%c288_659, %c0_660] : memref<432x512xbf16, #tpu.memory_space<vmem>>, vector<16x512xbf16>
    tpu.vector_store %arg15[%c288_659, %c0_660], %540 {strides = array<i32>} : memref<432x512xbf16, #tpu.memory_space<vmem>>, vector<16x512xbf16>,
    %c0_661 = arith.constant 0 : index
    %c184_662 = arith.constant 184 : index
    %542 = vector.load %arg14[%c0_661, %c184_662] : memref<16x768xbf16, #tpu.memory_space<vmem>>, vector<16x512xbf16>
    %c19_663 = arith.constant 19 : index
    %c0_664 = arith.constant 0 : index
    %c0_665 = arith.constant 0 : index
    %543 = vector.load %arg4[%c19_663, %c0_664, %c0_665] : memref<27x16x512xbf16, #tpu.memory_space<vmem>>, vector<1x16x512xbf16>
    %544 = vector.shape_cast %543 : vector<1x16x512xbf16> to vector<16x512xbf16>
    %545 = arith.mulf %542, %544 : vector<16x512xbf16>
    %c304_666 = arith.constant 304 : index
    %c0_667 = arith.constant 0 : index
    %546 = vector.load %arg15[%c304_666, %c0_667] : memref<432x512xbf16, #tpu.memory_space<vmem>>, vector<16x512xbf16>
    tpu.vector_store %arg15[%c304_666, %c0_667], %545 {strides = array<i32>} : memref<432x512xbf16, #tpu.memory_space<vmem>>, vector<16x512xbf16>,
    %c0_668 = arith.constant 0 : index
    %c185_669 = arith.constant 185 : index
    %547 = vector.load %arg14[%c0_668, %c185_669] : memref<16x768xbf16, #tpu.memory_space<vmem>>, vector<16x512xbf16>
    %c20_670 = arith.constant 20 : index
    %c0_671 = arith.constant 0 : index
    %c0_672 = arith.constant 0 : index
    %548 = vector.load %arg4[%c20_670, %c0_671, %c0_672] : memref<27x16x512xbf16, #tpu.memory_space<vmem>>, vector<1x16x512xbf16>
    %549 = vector.shape_cast %548 : vector<1x16x512xbf16> to vector<16x512xbf16>
    %550 = arith.mulf %547, %549 : vector<16x512xbf16>
    %c320_673 = arith.constant 320 : index
    %c0_674 = arith.constant 0 : index
    %551 = vector.load %arg15[%c320_673, %c0_674] : memref<432x512xbf16, #tpu.memory_space<vmem>>, vector<16x512xbf16>
    tpu.vector_store %arg15[%c320_673, %c0_674], %550 {strides = array<i32>} : memref<432x512xbf16, #tpu.memory_space<vmem>>, vector<16x512xbf16>,
    %c0_675 = arith.constant 0 : index
    %c191_676 = arith.constant 191 : index
    %552 = vector.load %arg14[%c0_675, %c191_676] : memref<16x768xbf16, #tpu.memory_space<vmem>>, vector<16x512xbf16>
    %c21_677 = arith.constant 21 : index
    %c0_678 = arith.constant 0 : index
    %c0_679 = arith.constant 0 : index
    %553 = vector.load %arg4[%c21_677, %c0_678, %c0_679] : memref<27x16x512xbf16, #tpu.memory_space<vmem>>, vector<1x16x512xbf16>
    %554 = vector.shape_cast %553 : vector<1x16x512xbf16> to vector<16x512xbf16>
    %555 = arith.mulf %552, %554 : vector<16x512xbf16>
    %c336_680 = arith.constant 336 : index
    %c0_681 = arith.constant 0 : index
    %556 = vector.load %arg15[%c336_680, %c0_681] : memref<432x512xbf16, #tpu.memory_space<vmem>>, vector<16x512xbf16>
    tpu.vector_store %arg15[%c336_680, %c0_681], %555 {strides = array<i32>} : memref<432x512xbf16, #tpu.memory_space<vmem>>, vector<16x512xbf16>,
    %c0_682 = arith.constant 0 : index
    %c192_683 = arith.constant 192 : index
    %557 = vector.load %arg14[%c0_682, %c192_683] : memref<16x768xbf16, #tpu.memory_space<vmem>>, vector<16x512xbf16>
    %c22_684 = arith.constant 22 : index
    %c0_685 = arith.constant 0 : index
    %c0_686 = arith.constant 0 : index
    %558 = vector.load %arg4[%c22_684, %c0_685, %c0_686] : memref<27x16x512xbf16, #tpu.memory_space<vmem>>, vector<1x16x512xbf16>
    %559 = vector.shape_cast %558 : vector<1x16x512xbf16> to vector<16x512xbf16>
    %560 = arith.mulf %557, %559 : vector<16x512xbf16>
    %c352_687 = arith.constant 352 : index
    %c0_688 = arith.constant 0 : index
    %561 = vector.load %arg15[%c352_687, %c0_688] : memref<432x512xbf16, #tpu.memory_space<vmem>>, vector<16x512xbf16>
    tpu.vector_store %arg15[%c352_687, %c0_688], %560 {strides = array<i32>} : memref<432x512xbf16, #tpu.memory_space<vmem>>, vector<16x512xbf16>,
    %c0_689 = arith.constant 0 : index
    %c193_690 = arith.constant 193 : index
    %562 = vector.load %arg14[%c0_689, %c193_690] : memref<16x768xbf16, #tpu.memory_space<vmem>>, vector<16x512xbf16>
    %c23_691 = arith.constant 23 : index
    %c0_692 = arith.constant 0 : index
    %c0_693 = arith.constant 0 : index
    %563 = vector.load %arg4[%c23_691, %c0_692, %c0_693] : memref<27x16x512xbf16, #tpu.memory_space<vmem>>, vector<1x16x512xbf16>
    %564 = vector.shape_cast %563 : vector<1x16x512xbf16> to vector<16x512xbf16>
    %565 = arith.mulf %562, %564 : vector<16x512xbf16>
    %c368_694 = arith.constant 368 : index
    %c0_695 = arith.constant 0 : index
    %566 = vector.load %arg15[%c368_694, %c0_695] : memref<432x512xbf16, #tpu.memory_space<vmem>>, vector<16x512xbf16>
    tpu.vector_store %arg15[%c368_694, %c0_695], %565 {strides = array<i32>} : memref<432x512xbf16, #tpu.memory_space<vmem>>, vector<16x512xbf16>,
    %c0_696 = arith.constant 0 : index
    %c199_697 = arith.constant 199 : index
    %567 = vector.load %arg14[%c0_696, %c199_697] : memref<16x768xbf16, #tpu.memory_space<vmem>>, vector<16x512xbf16>
    %c24_698 = arith.constant 24 : index
    %c0_699 = arith.constant 0 : index
    %c0_700 = arith.constant 0 : index
    %568 = vector.load %arg4[%c24_698, %c0_699, %c0_700] : memref<27x16x512xbf16, #tpu.memory_space<vmem>>, vector<1x16x512xbf16>
    %569 = vector.shape_cast %568 : vector<1x16x512xbf16> to vector<16x512xbf16>
    %570 = arith.mulf %567, %569 : vector<16x512xbf16>
    %c384_701 = arith.constant 384 : index
    %c0_702 = arith.constant 0 : index
    %571 = vector.load %arg15[%c384_701, %c0_702] : memref<432x512xbf16, #tpu.memory_space<vmem>>, vector<16x512xbf16>
    tpu.vector_store %arg15[%c384_701, %c0_702], %570 {strides = array<i32>} : memref<432x512xbf16, #tpu.memory_space<vmem>>, vector<16x512xbf16>,
    %c0_703 = arith.constant 0 : index
    %c200_704 = arith.constant 200 : index
    %572 = vector.load %arg14[%c0_703, %c200_704] : memref<16x768xbf16, #tpu.memory_space<vmem>>, vector<16x512xbf16>
    %c25_705 = arith.constant 25 : index
    %c0_706 = arith.constant 0 : index
    %c0_707 = arith.constant 0 : index
    %573 = vector.load %arg4[%c25_705, %c0_706, %c0_707] : memref<27x16x512xbf16, #tpu.memory_space<vmem>>, vector<1x16x512xbf16>
    %574 = vector.shape_cast %573 : vector<1x16x512xbf16> to vector<16x512xbf16>
    %575 = arith.mulf %572, %574 : vector<16x512xbf16>
    %c400_708 = arith.constant 400 : index
    %c0_709 = arith.constant 0 : index
    %576 = vector.load %arg15[%c400_708, %c0_709] : memref<432x512xbf16, #tpu.memory_space<vmem>>, vector<16x512xbf16>
    tpu.vector_store %arg15[%c400_708, %c0_709], %575 {strides = array<i32>} : memref<432x512xbf16, #tpu.memory_space<vmem>>, vector<16x512xbf16>,
    %c0_710 = arith.constant 0 : index
    %c201_711 = arith.constant 201 : index
    %577 = vector.load %arg14[%c0_710, %c201_711] : memref<16x768xbf16, #tpu.memory_space<vmem>>, vector<16x512xbf16>
    %c26_712 = arith.constant 26 : index
    %c0_713 = arith.constant 0 : index
    %c0_714 = arith.constant 0 : index
    %578 = vector.load %arg4[%c26_712, %c0_713, %c0_714] : memref<27x16x512xbf16, #tpu.memory_space<vmem>>, vector<1x16x512xbf16>
    %579 = vector.shape_cast %578 : vector<1x16x512xbf16> to vector<16x512xbf16>
    %580 = arith.mulf %577, %579 : vector<16x512xbf16>
    %c416_715 = arith.constant 416 : index
    %c0_716 = arith.constant 0 : index
    %581 = vector.load %arg15[%c416_715, %c0_716] : memref<432x512xbf16, #tpu.memory_space<vmem>>, vector<16x512xbf16>
    tpu.vector_store %arg15[%c416_715, %c0_716], %580 {strides = array<i32>} : memref<432x512xbf16, #tpu.memory_space<vmem>>, vector<16x512xbf16>,
    %c0_717 = arith.constant 0 : index
    %c0_718 = arith.constant 0 : index
    %582 = vector.load %arg11[%c0_717, %c0_718] : memref<8x432xbf16, #tpu.memory_space<vmem>>, vector<8x432xbf16>
    %c0_719 = arith.constant 0 : index
    %c0_720 = arith.constant 0 : index
    %583 = vector.load %arg15[%c0_719, %c0_720] : memref<432x512xbf16, #tpu.memory_space<vmem>>, vector<432x512xbf16>
    %cst_721 = arith.constant dense<0.000000e+00> : vector<8x512xf32>
    %584 = tpu.matmul %582, %583, %cst_721 {dimension_numbers = #tpu.dot_dimension_numbers<[1], [0], [0], [1], [0, 0, 1, 1], [], []>} : vector<8x432xbf16>, vector<432x512xbf16>, vector<8x512xf32> -> vector<8x512xf32>
    %c0_722 = arith.constant 0 : index
    %c0_723 = arith.constant 0 : index
    %585 = vector.load %arg12[%c0_722, %c0_723] : memref<8x1xf32, #tpu.memory_space<vmem>>, vector<8x1xf32>
    %586 = vector.broadcast %585 : vector<8x1xf32> to vector<8x512xf32>
    %587 = arith.addf %584, %586 : vector<8x512xf32>
    %588 = arith.addf %587, %445 : vector<8x512xf32>
    %cst_724 = arith.constant 0.000000e+00 : f32
    %589 = vector.broadcast %cst_724 : f32 to vector<8x512xf32>
    %590 = arith.maximumf %588, %589 : vector<8x512xf32>
    %c0_725 = arith.constant 0 : index
    %c0_726 = arith.constant 0 : index
    %c0_727 = arith.constant 0 : index
    %591 = vector.load %arg13[%c0_725, %c0_726, %c0_727] : memref<1x8x512xf32, #tpu.memory_space<vmem>>, vector<1x8x512xf32>
    %592 = vector.shape_cast %591 : vector<1x8x512xf32> to vector<8x512xf32>
    %593 = vector.shape_cast %590 : vector<8x512xf32> to vector<1x8x512xf32>
    tpu.vector_store %arg13[%c0_725, %c0_726, %c0_727], %593 {strides = array<i32>} : memref<1x8x512xf32, #tpu.memory_space<vmem>>, vector<1x8x512xf32>,
    return
  }
  func.func @transform_0(%arg0: i32) -> (i32, i32, i32) {
    %c0_i32 = arith.constant 0 : i32
    %c0_i32_0 = arith.constant 0 : i32
    %c0_i32_1 = arith.constant 0 : i32
    return %arg0, %c0_i32, %c0_i32_0 : i32, i32, i32
  }
  func.func @transform_1(%arg0: i32) -> (i32, i32, i32) {
    %c0_i32 = arith.constant 0 : i32
    %c0_i32_0 = arith.constant 0 : i32
    %c0_i32_1 = arith.constant 0 : i32
    return %arg0, %c0_i32, %c0_i32_0 : i32, i32, i32
  }
  func.func @transform_2(%arg0: i32) -> (i32, i32) {
    %c0_i32 = arith.constant 0 : i32
    %c0_i32_0 = arith.constant 0 : i32
    %c0_i32_1 = arith.constant 0 : i32
    return %c0_i32, %c0_i32_0 : i32, i32
  }
  func.func @transform_3(%arg0: i32) -> (i32, i32, i32) {
    %c0_i32 = arith.constant 0 : i32
    %c0_i32_0 = arith.constant 0 : i32
    %c0_i32_1 = arith.constant 0 : i32
    %c0_i32_2 = arith.constant 0 : i32
    return %c0_i32, %c0_i32_0, %c0_i32_1 : i32, i32, i32
  }
  func.func @transform_4(%arg0: i32) -> (i32, i32) {
    %c0_i32 = arith.constant 0 : i32
    %c0_i32_0 = arith.constant 0 : i32
    %c0_i32_1 = arith.constant 0 : i32
    return %c0_i32, %c0_i32_0 : i32, i32
  }
  func.func @transform_5(%arg0: i32) -> (i32, i32) {
    %c0_i32 = arith.constant 0 : i32
    %c0_i32_0 = arith.constant 0 : i32
    %c0_i32_1 = arith.constant 0 : i32
    return %c0_i32, %c0_i32_0 : i32, i32
  }
  func.func @transform_6(%arg0: i32) -> (i32, i32) {
    %c0_i32 = arith.constant 0 : i32
    %c0_i32_0 = arith.constant 0 : i32
    %c0_i32_1 = arith.constant 0 : i32
    return %c0_i32, %c0_i32_0 : i32, i32
  }
  func.func @transform_7(%arg0: i32) -> (i32, i32) {
    %c0_i32 = arith.constant 0 : i32
    %c0_i32_0 = arith.constant 0 : i32
    %c0_i32_1 = arith.constant 0 : i32
    return %c0_i32, %c0_i32_0 : i32, i32
  }
  func.func @transform_8(%arg0: i32) -> (i32, i32) {
    %c0_i32 = arith.constant 0 : i32
    %c0_i32_0 = arith.constant 0 : i32
    %c0_i32_1 = arith.constant 0 : i32
    return %c0_i32, %c0_i32_0 : i32, i32
  }
  func.func @transform_9(%arg0: i32) -> (i32, i32) {
    %c0_i32 = arith.constant 0 : i32
    %c0_i32_0 = arith.constant 0 : i32
    %c0_i32_1 = arith.constant 0 : i32
    return %c0_i32, %c0_i32_0 : i32, i32
  }
  func.func @transform_10(%arg0: i32) -> (i32, i32) {
    %c0_i32 = arith.constant 0 : i32
    %c0_i32_0 = arith.constant 0 : i32
    %c0_i32_1 = arith.constant 0 : i32
    return %c0_i32, %c0_i32_0 : i32, i32
  }
  func.func @transform_11(%arg0: i32) -> (i32, i32) {
    %c0_i32 = arith.constant 0 : i32
    %c0_i32_0 = arith.constant 0 : i32
    %c0_i32_1 = arith.constant 0 : i32
    return %c0_i32, %c0_i32_0 : i32, i32
  }
  func.func @transform_12(%arg0: i32) -> (i32, i32, i32) {
    %c0_i32 = arith.constant 0 : i32
    %c0_i32_0 = arith.constant 0 : i32
    %c0_i32_1 = arith.constant 0 : i32
    return %arg0, %c0_i32, %c0_i32_0 : i32, i32, i32
  }
}

</mosaic_0001>

<bundles_post_ra>
// kernel: combination_module.1
= control target key start
LH: loop header
LB: loop body
LE: loop exit
PB: predicated region body
PF: predicated region fallthrough
CT: control target
= control target key end

     0   :  { %s11360_s21 = smov 0   ;;  %s16644_s0 = inlined_call_operand.vmem [shape: f32[2,8,512], index: 0, kind: input, shape index: {}]   ;;  %s16645_s1 = inlined_call_operand.vmem [shape: bf16[2,8,64], index: 1, kind: input, shape index: {}]   ;;  %s16646_s2 = inlined_call_operand.vmem [shape: bf16[64,512], index: 2, kind: input, shape index: {}]   ;;  %s16647_s3 = inlined_call_operand.vmem [shape: bf16[27,16,512], index: 3, kind: input, shape index: {}]   ;;  %s16648_s4 = inlined_call_operand.vmem [shape: bf16[16,432], index: 4, kind: input, shape index: {}]   ;;  %s16649_s5 = inlined_call_operand.vmem [shape: f32[16,1], index: 5, kind: input, shape index: {}, may-alias: {5,9}]   ;;  %s16650_s6 = inlined_call_operand.vmem [shape: bf16[8,432], index: 6, kind: input, shape index: {}]   ;;  %s16651_s7 = inlined_call_operand.vmem [shape: f32[8,1], index: 7, kind: input, shape index: {}, may-alias: {7,11}]   ;;  %s16652_s8 = inlined_call_operand.vmem [shape: bf16[16,432], index: 8, kind: input, shape index: {}]   ;;  %s16653_s9 = inlined_call_operand.vmem [shape: f32[16,1], index: 9, kind: input, shape index: {}, may-alias: {5,9}]   ;;  %s16654_s10 = inlined_call_operand.vmem [shape: bf16[8,432], index: 10, kind: input, shape index: {}]   ;;  %s16655_s11 = inlined_call_operand.vmem [shape: f32[8,1], index: 11, kind: input, shape index: {}, may-alias: {7,11}]   ;;  %s16656_s12 = inlined_call_operand.vmem [shape: f32[2,8,512], index: 12, kind: output, shape index: {}]  }
   0x1   :  { %16704 = sst [smem:[#allocation14_spill]] %s16644_s0 }
   0x2   :  { %16705 = sst [smem:[#allocation15_spill]] %s16645_s1 }
   0x3   :  { %16706 = sst [smem:[#allocation16_spill]] %s16646_s2 }
   0x4   :  { %16707 = sst [smem:[#allocation17_spill]] %s16648_s4 }
   0x5   :  { %16708 = sst [smem:[#allocation18_spill]] %s16653_s9 }
   0x6   :  { %16709 = sst [smem:[#allocation19_spill]] %s16654_s10 }
   0x7   :  { %16710 = sst [smem:[#allocation20_spill]] %s16655_s11 }
   0x8   :  { %16711 = sst [smem:[#allocation21_spill]] %s16656_s12 }
   0x9 LB: > { %16712 = sst [smem:[#allocation4_spill]] %s11274_s21  ;;  %s9643_s22 = sadd.s32 4294967295, %s11274_s21   ;;  %s11274_s21 = sphi %s11360_s21, %s22_s21  }
   0xa   : > { %p9647_p0 = scmp.ge.s32.totalorder %s11274_s21, 1  ;;  %p371_p1 = scmp.lt.s32.totalorder %s11274_s21, 3 }
   0xc   : > { %p372_p2 = pnand %p9647_p0, %p371_p1 }
   0xe   : > { %375 = sbr.rel (%p372_p2) target bundleno = 4945 (0x1351), region = 68 }
  0x15   : > { %v10600_v0 = vld [vmem:[%s16647_s3 + $0x8] ss:$16 sps:$4 sm:$0xff]   ;;  %v10602_v1 = vld [vmem:[%s16647_s3 + $0xc] ss:$16 sps:$4 sm:$0xff]   ;;  %s16657_s27 = smov 55   ;;  %v11277_v4 = vmov 0  }
  0x16   : > { %658 = vrot.lane.b32.xlu1 %v10600_v0, %s16657_s27  ;;  %v10603_v2 = vld [vmem:[%s16647_s3] ss:$16 sps:$4 sm:$0xff]   ;;  %v10605_v3 = vld [vmem:[%s16647_s3 + $0x4] ss:$16 sps:$4 sm:$0xff]   ;;  %567 = vmatprep.mubr.bf16.mxu0 %v11277_v4  ;;  %s16713_s2 = sld [smem:[#allocation16_spill]]  ;;  %p11393_p3 = scmp.lt.s32.totalorder %s9643_s22, 1 }
  0x17   : > { %608 = vmatprep.mubr.bf16.mxu1 %v11277_v4  ;;  %10598 = vset.pattern.permute.xlu0 %v11277_v4  ;;  %v10618_v13 = vld [vmem:[%s16647_s3 + $0x20] ss:$16 sps:$4 sm:$0xff]   ;;  %v10620_v14 = vld [vmem:[%s16647_s3 + $0x24] ss:$16 sps:$4 sm:$0xff]   ;;  %s16659_s25 = smov 56   ;;  %s16716_s1 = sld [smem:[#allocation15_spill]] }
  0x18   : > { %654 = vrot.lane.b32.xlu0 %v10603_v2, %s16657_s27  ;;  %10599 = vset.pattern.permute.xlu1 %v11277_v4  ;;  %s16899_s22 = smov (!%p11393_p3, %s9643_s22), 1  ;;  %v10627_v19 = vld [vmem:[%s16647_s3 + $0x28] ss:$16 sps:$4 sm:$0xff]   ;;  %v10629_v20 = vld [vmem:[%s16647_s3 + $0x2c] ss:$16 sps:$4 sm:$0xff]   ;;  %vm531_vm0 = vcmask 523264  }
  0x19   : > { %16715 = sst [smem:[#allocation5_spill]] %s16899_s22  ;;  %s9650_s16 = sshll.u32 %s16899_s22, 2  ;;  %v10636_v25 = vld [vmem:[%s16647_s3 + $0x44] ss:$16 sps:$4 sm:$0xff]   ;;  %v10638_v26 = vld [vmem:[%s16647_s3 + $0x40] ss:$16 sps:$4 sm:$0xff]  }
  0x1a   : > { %660 = vrot.lane.b32.xlu1 %v10602_v1, %s16657_s27  ;;  %s16661_s24 = smov 57   ;;  %v10639_v28 = vld [vmem:[%s16647_s3 + $0x4c] ss:$16 sps:$4 sm:$0xff]   ;;  %v10641_v29 = vld [vmem:[%s16647_s3 + $0x48] ss:$16 sps:$4 sm:$0xff]   ;;  %s16675_s29 = smov 64  }
  0x1b   : > { %v10642_v30 = vld [vmem:[%s16647_s3 + $0x60] ss:$16 sps:$4 sm:$0xff]   ;;  %v10644_v31 = vld [vmem:[%s16647_s3 + $0x64] ss:$16 sps:$4 sm:$0xff]   ;;  %v10645_v32 = vld [vmem:[%s16647_s3 + $0x68] ss:$16 sps:$4 sm:$0xff]  }
  0x1c   : > { %v10606_v5 = vld [vmem:[%s16713_s2 + $0x4] ss:$16 sps:$4 sm:$0xff]   ;;  %v10608_v6 = vld [vmem:[%s16713_s2 + $0xc] ss:$16 sps:$4 sm:$0xff]   ;;  %v10610_v7 = vld [vmem:[%s16713_s2] ss:$16 sps:$4 sm:$0xff]   ;;  %656 = vrot.lane.b32.xlu0 %v10605_v3, %s16657_s27 }
  0x1d   : > { %535 = vmatprep.subr.bf16.mxu0 %v10606_v5  ;;  %v10611_v8 = vld [vmem:[%s16713_s2 + $0x8] ss:$16 sps:$4 sm:$0xff]   ;;  %576 = vmatprep.subr.bf16.mxu1 %v10608_v6  ;;  %v10612_v9 = vld [vmem:[%s16713_s2 + $0x24] ss:$16 sps:$4 sm:$0xff]   ;;  %v10614_v10 = vld [vmem:[%s16713_s2 + $0x2c] ss:$16 sps:$4 sm:$0xff]   ;;  %s425_s15 = scalar_lea.vmem %s16716_s1, %s9650_s16 }
  0x1e   : > { %536 = vmatpush1.bf16.msra.mxu0 %v10610_v7  ;;  %577 = vmatpush1.bf16.msra.mxu1 %v10611_v8  ;;  %v10616_v11 = vld [vmem:[%s16713_s2 + $0x20] ss:$16 sps:$4 sm:$0xff]   ;;  %v10617_v12 = vld [vmem:[%s16713_s2 + $0x28] ss:$16 sps:$4 sm:$0xff]   ;;  %v10621_v15 = vld [vmem:[%s16713_s2 + $0x44] ss:$16 sps:$4 sm:$0xff]  }
  0x1f   : > { %537 = vmatprep.subr.bf16.mxu0 %v10612_v9  ;;  %578 = vmatprep.subr.bf16.mxu1 %v10614_v10  ;;  %v10623_v16 = vld [vmem:[%s16713_s2 + $0x4c] ss:$16 sps:$4 sm:$0xff]   ;;  %v10625_v17 = vld [vmem:[%s16713_s2 + $0x40] ss:$16 sps:$4 sm:$0xff]   ;;  %v10626_v18 = vld [vmem:[%s16713_s2 + $0x48] ss:$16 sps:$4 sm:$0xff]  }
  0x20   : > { %730 = vrot.lane.b32.xlu1 %v10618_v13, %s16659_s25  ;;  %732 = vrot.lane.b32.xlu0 %v10620_v14, %s16659_s25  ;;  %v10630_v21 = vld [vmem:[%s16713_s2 + $0x64] ss:$16 sps:$4 sm:$0xff]   ;;  %v10632_v22 = vld [vmem:[%s16713_s2 + $0x6c] ss:$16 sps:$4 sm:$0xff]   ;;  %s16684_s26 = smov 65   ;;  %s16687_s30 = smov 71  }
  0x21   : > { %v10634_v23 = vld [vmem:[%s16713_s2 + $0x60] ss:$16 sps:$4 sm:$0xff]   ;;  %v10635_v24 = vld [vmem:[%s16713_s2 + $0x68] ss:$16 sps:$4 sm:$0xff]   ;;  %v10647_v33 = vld [vmem:[%s16647_s3 + $0x6c] ss:$16 sps:$4 sm:$0xff]  }
  0x22   : > { %538 = vmatpush1.bf16.msra.mxu0 %v10616_v11  ;;  %579 = vmatpush1.bf16.msra.mxu1 %v10617_v12  ;;  %v434_v27 = vld [vmem:[%s425_s15] sm:$0xf]  ;;  %s16679_s15 = smov 63   ;;  %v10648_v34 = vld [vmem:[%s16647_s3 + $0x84] ss:$16 sps:$4 sm:$0xff]   ;;  %s16689_s20 = smov 72  }
  0x23   : > { %539 = vmatprep.subr.bf16.mxu0 %v10621_v15  ;;  %580 = vmatprep.subr.bf16.mxu1 %v10623_v16  ;;  %v10650_v35 = vld [vmem:[%s16647_s3 + $0x80] ss:$16 sps:$4 sm:$0xff]   ;;  %v10651_v36 = vld [vmem:[%s16647_s3 + $0x8c] ss:$16 sps:$4 sm:$0xff]   ;;  %v10653_v37 = vld [vmem:[%s16647_s3 + $0x88] ss:$16 sps:$4 sm:$0xff]  }
  0x24   : > { %734 = vrot.lane.b32.xlu1 %v10627_v19, %s16659_s25  ;;  %736 = vrot.lane.b32.xlu0 %v10629_v20, %s16659_s25  ;;  %v10654_v38 = vld [vmem:[%s16647_s3 + $0xa0] ss:$16 sps:$4 sm:$0xff]   ;;  %v10656_v39 = vld [vmem:[%s16647_s3 + $0xa4] ss:$16 sps:$4 sm:$0xff]   ;;  %s16691_s27 = smov 73   ;;  %s16663_s16 = smov 119  }
  0x25   : > { %v10657_v40 = vld [vmem:[%s16647_s3 + $0xa8] ss:$16 sps:$4 sm:$0xff]   ;;  %v10659_v41 = vld [vmem:[%s16647_s3 + $0xac] ss:$16 sps:$4 sm:$0xff]   ;;  %v10660_v42 = vld [vmem:[%s16647_s3 + $0xc4] ss:$16 sps:$4 sm:$0xff]  }
  0x26   : > { %540 = vmatpush1.bf16.msra.mxu0 %v10625_v17  ;;  %581 = vmatpush1.bf16.msra.mxu1 %v10626_v18  ;;  %v10662_v43 = vld [vmem:[%s16647_s3 + $0xc0] ss:$16 sps:$4 sm:$0xff]   ;;  %v10663_v44 = vld [vmem:[%s16647_s3 + $0xcc] ss:$16 sps:$4 sm:$0xff]   ;;  %v10665_v45 = vld [vmem:[%s16647_s3 + $0xc8] ss:$16 sps:$4 sm:$0xff]  }
  0x27   : > { %541 = vmatprep.subr.bf16.mxu0 %v10630_v21  ;;  %582 = vmatprep.subr.bf16.mxu1 %v10632_v22  ;;  %v10666_v46 = vld [vmem:[%s16647_s3 + $0xe0] ss:$16 sps:$4 sm:$0xff]   ;;  %v10668_v47 = vld [vmem:[%s16647_s3 + $0xe4] ss:$16 sps:$4 sm:$0xff]   ;;  %v10669_v48 = vld [vmem:[%s16647_s3 + $0xe8] ss:$16 sps:$4 sm:$0xff]  }
  0x28   : > { %808 = vrot.lane.b32.xlu1 %v10636_v25, %s16661_s24  ;;  %806 = vrot.lane.b32.xlu0 %v10638_v26, %s16661_s24  ;;  %v10671_v49 = vld [vmem:[%s16647_s3 + $0xec] ss:$16 sps:$4 sm:$0xff]   ;;  %v10672_v50 = vld [vmem:[%s16647_s3 + $0x104] ss:$16 sps:$4 sm:$0xff]   ;;  %s16667_s25 = smov 121   ;;  %s16677_s19 = smov 127  }
  0x29   : > { %v10674_v51 = vld [vmem:[%s16647_s3 + $0x100] ss:$16 sps:$4 sm:$0xff]   ;;  %v10675_v52 = vld [vmem:[%s16647_s3 + $0x10c] ss:$16 sps:$4 sm:$0xff]   ;;  %v10677_v53 = vld [vmem:[%s16647_s3 + $0x108] ss:$16 sps:$4 sm:$0xff]  }
  0x2a   : > { %542 = vmatpush1.bf16.msra.mxu0 %v10634_v23  ;;  %583 = vmatpush1.bf16.msra.mxu1 %v10635_v24  ;;  %v10678_v54 = vld [vmem:[%s16647_s3 + $0x120] ss:$16 sps:$4 sm:$0xff]   ;;  %v10680_v55 = vld [vmem:[%s16647_s3 + $0x124] ss:$16 sps:$4 sm:$0xff]   ;;  %v10681_v56 = vld [vmem:[%s16647_s3 + $0x128] ss:$16 sps:$4 sm:$0xff]  }
  0x2b   : > { %v10683_v57 = vld [vmem:[%s16647_s3 + $0x12c] ss:$16 sps:$4 sm:$0xff]   ;;  %v10684_v58 = vld [vmem:[%s16647_s3 + $0x144] ss:$16 sps:$4 sm:$0xff]   ;;  %v10686_v59 = vld [vmem:[%s16647_s3 + $0x140] ss:$16 sps:$4 sm:$0xff]  }
  0x2c   : > { %812 = vrot.lane.b32.xlu1 %v10639_v28, %s16661_s24  ;;  %810 = vrot.lane.b32.xlu0 %v10641_v29, %s16661_s24  ;;  %v10687_v60 = vld [vmem:[%s16647_s3 + $0x14c] ss:$16 sps:$4 sm:$0xff]   ;;  %v10689_v61 = vld [vmem:[%s16647_s3 + $0x148] ss:$16 sps:$4 sm:$0xff]   ;;  %s16665_s24 = smov 120   ;;  %s16718_s23 = smov 56  }
  0x2d   : > { %9669 = vmatmul.mubr.msk.bf16.vlgmr.msra.gmra.mrb[0].mxu0 %vm531_vm0, %v434_v27  ;;  %9670 = vmatmul.mubr.msk.bf16.vlgmr.msra.gmra.mrb[0].mxu1 %vm531_vm0, %v434_v27  ;;  %v10690_v62 = vld [vmem:[%s16647_s3 + $0x160] ss:$16 sps:$4 sm:$0xff]   ;;  %v10692_v63 = vld [vmem:[%s16647_s3 + $0x164] ss:$16 sps:$4 sm:$0xff]   ;;  %v10697_v0 = vld [vmem:[%s16647_s3 + $0x168] ss:$16 sps:$4 sm:$0xff]  }
  0x2e   : > { %v10693_v1 = vld [vmem:[%s16647_s3 + $0x16c] ss:$16 sps:$4 sm:$0xff]   ;;  %v10698_v2 = vld [vmem:[%s16647_s3 + $0x184] ss:$16 sps:$4 sm:$0xff]   ;;  %v10695_v3 = vld [vmem:[%s16647_s3 + $0x180] ss:$16 sps:$4 sm:$0xff]  }
  0x2f   : > { %s16719_s28 = smov 55   ;;  %s16671_s13 = smov 9   ;;  %vm738_vm1 = vcmask 457728   ;;  %vm662_vm2 = vcmask 449536   ;;  %vm814_vm3 = vcmask 465920   ;;  %vm890_vm4 = vcmask 515072  }
  0x30   : > { %882 = vrot.lane.b32.xlu1 %v10642_v30, %s16679_s15  ;;  %884 = vrot.lane.b32.xlu0 %v10644_v31, %s16679_s15  ;;  %s16669_s14 = smov 8   ;;  %s16681_s17 = sshll.u32 %s16899_s22, 5  ;;  %vm16686_vm5 = vcmask 531456   ;;  %vm843_vm6 = vcmask 580608   ;;  %vm767_vm7 = vcmask 588800   ;;  %vm691_vm8 = vcmask 596992  }
  0x31   : > { %s16720_s0 = sld [smem:[#allocation14_spill]]  ;;  %vm16701_vm9 = vcmask 973824   ;;  %vm16703_vm10 = vcmask 982016   ;;  %vm1489_vm11 = vcmask 990208   ;;  %vm16697_vm12 = vcmask 1039360   ;;  %s16728_s4 = sld [smem:[#allocation17_spill]] }
  0x32   : > { %vm16696_vm13 = vcmask 7168   ;;  %vm1366_vm14 = vcmask 72704   ;;  %vm1442_vm15 = vcmask 64512   ;;  %s16729_s1 = smov 120   ;;  %s16730_s2 = smov 119  }
  0x33   : > { %s16732_s12 = smov 72   ;;  %s16734_s11 = smov 65  }
  0x34   : > { %886 = vrot.lane.b32.xlu1 %v10645_v32, %s16679_s15  ;;  %888 = vrot.lane.b32.xlu0 %v10647_v33, %s16679_s15  ;;  %s16821_s21 = sld [smem:[#allocation18_spill]] }
  0x38   : > { %960 = vrot.lane.b32.xlu1 %v10648_v34, %s16675_s29  ;;  %958 = vrot.lane.b32.xlu0 %v10650_v35, %s16675_s29 }
  0x3a   : > { %s16822_s22 = smov %s16821_s21 }
  0x3c   : > { %964 = vrot.lane.b32.xlu1 %v10651_v36, %s16675_s29  ;;  %962 = vrot.lane.b32.xlu0 %v10653_v37, %s16675_s29 }
  0x40   : > { %1033 = vrot.lane.b32.xlu1 %v10654_v38, %s16684_s26  ;;  %1035 = vrot.lane.b32.xlu0 %v10656_v39, %s16684_s26 }
  0x44   : > { %1037 = vrot.lane.b32.xlu1 %v10657_v40, %s16684_s26  ;;  %1039 = vrot.lane.b32.xlu0 %v10659_v41, %s16684_s26 }
  0x48   : > { %1109 = vrot.lane.b32.xlu1 %v10660_v42, %s16687_s30  ;;  %1107 = vrot.lane.b32.xlu0 %v10662_v43, %s16687_s30 }
  0x4c   : > { %1113 = vrot.lane.b32.xlu1 %v10663_v44, %s16687_s30  ;;  %1111 = vrot.lane.b32.xlu0 %v10665_v45, %s16687_s30 }
  0x50   : > { %1181 = vrot.lane.b32.xlu1 %v10666_v46, %s16689_s20  ;;  %1183 = vrot.lane.b32.xlu0 %v10668_v47, %s16689_s20 }
  0x54   : > { %1185 = vrot.lane.b32.xlu1 %v10669_v48, %s16689_s20  ;;  %1187 = vrot.lane.b32.xlu0 %v10671_v49, %s16689_s20 }
  0x58   : > { %1257 = vrot.lane.b32.xlu1 %v10672_v50, %s16691_s27  ;;  %1255 = vrot.lane.b32.xlu0 %v10674_v51, %s16691_s27 }
  0x5c   : > { %1261 = vrot.lane.b32.xlu1 %v10675_v52, %s16691_s27  ;;  %1259 = vrot.lane.b32.xlu0 %v10677_v53, %s16691_s27 }
  0x60   : > { %1329 = vrot.lane.b32.xlu1 %v10678_v54, %s16663_s16  ;;  %1331 = vrot.lane.b32.xlu0 %v10680_v55, %s16663_s16 }
  0x64   : > { %1333 = vrot.lane.b32.xlu1 %v10681_v56, %s16663_s16  ;;  %1335 = vrot.lane.b32.xlu0 %v10683_v57, %s16663_s16  ;;  %s16717_s16 = smov 57  }
  0x68   : > { %1407 = vrot.lane.b32.xlu1 %v10684_v58, %s16665_s24  ;;  %1405 = vrot.lane.b32.xlu0 %v10686_v59, %s16665_s24  ;;  %v10699_v58 = vld [vmem:[%s16647_s3 + $0x188] ss:$16 sps:$4 sm:$0xff]  }
  0x6c   : > { %1411 = vrot.lane.b32.xlu1 %v10687_v60, %s16665_s24  ;;  %1409 = vrot.lane.b32.xlu0 %v10689_v61, %s16665_s24  ;;  %s16673_s24 = smov 7  }
  0x70   : > { %1481 = vrot.lane.b32.xlu1 %v10690_v62, %s16667_s25  ;;  %1483 = vrot.lane.b32.xlu0 %v10692_v63, %s16667_s25  ;;  %v10701_v63 = vld [vmem:[%s16647_s3 + $0x18c] ss:$16 sps:$4 sm:$0xff]  }
  0x74   : > { %1485 = vrot.lane.b32.xlu1 %v10697_v0, %s16667_s25  ;;  %1487 = vrot.lane.b32.xlu0 %v10693_v1, %s16667_s25  ;;  %v10702_v1 = vld [vmem:[%s16647_s3 + $0x1c0] ss:$16 sps:$4 sm:$0xff]   ;;  %s16724_s25 = smov 7  }
  0x78   : > { %1559 = vrot.lane.b32.xlu1 %v10698_v2, %s16677_s19  ;;  %1557 = vrot.lane.b32.xlu0 %v10695_v3, %s16677_s19 }
  0x88   : > { %v11634_v4 = vpop.permute.xlu1 %658 }
  0x8a   : > { %v11636_v5 = vpop.permute.xlu0 %654 }
  0x8b   : > { %v671_v6 = vmul.bf16 0, %v11636_v5 }
  0x8c   : > { %v11639_v7 = vpop.permute.xlu1 %660 }
  0x8d   : > { %681 = vrot.lane.b32.xlu0 %v671_v6, %s16691_s27  ;;  %v10704_v6 = vld [vmem:[%s16647_s3 + $0x1c8] ss:$16 sps:$4 sm:$0xff]  }
  0x8e   : > { %v11642_v8 = vpop.permute.xlu0 %656 }
  0x92   : > { %v11644_v9 = vpop.permute.xlu1 %730  ;;  %v11647_v11 = vpop.permute.xlu0 %732 }
  0x93   : > { %v747_v10 = vmul.bf16 0, %v11644_v9 }
  0x95   : > { %757 = vrot.lane.b32.xlu1 %v747_v10, %s16689_s20  ;;  %v10707_v10 = vld [vmem:[%s16647_s3 + $0x1c4] ss:$16 sps:$4 sm:$0xff]  }
  0x96   : > { %v11650_v12 = vpop.permute.xlu1 %734  ;;  %v11652_v13 = vpop.permute.xlu0 %736 }
  0x9a   : > { %v11654_v14 = vpop.permute.xlu1 %808  ;;  %v11656_v15 = vpop.permute.xlu0 %806 }
  0x9b   : > { %v823_v16 = vmul.bf16 0, %v11656_v15 }
  0x9d   : > { %833 = vrot.lane.b32.xlu0 %v823_v16, %s16687_s30 }
  0x9e   : > { %v11659_v17 = vpop.permute.xlu1 %812  ;;  %v11662_v18 = vpop.permute.xlu0 %810 }
  0xa2   : > { %v11664_v19 = vpop.permute.xlu1 %882  ;;  %v11667_v21 = vpop.permute.xlu0 %884 }
  0xa3   : > { %v899_v20 = vmul.bf16 0, %v11664_v19 }
  0xa5   : > { %909 = vrot.lane.b32.xlu1 %v899_v20, %s16684_s26 }
  0xa6   : > { %v11670_v22 = vpop.permute.xlu1 %886  ;;  %v11672_v23 = vpop.permute.xlu0 %888 }
  0xaa   : > { %v11674_v24 = vpop.permute.xlu1 %960  ;;  %v11676_v25 = vpop.permute.xlu0 %958 }
  0xab   : > { %v975_v26 = vmul.bf16 0, %v11676_v25 }
  0xad   : > { %985 = vrot.lane.b32.xlu0 %v975_v26, %s16675_s29  ;;  %s16722_s29 = smov 64  }
  0xae   : > { %v11679_v27 = vpop.permute.xlu1 %964  ;;  %v11682_v28 = vpop.permute.xlu0 %962 }
  0xb2   : > { %v11684_v29 = vpop.permute.xlu1 %1033  ;;  %v11687_v31 = vpop.permute.xlu0 %1035 }
  0xb3   : > { %v1049_v30 = vmul.bf16 0, %v11684_v29 }
  0xb5   : > { %1059 = vrot.lane.b32.xlu1 %v1049_v30, %s16679_s15  ;;  %s11782_s15 = scalar_lea.vmem %s16720_s0, %s16681_s17  ;;  %s16727_s17 = smov 121  }
  0xb6   : > { %v11690_v32 = vpop.permute.xlu1 %1037  ;;  %v11692_v33 = vpop.permute.xlu0 %1039  ;;  %v617_v16 = vld [vmem:[%s11782_s15] sm:$0xff]  ;;  %v619_v26 = vld [vmem:[%s11782_s15 + $0x10] sm:$0xff]  ;;  %s16759_s0 = smov 1  }
  0xba   : > { %v11694_v34 = vpop.permute.xlu1 %1109  ;;  %v11696_v35 = vpop.permute.xlu0 %1107 }
  0xbb   : > { %v1123_v36 = vmul.bf16 0, %v11696_v35 }
  0xbd   : > { %1133 = vrot.lane.b32.xlu0 %v1123_v36, %s16717_s16 }
  0xbe   : > { %v11699_v37 = vpop.permute.xlu1 %1113  ;;  %v11702_v38 = vpop.permute.xlu0 %1111 }
  0xc2   : > { %v11704_v39 = vpop.permute.xlu1 %1181  ;;  %v11707_v41 = vpop.permute.xlu0 %1183 }
  0xc3   : > { %v1197_v40 = vmul.bf16 0, %v11704_v39 }
  0xc5   : > { %1207 = vrot.lane.b32.xlu1 %v1197_v40, %s16718_s23 }
  0xc6   : > { %v11710_v42 = vpop.permute.xlu1 %1185  ;;  %v11712_v43 = vpop.permute.xlu0 %1187 }
  0xca   : > { %v11714_v44 = vpop.permute.xlu1 %1257  ;;  %v11716_v45 = vpop.permute.xlu0 %1255 }
  0xcb   : > { %v1271_v46 = vmul.bf16 0, %v11716_v45 }
  0xcd   : > { %1281 = vrot.lane.b32.xlu0 %v1271_v46, %s16719_s28  ;;  %v663_v46 = vsel %vm662_vm2, %v11636_v5, %v11642_v8  ;;  %v665_v5 = vsel %vm662_vm2, %v11634_v4, %v11639_v7 }
  0xce   : > { %v11719_v47 = vpop.permute.xlu1 %1261  ;;  %v11722_v48 = vpop.permute.xlu0 %1259 }
  0xd2   : > { %v11724_v49 = vpop.permute.xlu1 %1329  ;;  %v11727_v51 = vpop.permute.xlu0 %1331 }
  0xd3   : > { %v1346_v50 = vmul.bf16 0, %v11724_v49 }
  0xd5   : > { %1356 = vrot.lane.b32.xlu1 %v1346_v50, %s16671_s13  ;;  %s16682_s13 = smov 1   ;;  %v739_v50 = vsel %vm738_vm1, %v11644_v9, %v11647_v11  ;;  %v741_v9 = vsel %vm738_vm1, %v11650_v12, %v11652_v13 }
  0xd6   : > { %v11730_v52 = vpop.permute.xlu1 %1333  ;;  %v11732_v53 = vpop.permute.xlu0 %1335 }
  0xda   : > { %v11734_v54 = vpop.permute.xlu1 %1407  ;;  %v11736_v55 = vpop.permute.xlu0 %1405 }
  0xdb   : > { %v1422_v56 = vmul.bf16 0, %v11736_v55 }
  0xdd   : > { %1432 = vrot.lane.b32.xlu0 %v1422_v56, %s16669_s14  ;;  %s16725_s14 = smov 8  }
  0xde   : > { %v11740_v57 = vpop.permute.xlu1 %1411  ;;  %v11745_v59 = vpop.permute.xlu0 %1409 }
  0xe1   : > { %1561 = vrot.lane.b32.xlu0 %v10699_v58, %s16677_s19 }
  0xe2   : > { %v11748_v60 = vpop.permute.xlu1 %1481  ;;  %v11751_v62 = vpop.permute.xlu0 %1483 }
  0xe3   : > { %v1498_v61 = vmul.bf16 0, %v11748_v60 }
  0xe5   : > { %1508 = vrot.lane.b32.xlu1 %v1498_v61, %s16673_s24  ;;  %s16721_s24 = smov 63  }
  0xe6   : > { %v11757_v0 = vpop.permute.xlu0 %1487 }
  0xe9   : > { %1563 = vrot.lane.b32.xlu1 %v10701_v63, %s16677_s19  ;;  %s16723_s19 = smov 9  }
  0xea   : > { %v11763_v2 = vpop.permute.xlu0 %1557 }
  0xeb   : > { %v1574_v3 = vmul.bf16 0, %v11763_v2 }
  0xed   : > { %1641 = vrot.lane.b32.xlu1 %v10702_v1, %s16682_s13  ;;  %1584 = vrot.lane.b32.xlu0 %v1574_v3, %s16682_s13 }
  0xf1   : > { %1645 = vrot.lane.b32.xlu1 %v10704_v6, %s16682_s13  ;;  %1643 = vrot.lane.b32.xlu0 %v10707_v10, %s16682_s13 }
 0x100   : > { %v569_v20 = vpop.f32.mrb[0].mxu0  ;;  %v610_v36 = vpop.f32.mrb[0].mxu1 }
 0x101   : > { %v11786_v30 = vpack.c.bf16 %v569_v20, %v617_v16  ;;  %v11788_v40 = vpop.f32.mrb[1].mxu0  ;;  %v11796_v56 = vpop.f32.mrb[1].mxu1  ;;  %v11798_v61 = vpack.c.bf16 %v610_v36, %v619_v26  ;;  %v815_v26 = vsel %vm814_vm3, %v11656_v15, %v11654_v14  ;;  %v891_v36 = vsel %vm890_vm4, %v11664_v19, %v11667_v21 }
 0x102   : > { %v573_v58 = vpop.f32.mrb[2].mxu0  ;;  %v614_v1 = vpop.f32.mrb[2].mxu1  ;;  %v893_v15 = vsel %vm890_vm4, %v11670_v22, %v11672_v23 }
 0x103   : > { %v574_v63 = vpop.f32.mrb[3].mxu0  ;;  %v748_v3 = vmul.bf16 %v739_v50, %v11786_v30  ;;  %v672_v6 = vmul.bf16 %v663_v46, %v11786_v30  ;;  %v615_v10 = vpop.f32.mrb[3].mxu1  ;;  %v750_v16 = vmul.bf16 %v741_v9, %v11798_v61  ;;  %v674_v20 = vmul.bf16 %v665_v5, %v11798_v61 }
 0x104   : > { %v900_v46 = vmul.bf16 %v891_v36, %v11786_v30  ;;  %v824_v50 = vmul.bf16 %v815_v26, %v11786_v30  ;;  %v817_v58 = vsel %vm814_vm3, %v11662_v18, %v11659_v17  ;;  %v902_v63 = vmul.bf16 %v893_v15, %v11798_v61 }
 0x105   : > { %759 = vrot.lane.b32.xlu0 %v748_v3, %s16689_s20  ;;  %683 = vrot.lane.b32.xlu1 %v672_v6, %s16691_s27  ;;  %v826_v19 = vmul.bf16 %v817_v58, %v11798_v61  ;;  %v967_v1 = vsel %vm531_vm0, %v11676_v25, %v11674_v24  ;;  %v1041_v3 = vsel %vm16686_vm5, %v11684_v29, %v11687_v31 }
 0x106   : > { %v1050_v6 = vmul.bf16 %v1041_v3, %v11786_v30  ;;  %v976_v10 = vmul.bf16 %v967_v1, %v11786_v30  ;;  %v969_v5 = vsel %vm531_vm0, %v11682_v28, %v11679_v27  ;;  %v1043_v25 = vsel %vm16686_vm5, %v11690_v32, %v11692_v33 }
 0x107   : > { %v1052_v29 = vmul.bf16 %v1043_v25, %v11798_v61  ;;  %v978_v9 = vmul.bf16 %v969_v5, %v11798_v61  ;;  %v1263_v58 = vsel %vm691_vm8, %v11716_v45, %v11714_v44  ;;  %v1338_v15 = vsel %vm16701_vm9, %v11724_v49, %v11727_v51  ;;  %v11900_v5 = vpop.permute.xlu1 %1485 }
 0x108   : > { %v1265_v1 = vsel %vm691_vm8, %v11722_v48, %v11719_v47  ;;  %v1340_v45 = vsel %vm16701_vm9, %v11730_v52, %v11732_v53 }
 0x109   : > { %763 = vrot.lane.b32.xlu0 %v750_v16, %s16689_s20  ;;  %687 = vrot.lane.b32.xlu1 %v674_v20, %s16691_s27  ;;  %v1115_v16 = vsel %vm843_vm6, %v11696_v35, %v11694_v34  ;;  %v1189_v20 = vsel %vm767_vm7, %v11704_v39, %v11707_v41  ;;  %v1191_v35 = vsel %vm767_vm7, %v11710_v42, %v11712_v43 }
 0x10a   : > { %v1198_v26 = vmul.bf16 %v1189_v20, %v11786_v30  ;;  %v1124_v36 = vmul.bf16 %v1115_v16, %v11786_v30  ;;  %v1200_v39 = vmul.bf16 %v1191_v35, %v11798_v61  ;;  %v1349_v49 = vmul.bf16 %v1340_v45, %v11798_v61 }
 0x10b   : > { %v1274_v3 = vmul.bf16 %v1265_v1, %v11798_v61  ;;  %v1416_v16 = vsel %vm16703_vm10, %v11745_v59, %v11740_v57  ;;  %v664_v35 = vsel %vm662_vm2, %v11642_v8, %v11634_v4  ;;  %v816_v4 = vsel %vm814_vm3, %v11654_v14, %v11662_v18 }
 0x10d   : > { %911 = vrot.lane.b32.xlu0 %v900_v46, %s16684_s26  ;;  %835 = vrot.lane.b32.xlu1 %v824_v50, %s16687_s30  ;;  %v1117_v46 = vsel %vm843_vm6, %v11702_v38, %v11699_v37 }
 0x10e   : > { %v1126_v50 = vmul.bf16 %v1117_v46, %v11798_v61  ;;  %v620_v46 = vld [vmem:[%s11782_s15 + $0x18] sm:$0xff] }
 0x111   : > { %915 = vrot.lane.b32.xlu0 %v902_v63, %s16684_s26  ;;  %839 = vrot.lane.b32.xlu1 %v826_v19, %s16687_s30  ;;  %v1347_v63 = vmul.bf16 %v1338_v15, %v11786_v30  ;;  %v1272_v19 = vmul.bf16 %v1263_v58, %v11786_v30 }
 0x115   : > { %1061 = vrot.lane.b32.xlu0 %v1050_v6, %s16721_s24  ;;  %987 = vrot.lane.b32.xlu1 %v976_v10, %s16722_s29  ;;  %v1414_v6 = vsel %vm16703_vm10, %v11736_v55, %v11734_v54  ;;  %v1490_v10 = vsel %vm1489_vm11, %v11748_v60, %v11751_v62  ;;  %v1492_v55 = vsel %vm1489_vm11, %v11900_v5, %v11757_v0  ;;  %v1560_v60 = vpop.permute.xlu1 %1559 }
 0x116   : > { %v1499_v25 = vmul.bf16 %v1490_v10, %v11786_v30 }
 0x119   : > { %1065 = vrot.lane.b32.xlu0 %v1052_v29, %s16721_s24  ;;  %991 = vrot.lane.b32.xlu1 %v978_v9, %s16722_s29  ;;  %v1423_v29 = vmul.bf16 %v1414_v6, %v11786_v30  ;;  %v618_v9 = vld [vmem:[%s11782_s15 + $0x8] sm:$0xff]  ;;  %v11951_v14 = vpop.permute.xlu1 %757  ;;  %s16726_s15 = smov 127  }
 0x11a   : > { %v11914_v20 = vpack.c.bf16 %v11788_v40, %v618_v9 }
 0x11c   : > { %v673_v40 = vmul.bf16 %v664_v35, %v11914_v20  ;;  %v825_v8 = vmul.bf16 %v816_v4, %v11914_v20 }
 0x11d   : > { %1209 = vrot.lane.b32.xlu0 %v1198_v26, %s16718_s23  ;;  %1135 = vrot.lane.b32.xlu1 %v1124_v36, %s16717_s16  ;;  %v1501_v26 = vmul.bf16 %v1492_v55, %v11798_v61  ;;  %v1425_v36 = vmul.bf16 %v1416_v16, %v11798_v61 }
 0x121   : > { %1213 = vrot.lane.b32.xlu0 %v1200_v39, %s16718_s23  ;;  %1139 = vrot.lane.b32.xlu1 %v1126_v50, %s16717_s16  ;;  %v1566_v39 = vsel %vm16697_vm12, %v11763_v2, %v1560_v60  ;;  %v11927_v50 = vpack.c.bf16 %v11796_v56, %v620_v46  ;;  %v968_v56 = vsel %vm531_vm0, %v11674_v24, %v11682_v28  ;;  %v11961_v24 = vpop.permute.xlu1 %909 }
 0x122   : > { %v1575_v58 = vmul.bf16 %v1566_v39, %v11786_v30  ;;  %v10706_v39 = vld [vmem:[%s16647_s3 + $0x1cc] ss:$16 sps:$4 sm:$0xff]  }
 0x123   : > { %v675_v15 = vmul.bf16 %v11639_v7, %v11927_v50  ;;  %v827_v2 = vmul.bf16 %v11659_v17, %v11927_v50  ;;  %v11947_v7 = vpop.permute.xlu0 %681  ;;  %v1116_v17 = vsel %vm843_vm6, %v11694_v34, %v11702_v38  ;;  %v1264_v34 = vsel %vm691_vm8, %v11714_v44, %v11722_v48 }
 0x124   : > { %v1125_v1 = vmul.bf16 %v1116_v17, %v11914_v20  ;;  %v1273_v6 = vmul.bf16 %v1264_v34, %v11914_v20  ;;  %v1415_v44 = vsel %vm16703_vm10, %v11734_v54, %v11745_v59  ;;  %v740_v54 = vsel %vm738_vm1, %v11647_v11, %v11650_v12 }
 0x125   : > { %1358 = vrot.lane.b32.xlu0 %v1347_v63, %s16723_s19  ;;  %1283 = vrot.lane.b32.xlu1 %v1272_v19, %s16719_s28  ;;  %v977_v63 = vmul.bf16 %v968_v56, %v11914_v20  ;;  %v979_v19 = vmul.bf16 %v11679_v27, %v11927_v50  ;;  %v1127_v27 = vmul.bf16 %v11699_v37, %v11927_v50 }
 0x126   : > { %v1275_v37 = vmul.bf16 %v11719_v47, %v11927_v50  ;;  %v749_v35 = vmul.bf16 %v740_v54, %v11914_v20  ;;  %v892_v12 = vsel %vm890_vm4, %v11667_v21, %v11670_v22  ;;  %v903_v4 = vmul.bf16 %v11672_v23, %v11927_v50 }
 0x127   : > { %v11953_v18 = vpop.permute.xlu0 %833  ;;  %v11967_v45 = vpop.permute.xlu1 %1059  ;;  %v1042_v21 = vsel %vm16686_vm5, %v11687_v31, %v11690_v32  ;;  %v1190_v23 = vsel %vm767_vm7, %v11707_v41, %v11710_v42  ;;  %v1201_v32 = vmul.bf16 %v11712_v43, %v11927_v50  ;;  %v1350_v43 = vmul.bf16 %v11732_v53, %v11927_v50 }
 0x128   : > { %v1051_v22 = vmul.bf16 %v1042_v21, %v11914_v20 }
 0x129   : > { %1362 = vrot.lane.b32.xlu0 %v1349_v49, %s16723_s19  ;;  %1287 = vrot.lane.b32.xlu1 %v1274_v3, %s16719_s28 }
 0x12b   : > { %v11963_v28 = vpop.permute.xlu0 %985 }
 0x12d   : > { %1510 = vrot.lane.b32.xlu0 %v1499_v25, %s16724_s25  ;;  %1434 = vrot.lane.b32.xlu1 %v1423_v29, %s16725_s14  ;;  %v1424_v29 = vmul.bf16 %v1415_v44, %v11914_v20 }
 0x12f   : > { %v11969_v49 = vpop.permute.xlu0 %1133 }
 0x131   : > { %1514 = vrot.lane.b32.xlu0 %v1501_v26, %s16724_s25  ;;  %1438 = vrot.lane.b32.xlu1 %v1425_v36, %s16725_s14  ;;  %v1426_v26 = vmul.bf16 %v11740_v57, %v11927_v50 }
 0x135   : > { %685 = vrot.lane.b32.xlu0 %v673_v40, %s16691_s27  ;;  %1586 = vrot.lane.b32.xlu1 %v1575_v58, %s16682_s13 }
 0x137   : > { %v11977_v38 = vpop.permute.xlu1 %1207 }
 0x139   : > { %689 = vrot.lane.b32.xlu0 %v675_v15, %s16691_s27  ;;  %v901_v15 = vmul.bf16 %v892_v12, %v11914_v20 }
 0x13d   : > { %837 = vrot.lane.b32.xlu0 %v825_v8, %s16687_s30 }
 0x13f   : > { %v11979_v3 = vpop.permute.xlu0 %1281 }
 0x141   : > { %841 = vrot.lane.b32.xlu0 %v827_v2, %s16687_s30  ;;  %v1053_v2 = vmul.bf16 %v11692_v33, %v11927_v50  ;;  %v1339_v33 = vsel %vm16701_vm9, %v11727_v51, %v11730_v52  ;;  %v1491_v51 = vsel %vm1489_vm11, %v11751_v62, %v11900_v5 }
 0x142   : > { %v1348_v42 = vmul.bf16 %v1339_v33, %v11914_v20 }
 0x145   : > { %989 = vrot.lane.b32.xlu0 %v977_v63, %s16722_s29  ;;  %v1199_v63 = vmul.bf16 %v1190_v23, %v11914_v20 }
 0x147   : > { %v11983_v10 = vpop.permute.xlu1 %1356 }
 0x149   : > { %993 = vrot.lane.b32.xlu0 %v979_v19, %s16722_s29 }
 0x14d   : > { %1137 = vrot.lane.b32.xlu0 %v1125_v1, %s16717_s16 }
 0x14f   : > { %v11985_v25 = vpop.permute.xlu0 %1432 }
 0x151   : > { %1141 = vrot.lane.b32.xlu0 %v1127_v27, %s16717_s16  ;;  %v1500_v27 = vmul.bf16 %v1491_v51, %v11914_v20 }
 0x153   : > { %v1562_v9 = vpop.permute.xlu0 %1561 }
 0x154   : > { %v1567_v47 = vsel %vm16697_vm12, %v1560_v60, %v1562_v9  ;;  %v751_v60 = vmul.bf16 %v11652_v13, %v11927_v50 }
 0x155   : > { %1285 = vrot.lane.b32.xlu0 %v1273_v6, %s16719_s28  ;;  %v1576_v59 = vmul.bf16 %v1567_v47, %v11914_v20 }
 0x157   : > { %v11993_v48 = vpop.permute.xlu1 %1508 }
 0x159   : > { %1289 = vrot.lane.b32.xlu0 %v1275_v37, %s16719_s28  ;;  %v1502_v37 = vmul.bf16 %v11757_v0, %v11927_v50 }
 0x15b   : > { %v1564_v16 = vpop.permute.xlu1 %1563 }
 0x15c   : > { %v1568_v55 = vsel %vm16697_vm12, %v1562_v9, %v1564_v16  ;;  %v1578_v57 = vmul.bf16 %v1564_v16, %v11927_v50 }
 0x15d   : > { %1436 = vrot.lane.b32.xlu0 %v1424_v29, %s16725_s14  ;;  %v1577_v36 = vmul.bf16 %v1568_v55, %v11798_v61 }
 0x15f   : > { %1590 = vrot.lane.b32.xlu1 %v1577_v36, %s16682_s13  ;;  %v12008_v46 = vpop.permute.xlu0 %1584  ;;  %v1642_v40 = vpop.permute.xlu1 %1641 }
 0x160   : > { %v1657_v44 = vmul.bf16 %v1642_v40, %v11786_v30 }
 0x161   : > { %1440 = vrot.lane.b32.xlu0 %v1426_v26, %s16725_s14 }
 0x163   : > { %761 = vrot.lane.b32.xlu1 %v749_v35, %s16689_s20  ;;  %v1644_v11 = vpop.permute.xlu0 %1643  ;;  %v12060_v41 = vpop.permute.xlu1 %1645 }
 0x164   : > { %v1649_v58 = vsel %vm16696_vm13, %v1642_v40, %v1644_v11  ;;  %v1650_v62 = vsel %vm16696_vm13, %v1644_v11, %v12060_v41 }
 0x165   : > { %1588 = vrot.lane.b32.xlu0 %v1576_v59, %s16682_s13  ;;  %v1658_v13 = vmul.bf16 %v1649_v58, %v11914_v20  ;;  %v1659_v9 = vmul.bf16 %v1650_v62, %v11798_v61 }
 0x167   : > { %765 = vrot.lane.b32.xlu1 %v751_v60, %s16689_s20  ;;  %s16731_s20 = smov 73  }
 0x169   : > { %1592 = vrot.lane.b32.xlu0 %v1578_v57, %s16682_s13 }
 0x16b   : > { %913 = vrot.lane.b32.xlu1 %v901_v15, %s16684_s26 }
 0x16d   : > { %1647 = vrot.lane.b32.xlu0 %v10706_v39, %s16682_s13  ;;  %s16733_s13 = smov 71  }
 0x16f   : > { %917 = vrot.lane.b32.xlu1 %v903_v4, %s16684_s26 }
 0x171   : > { %1669 = vrot.lane.b32.xlu0 %v1658_v13, %s16726_s15 }
 0x173   : > { %1063 = vrot.lane.b32.xlu1 %v1051_v22, %s16721_s24 }
 0x177   : > { %v12038_v8 = vpop.permute.xlu0 %759  ;;  %1067 = vrot.lane.b32.xlu1 %v1053_v2, %s16721_s24  ;;  %v684_v1 = vpop.permute.xlu1 %683 }
 0x178   : > { %v692_v35 = vsel %vm691_vm8, %v11947_v7, %v684_v1 }
 0x17b   : > { %v12046_v56 = vpop.permute.xlu0 %763  ;;  %1211 = vrot.lane.b32.xlu1 %v1199_v63, %s16718_s23  ;;  %v688_v34 = vpop.permute.xlu1 %687 }
 0x17f   : > { %v12050_v31 = vpop.permute.xlu0 %911  ;;  %1215 = vrot.lane.b32.xlu1 %v1201_v32, %s16718_s23  ;;  %v836_v29 = vpop.permute.xlu1 %835 }
 0x183   : > { %v12058_v19 = vpop.permute.xlu0 %915  ;;  %1360 = vrot.lane.b32.xlu1 %v1348_v42, %s16723_s19  ;;  %v12090_v16 = vpop.permute.xlu1 %839 }
 0x187   : > { %v12064_v17 = vpop.permute.xlu0 %1061  ;;  %1364 = vrot.lane.b32.xlu1 %v1350_v43, %s16723_s19  ;;  %v12097_v26 = vpop.permute.xlu1 %987 }
 0x18b   : > { %v12072_v52 = vpop.permute.xlu0 %1065  ;;  %1512 = vrot.lane.b32.xlu1 %v1500_v27, %s16724_s25  ;;  %v12101_v36 = vpop.permute.xlu1 %991 }
 0x18f   : > { %v12076_v6 = vpop.permute.xlu0 %1209  ;;  %1516 = vrot.lane.b32.xlu1 %v1502_v37, %s16724_s25  ;;  %v12106_v60 = vpop.permute.xlu1 %1135  ;;  %v768_v37 = vsel %vm767_vm7, %v11951_v14, %v12038_v8 }
 0x193   : > { %v12081_v53 = vpop.permute.xlu0 %1213  ;;  %1667 = vrot.lane.b32.xlu1 %v1657_v44, %s16726_s15  ;;  %v12110_v40 = vpop.permute.xlu1 %1139 }
 0x197   : > { %v12087_v5 = vpop.permute.xlu0 %1358  ;;  %1671 = vrot.lane.b32.xlu1 %v1659_v9, %s16726_s15  ;;  %v12114_v13 = vpop.permute.xlu1 %1283 }
 0x19b   : > { %v12093_v0 = vpop.permute.xlu0 %1362  ;;  %v12116_v7 = vpop.permute.xlu1 %1287 }
 0x19f   : > { %v12095_v55 = vpop.permute.xlu0 %1510  ;;  %v12122_v2 = vpop.permute.xlu1 %1434 }
 0x1a3   : > { %v12099_v47 = vpop.permute.xlu0 %1514  ;;  %v12126_v63 = vpop.permute.xlu1 %1438 }
 0x1a7   : > { %v686_v54 = vpop.permute.xlu0 %685  ;;  %v12132_v42 = vpop.permute.xlu1 %1586 }
 0x1a8   : > { %v693_v59 = vsel %vm691_vm8, %v684_v1, %v686_v54  ;;  %v694_v11 = vsel %vm691_vm8, %v686_v54, %v688_v34 }
 0x1a9   : > { %2724 = vmatprep.subr.bf16.mxu0 %v693_v59  ;;  %v844_v59 = vsel %vm843_vm6, %v11953_v18, %v836_v29 }
 0x1aa   : > { %2725 = vmatpush1.bf16.msra.mxu0 %v692_v35 }
 0x1ab   : > { %v690_v57 = vpop.permute.xlu0 %689 }
 0x1ac   : > { %v695_v39 = vsel %vm691_vm8, %v688_v34, %v690_v57 }
 0x1ad   : > { %2810 = vmatprep.subr.bf16.mxu1 %v695_v39 }
 0x1ae   : > { %2811 = vmatpush1.bf16.msra.mxu1 %v694_v11 }
 0x1af   : > { %v838_v12 = vpop.permute.xlu0 %837 }
 0x1b0   : > { %v845_v62 = vsel %vm843_vm6, %v836_v29, %v838_v12  ;;  %v10710_v29 = vld [vmem:[%s16647_s3 + $0x1e4] ss:$16 sps:$4 sm:$0xff]  }
 0x1b3   : > { %v842_v58 = vpop.permute.xlu0 %841 }
 0x1b4   : > { %v847_v14 = vsel %vm843_vm6, %v12090_v16, %v842_v58 }
 0x1b7   : > { %v12112_v15 = vpop.permute.xlu0 %989 }
 0x1b8   : > { %v996_v58 = vsel %vm531_vm0, %v12097_v26, %v12112_v15 }
 0x1bb   : > { %v994_v4 = vpop.permute.xlu0 %993 }
 0x1bf   : > { %v12118_v21 = vpop.permute.xlu0 %1137 }
 0x1c3   : > { %v12120_v22 = vpop.permute.xlu0 %1141 }
 0x1c7   : > { %v12124_v23 = vpop.permute.xlu0 %1285 }
 0x1cb   : > { %v12128_v32 = vpop.permute.xlu0 %1289 }
 0x1cf   : > { %v12130_v33 = vpop.permute.xlu0 %1436 }
 0x1d1   : > { %v12136_v43 = vpop.permute.xlu1 %1590 }
 0x1d3   : > { %v12134_v1 = vpop.permute.xlu0 %1440 }
 0x1d5   : > { %v762_v27 = vpop.permute.xlu1 %761 }
 0x1d6   : > { %v769_v34 = vsel %vm767_vm7, %v12038_v8, %v762_v27  ;;  %v770_v35 = vsel %vm767_vm7, %v762_v27, %v12046_v56  ;;  %v10708_v27 = vld [vmem:[%s16647_s3 + $0x1e0] ss:$16 sps:$4 sm:$0xff]  }
 0x1d7   : > { %v12138_v51 = vpop.permute.xlu0 %1588  ;;  %2726 = vmatprep.subr.bf16.mxu0 %v769_v34 }
 0x1d8   : > { %2727 = vmatpush1.bf16.msra.mxu0 %v768_v37 }
 0x1d9   : > { %2728 = vmatprep.subr.bf16.mxu0 %v845_v62  ;;  %v766_v9 = vpop.permute.xlu1 %765  ;;  %v10711_v62 = vld [vmem:[%s16647_s3 + $0x1e8] ss:$16 sps:$4 sm:$0xff]  }
 0x1da   : > { %v771_v54 = vsel %vm767_vm7, %v12046_v56, %v766_v9  ;;  %v920_v56 = vsel %vm16686_vm5, %v11961_v24, %v12050_v31  ;;  %v998_v9 = vsel %vm531_vm0, %v12101_v36, %v994_v4  ;;  %v1144_v4 = vsel %vm814_vm3, %v12106_v60, %v12118_v21 }
 0x1db   : > { %v12145_v44 = vpop.permute.xlu0 %1592  ;;  %2812 = vmatprep.subr.bf16.mxu1 %v771_v54 }
 0x1dc   : > { %2729 = vmatpush1.bf16.msra.mxu0 %v844_v59  ;;  %2813 = vmatpush1.bf16.msra.mxu1 %v770_v35 }
 0x1dd   : > { %2814 = vmatprep.subr.bf16.mxu1 %v847_v14  ;;  %v914_v11 = vpop.permute.xlu1 %913  ;;  %v1217_v14 = vsel %vm738_vm1, %v11977_v38, %v12076_v6  ;;  %v1291_v38 = vsel %vm662_vm2, %v11979_v3, %v12114_v13  ;;  %v1367_v3 = vsel %vm1366_vm14, %v11983_v10, %v12087_v5  ;;  %v1443_v10 = vsel %vm1442_vm15, %v11985_v25, %v12122_v2 }
 0x1de   : > { %v921_v18 = vsel %vm16686_vm5, %v12050_v31, %v914_v11  ;;  %v922_v37 = vsel %vm16686_vm5, %v914_v11, %v12058_v19 }
 0x1df   : > { %v1648_v57 = vpop.permute.xlu0 %1647  ;;  %2730 = vmatprep.subr.bf16.mxu0 %v921_v18  ;;  %v1597_v18 = vsel %vm16696_vm13, %v12138_v51, %v12136_v43 }
 0x1e0   : > { %v1651_v8 = vsel %vm16696_vm13, %v12060_v41, %v1648_v57  ;;  %v1661_v39 = vmul.bf16 0, %v1648_v57  ;;  %2731 = vmatpush1.bf16.msra.mxu0 %v920_v56  ;;  %v846_v41 = vsel %vm843_vm6, %v838_v12, %v12090_v16  ;;  %v995_v16 = vsel %vm531_vm0, %v11963_v28, %v12097_v26  ;;  %v10713_v12 = vld [vmem:[%s16647_s3 + $0x1ec] ss:$16 sps:$4 sm:$0xff]  }
 0x1e1   : > { %v1660_v34 = vmul.bf16 %v1651_v8, %v11927_v50  ;;  %2815 = vmatpush1.bf16.msra.mxu1 %v846_v41  ;;  %2732 = vmatprep.subr.bf16.mxu0 %v996_v58  ;;  %v918_v24 = vpop.permute.xlu1 %917  ;;  %v997_v26 = vsel %vm531_vm0, %v12112_v15, %v12101_v36  ;;  %v1146_v36 = vsel %vm814_vm3, %v12110_v40, %v12120_v22 }
 0x1e2   : > { %1675 = vrot.lane.b32.xlu1 %v1661_v39, %s16726_s15  ;;  %v923_v31 = vsel %vm16686_vm5, %v12058_v19, %v918_v24  ;;  %v1069_v19 = vsel %vm890_vm4, %v11967_v45, %v12064_v17  ;;  %v1143_v45 = vsel %vm814_vm3, %v11969_v49, %v12106_v60  ;;  %v1145_v49 = vsel %vm814_vm3, %v12118_v21, %v12110_v40 }
 0x1e3   : > { %1673 = vrot.lane.b32.xlu0 %v1660_v34, %s16726_s15  ;;  %2816 = vmatprep.subr.bf16.mxu1 %v923_v31  ;;  %v1294_v40 = vsel %vm662_vm2, %v12116_v7, %v12128_v32  ;;  %vm16698_vm5 = vcmask 56320  }
 0x1e4   : > { %2733 = vmatpush1.bf16.msra.mxu0 %v995_v16  ;;  %v1519_v25 = vsel %vm16698_vm5, %v11993_v48, %v12095_v55  ;;  %v1595_v48 = vsel %vm16696_vm13, %v12008_v46, %v12132_v42  ;;  %v1670_v46 = vpop.permute.xlu0 %1669 }
 0x1e5   : > { %2817 = vmatpush1.bf16.msra.mxu1 %v922_v37  ;;  %v1064_v54 = vpop.permute.xlu1 %1063 }
 0x1e6   : > { %1717 = vrot.lane.b32.xlu1 %v10710_v29, %s16724_s25  ;;  %2818 = vmatprep.subr.bf16.mxu1 %v998_v9  ;;  %v1070_v28 = vsel %vm890_vm4, %v12064_v17, %v1064_v54  ;;  %v1071_v17 = vsel %vm890_vm4, %v1064_v54, %v12072_v52 }
 0x1e7   : > { %1715 = vrot.lane.b32.xlu0 %v10708_v27, %s16724_s25  ;;  %2734 = vmatprep.subr.bf16.mxu0 %v1070_v28  ;;  %v10714_v28 = vld [vmem:[%s16647_s3 + $0x200] ss:$16 sps:$4 sm:$0xff]  }
 0x1e8   : > { %2735 = vmatpush1.bf16.msra.mxu0 %v1069_v19 }
 0x1e9   : > { %2819 = vmatpush1.bf16.msra.mxu1 %v997_v26  ;;  %2736 = vmatprep.subr.bf16.mxu0 %v1144_v4  ;;  %v1068_v59 = vpop.permute.xlu1 %1067  ;;  %v10716_v26 = vld [vmem:[%s16647_s3 + $0x204] ss:$16 sps:$4 sm:$0xff]   ;;  %v10717_v4 = vld [vmem:[%s16647_s3 + $0x208] ss:$16 sps:$4 sm:$0xff]  }
 0x1ea   : > { %1721 = vrot.lane.b32.xlu1 %v10713_v12, %s16724_s25  ;;  %v1072_v35 = vsel %vm890_vm4, %v12072_v52, %v1068_v59  ;;  %v1292_v52 = vsel %vm662_vm2, %v12114_v13, %v12124_v23  ;;  %v1444_v13 = vsel %vm1442_vm15, %v12122_v2, %v12130_v33  ;;  %v1596_v2 = vsel %vm16696_vm13, %v12132_v42, %v12138_v51  ;;  %v10719_v59 = vld [vmem:[%s16647_s3 + $0x20c] ss:$16 sps:$4 sm:$0xff]  }
 0x1eb   : > { %1719 = vrot.lane.b32.xlu0 %v10711_v62, %s16724_s25  ;;  %2820 = vmatprep.subr.bf16.mxu1 %v1072_v35 }
 0x1ec   : > { %2737 = vmatpush1.bf16.msra.mxu0 %v1143_v45 }
 0x1ed   : > { %2821 = vmatpush1.bf16.msra.mxu1 %v1071_v17  ;;  %v1212_v15 = vpop.permute.xlu1 %1211  ;;  %v10728_v17 = vld [vmem:[%s16728_s4 + $0x4] ss:$16 sps:$4 sm:$0xff]  }
 0x1ee   : > { %2822 = vmatprep.subr.bf16.mxu1 %v1146_v36  ;;  %v1218_v57 = vsel %vm738_vm1, %v12076_v6, %v1212_v15  ;;  %v1219_v6 = vsel %vm738_vm1, %v1212_v15, %v12081_v53  ;;  %2756 = vmatprep.mubr.bf16.mxu0 %v10728_v17 }
 0x1ef   : > { %2738 = vmatprep.subr.bf16.mxu0 %v1218_v57  ;;  %2842 = vmatprep.mubr.bf16.mxu1 %v10728_v17 }
 0x1f0   : > { %2739 = vmatpush1.bf16.msra.mxu0 %v1217_v14 }
 0x1f1   : > { %2823 = vmatpush1.bf16.msra.mxu1 %v1145_v49  ;;  %2740 = vmatprep.subr.bf16.mxu0 %v1292_v52  ;;  %v1216_v60 = vpop.permute.xlu1 %1215  ;;  %v10726_v49 = vld [vmem:[%s16728_s4] ss:$16 sps:$4 sm:$0xff]  }
 0x1f2   : > { %v1220_v22 = vsel %vm738_vm1, %v12081_v53, %v1216_v60  ;;  %v1293_v53 = vsel %vm662_vm2, %v12124_v23, %v12116_v7  ;;  %v1446_v7 = vsel %vm1442_vm15, %v12126_v63, %v12134_v1 }
 0x1f3   : > { %2824 = vmatprep.subr.bf16.mxu1 %v1220_v22 }
 0x1f4   : > { %2741 = vmatpush1.bf16.msra.mxu0 %v1291_v38 }
 0x1f5   : > { %2825 = vmatpush1.bf16.msra.mxu1 %v1219_v6  ;;  %v1361_v21 = vpop.permute.xlu1 %1360 }
 0x1f6   : > { %2826 = vmatprep.subr.bf16.mxu1 %v1294_v40  ;;  %v1368_v8 = vsel %vm1366_vm14, %v12087_v5, %v1361_v21  ;;  %v1369_v5 = vsel %vm1366_vm14, %v1361_v21, %v12093_v0 }
 0x1f7   : > { %2742 = vmatprep.subr.bf16.mxu0 %v1368_v8 }
 0x1f8   : > { %2743 = vmatpush1.bf16.msra.mxu0 %v1367_v3 }
 0x1f9   : > { %2827 = vmatpush1.bf16.msra.mxu1 %v1293_v53  ;;  %2744 = vmatprep.subr.bf16.mxu0 %v1444_v13  ;;  %v1365_v32 = vpop.permute.xlu1 %1364 }
 0x1fa   : > { %v1370_v39 = vsel %vm1366_vm14, %v12093_v0, %v1365_v32  ;;  %v1445_v0 = vsel %vm1442_vm15, %v12130_v33, %v12126_v63  ;;  %v1598_v63 = vsel %vm16696_vm13, %v12136_v43, %v12145_v44  ;;  %vm16735_vm13 = vcmask 531456  }
 0x1fb   : > { %2828 = vmatprep.subr.bf16.mxu1 %v1370_v39 }
 0x1fc   : > { %2745 = vmatpush1.bf16.msra.mxu0 %v1443_v10 }
 0x1fd   : > { %2829 = vmatpush1.bf16.msra.mxu1 %v1369_v5  ;;  %v1513_v23 = vpop.permute.xlu1 %1512 }
 0x1fe   : > { %2830 = vmatprep.subr.bf16.mxu1 %v1446_v7  ;;  %v1520_v11 = vsel %vm16698_vm5, %v12095_v55, %v1513_v23  ;;  %v1521_v55 = vsel %vm16698_vm5, %v1513_v23, %v12099_v47  ;;  %v10720_v7 = vld [vmem:[%s16647_s3 + $0x220] ss:$16 sps:$4 sm:$0xff]   ;;  %v10722_v23 = vld [vmem:[%s16647_s3 + $0x224] ss:$16 sps:$4 sm:$0xff]  }
 0x1ff   : > { %2746 = vmatprep.subr.bf16.mxu0 %v1520_v11  ;;  %v10723_v11 = vld [vmem:[%s16647_s3 + $0x228] ss:$16 sps:$4 sm:$0xff]  }
 0x200   : > { %2747 = vmatpush1.bf16.msra.mxu0 %v1519_v25  ;;  %v10725_v25 = vld [vmem:[%s16647_s3 + $0x22c] ss:$16 sps:$4 sm:$0xff]  }
 0x201   : > { %2831 = vmatpush1.bf16.msra.mxu1 %v1445_v0  ;;  %2748 = vmatprep.subr.bf16.mxu0 %v1596_v2  ;;  %v1517_v1 = vpop.permute.xlu1 %1516 }
 0x202   : > { %v1522_v34 = vsel %vm16698_vm5, %v12099_v47, %v1517_v1 }
 0x203   : > { %2832 = vmatprep.subr.bf16.mxu1 %v1522_v34 }
 0x204   : > { %2749 = vmatpush1.bf16.msra.mxu0 %v1595_v48 }
 0x205   : > { %2833 = vmatpush1.bf16.msra.mxu1 %v1521_v55  ;;  %2750 = vmatprep.subr.bf16.mxu0 %v11914_v20  ;;  %v1668_v33 = vpop.permute.xlu1 %1667 }
 0x206   : > { %2834 = vmatprep.subr.bf16.mxu1 %v1598_v63  ;;  %v1677_v56 = vsel %vm16697_vm12, %v1668_v33, %v1670_v46 }
 0x208   : > { %2751 = vmatpush1.bf16.msra.mxu0 %v11786_v30 }
 0x209   : > { %2835 = vmatpush1.bf16.msra.mxu1 %v1597_v18  ;;  %v1672_v42 = vpop.permute.xlu1 %1671 }
 0x20a   : > { %2836 = vmatprep.subr.bf16.mxu1 %v11927_v50  ;;  %v1678_v47 = vsel %vm16697_vm12, %v1670_v46, %v1672_v42 }
 0x20b   : > { %2752 = vmatprep.subr.bf16.mxu0 %v1678_v47 }
 0x20c   : > { %2753 = vmatpush1.bf16.msra.mxu0 %v1677_v56 }
 0x20d   : > { %2837 = vmatpush1.bf16.msra.mxu1 %v11798_v61 }
 0x254   : > { %v1676_v44 = vpop.permute.xlu1 %1675 }
 0x255   : > { %v1674_v29 = vpop.permute.xlu0 %1673 }
 0x256   : > { %v1680_v41 = vsel %vm16697_vm12, %v1674_v29, %v1676_v44  ;;  %v1679_v58 = vsel %vm16697_vm12, %v1672_v42, %v1674_v29  ;;  %vm16736_vm12 = vmmov %vm16735_vm13 }
 0x257   : > { %2838 = vmatprep.subr.bf16.mxu1 %v1680_v41 }
 0x258   : > { %2839 = vmatpush1.bf16.msra.mxu1 %v1679_v58  ;;  %v1718_v43 = vpop.permute.xlu1 %1717 }
 0x259   : > { %v1716_v51 = vpop.permute.xlu0 %1715 }
 0x25a   : > { %v1731_v27 = vmul.bf16 %v1716_v51, %v11786_v30  ;;  %v1723_v24 = vsel %vm16698_vm5, %v1716_v51, %v1718_v43 }
 0x25b   : > { %v1732_v31 = vmul.bf16 %v1723_v24, %v11914_v20  ;;  %v10729_v24 = vld [vmem:[%s16647_s3 + $0x240] ss:$16 sps:$4 sm:$0xff]  }
 0x25c   : > { %1741 = vrot.lane.b32.xlu0 %v1731_v27, %s16727_s17  ;;  %v1722_v16 = vpop.permute.xlu1 %1721 }
 0x25d   : > { %v1720_v12 = vpop.permute.xlu0 %1719  ;;  %1743 = vrot.lane.b32.xlu1 %v1732_v31, %s16727_s17  ;;  %v1735_v19 = vmul.bf16 0, %v1722_v16 }
 0x25e   : > { %v1724_v37 = vsel %vm16698_vm5, %v1718_v43, %v1720_v12  ;;  %v1725_v62 = vsel %vm16698_vm5, %v1720_v12, %v1722_v16  ;;  %v10731_v16 = vld [vmem:[%s16647_s3 + $0x244] ss:$16 sps:$4 sm:$0xff]   ;;  %v10732_v12 = vld [vmem:[%s16647_s3 + $0x248] ss:$16 sps:$4 sm:$0xff]   ;;  %vm16737_vm5 = vmmov %vm16736_vm12 }
 0x25f   : > { %v1733_v9 = vmul.bf16 %v1724_v37, %v11798_v61  ;;  %v1734_v54 = vmul.bf16 %v1725_v62, %v11927_v50  ;;  %v10734_v37 = vld [vmem:[%s16647_s3 + $0x24c] ss:$16 sps:$4 sm:$0xff]  }
 0x261   : > { %1745 = vrot.lane.b32.xlu0 %v1733_v9, %s16727_s17  ;;  %1747 = vrot.lane.b32.xlu1 %v1734_v54, %s16727_s17 }
 0x265   : > { %1749 = vrot.lane.b32.xlu0 %v1735_v19, %s16727_s17  ;;  %1789 = vrot.lane.b32.xlu1 %v10714_v28, %s16725_s14 }
 0x269   : > { %1791 = vrot.lane.b32.xlu0 %v10716_v26, %s16725_s14  ;;  %1793 = vrot.lane.b32.xlu1 %v10717_v4, %s16725_s14 }
 0x26d   : > { %1795 = vrot.lane.b32.xlu0 %v10719_v59, %s16725_s14 }
 0x2ce   : > { %v1742_v35 = vpop.permute.xlu0 %1741 }
 0x2cf   : > { %v1744_v45 = vpop.permute.xlu1 %1743 }
 0x2d0   : > { %v1751_v14 = vsel %vm1489_vm11, %v1742_v35, %v1744_v45 }
 0x2d3   : > { %v1746_v36 = vpop.permute.xlu0 %1745  ;;  %v1748_v15 = vpop.permute.xlu1 %1747 }
 0x2d4   : > { %v1752_v57 = vsel %vm1489_vm11, %v1744_v45, %v1746_v36  ;;  %v1753_v6 = vsel %vm1489_vm11, %v1746_v36, %v1748_v15 }
 0x2d5   : > { %2754 = vmatprep.subr.bf16.mxu0 %v1752_v57 }
 0x2d6   : > { %2755 = vmatpush1.bf16.msra.mxu0 %v1751_v14 }
 0x2d7   : > { %v1750_v52 = vpop.permute.xlu0 %1749  ;;  %v1790_v60 = vpop.permute.xlu1 %1789 }
 0x2d8   : > { %v1805_v22 = vmul.bf16 %v1790_v60, %v11786_v30  ;;  %v1754_v38 = vsel %vm1489_vm11, %v1748_v15, %v1750_v52 }
 0x2d9   : > { %2840 = vmatprep.subr.bf16.mxu1 %v1754_v38  ;;  %2757 = vmatmul.mubr.bf16.vlgmr.msra.gmra.mrb[4].mxu0 %v10726_v49 }
 0x2da   : > { %2841 = vmatpush1.bf16.msra.mxu1 %v1753_v6  ;;  %1815 = vrot.lane.b32.xlu1 %v1805_v22, %s16729_s1 }
 0x2db   : > { %v1792_v40 = vpop.permute.xlu0 %1791  ;;  %v1794_v21 = vpop.permute.xlu1 %1793 }
 0x2dc   : > { %v1797_v8 = vsel %vm1442_vm15, %v1790_v60, %v1792_v40  ;;  %v1798_v3 = vsel %vm1442_vm15, %v1792_v40, %v1794_v21  ;;  %v10735_v40 = vld [vmem:[%s16647_s3 + $0x260] ss:$16 sps:$4 sm:$0xff]  }
 0x2dd   : > { %v1806_v53 = vmul.bf16 %v1797_v8, %v11914_v20  ;;  %v1807_v13 = vmul.bf16 %v1798_v3, %v11798_v61  ;;  %2843 = vmatmul.mubr.bf16.vlgmr.msra.gmra.mrb[4].mxu1 %v10726_v49  ;;  %v10738_v8 = vld [vmem:[%s16647_s3 + $0x268] ss:$16 sps:$4 sm:$0xff]   ;;  %v10740_v3 = vld [vmem:[%s16647_s3 + $0x26c] ss:$16 sps:$4 sm:$0xff]  }
 0x2df   : > { %v1796_v32 = vpop.permute.xlu0 %1795  ;;  %1817 = vrot.lane.b32.xlu0 %v1806_v53, %s16729_s1  ;;  %1819 = vrot.lane.b32.xlu1 %v1807_v13, %s16729_s1 }
 0x2e0   : > { %v1799_v39 = vsel %vm1442_vm15, %v1794_v21, %v1796_v32  ;;  %v1809_v10 = vmul.bf16 0, %v1796_v32  ;;  %v10737_v21 = vld [vmem:[%s16647_s3 + $0x264] ss:$16 sps:$4 sm:$0xff]  }
 0x2e1   : > { %v1808_v5 = vmul.bf16 %v1799_v39, %v11927_v50 }
 0x2e3   : > { %1821 = vrot.lane.b32.xlu0 %v1808_v5, %s16729_s1  ;;  %1823 = vrot.lane.b32.xlu1 %v1809_v10, %s16729_s1 }
 0x2e7   : > { %1863 = vrot.lane.b32.xlu0 %v10720_v7, %s16723_s19  ;;  %1865 = vrot.lane.b32.xlu1 %v10722_v23, %s16723_s19 }
 0x2eb   : > { %1867 = vrot.lane.b32.xlu0 %v10723_v11, %s16723_s19  ;;  %1869 = vrot.lane.b32.xlu1 %v10725_v25, %s16723_s19 }
 0x34c   : > { %v1816_v0 = vpop.permute.xlu1 %1815 }
 0x351   : > { %v1818_v2 = vpop.permute.xlu0 %1817  ;;  %v1820_v1 = vpop.permute.xlu1 %1819 }
 0x352   : > { %v1826_v34 = vsel %vm16703_vm10, %v1818_v2, %v1820_v1  ;;  %v1825_v48 = vsel %vm16703_vm10, %v1816_v0, %v1818_v2 }
 0x353   : > { %2767 = vmatprep.subr.bf16.mxu0 %v1826_v34 }
 0x354   : > { %2768 = vmatpush1.bf16.msra.mxu0 %v1825_v48 }
 0x355   : > { %v1822_v55 = vpop.permute.xlu0 %1821  ;;  %v1824_v63 = vpop.permute.xlu1 %1823 }
 0x356   : > { %v1828_v33 = vsel %vm16703_vm10, %v1822_v55, %v1824_v63  ;;  %v1827_v18 = vsel %vm16703_vm10, %v1820_v1, %v1822_v55 }
 0x357   : > { %2853 = vmatprep.subr.bf16.mxu1 %v1828_v33 }
 0x358   : > { %2854 = vmatpush1.bf16.msra.mxu1 %v1827_v18 }
 0x359   : > { %v1864_v46 = vpop.permute.xlu0 %1863  ;;  %v1866_v42 = vpop.permute.xlu1 %1865 }
 0x35a   : > { %v1879_v47 = vmul.bf16 %v1864_v46, %v11786_v30  ;;  %v1871_v56 = vsel %vm1366_vm14, %v1864_v46, %v1866_v42 }
 0x35b   : > { %v1880_v44 = vmul.bf16 %v1871_v56, %v11914_v20  ;;  %v10743_v56 = vld [vmem:[%s16647_s3 + $0x284] ss:$16 sps:$4 sm:$0xff]  }
 0x35c   : > { %1889 = vrot.lane.b32.xlu0 %v1879_v47, %s16730_s2 }
 0x35d   : > { %v1868_v29 = vpop.permute.xlu0 %1867  ;;  %1891 = vrot.lane.b32.xlu1 %v1880_v44, %s16730_s2  ;;  %v1870_v41 = vpop.permute.xlu1 %1869  ;;  %v10744_v44 = vld [vmem:[%s16647_s3 + $0x288] ss:$16 sps:$4 sm:$0xff]  }
 0x35e   : > { %v1872_v58 = vsel %vm1366_vm14, %v1866_v42, %v1868_v29  ;;  %v1873_v43 = vsel %vm1366_vm14, %v1868_v29, %v1870_v41  ;;  %v1883_v31 = vmul.bf16 0, %v1870_v41  ;;  %v10741_v42 = vld [vmem:[%s16647_s3 + $0x280] ss:$16 sps:$4 sm:$0xff]   ;;  %v10746_v29 = vld [vmem:[%s16647_s3 + $0x28c] ss:$16 sps:$4 sm:$0xff]  }
 0x35f   : > { %v1881_v51 = vmul.bf16 %v1872_v58, %v11798_v61  ;;  %v1882_v27 = vmul.bf16 %v1873_v43, %v11927_v50 }
 0x361   : > { %1893 = vrot.lane.b32.xlu0 %v1881_v51, %s16730_s2  ;;  %1895 = vrot.lane.b32.xlu1 %v1882_v27, %s16730_s2 }
 0x365   : > { %1897 = vrot.lane.b32.xlu0 %v1883_v31, %s16730_s2  ;;  %1937 = vrot.lane.b32.xlu1 %v10729_v24, %s16719_s28 }
 0x369   : > { %1939 = vrot.lane.b32.xlu0 %v10731_v16, %s16719_s28  ;;  %1941 = vrot.lane.b32.xlu1 %v10732_v12, %s16719_s28 }
 0x36d   : > { %1943 = vrot.lane.b32.xlu0 %v10734_v37, %s16719_s28 }
 0x3ce   : > { %v1890_v62 = vpop.permute.xlu0 %1889 }
 0x3cf   : > { %v1892_v9 = vpop.permute.xlu1 %1891 }
 0x3d0   : > { %v1899_v26 = vsel %vm16701_vm9, %v1890_v62, %v1892_v9 }
 0x3d3   : > { %v1894_v54 = vpop.permute.xlu0 %1893  ;;  %v1896_v28 = vpop.permute.xlu1 %1895 }
 0x3d4   : > { %v1900_v19 = vsel %vm16701_vm9, %v1892_v9, %v1894_v54  ;;  %v1901_v17 = vsel %vm16701_vm9, %v1894_v54, %v1896_v28 }
 0x3d5   : > { %2769 = vmatprep.subr.bf16.mxu0 %v1900_v19 }
 0x3d6   : > { %2770 = vmatpush1.bf16.msra.mxu0 %v1899_v26 }
 0x3d7   : > { %v1898_v4 = vpop.permute.xlu0 %1897  ;;  %v1938_v59 = vpop.permute.xlu1 %1937 }
 0x3d8   : > { %v1953_v35 = vmul.bf16 %v1938_v59, %v11786_v30  ;;  %v1902_v45 = vsel %vm16701_vm9, %v1896_v28, %v1898_v4 }
 0x3d9   : > { %2855 = vmatprep.subr.bf16.mxu1 %v1902_v45 }
 0x3da   : > { %2856 = vmatpush1.bf16.msra.mxu1 %v1901_v17  ;;  %1963 = vrot.lane.b32.xlu1 %v1953_v35, %s16731_s20 }
 0x3db   : > { %v1940_v36 = vpop.permute.xlu0 %1939  ;;  %v1942_v15 = vpop.permute.xlu1 %1941 }
 0x3dc   : > { %v1945_v57 = vsel %vm662_vm2, %v1938_v59, %v1940_v36  ;;  %v1946_v14 = vsel %vm662_vm2, %v1940_v36, %v1942_v15  ;;  %v10747_v36 = vld [vmem:[%s16647_s3 + $0x2a0] ss:$16 sps:$4 sm:$0xff]  }
 0x3dd   : > { %v1954_v49 = vmul.bf16 %v1945_v57, %v11914_v20  ;;  %v1955_v52 = vmul.bf16 %v1946_v14, %v11798_v61  ;;  %v10750_v57 = vld [vmem:[%s16647_s3 + $0x2a8] ss:$16 sps:$4 sm:$0xff]   ;;  %v10752_v14 = vld [vmem:[%s16647_s3 + $0x2ac] ss:$16 sps:$4 sm:$0xff]  }
 0x3df   : > { %v1944_v60 = vpop.permute.xlu0 %1943  ;;  %1965 = vrot.lane.b32.xlu0 %v1954_v49, %s16731_s20  ;;  %1967 = vrot.lane.b32.xlu1 %v1955_v52, %s16731_s20 }
 0x3e0   : > { %v1947_v22 = vsel %vm662_vm2, %v1942_v15, %v1944_v60  ;;  %v1957_v38 = vmul.bf16 0, %v1944_v60  ;;  %v10749_v15 = vld [vmem:[%s16647_s3 + $0x2a4] ss:$16 sps:$4 sm:$0xff]  }
 0x3e1   : > { %v1956_v6 = vmul.bf16 %v1947_v22, %v11927_v50 }
 0x3e3   : > { %1969 = vrot.lane.b32.xlu0 %v1956_v6, %s16731_s20  ;;  %1971 = vrot.lane.b32.xlu1 %v1957_v38, %s16731_s20 }
 0x3e7   : > { %2011 = vrot.lane.b32.xlu0 %v10735_v40, %s16718_s23  ;;  %2013 = vrot.lane.b32.xlu1 %v10737_v21, %s16718_s23 }
 0x3eb   : > { %2015 = vrot.lane.b32.xlu0 %v10738_v8, %s16718_s23  ;;  %2017 = vrot.lane.b32.xlu1 %v10740_v3, %s16718_s23 }
 0x44c   : > { %v1964_v53 = vpop.permute.xlu1 %1963 }
 0x451   : > { %v1966_v13 = vpop.permute.xlu0 %1965  ;;  %v1968_v32 = vpop.permute.xlu1 %1967 }
 0x452   : > { %v1974_v39 = vsel %vm691_vm8, %v1966_v13, %v1968_v32  ;;  %v1973_v10 = vsel %vm691_vm8, %v1964_v53, %v1966_v13 }
 0x453   : > { %2771 = vmatprep.subr.bf16.mxu0 %v1974_v39 }
 0x454   : > { %2772 = vmatpush1.bf16.msra.mxu0 %v1973_v10  ;;  %v10753_v10 = vld [vmem:[%s16647_s3 + $0x2c0] ss:$16 sps:$4 sm:$0xff]  }
 0x455   : > { %v1970_v5 = vpop.permute.xlu0 %1969  ;;  %v1972_v7 = vpop.permute.xlu1 %1971 }
 0x456   : > { %v1976_v23 = vsel %vm691_vm8, %v1970_v5, %v1972_v7  ;;  %v1975_v11 = vsel %vm691_vm8, %v1968_v32, %v1970_v5  ;;  %v10755_v5 = vld [vmem:[%s16647_s3 + $0x2c4] ss:$16 sps:$4 sm:$0xff]   ;;  %v10756_v7 = vld [vmem:[%s16647_s3 + $0x2c8] ss:$16 sps:$4 sm:$0xff]  }
 0x457   : > { %2857 = vmatprep.subr.bf16.mxu1 %v1976_v23  ;;  %v10758_v23 = vld [vmem:[%s16647_s3 + $0x2cc] ss:$16 sps:$4 sm:$0xff]  }
 0x458   : > { %2858 = vmatpush1.bf16.msra.mxu1 %v1975_v11  ;;  %v10759_v11 = vld [vmem:[%s16647_s3 + $0x2e0] ss:$16 sps:$4 sm:$0xff]  }
 0x459   : > { %v2012_v25 = vpop.permute.xlu0 %2011  ;;  %v2014_v0 = vpop.permute.xlu1 %2013 }
 0x45a   : > { %v2027_v2 = vmul.bf16 %v2012_v25, %v11786_v30  ;;  %v2019_v1 = vsel %vm738_vm1, %v2012_v25, %v2014_v0  ;;  %v10761_v25 = vld [vmem:[%s16647_s3 + $0x2e4] ss:$16 sps:$4 sm:$0xff]  }
 0x45b   : > { %v2028_v34 = vmul.bf16 %v2019_v1, %v11914_v20  ;;  %v10765_v1 = vld [vmem:[%s16647_s3 + $0x300] ss:$16 sps:$4 sm:$0xff]  }
 0x45c   : > { %2037 = vrot.lane.b32.xlu0 %v2027_v2, %s16732_s12  ;;  %v10764_v2 = vld [vmem:[%s16647_s3 + $0x2ec] ss:$16 sps:$4 sm:$0xff]  }
 0x45d   : > { %v2016_v48 = vpop.permute.xlu0 %2015  ;;  %2039 = vrot.lane.b32.xlu1 %v2028_v34, %s16732_s12  ;;  %v2018_v55 = vpop.permute.xlu1 %2017  ;;  %v10767_v34 = vld [vmem:[%s16647_s3 + $0x304] ss:$16 sps:$4 sm:$0xff]  }
 0x45e   : > { %v2020_v63 = vsel %vm738_vm1, %v2014_v0, %v2016_v48  ;;  %v2021_v33 = vsel %vm738_vm1, %v2016_v48, %v2018_v55  ;;  %v2031_v47 = vmul.bf16 0, %v2018_v55  ;;  %v10762_v0 = vld [vmem:[%s16647_s3 + $0x2e8] ss:$16 sps:$4 sm:$0xff]   ;;  %v10770_v55 = vld [vmem:[%s16647_s3 + $0x30c] ss:$16 sps:$4 sm:$0xff]  }
 0x45f   : > { %v2029_v18 = vmul.bf16 %v2020_v63, %v11798_v61  ;;  %v2030_v46 = vmul.bf16 %v2021_v33, %v11927_v50  ;;  %v10768_v48 = vld [vmem:[%s16647_s3 + $0x308] ss:$16 sps:$4 sm:$0xff]   ;;  %v10771_v63 = vld [vmem:[%s16647_s3 + $0x320] ss:$16 sps:$4 sm:$0xff]   ;;  %v10773_v33 = vld [vmem:[%s16647_s3 + $0x324] ss:$16 sps:$4 sm:$0xff]  }
 0x461   : > { %2041 = vrot.lane.b32.xlu0 %v2029_v18, %s16732_s12  ;;  %2043 = vrot.lane.b32.xlu1 %v2030_v46, %s16732_s12  ;;  %v10774_v18 = vld [vmem:[%s16647_s3 + $0x328] ss:$16 sps:$4 sm:$0xff]   ;;  %v10776_v46 = vld [vmem:[%s16647_s3 + $0x32c] ss:$16 sps:$4 sm:$0xff]  }
 0x465   : > { %2045 = vrot.lane.b32.xlu0 %v2031_v47, %s16732_s12  ;;  %2085 = vrot.lane.b32.xlu1 %v10741_v42, %s16717_s16  ;;  %v10777_v42 = vld [vmem:[%s16647_s3 + $0x340] ss:$16 sps:$4 sm:$0xff]   ;;  %v10779_v47 = vld [vmem:[%s16647_s3 + $0x344] ss:$16 sps:$4 sm:$0xff]  }
 0x469   : > { %2087 = vrot.lane.b32.xlu0 %v10743_v56, %s16717_s16  ;;  %2089 = vrot.lane.b32.xlu1 %v10744_v44, %s16717_s16  ;;  %v10780_v44 = vld [vmem:[%s16647_s3 + $0x348] ss:$16 sps:$4 sm:$0xff]  }
 0x46d   : > { %2091 = vrot.lane.b32.xlu0 %v10746_v29, %s16717_s16 }
 0x4ce   : > { %v2038_v41 = vpop.permute.xlu0 %2037 }
 0x4cf   : > { %v2040_v58 = vpop.permute.xlu1 %2039 }
 0x4d0   : > { %v2047_v24 = vsel %vm767_vm7, %v2038_v41, %v2040_v58  ;;  %v10782_v41 = vld [vmem:[%s16647_s3 + $0x34c] ss:$16 sps:$4 sm:$0xff]  }
 0x4d3   : > { %v2042_v43 = vpop.permute.xlu0 %2041  ;;  %v2044_v51 = vpop.permute.xlu1 %2043 }
 0x4d4   : > { %v2048_v27 = vsel %vm767_vm7, %v2040_v58, %v2042_v43  ;;  %v2049_v62 = vsel %vm767_vm7, %v2042_v43, %v2044_v51 }
 0x4d5   : > { %2773 = vmatprep.subr.bf16.mxu0 %v2048_v27 }
 0x4d6   : > { %2774 = vmatpush1.bf16.msra.mxu0 %v2047_v24 }
 0x4d7   : > { %v2046_v31 = vpop.permute.xlu0 %2045  ;;  %v2086_v16 = vpop.permute.xlu1 %2085 }
 0x4d8   : > { %v2101_v12 = vmul.bf16 %v2086_v16, %v11786_v30  ;;  %v2050_v37 = vsel %vm767_vm7, %v2044_v51, %v2046_v31 }
 0x4d9   : > { %2859 = vmatprep.subr.bf16.mxu1 %v2050_v37 }
 0x4da   : > { %2860 = vmatpush1.bf16.msra.mxu1 %v2049_v62  ;;  %2111 = vrot.lane.b32.xlu1 %v2101_v12, %s16733_s13 }
 0x4db   : > { %v2088_v9 = vpop.permute.xlu0 %2087  ;;  %v2090_v54 = vpop.permute.xlu1 %2089 }
 0x4dc   : > { %v2093_v28 = vsel %vm814_vm3, %v2086_v16, %v2088_v9  ;;  %v2094_v19 = vsel %vm814_vm3, %v2088_v9, %v2090_v54 }
 0x4dd   : > { %v2102_v26 = vmul.bf16 %v2093_v28, %v11914_v20  ;;  %v2103_v4 = vmul.bf16 %v2094_v19, %v11798_v61 }
 0x4df   : > { %v2092_v59 = vpop.permute.xlu0 %2091  ;;  %2113 = vrot.lane.b32.xlu0 %v2102_v26, %s16733_s13  ;;  %2115 = vrot.lane.b32.xlu1 %v2103_v4, %s16733_s13 }
 0x4e0   : > { %v2095_v35 = vsel %vm814_vm3, %v2090_v54, %v2092_v59  ;;  %v2105_v45 = vmul.bf16 0, %v2092_v59 }
 0x4e1   : > { %v2104_v17 = vmul.bf16 %v2095_v35, %v11927_v50 }
 0x4e3   : > { %2117 = vrot.lane.b32.xlu0 %v2104_v17, %s16733_s13  ;;  %2119 = vrot.lane.b32.xlu1 %v2105_v45, %s16733_s13 }
 0x4e7   : > { %2159 = vrot.lane.b32.xlu0 %v10747_v36, %s16721_s24  ;;  %2161 = vrot.lane.b32.xlu1 %v10749_v15, %s16721_s24 }
 0x4eb   : > { %2163 = vrot.lane.b32.xlu0 %v10750_v57, %s16721_s24  ;;  %2165 = vrot.lane.b32.xlu1 %v10752_v14, %s16721_s24 }
 0x54c   : > { %v2112_v49 = vpop.permute.xlu1 %2111 }
 0x551   : > { %v2114_v52 = vpop.permute.xlu0 %2113  ;;  %v2116_v60 = vpop.permute.xlu1 %2115 }
 0x552   : > { %v2122_v22 = vsel %vm843_vm6, %v2114_v52, %v2116_v60  ;;  %v2121_v38 = vsel %vm843_vm6, %v2112_v49, %v2114_v52 }
 0x553   : > { %2775 = vmatprep.subr.bf16.mxu0 %v2122_v22 }
 0x554   : > { %2776 = vmatpush1.bf16.msra.mxu0 %v2121_v38 }
 0x555   : > { %v2118_v6 = vpop.permute.xlu0 %2117  ;;  %v2120_v40 = vpop.permute.xlu1 %2119 }
 0x556   : > { %v2124_v21 = vsel %vm843_vm6, %v2118_v6, %v2120_v40  ;;  %v2123_v8 = vsel %vm843_vm6, %v2116_v60, %v2118_v6 }
 0x557   : > { %2861 = vmatprep.subr.bf16.mxu1 %v2124_v21 }
 0x558   : > { %2862 = vmatpush1.bf16.msra.mxu1 %v2123_v8 }
 0x559   : > { %v2160_v3 = vpop.permute.xlu0 %2159  ;;  %v2162_v53 = vpop.permute.xlu1 %2161 }
 0x55a   : > { %v2175_v13 = vmul.bf16 %v2160_v3, %v11786_v30  ;;  %v2167_v32 = vsel %vm890_vm4, %v2160_v3, %v2162_v53 }
 0x55b   : > { %v2176_v39 = vmul.bf16 %v2167_v32, %v11914_v20 }
 0x55c   : > { %2185 = vrot.lane.b32.xlu0 %v2175_v13, %s16734_s11 }
 0x55d   : > { %2187 = vrot.lane.b32.xlu1 %v2176_v39, %s16734_s11  ;;  %v2164_v56 = vpop.permute.xlu0 %2163  ;;  %v2166_v29 = vpop.permute.xlu1 %2165 }
 0x55e   : > { %v2168_v58 = vsel %vm890_vm4, %v2162_v53, %v2164_v56  ;;  %v2169_v43 = vsel %vm890_vm4, %v2164_v56, %v2166_v29  ;;  %v2179_v24 = vmul.bf16 0, %v2166_v29 }
 0x55f   : > { %v2177_v51 = vmul.bf16 %v2168_v58, %v11798_v61  ;;  %v2178_v27 = vmul.bf16 %v2169_v43, %v11927_v50 }
 0x560   : > { %2233 = vrot.lane.b32.xlu0 %v10753_v10, %s16722_s29 }
 0x561   : > { %2235 = vrot.lane.b32.xlu1 %v10755_v5, %s16722_s29 }
 0x564   : > { %2237 = vrot.lane.b32.xlu0 %v10756_v7, %s16722_s29 }
 0x565   : > { %2239 = vrot.lane.b32.xlu1 %v10758_v23, %s16722_s29 }
 0x568   : > { %2307 = vrot.lane.b32.xlu0 %v10759_v11, %s16734_s11 }
 0x569   : > { %2309 = vrot.lane.b32.xlu1 %v10761_v25, %s16734_s11 }
 0x56c   : > { %2311 = vrot.lane.b32.xlu0 %v10762_v0, %s16734_s11 }
 0x56d   : > { %2313 = vrot.lane.b32.xlu1 %v10764_v2, %s16734_s11 }
 0x570   : > { %2381 = vrot.lane.b32.xlu0 %v10765_v1, %s16733_s13 }
 0x571   : > { %2383 = vrot.lane.b32.xlu1 %v10767_v34, %s16733_s13 }
 0x574   : > { %2385 = vrot.lane.b32.xlu0 %v10768_v48, %s16733_s13 }
 0x575   : > { %2387 = vrot.lane.b32.xlu1 %v10770_v55, %s16733_s13 }
 0x578   : > { %2455 = vrot.lane.b32.xlu0 %v10771_v63, %s16732_s12 }
 0x579   : > { %2457 = vrot.lane.b32.xlu1 %v10773_v33, %s16732_s12 }
 0x57c   : > { %2459 = vrot.lane.b32.xlu0 %v10774_v18, %s16732_s12 }
 0x57d   : > { %2461 = vrot.lane.b32.xlu1 %v10776_v46, %s16732_s12 }
 0x580   : > { %2529 = vrot.lane.b32.xlu0 %v10777_v42, %s16731_s20 }
 0x581   : > { %2531 = vrot.lane.b32.xlu1 %v10779_v47, %s16731_s20 }
 0x584   : > { %2533 = vrot.lane.b32.xlu0 %v10780_v44, %s16731_s20 }
 0x585   : > { %2535 = vrot.lane.b32.xlu1 %v10782_v41, %s16731_s20 }
 0x588   : > { %2189 = vrot.lane.b32.xlu0 %v2177_v51, %s16734_s11  ;;  %v10791_v51 = vld [vmem:[%s16728_s4 + $0xc] ss:$16 sps:$4 sm:$0xff]  }
 0x589   : > { %2191 = vrot.lane.b32.xlu1 %v2178_v27, %s16734_s11 }
 0x58c   : > { %2193 = vrot.lane.b32.xlu0 %v2179_v24, %s16734_s11 }
 0x5ce   : > { %v12581_v31 = vpop.permute.xlu0 %2185 }
 0x5cf   : > { %v12583_v16 = vpop.permute.xlu1 %2187 }
 0x5d2   : > { %v2234_v12 = vpop.permute.xlu0 %2233 }
 0x5d3   : > { %v2249_v37 = vmul.bf16 %v2234_v12, %v11786_v30  ;;  %v2236_v62 = vpop.permute.xlu1 %2235 }
 0x5d4   : > { %v2241_v9 = vsel %vm531_vm0, %v2234_v12, %v2236_v62 }
 0x5d5   : > { %v2250_v54 = vmul.bf16 %v2241_v9, %v11914_v20  ;;  %2259 = vrot.lane.b32.xlu1 %v2249_v37, %s16722_s29 }
 0x5d6   : > { %v2238_v28 = vpop.permute.xlu0 %2237 }
 0x5d7   : > { %v2242_v19 = vsel %vm531_vm0, %v2236_v62, %v2238_v28  ;;  %2261 = vrot.lane.b32.xlu0 %v2250_v54, %s16722_s29  ;;  %v2240_v26 = vpop.permute.xlu1 %2239 }
 0x5d8   : > { %v2251_v4 = vmul.bf16 %v2242_v19, %v11798_v61  ;;  %v2243_v59 = vsel %vm531_vm0, %v2238_v28, %v2240_v26  ;;  %v2253_v45 = vmul.bf16 0, %v2240_v26  ;;  %v2689_v19 = vld [vmem:[%s16649_s5] sm:$0xff] }
 0x5d9   : > { %v2252_v35 = vmul.bf16 %v2243_v59, %v11927_v50  ;;  %v10783_v26 = vld [vmem:[%s16647_s3 + $0x4] ss:$16 sps:$4 sm:$0xff]   ;;  %v10790_v59 = vld [vmem:[%s16647_s3 + $0x8] ss:$16 sps:$4 sm:$0xff]  }
 0x5da   : > { %v2308_v17 = vpop.permute.xlu0 %2307  ;;  %2263 = vrot.lane.b32.xlu1 %v2251_v4, %s16722_s29  ;;  %v10786_v4 = vld [vmem:[%s16647_s3 + $0xc] ss:$16 sps:$4 sm:$0xff]  }
 0x5db   : > { %2265 = vrot.lane.b32.xlu0 %v2252_v35, %s16722_s29  ;;  %v2310_v36 = vpop.permute.xlu1 %2309  ;;  %v2323_v15 = vmul.bf16 %v2308_v17, %v11786_v30  ;;  %v10788_v35 = vld [vmem:[%s16647_s3 + $0x20] ss:$16 sps:$4 sm:$0xff]  }
 0x5dc   : > { %v2315_v57 = vsel %vm16735_vm13, %v2308_v17, %v2310_v36  ;;  %vm16738_vm13 = vmmov %vm16736_vm12 }
 0x5dd   : > { %v2324_v60 = vmul.bf16 %v2315_v57, %v11914_v20  ;;  %v2195_v12 = vsel %vm16738_vm13, %v12581_v31, %v12583_v16  ;;  %vm16739_vm13 = vmmov %vm16736_vm12 }
 0x5de   : > { %v2312_v14 = vpop.permute.xlu0 %2311  ;;  %2267 = vrot.lane.b32.xlu1 %v2253_v45, %s16722_s29  ;;  %v10794_v45 = vld [vmem:[%s16647_s3 + $0x28] ss:$16 sps:$4 sm:$0xff]  }
 0x5df   : > { %v2316_v49 = vsel %vm16736_vm12, %v2310_v36, %v2312_v14  ;;  %2333 = vrot.lane.b32.xlu0 %v2323_v15, %s16721_s24  ;;  %v2314_v52 = vpop.permute.xlu1 %2313 }
 0x5e0   : > { %v2325_v22 = vmul.bf16 %v2316_v49, %v11798_v61  ;;  %v2317_v38 = vsel %vm16737_vm5, %v2312_v14, %v2314_v52  ;;  %v2327_v8 = vmul.bf16 0, %v2314_v52  ;;  %vm16702_vm5 = vcmask 392192  }
 0x5e1   : > { %v2326_v21 = vmul.bf16 %v2317_v38, %v11927_v50  ;;  %9880 = vmatprep.mubr.msk.bf16.mxu1 %vm16702_vm5, %v10791_v51  ;;  %9879 = vmatprep.mubr.msk.bf16.mxu0 %vm16702_vm5, %v10791_v51  ;;  %v10793_v51 = vld [vmem:[%s16728_s4 + $0x8] ss:$16 sps:$4 sm:$0xff]   ;;  %vm16758_vm5 = vcmask 1039360  }
 0x5e2   : > { %v2382_v6 = vpop.permute.xlu0 %2381  ;;  %2335 = vrot.lane.b32.xlu1 %v2324_v60, %s16721_s24 }
 0x5e3   : > { %2337 = vrot.lane.b32.xlu0 %v2325_v22, %s16721_s24  ;;  %v2384_v40 = vpop.permute.xlu1 %2383  ;;  %v2397_v32 = vmul.bf16 %v2382_v6, %v11786_v30 }
 0x5e4   : > { %v2389_v3 = vsel %vm843_vm6, %v2382_v6, %v2384_v40 }
 0x5e5   : > { %v2398_v39 = vmul.bf16 %v2389_v3, %v11914_v20 }
 0x5e6   : > { %v2386_v53 = vpop.permute.xlu0 %2385  ;;  %2339 = vrot.lane.b32.xlu1 %v2326_v21, %s16721_s24 }
 0x5e7   : > { %2341 = vrot.lane.b32.xlu0 %v2327_v8, %s16721_s24  ;;  %v2388_v13 = vpop.permute.xlu1 %2387  ;;  %v2390_v10 = vsel %vm843_vm6, %v2384_v40, %v2386_v53 }
 0x5e8   : > { %v2391_v5 = vsel %vm843_vm6, %v2386_v53, %v2388_v13  ;;  %v2399_v11 = vmul.bf16 %v2390_v10, %v11798_v61  ;;  %v2401_v0 = vmul.bf16 0, %v2388_v13 }
 0x5e9   : > { %v2400_v25 = vmul.bf16 %v2391_v5, %v11927_v50 }
 0x5ea   : > { %v2456_v7 = vpop.permute.xlu0 %2455  ;;  %2407 = vrot.lane.b32.xlu1 %v2397_v32, %s16717_s16 }
 0x5eb   : > { %2409 = vrot.lane.b32.xlu0 %v2398_v39, %s16717_s16  ;;  %v2458_v23 = vpop.permute.xlu1 %2457  ;;  %v2471_v29 = vmul.bf16 %v2456_v7, %v11786_v30 }
 0x5ec   : > { %v2463_v2 = vsel %vm767_vm7, %v2456_v7, %v2458_v23 }
 0x5ed   : > { %v2472_v48 = vmul.bf16 %v2463_v2, %v11914_v20 }
 0x5ee   : > { %v2460_v1 = vpop.permute.xlu0 %2459  ;;  %2411 = vrot.lane.b32.xlu1 %v2399_v11, %s16717_s16 }
 0x5ef   : > { %2413 = vrot.lane.b32.xlu0 %v2400_v25, %s16717_s16  ;;  %v2462_v34 = vpop.permute.xlu1 %2461  ;;  %v2464_v55 = vsel %vm767_vm7, %v2458_v23, %v2460_v1 }
 0x5f0   : > { %v2465_v63 = vsel %vm767_vm7, %v2460_v1, %v2462_v34  ;;  %v2473_v46 = vmul.bf16 %v2464_v55, %v11798_v61  ;;  %v2475_v47 = vmul.bf16 0, %v2462_v34 }
 0x5f1   : > { %v2474_v42 = vmul.bf16 %v2465_v63, %v11927_v50 }
 0x5f2   : > { %v2530_v33 = vpop.permute.xlu0 %2529  ;;  %2415 = vrot.lane.b32.xlu1 %v2401_v0, %s16717_s16 }
 0x5f3   : > { %2483 = vrot.lane.b32.xlu0 %v2472_v48, %s16718_s23  ;;  %v2532_v18 = vpop.permute.xlu1 %2531 }
 0x5f4   : > { %v2537_v41 = vsel %vm691_vm8, %v2530_v33, %v2532_v18 }
 0x5f5   : > { %v2546_v24 = vmul.bf16 %v2537_v41, %v11914_v20 }
 0x5f6   : > { %v2534_v56 = vpop.permute.xlu0 %2533  ;;  %2485 = vrot.lane.b32.xlu1 %v2473_v46, %s16718_s23 }
 0x5f7   : > { %2487 = vrot.lane.b32.xlu0 %v2474_v42, %s16718_s23  ;;  %v2536_v44 = vpop.permute.xlu1 %2535  ;;  %v2538_v58 = vsel %vm691_vm8, %v2532_v18, %v2534_v56 }
 0x5f8   : > { %v2547_v37 = vmul.bf16 %v2538_v58, %v11798_v61  ;;  %v2539_v62 = vsel %vm691_vm8, %v2534_v56, %v2536_v44  ;;  %v2545_v61 = vmul.bf16 %v2530_v33, %v11786_v30  ;;  %v10785_v30 = vld [vmem:[%s16647_s3] ss:$16 sps:$4 sm:$0xff]  }
 0x5f9   : > { %v2548_v28 = vmul.bf16 %v2539_v62, %v11927_v50  ;;  %v2690_v50 = vld [vmem:[%s16649_s5 + $0x8] sm:$0xff] }
 0x5fa   : > { %v2190_v43 = vpop.permute.xlu0 %2189  ;;  %2489 = vrot.lane.b32.xlu1 %v2475_v47, %s16718_s23 }
 0x5fb   : > { %2481 = vrot.lane.b32.xlu0 %v2471_v29, %s16718_s23  ;;  %v2196_v27 = vsel %vm16736_vm12, %v12583_v16, %v2190_v43  ;;  %v2192_v9 = vpop.permute.xlu1 %2191  ;;  %v2549_v16 = vmul.bf16 0, %v2536_v44 }
 0x5fc   : > { %2777 = vmatprep.subr.bf16.mxu0 %v2196_v27  ;;  %v2197_v31 = vsel %vm16739_vm13, %v2190_v43, %v2192_v9  ;;  %vm16748_vm13 = vmmov %vm16736_vm12 }
 0x5fd   : > { %2778 = vmatpush1.bf16.msra.mxu0 %v2195_v12 }
 0x5fe   : > { %v2194_v54 = vpop.permute.xlu0 %2193  ;;  %2557 = vrot.lane.b32.xlu1 %v2546_v24, %s16719_s28 }
 0x5ff   : > { %2559 = vrot.lane.b32.xlu0 %v2547_v37, %s16719_s28  ;;  %v2198_v20 = vsel %vm16736_vm12, %v2192_v9, %v2194_v54 }
 0x600   : > { %2863 = vmatprep.subr.bf16.mxu1 %v2198_v20 }
 0x601   : > { %2864 = vmatpush1.bf16.msra.mxu1 %v2197_v31 }
 0x602   : > { %2561 = vrot.lane.b32.xlu1 %v2548_v28, %s16719_s28  ;;  %v10796_v28 = vld [vmem:[%s16647_s3 + $0x24] ss:$16 sps:$4 sm:$0xff]  }
 0x603   : > { %2563 = vrot.lane.b32.xlu0 %v2549_v16, %s16719_s28 }
 0x606   : > { %2555 = vrot.lane.b32.xlu1 %v2545_v61, %s16719_s28  ;;  %v10797_v61 = vld [vmem:[%s16647_s3 + $0x2c] ss:$16 sps:$4 sm:$0xff]  }
 0x607   : > { %2693 = vperm.xlu0 %10598, %v2689_v19   ;;  %v10798_v19 = vld [vmem:[%s16647_s3 + $0x44] ss:$16 sps:$4 sm:$0xff]  }
 0x60a   : > { %2698 = vperm.xlu1 %10599, %v2690_v50   ;;  %v10800_v50 = vld [vmem:[%s16647_s3 + $0x40] ss:$16 sps:$4 sm:$0xff]  }
 0x60b   : > { %2935 = vrot.lane.b32.xlu0 %v10783_v26, %s16719_s28  ;;  %v10801_v26 = vld [vmem:[%s16647_s3 + $0x4c] ss:$16 sps:$4 sm:$0xff]  }
 0x60e   : > { %2933 = vrot.lane.b32.xlu1 %v10785_v30, %s16719_s28  ;;  %v10805_v30 = vld [vmem:[%s16647_s3 + $0x48] ss:$16 sps:$4 sm:$0xff]  }
 0x60f   : > { %2939 = vrot.lane.b32.xlu0 %v10786_v4, %s16719_s28  ;;  %v10803_v4 = vld [vmem:[%s16647_s3 + $0x60] ss:$16 sps:$4 sm:$0xff]  }
 0x612   : > { %2937 = vrot.lane.b32.xlu1 %v10790_v59, %s16719_s28  ;;  %v10806_v59 = vld [vmem:[%s16647_s3 + $0x68] ss:$16 sps:$4 sm:$0xff]  }
 0x613   : > { %3006 = vrot.lane.b32.xlu0 %v10788_v35, %s16718_s23 }
 0x617   : > { %3010 = vrot.lane.b32.xlu0 %v10794_v45, %s16718_s23 }
 0x647   : > { %v2260_v17 = vpop.permute.xlu1 %2259 }
 0x649   : > { %v2262_v36 = vpop.permute.xlu0 %2261 }
 0x64a   : > { %v2269_v49 = vsel %vm531_vm0, %v2260_v17, %v2262_v36 }
 0x64c   : > { %v2264_v15 = vpop.permute.xlu1 %2263 }
 0x64d   : > { %v2266_v57 = vpop.permute.xlu0 %2265  ;;  %v2270_v14 = vsel %vm531_vm0, %v2262_v36, %v2264_v15 }
 0x64e   : > { %2779 = vmatprep.subr.bf16.mxu0 %v2270_v14  ;;  %v2271_v38 = vsel %vm531_vm0, %v2264_v15, %v2266_v57 }
 0x64f   : > { %2780 = vmatpush1.bf16.msra.mxu0 %v2269_v49 }
 0x650   : > { %v2268_v52 = vpop.permute.xlu1 %2267 }
 0x651   : > { %v2334_v60 = vpop.permute.xlu0 %2333  ;;  %v2272_v22 = vsel %vm531_vm0, %v2266_v57, %v2268_v52 }
 0x652   : > { %2865 = vmatprep.subr.bf16.mxu1 %v2272_v22  ;;  %v10808_v22 = vld [vmem:[%s16647_s3 + $0x64] ss:$16 sps:$4 sm:$0xff]  }
 0x653   : > { %2866 = vmatpush1.bf16.msra.mxu1 %v2271_v38 }
 0x654   : > { %v2336_v6 = vpop.permute.xlu1 %2335 }
 0x655   : > { %v2338_v40 = vpop.permute.xlu0 %2337  ;;  %v2343_v8 = vsel %vm890_vm4, %v2334_v60, %v2336_v6 }
 0x656   : > { %v2344_v21 = vsel %vm890_vm4, %v2336_v6, %v2338_v40 }
 0x657   : > { %2781 = vmatprep.subr.bf16.mxu0 %v2344_v21  ;;  %v10810_v21 = vld [vmem:[%s16647_s3 + $0x84] ss:$16 sps:$4 sm:$0xff]  }
 0x658   : > { %2782 = vmatpush1.bf16.msra.mxu0 %v2343_v8  ;;  %v2340_v3 = vpop.permute.xlu1 %2339  ;;  %v10812_v8 = vld [vmem:[%s16647_s3 + $0x80] ss:$16 sps:$4 sm:$0xff]  }
 0x659   : > { %v2342_v53 = vpop.permute.xlu0 %2341  ;;  %v2345_v32 = vsel %vm890_vm4, %v2338_v40, %v2340_v3  ;;  %v10809_v40 = vld [vmem:[%s16647_s3 + $0x6c] ss:$16 sps:$4 sm:$0xff]  }
 0x65a   : > { %v2346_v13 = vsel %vm890_vm4, %v2340_v3, %v2342_v53  ;;  %v10813_v3 = vld [vmem:[%s16647_s3 + $0x8c] ss:$16 sps:$4 sm:$0xff]   ;;  %v10815_v53 = vld [vmem:[%s16647_s3 + $0x88] ss:$16 sps:$4 sm:$0xff]  }
 0x65b   : > { %2867 = vmatprep.subr.bf16.mxu1 %v2346_v13  ;;  %v10816_v13 = vld [vmem:[%s16647_s3 + $0xa0] ss:$16 sps:$4 sm:$0xff]  }
 0x65c   : > { %2868 = vmatpush1.bf16.msra.mxu1 %v2345_v32  ;;  %v2408_v39 = vpop.permute.xlu1 %2407  ;;  %v10818_v32 = vld [vmem:[%s16647_s3 + $0xa8] ss:$16 sps:$4 sm:$0xff]  }
 0x65d   : > { %v2410_v10 = vpop.permute.xlu0 %2409 }
 0x65e   : > { %v2417_v11 = vsel %vm814_vm3, %v2408_v39, %v2410_v10 }
 0x660   : > { %v2412_v5 = vpop.permute.xlu1 %2411 }
 0x661   : > { %v2414_v7 = vpop.permute.xlu0 %2413  ;;  %v2418_v23 = vsel %vm814_vm3, %v2410_v10, %v2412_v5 }
 0x662   : > { %2783 = vmatprep.subr.bf16.mxu0 %v2418_v23  ;;  %v2419_v1 = vsel %vm814_vm3, %v2412_v5, %v2414_v7 }
 0x663   : > { %2784 = vmatpush1.bf16.msra.mxu0 %v2417_v11 }
 0x664   : > { %v2416_v25 = vpop.permute.xlu1 %2415 }
 0x665   : > { %v2484_v0 = vpop.permute.xlu0 %2483  ;;  %v2420_v2 = vsel %vm814_vm3, %v2414_v7, %v2416_v25 }
 0x666   : > { %2869 = vmatprep.subr.bf16.mxu1 %v2420_v2 }
 0x667   : > { %2870 = vmatpush1.bf16.msra.mxu1 %v2419_v1 }
 0x668   : > { %v2486_v34 = vpop.permute.xlu1 %2485 }
 0x669   : > { %v2488_v48 = vpop.permute.xlu0 %2487  ;;  %v2492_v55 = vsel %vm738_vm1, %v2484_v0, %v2486_v34 }
 0x66a   : > { %2785 = vmatprep.subr.bf16.mxu0 %v2492_v55  ;;  %v2493_v42 = vsel %vm738_vm1, %v2486_v34, %v2488_v48 }
 0x66c   : > { %v2490_v63 = vpop.permute.xlu1 %2489 }
 0x66d   : > { %v2482_v33 = vpop.permute.xlu0 %2481  ;;  %v2494_v18 = vsel %vm738_vm1, %v2488_v48, %v2490_v63 }
 0x66e   : > { %v2491_v46 = vsel %vm738_vm1, %v2482_v33, %v2484_v0  ;;  %2871 = vmatprep.subr.bf16.mxu1 %v2494_v18 }
 0x66f   : > { %2786 = vmatpush1.bf16.msra.mxu0 %v2491_v46  ;;  %2872 = vmatpush1.bf16.msra.mxu1 %v2493_v42 }
 0x670   : > { %v2558_v47 = vpop.permute.xlu1 %2557 }
 0x671   : > { %v2560_v56 = vpop.permute.xlu0 %2559 }
 0x672   : > { %v2566_v44 = vsel %vm662_vm2, %v2558_v47, %v2560_v56 }
 0x673   : > { %2787 = vmatprep.subr.bf16.mxu0 %v2566_v44 }
 0x674   : > { %v2562_v29 = vpop.permute.xlu1 %2561 }
 0x675   : > { %v2564_v41 = vpop.permute.xlu0 %2563  ;;  %v2567_v43 = vsel %vm662_vm2, %v2560_v56, %v2562_v29 }
 0x676   : > { %v2568_v58 = vsel %vm662_vm2, %v2562_v29, %v2564_v41  ;;  %v10821_v29 = vld [vmem:[%s16647_s3 + $0xac] ss:$16 sps:$4 sm:$0xff]   ;;  %v10822_v41 = vld [vmem:[%s16647_s3 + $0xc4] ss:$16 sps:$4 sm:$0xff]  }
 0x677   : > { %2873 = vmatprep.subr.bf16.mxu1 %v2568_v58  ;;  %v10824_v58 = vld [vmem:[%s16647_s3 + $0xc0] ss:$16 sps:$4 sm:$0xff]  }
 0x678   : > { %2874 = vmatpush1.bf16.msra.mxu1 %v2567_v43  ;;  %v2556_v27 = vpop.permute.xlu1 %2555  ;;  %v10825_v43 = vld [vmem:[%s16647_s3 + $0xcc] ss:$16 sps:$4 sm:$0xff]  }
 0x679   : > { %v2565_v24 = vsel %vm662_vm2, %v2556_v27, %v2558_v47  ;;  %v10820_v47 = vld [vmem:[%s16647_s3 + $0xa4] ss:$16 sps:$4 sm:$0xff]   ;;  %v10828_v27 = vld [vmem:[%s16647_s3 + $0xe0] ss:$16 sps:$4 sm:$0xff]  }
 0x67a   : > { %2788 = vmatpush1.bf16.msra.mxu0 %v2565_v24  ;;  %v10830_v24 = vld [vmem:[%s16647_s3 + $0xe8] ss:$16 sps:$4 sm:$0xff]  }
 0x67b   : > { %2886 = vmatmul.mubr.bf16.vlgmr.msra.gmra.mrb[4].mxu1 %v10793_v51 }
 0x67d   : > { %2800 = vmatmul.mubr.bf16.vlgmr.msra.gmra.mrb[4].mxu0 %v10793_v51  ;;  %v10827_v51 = vld [vmem:[%s16647_s3 + $0xc8] ss:$16 sps:$4 sm:$0xff]  }
 0x686   : > { %v12710_v12 = vpop.permute.xlu0 %2693 }
 0x689   : > { %v12712_v37 = vpop.permute.xlu1 %2698 }
 0x68a   : > { %16740 = vst [vmem:[#allocation6_spill] sm:$0xff] %v12712_v37  ;;  %v12714_v62 = vpop.permute.xlu0 %2935 }
 0x68d   : > { %v12716_v9 = vpop.permute.xlu1 %2933 }
 0x68e   : > { %v2949_v54 = vmul.bf16 0, %v12716_v9  ;;  %v12719_v20 = vpop.permute.xlu0 %2939 }
 0x690   : > { %2959 = vrot.lane.b32.xlu1 %v2949_v54, %s16731_s20 }
 0x691   : > { %v12758_v35 = vpop.permute.xlu1 %2937 }
 0x692   : > { %v12725_v31 = vpop.permute.xlu0 %3006 }
 0x693   : > { %v3022_v16 = vmul.bf16 0, %v12725_v31 }
 0x694   : > { %3008 = vrot.lane.b32.xlu1 %v10796_v28, %s16718_s23 }
 0x695   : > { %3032 = vrot.lane.b32.xlu0 %v3022_v16, %s16732_s12 }
 0x696   : > { %v12760_v45 = vpop.permute.xlu0 %3010 }
 0x698   : > { %3012 = vrot.lane.b32.xlu1 %v10797_v61, %s16718_s23 }
 0x699   : > { %3081 = vrot.lane.b32.xlu0 %v10798_v19, %s16717_s16 }
 0x69c   : > { %3079 = vrot.lane.b32.xlu1 %v10800_v50, %s16717_s16 }
 0x69d   : > { %3085 = vrot.lane.b32.xlu0 %v10801_v26, %s16717_s16 }
 0x6a0   : > { %3083 = vrot.lane.b32.xlu1 %v10805_v30, %s16717_s16 }
 0x6a1   : > { %3152 = vrot.lane.b32.xlu0 %v10803_v4, %s16721_s24 }
 0x6a5   : > { %3156 = vrot.lane.b32.xlu0 %v10806_v59, %s16721_s24 }
 0x702   : > { %v12762_v17 = vpop.permute.xlu1 %2959 }
 0x706   : > { %v12764_v36 = vpop.permute.xlu1 %3008 }
 0x707   : > { %v12766_v15 = vpop.permute.xlu0 %3032 }
 0x70a   : > { %v12768_v57 = vpop.permute.xlu1 %3012 }
 0x70b   : > { %v12770_v14 = vpop.permute.xlu0 %3081 }
 0x70e   : > { %v12772_v49 = vpop.permute.xlu1 %3079 }
 0x70f   : > { %v3095_v52 = vmul.bf16 0, %v12772_v49  ;;  %v12775_v60 = vpop.permute.xlu0 %3085 }
 0x711   : > { %3105 = vrot.lane.b32.xlu1 %v3095_v52, %s16733_s13  ;;  %v10832_v52 = vld [vmem:[%s16647_s3 + $0xe4] ss:$16 sps:$4 sm:$0xff]  }
 0x712   : > { %v12830_v2 = vpop.permute.xlu1 %3083 }
 0x713   : > { %v12781_v38 = vpop.permute.xlu0 %3152 }
 0x714   : > { %v3168_v6 = vmul.bf16 0, %v12781_v38 }
 0x715   : > { %3154 = vrot.lane.b32.xlu1 %v10808_v22, %s16721_s24 }
 0x716   : > { %3178 = vrot.lane.b32.xlu0 %v3168_v6, %s16734_s11 }
 0x717   : > { %v12832_v1 = vpop.permute.xlu0 %3156 }
 0x719   : > { %3158 = vrot.lane.b32.xlu1 %v10809_v40, %s16721_s24  ;;  %v10833_v40 = vld [vmem:[%s16647_s3 + $0xec] ss:$16 sps:$4 sm:$0xff]  }
 0x71a   : > { %3227 = vrot.lane.b32.xlu0 %v10810_v21, %s16722_s29  ;;  %v10834_v21 = vld [vmem:[%s16647_s3 + $0x104] ss:$16 sps:$4 sm:$0xff]  }
 0x71d   : > { %3225 = vrot.lane.b32.xlu1 %v10812_v8, %s16722_s29  ;;  %v10836_v8 = vld [vmem:[%s16647_s3 + $0x100] ss:$16 sps:$4 sm:$0xff]  }
 0x71e   : > { %3231 = vrot.lane.b32.xlu0 %v10813_v3, %s16722_s29  ;;  %v10837_v3 = vld [vmem:[%s16647_s3 + $0x10c] ss:$16 sps:$4 sm:$0xff]  }
 0x721   : > { %3229 = vrot.lane.b32.xlu1 %v10815_v53, %s16722_s29  ;;  %v10839_v53 = vld [vmem:[%s16647_s3 + $0x108] ss:$16 sps:$4 sm:$0xff]  }
 0x722   : > { %3298 = vrot.lane.b32.xlu0 %v10816_v13, %s16734_s11  ;;  %v10840_v13 = vld [vmem:[%s16647_s3 + $0x120] ss:$16 sps:$4 sm:$0xff]  }
 0x726   : > { %3302 = vrot.lane.b32.xlu0 %v10818_v32, %s16734_s11  ;;  %v10842_v32 = vld [vmem:[%s16647_s3 + $0x128] ss:$16 sps:$4 sm:$0xff]  }
 0x74e   : > { %v12814_v39 = vpop.f32.mrb[4].mxu1 }
 0x74f   : > { %v12816_v10 = vpop.f32.mrb[5].mxu1 }
 0x750   : > { %v12818_v5 = vpop.f32.mrb[4].mxu0  ;;  %v12820_v7 = vpop.f32.mrb[6].mxu1 }
 0x751   : > { %16741 = vst [vmem:[#allocation7_spill] sm:$0xff] %v12820_v7  ;;  %v12822_v23 = vpop.f32.mrb[5].mxu0  ;;  %v12824_v11 = vpop.f32.mrb[7].mxu1  ;;  %v10856_v7 = vld [vmem:[%s16647_s3 + $0x164] ss:$16 sps:$4 sm:$0xff]  }
 0x752   : > { %16742 = vst [vmem:[#allocation8_spill] sm:$0xff] %v12824_v11  ;;  %v12826_v25 = vpop.f32.mrb[6].mxu0 }
 0x753   : > { %16743 = vst [vmem:[#allocation9_spill] sm:$0xff] %v12826_v25  ;;  %v12828_v0 = vpop.f32.mrb[7].mxu0  ;;  %v10519_v25 = vadd.f32 %v12814_v39, %v12710_v12  ;;  %v10857_v39 = vld [vmem:[%s16647_s3 + $0x16c] ss:$16 sps:$4 sm:$0xff]  }
 0x754   : > { %16744 = vst [vmem:[#allocation10_spill] sm:$0xff] %v12828_v0 }
 0x783   : > { %v12834_v34 = vpop.permute.xlu1 %3105 }
 0x787   : > { %v12836_v48 = vpop.permute.xlu1 %3154 }
 0x788   : > { %v12838_v55 = vpop.permute.xlu0 %3178 }
 0x78b   : > { %v12840_v63 = vpop.permute.xlu1 %3158 }
 0x78c   : > { %v12842_v33 = vpop.permute.xlu0 %3227 }
 0x78f   : > { %v12844_v18 = vpop.permute.xlu1 %3225 }
 0x790   : > { %v3241_v46 = vmul.bf16 0, %v12844_v18  ;;  %v12847_v42 = vpop.permute.xlu0 %3231 }
 0x792   : > { %3251 = vrot.lane.b32.xlu1 %v3241_v46, %s16722_s29 }
 0x793   : > { %v12886_v54 = vpop.permute.xlu1 %3229 }
 0x794   : > { %v12853_v56 = vpop.permute.xlu0 %3298 }
 0x795   : > { %v3314_v44 = vmul.bf16 0, %v12853_v56 }
 0x796   : > { %3300 = vrot.lane.b32.xlu1 %v10820_v47, %s16734_s11 }
 0x797   : > { %3324 = vrot.lane.b32.xlu0 %v3314_v44, %s16721_s24 }
 0x798   : > { %v12888_v28 = vpop.permute.xlu0 %3302 }
 0x79a   : > { %3304 = vrot.lane.b32.xlu1 %v10821_v29, %s16734_s11 }
 0x79b   : > { %3373 = vrot.lane.b32.xlu0 %v10822_v41, %s16733_s13 }
 0x79e   : > { %3371 = vrot.lane.b32.xlu1 %v10824_v58, %s16733_s13 }
 0x79f   : > { %3377 = vrot.lane.b32.xlu0 %v10825_v43, %s16733_s13 }
 0x7a2   : > { %3375 = vrot.lane.b32.xlu1 %v10827_v51, %s16733_s13 }
 0x7a3   : > { %3444 = vrot.lane.b32.xlu0 %v10828_v27, %s16732_s12 }
 0x7a7   : > { %3448 = vrot.lane.b32.xlu0 %v10830_v24, %s16732_s12 }
 0x804   : > { %v12890_v16 = vpop.permute.xlu1 %3251 }
 0x808   : > { %v12892_v61 = vpop.permute.xlu1 %3300 }
 0x809   : > { %v12894_v19 = vpop.permute.xlu0 %3324 }
 0x80c   : > { %v12896_v50 = vpop.permute.xlu1 %3304 }
 0x80d   : > { %v12898_v26 = vpop.permute.xlu0 %3373 }
 0x810   : > { %v12900_v30 = vpop.permute.xlu1 %3371 }
 0x811   : > { %v3387_v4 = vmul.bf16 0, %v12900_v30  ;;  %v12903_v59 = vpop.permute.xlu0 %3377 }
 0x813   : > { %3397 = vrot.lane.b32.xlu1 %v3387_v4, %s16717_s16  ;;  %v10844_v4 = vld [vmem:[%s16647_s3 + $0x124] ss:$16 sps:$4 sm:$0xff]  }
 0x814   : > { %v12942_v46 = vpop.permute.xlu1 %3375 }
 0x815   : > { %v12909_v22 = vpop.permute.xlu0 %3444 }
 0x816   : > { %v3460_v6 = vmul.bf16 0, %v12909_v22 }
 0x817   : > { %3446 = vrot.lane.b32.xlu1 %v10832_v52, %s16732_s12 }
 0x818   : > { %3470 = vrot.lane.b32.xlu0 %v3460_v6, %s16718_s23 }
 0x819   : > { %v12944_v47 = vpop.permute.xlu0 %3448 }
 0x81b   : > { %3450 = vrot.lane.b32.xlu1 %v10833_v40, %s16732_s12  ;;  %v10845_v40 = vld [vmem:[%s16647_s3 + $0x12c] ss:$16 sps:$4 sm:$0xff]  }
 0x81c   : > { %3519 = vrot.lane.b32.xlu0 %v10834_v21, %s16731_s20  ;;  %v10846_v21 = vld [vmem:[%s16647_s3 + $0x144] ss:$16 sps:$4 sm:$0xff]  }
 0x81f   : > { %3517 = vrot.lane.b32.xlu1 %v10836_v8, %s16731_s20  ;;  %v10848_v8 = vld [vmem:[%s16647_s3 + $0x140] ss:$16 sps:$4 sm:$0xff]  }
 0x820   : > { %3523 = vrot.lane.b32.xlu0 %v10837_v3, %s16731_s20  ;;  %v10849_v3 = vld [vmem:[%s16647_s3 + $0x14c] ss:$16 sps:$4 sm:$0xff]  }
 0x823   : > { %3521 = vrot.lane.b32.xlu1 %v10839_v53, %s16731_s20  ;;  %v10851_v53 = vld [vmem:[%s16647_s3 + $0x148] ss:$16 sps:$4 sm:$0xff]  }
 0x824   : > { %3590 = vrot.lane.b32.xlu0 %v10840_v13, %s16730_s2  ;;  %v10852_v13 = vld [vmem:[%s16647_s3 + $0x160] ss:$16 sps:$4 sm:$0xff]  }
 0x828   : > { %3594 = vrot.lane.b32.xlu0 %v10842_v32, %s16730_s2  ;;  %v10854_v32 = vld [vmem:[%s16647_s3 + $0x168] ss:$16 sps:$4 sm:$0xff]  }
 0x885   : > { %v12946_v44 = vpop.permute.xlu1 %3397 }
 0x889   : > { %v12948_v29 = vpop.permute.xlu1 %3446 }
 0x88a   : > { %v12950_v41 = vpop.permute.xlu0 %3470 }
 0x88b   : > { %16745 = vst [vmem:[#allocation11_spill] sm:$0xff] %v12950_v41 }
 0x88d   : > { %v12952_v58 = vpop.permute.xlu1 %3450 }
 0x88e   : > { %v12954_v43 = vpop.permute.xlu0 %3519 }
 0x891   : > { %v12956_v51 = vpop.permute.xlu1 %3517 }
 0x892   : > { %v3533_v27 = vmul.bf16 0, %v12956_v51  ;;  %v12959_v24 = vpop.permute.xlu0 %3523 }
 0x894   : > { %3543 = vrot.lane.b32.xlu1 %v3533_v27, %s16719_s28 }
 0x895   : > { %v12998_v27 = vpop.permute.xlu1 %3521 }
 0x896   : > { %v12965_v52 = vpop.permute.xlu0 %3590 }
 0x897   : > { %v3606_v6 = vmul.bf16 0, %v12965_v52 }
 0x898   : > { %3592 = vrot.lane.b32.xlu1 %v10844_v4, %s16730_s2 }
 0x899   : > { %3616 = vrot.lane.b32.xlu0 %v3606_v6, %s16723_s19 }
 0x89a   : > { %v13000_v4 = vpop.permute.xlu0 %3594 }
 0x89c   : > { %3596 = vrot.lane.b32.xlu1 %v10845_v40, %s16730_s2 }
 0x89d   : > { %3665 = vrot.lane.b32.xlu0 %v10846_v21, %s16729_s1 }
 0x8a0   : > { %3663 = vrot.lane.b32.xlu1 %v10848_v8, %s16729_s1 }
 0x8a1   : > { %3669 = vrot.lane.b32.xlu0 %v10849_v3, %s16729_s1 }
 0x8a4   : > { %3667 = vrot.lane.b32.xlu1 %v10851_v53, %s16729_s1  ;;  %v10515_v53 = vadd.f32 %v12818_v5, %v12710_v12  ;;  %v11294_v5 = vmov 0.0  }
 0x8a5   : > { %3736 = vrot.lane.b32.xlu0 %v10852_v13, %s16727_s17 }
 0x8a6   : > { %v2896_v11 = vmax.f32 %v10515_v53, 0.0  ;;  %v2941_v53 = vsel %vm662_vm2, %v12716_v9, %v12714_v62 }
 0x8a9   : > { %3740 = vrot.lane.b32.xlu0 %v10854_v32, %s16727_s17 }
 0x906   : > { %v13002_v6 = vpop.permute.xlu1 %3543 }
 0x907   : > { %16746 = vst [vmem:[#allocation12_spill] sm:$0xff] %v13002_v6  ;;  %v13028_v6 = vpack.c.bf16 %v11294_v5, %v2896_v11 }
 0x909   : > { %v2950_v11 = vmul.bf16 %v2941_v53, %v13028_v6  ;;  %v3160_v53 = vsel %vm890_vm4, %v12781_v38, %v12836_v48  ;;  %v3233_v38 = vsel %vm531_vm0, %v12844_v18, %v12842_v33 }
 0x90a   : > { %v13004_v40 = vpop.permute.xlu1 %3592 }
 0x90b   : > { %v13006_v21 = vpop.permute.xlu0 %3616 }
 0x90c   : > { %16747 = vst [vmem:[#allocation13_spill] sm:$0xff] %v13006_v21  ;;  %v2898_v21 = vmax.f32 %v10519_v25, 0.0 }
 0x90e   : > { %v13008_v8 = vpop.permute.xlu1 %3596  ;;  %v13040_v25 = vpack.c.bf16 %v11294_v5, %v2898_v21  ;;  %v3016_v21 = vsel %vm738_vm1, %v12760_v45, %v12768_v57 }
 0x90f   : > { %v13010_v3 = vpop.permute.xlu0 %3665 }
 0x912   : > { %v13014_v13 = vpop.permute.xlu1 %3663 }
 0x913   : > { %v3679_v32 = vmul.bf16 0, %v13014_v13  ;;  %v13017_v0 = vpop.permute.xlu0 %3669 }
 0x915   : > { %3689 = vrot.lane.b32.xlu1 %v3679_v32, %s16725_s14 }
 0x917   : > { %v13025_v37 = vpop.permute.xlu0 %3736 }
 0x918   : > { %v3752_v41 = vmul.bf16 0, %v13025_v37 }
 0x919   : > { %3738 = vrot.lane.b32.xlu1 %v10856_v7, %s16727_s17  ;;  %v3014_v7 = vsel %vm738_vm1, %v12725_v31, %v12764_v36  ;;  %v3087_v31 = vsel %vm814_vm3, %v12772_v49, %v12770_v14 }
 0x91a   : > { %3762 = vrot.lane.b32.xlu0 %v3752_v41, %s16724_s25  ;;  %v2943_v41 = vsel %vm662_vm2, %v12758_v35, %v12719_v20  ;;  %v3023_v32 = vmul.bf16 %v3014_v7, %v13028_v6  ;;  %v3089_v7 = vsel %vm814_vm3, %v12830_v2, %v12775_v60 }
 0x91b   : > { %v2952_v9 = vmul.bf16 %v2943_v41, %v13040_v25  ;;  %v3169_v41 = vmul.bf16 %v3160_v53, %v13028_v6  ;;  %v3098_v49 = vmul.bf16 %v3089_v7, %v13040_v25 }
 0x91d   : > { %3742 = vrot.lane.b32.xlu1 %v10857_v39, %s16727_s17  ;;  %v3025_v39 = vmul.bf16 %v3016_v21, %v13040_v25  ;;  %v3242_v21 = vmul.bf16 %v3233_v38, %v13028_v6 }
 0x91e   : > { %2961 = vrot.lane.b32.xlu0 %v2950_v11, %s16731_s20  ;;  %v3096_v11 = vmul.bf16 %v3087_v31, %v13028_v6  ;;  %v3306_v31 = vsel %vm16736_vm12, %v12853_v56, %v12892_v61  ;;  %v3379_v56 = vsel %vm843_vm6, %v12900_v30, %v12898_v26 }
 0x91f   : > { %v3315_v18 = vmul.bf16 %v3306_v31, %v13028_v6 }
 0x921   : > { %3034 = vrot.lane.b32.xlu1 %v3023_v32, %s16732_s12  ;;  %v3162_v32 = vsel %vm890_vm4, %v12832_v1, %v12840_v63 }
 0x922   : > { %2965 = vrot.lane.b32.xlu0 %v2952_v9, %s16731_s20  ;;  %v3171_v9 = vmul.bf16 %v3162_v32, %v13040_v25  ;;  %v3381_v32 = vsel %vm843_vm6, %v12942_v46, %v12903_v59 }
 0x923   : > { %v3390_v38 = vmul.bf16 %v3381_v32, %v13040_v25 }
 0x925   : > { %3038 = vrot.lane.b32.xlu1 %v3025_v39, %s16732_s12  ;;  %v3235_v39 = vsel %vm531_vm0, %v12886_v54, %v12847_v42 }
 0x926   : > { %3107 = vrot.lane.b32.xlu0 %v3096_v11, %s16733_s13  ;;  %v3244_v53 = vmul.bf16 %v3235_v39, %v13040_v25  ;;  %v3308_v11 = vsel %vm16748_vm13, %v12888_v28, %v12896_v50  ;;  %v3598_v39 = vsel %vm16701_vm9, %v12965_v52, %v13004_v40  ;;  %v3671_v52 = vsel %vm16703_vm10, %v13014_v13, %v13010_v3  ;;  %vm16749_vm13 = vmmov %vm16736_vm12 }
 0x927   : > { %v3317_v7 = vmul.bf16 %v3308_v11, %v13040_v25  ;;  %v3680_v32 = vmul.bf16 %v3671_v52, %v13028_v6 }
 0x929   : > { %3180 = vrot.lane.b32.xlu1 %v3169_v41, %s16734_s11  ;;  %v3388_v41 = vmul.bf16 %v3379_v56, %v13028_v6  ;;  %v3600_v56 = vsel %vm16701_vm9, %v13000_v4, %v13008_v8 }
 0x92a   : > { %3111 = vrot.lane.b32.xlu0 %v3098_v49, %s16733_s13  ;;  %v3452_v49 = vsel %vm767_vm7, %v12909_v22, %v12948_v29  ;;  %v3525_v22 = vsel %vm691_vm8, %v12956_v51, %v12954_v43  ;;  %v3607_v51 = vmul.bf16 %v3598_v39, %v13028_v6 }
 0x92b   : > { %v3461_v30 = vmul.bf16 %v3452_v49, %v13028_v6  ;;  %v3534_v31 = vmul.bf16 %v3525_v22, %v13028_v6 }
 0x92d   : > { %3184 = vrot.lane.b32.xlu1 %v3171_v9, %s16734_s11  ;;  %v3454_v9 = vsel %vm767_vm7, %v12944_v47, %v12952_v58 }
 0x92e   : > { %3253 = vrot.lane.b32.xlu0 %v3242_v21, %s16722_s29  ;;  %v3463_v21 = vmul.bf16 %v3454_v9, %v13040_v25 }
 0x931   : > { %3326 = vrot.lane.b32.xlu1 %v3315_v18, %s16721_s24  ;;  %v3527_v18 = vsel %vm691_vm8, %v12998_v27, %v12959_v24 }
 0x932   : > { %3257 = vrot.lane.b32.xlu0 %v3244_v53, %s16722_s29  ;;  %v10516_v53 = vadd.f32 %v12822_v23, %v12710_v12  ;;  %v3536_v11 = vmul.bf16 %v3527_v18, %v13040_v25  ;;  %v10520_v23 = vadd.f32 %v12816_v10, %v12710_v12  ;;  %v3015_v12 = vsel %vm738_vm1, %v12764_v36, %v12760_v45  ;;  %v3741_v18 = vpop.permute.xlu0 %3740 }
 0x933   : > { %v3307_v36 = vsel %vm16736_vm12, %v12892_v61, %v12888_v28  ;;  %v3599_v61 = vsel %vm16701_vm9, %v13004_v40, %v13000_v4  ;;  %vm16750_vm9 = vmmov %vm16736_vm12 }
 0x934   : > { %v2897_v49 = vmax.f32 %v10516_v53, 0.0  ;;  %v2899_v13 = vmax.f32 %v10520_v23, 0.0  ;;  %v3088_v23 = vsel %vm814_vm3, %v12770_v14, %v12830_v2  ;;  %v3234_v14 = vsel %vm531_vm0, %v12842_v33, %v12886_v54 }
 0x935   : > { %3330 = vrot.lane.b32.xlu1 %v3317_v7, %s16721_s24  ;;  %v13142_v7 = vpop.permute.xlu1 %3667 }
 0x936   : > { %3399 = vrot.lane.b32.xlu0 %v3388_v41, %s16717_s16  ;;  %v3609_v41 = vmul.bf16 %v3600_v56, %v13040_v25  ;;  %v13163_v10 = vpack.c.bf16 %v11294_v5, %v2899_v13  ;;  %v3526_v13 = vsel %vm691_vm8, %v12954_v43, %v12998_v27 }
 0x938   : > { %v3172_v45 = vmul.bf16 %v12840_v63, %v13163_v10  ;;  %v3464_v28 = vmul.bf16 %v12952_v58, %v13163_v10  ;;  %v3391_v54 = vmul.bf16 %v12903_v59, %v13163_v10  ;;  %v3683_v27 = vmul.bf16 %v13017_v0, %v13163_v10 }
 0x939   : > { %3472 = vrot.lane.b32.xlu1 %v3461_v30, %s16718_s23  ;;  %v3673_v30 = vsel %vm16703_vm10, %v13142_v7, %v13017_v0  ;;  %v10863_v0 = vld [vmem:[%s16647_s3 + $0x188] ss:$16 sps:$4 sm:$0xff]  }
 0x93a   : > { %3403 = vrot.lane.b32.xlu0 %v3390_v38, %s16717_s16  ;;  %v13155_v38 = vpack.c.bf16 %v11294_v5, %v2897_v49  ;;  %v3682_v9 = vmul.bf16 %v3673_v30, %v13040_v25  ;;  %v3380_v30 = vsel %vm843_vm6, %v12898_v26, %v12942_v46  ;;  %v3537_v26 = vmul.bf16 %v12959_v24, %v13163_v10 }
 0x93c   : > { %v3024_v22 = vmul.bf16 %v3015_v12, %v13155_v38  ;;  %v3243_v2 = vmul.bf16 %v3234_v14, %v13155_v38  ;;  %v3672_v12 = vsel %vm16703_vm10, %v13010_v3, %v13142_v7  ;;  %v10862_v3 = vld [vmem:[%s16647_s3 + $0x180] ss:$16 sps:$4 sm:$0xff]   ;;  %vm16772_vm10 = vcmask 56320  }
 0x93d   : > { %3476 = vrot.lane.b32.xlu1 %v3463_v21, %s16718_s23  ;;  %v3026_v21 = vmul.bf16 %v12768_v57, %v13163_v10  ;;  %v3316_v57 = vmul.bf16 %v3307_v36, %v13155_v38  ;;  %v3681_v59 = vmul.bf16 %v3672_v12, %v13155_v38 }
 0x93e   : > { %3545 = vrot.lane.b32.xlu0 %v3534_v31, %s16719_s28  ;;  %v3161_v31 = vsel %vm890_vm4, %v12836_v48, %v12832_v1  ;;  %v3318_v1 = vmul.bf16 %v12896_v50, %v13163_v10  ;;  %v3453_v48 = vsel %vm767_vm7, %v12948_v29, %v12944_v47  ;;  %v3608_v50 = vmul.bf16 %v3599_v61, %v13155_v38 }
 0x93f   : > { %v3170_v39 = vmul.bf16 %v3161_v31, %v13155_v38  ;;  %v3462_v63 = vmul.bf16 %v3453_v48, %v13155_v38  ;;  %v3610_v47 = vmul.bf16 %v13008_v8, %v13163_v10 }
 0x941   : > { %3618 = vrot.lane.b32.xlu1 %v3607_v51, %s16723_s19 }
 0x942   : > { %3549 = vrot.lane.b32.xlu0 %v3536_v11, %s16719_s28  ;;  %v2942_v11 = vsel %vm662_vm2, %v12714_v62, %v12758_v35  ;;  %v10860_v62 = vld [vmem:[%s16647_s3 + $0x18c] ss:$16 sps:$4 sm:$0xff]   ;;  %v3097_v35 = vmul.bf16 %v3088_v23, %v13155_v38 }
 0x943   : > { %v2951_v52 = vmul.bf16 %v2942_v11, %v13155_v38 }
 0x945   : > { %3622 = vrot.lane.b32.xlu1 %v3609_v41, %s16723_s19  ;;  %v2953_v41 = vmul.bf16 %v12719_v20, %v13163_v10  ;;  %v3099_v20 = vmul.bf16 %v12775_v60, %v13163_v10  ;;  %v3389_v60 = vmul.bf16 %v3380_v30, %v13155_v38 }
 0x946   : > { %3691 = vrot.lane.b32.xlu0 %v3680_v32, %s16725_s14  ;;  %v3245_v32 = vmul.bf16 %v12847_v42, %v13163_v10  ;;  %v3535_v42 = vmul.bf16 %v3526_v13, %v13155_v38 }
 0x94a   : > { %3695 = vrot.lane.b32.xlu0 %v3682_v9, %s16725_s14 }
 0x94e   : > { %3036 = vrot.lane.b32.xlu0 %v3024_v22, %s16732_s12 }
 0x952   : > { %3040 = vrot.lane.b32.xlu0 %v3026_v21, %s16732_s12 }
 0x956   : > { %3182 = vrot.lane.b32.xlu0 %v3170_v39, %s16734_s11 }
 0x95a   : > { %3186 = vrot.lane.b32.xlu0 %v3172_v45, %s16734_s11 }
 0x95e   : > { %3328 = vrot.lane.b32.xlu0 %v3316_v57, %s16721_s24 }
 0x962   : > { %3332 = vrot.lane.b32.xlu0 %v3318_v1, %s16721_s24 }
 0x966   : > { %3474 = vrot.lane.b32.xlu0 %v3462_v63, %s16718_s23 }
 0x96a   : > { %3478 = vrot.lane.b32.xlu0 %v3464_v28, %s16718_s23 }
 0x96e   : > { %3620 = vrot.lane.b32.xlu0 %v3608_v50, %s16723_s19 }
 0x972   : > { %3624 = vrot.lane.b32.xlu0 %v3610_v47, %s16723_s19 }
 0x987   : > { %v13202_v29 = vpop.permute.xlu1 %3689 }
 0x98b   : > { %v3739_v51 = vpop.permute.xlu1 %3738 }
 0x98c   : > { %v3744_v58 = vsel %vm1489_vm11, %v13025_v37, %v3739_v51  ;;  %v3745_v4 = vsel %vm1489_vm11, %v3739_v51, %v3741_v18  ;;  %v10858_v37 = vld [vmem:[%s16647_s3 + $0x184] ss:$16 sps:$4 sm:$0xff]   ;;  %v13241_v49 = vpop.permute.xlu0 %3762 }
 0x98d   : > { %v3753_v40 = vmul.bf16 %v3744_v58, %v13028_v6  ;;  %v3754_v53 = vmul.bf16 %v3745_v4, %v13155_v38 }
 0x98f   : > { %3766 = vrot.lane.b32.xlu0 %v3754_v53, %s16724_s25  ;;  %3764 = vrot.lane.b32.xlu1 %v3753_v40, %s16724_s25  ;;  %v3743_v8 = vpop.permute.xlu1 %3742 }
 0x990   : > { %v3756_v56 = vmul.bf16 %v3743_v8, %v13163_v10  ;;  %v2962_v33 = vpop.permute.xlu0 %2961  ;;  %v3746_v22 = vsel %vm1489_vm11, %v3741_v18, %v3743_v8 }
 0x991   : > { %v3755_v24 = vmul.bf16 %v3746_v22, %v13040_v25 }
 0x993   : > { %2963 = vrot.lane.b32.xlu1 %v2951_v52, %s16731_s20  ;;  %3770 = vrot.lane.b32.xlu0 %v3756_v56, %s16724_s25  ;;  %v3035_v7 = vpop.permute.xlu1 %3034 }
 0x994   : > { %v2966_v9 = vpop.permute.xlu0 %2965  ;;  %v3042_v14 = vsel %vm767_vm7, %v12766_v15, %v3035_v7 }
 0x997   : > { %2967 = vrot.lane.b32.xlu1 %v2953_v41, %s16731_s20  ;;  %3811 = vrot.lane.b32.xlu0 %v10858_v37, %s16726_s15  ;;  %v3039_v39 = vpop.permute.xlu1 %3038  ;;  %v2969_v41 = vsel %vm691_vm8, %v12762_v17, %v2962_v33 }
 0x998   : > { %v3108_v46 = vpop.permute.xlu0 %3107 }
 0x99b   : > { %3109 = vrot.lane.b32.xlu1 %v3097_v35, %s16733_s13  ;;  %3815 = vrot.lane.b32.xlu0 %v10860_v62, %s16726_s15  ;;  %v3181_v36 = vpop.permute.xlu1 %3180 }
 0x99c   : > { %v13267_v43 = vpop.permute.xlu0 %3111 }
 0x99f   : > { %3113 = vrot.lane.b32.xlu1 %v3099_v20, %s16733_s13  ;;  %v3185_v1 = vpop.permute.xlu1 %3184 }
 0x9a0   : > { %v13275_v21 = vpop.permute.xlu0 %3253 }
 0x9a3   : > { %3255 = vrot.lane.b32.xlu1 %v3243_v2, %s16722_s29  ;;  %v13294_v63 = vpop.permute.xlu1 %3326 }
 0x9a4   : > { %v13281_v31 = vpop.permute.xlu0 %3257 }
 0x9a7   : > { %3259 = vrot.lane.b32.xlu1 %v3245_v32, %s16722_s29  ;;  %v13298_v61 = vpop.permute.xlu1 %3330 }
 0x9a8   : > { %v13288_v45 = vpop.permute.xlu0 %3399 }
 0x9ab   : > { %3401 = vrot.lane.b32.xlu1 %v3389_v60, %s16717_s16  ;;  %v13302_v47 = vpop.permute.xlu1 %3472 }
 0x9ac   : > { %v13290_v57 = vpop.permute.xlu0 %3403 }
 0x9af   : > { %3405 = vrot.lane.b32.xlu1 %v3391_v54, %s16717_s16  ;;  %v13306_v51 = vpop.permute.xlu1 %3476 }
 0x9b0   : > { %v13292_v48 = vpop.permute.xlu0 %3545 }
 0x9b3   : > { %3547 = vrot.lane.b32.xlu1 %v3535_v42, %s16719_s28  ;;  %v13308_v4 = vpop.permute.xlu1 %3618  ;;  %v3188_v42 = vsel %vm16736_vm12, %v12838_v55, %v3181_v36 }
 0x9b4   : > { %v13296_v28 = vpop.permute.xlu0 %3549 }
 0x9b7   : > { %3551 = vrot.lane.b32.xlu1 %v3537_v26, %s16719_s28  ;;  %v13310_v53 = vpop.permute.xlu1 %3622 }
 0x9b8   : > { %v13300_v50 = vpop.permute.xlu0 %3691 }
 0x9bb   : > { %3693 = vrot.lane.b32.xlu1 %v3681_v59, %s16725_s14 }
 0x9bc   : > { %v13304_v18 = vpop.permute.xlu0 %3695 }
 0x9bf   : > { %3697 = vrot.lane.b32.xlu1 %v3683_v27, %s16725_s14  ;;  %v3261_v27 = vsel %vm531_vm0, %v12890_v16, %v13275_v21 }
 0x9c0   : > { %v3037_v58 = vpop.permute.xlu0 %3036 }
 0x9c1   : > { %v3043_v23 = vsel %vm767_vm7, %v3035_v7, %v3037_v58  ;;  %v3044_v54 = vsel %vm767_vm7, %v3037_v58, %v3039_v39  ;;  %v3334_v7 = vsel %vm890_vm4, %v12894_v19, %v13294_v63 }
 0x9c3   : > { %3768 = vrot.lane.b32.xlu1 %v3755_v24, %s16724_s25 }
 0x9c4   : > { %v3041_v40 = vpop.permute.xlu0 %3040 }
 0x9c5   : > { %v3045_v32 = vsel %vm767_vm7, %v3039_v39, %v3041_v40  ;;  %v16752_v40 = vld [vmem:[#allocation11_spill] sm:$0xff] }
 0x9c7   : > { %3809 = vrot.lane.b32.xlu1 %v10862_v3, %s16726_s15 }
 0x9c8   : > { %v3183_v8 = vpop.permute.xlu0 %3182 }
 0x9c9   : > { %v3189_v15 = vsel %vm16749_vm13, %v3181_v36, %v3183_v8  ;;  %vm16751_vm13 = vmmov %vm16750_vm9  ;;  %v3407_v36 = vsel %vm814_vm3, %v12946_v44, %v13288_v45 }
 0x9ca   : > { %v3190_v55 = vsel %vm16751_vm13, %v3183_v8, %v3185_v1  ;;  %v3480_v8 = vsel %vm738_vm1, %v16752_v40, %v13302_v47 }
 0x9cb   : > { %3813 = vrot.lane.b32.xlu1 %v10863_v0, %s16726_s15 }
 0x9cc   : > { %v3187_v56 = vpop.permute.xlu0 %3186 }
 0x9d0   : > { %v3329_v62 = vpop.permute.xlu0 %3328 }
 0x9d1   : > { %v3336_v19 = vsel %vm890_vm4, %v3329_v62, %v13298_v61 }
 0x9d4   : > { %v3333_v60 = vpop.permute.xlu0 %3332 }
 0xa01   : > { %v13312_v11 = vpop.permute.xlu1 %3764 }
 0xa05   : > { %v2964_v52 = vpop.permute.xlu1 %2963 }
 0xa06   : > { %v2970_v37 = vsel %vm691_vm8, %v2962_v33, %v2964_v52  ;;  %v2971_v2 = vsel %vm691_vm8, %v2964_v52, %v2966_v9  ;;  %v3115_v33 = vsel %vm843_vm6, %v12834_v34, %v3108_v46  ;;  %v3191_v34 = vsel %vm16750_vm9, %v3185_v1, %v3187_v56 }
 0xa07   : > { %4946 = vmatprep.subr.bf16.mxu0 %v2970_v37  ;;  %v16753_v37 = vld [vmem:[#allocation12_spill] sm:$0xff]  ;;  %vm16755_vm9 = vcmask 56320  }
 0xa08   : > { %4947 = vmatpush1.bf16.msra.mxu0 %v2969_v41  ;;  %v3553_v41 = vsel %vm662_vm2, %v16753_v37, %v13292_v48  ;;  %vm16756_vm12 = vmmov %vm16755_vm9 }
 0xa09   : > { %4948 = vmatprep.subr.bf16.mxu0 %v3043_v23  ;;  %v2968_v35 = vpop.permute.xlu1 %2967  ;;  %vm16757_vm13 = vmmov %vm16755_vm9 }
 0xa0a   : > { %v2972_v20 = vsel %vm691_vm8, %v2966_v9, %v2968_v35 }
 0xa0b   : > { %5028 = vmatprep.subr.bf16.mxu1 %v2972_v20  ;;  %v16754_v20 = vld [vmem:[#allocation13_spill] sm:$0xff] }
 0xa0c   : > { %4949 = vmatpush1.bf16.msra.mxu0 %v3042_v14  ;;  %5029 = vmatpush1.bf16.msra.mxu1 %v2971_v2  ;;  %v3626_v14 = vsel %vm1366_vm14, %v16754_v20, %v13308_v4  ;;  %v10878_v20 = vld [vmem:[%s16647_s3 + $0x200] ss:$16 sps:$4 sm:$0xff]  }
 0xa0d   : > { %5030 = vmatprep.subr.bf16.mxu1 %v3045_v32  ;;  %v3110_v17 = vpop.permute.xlu1 %3109 }
 0xa0e   : > { %v3116_v30 = vsel %vm843_vm6, %v3108_v46, %v3110_v17  ;;  %v3117_v26 = vsel %vm843_vm6, %v3110_v17, %v13267_v43  ;;  %v3475_v46 = vpop.permute.xlu0 %3474  ;;  %v3699_v17 = vsel %vm1442_vm15, %v13202_v29, %v13300_v50 }
 0xa0f   : > { %4950 = vmatprep.subr.bf16.mxu0 %v3116_v30 }
 0xa10   : > { %4951 = vmatpush1.bf16.msra.mxu0 %v3115_v33  ;;  %5031 = vmatpush1.bf16.msra.mxu1 %v3044_v54  ;;  %v3772_v54 = vsel %vm16756_vm12, %v13241_v49, %v13312_v11  ;;  %vm16760_vm12 = vmmov %vm16758_vm5 }
 0xa11   : > { %4952 = vmatprep.subr.bf16.mxu0 %v3189_v15  ;;  %v3114_v13 = vpop.permute.xlu1 %3113 }
 0xa12   : > { %v3118_v9 = vsel %vm843_vm6, %v13267_v43, %v3114_v13  ;;  %v3335_v43 = vsel %vm890_vm4, %v13294_v63, %v3329_v62  ;;  %v3479_v3 = vpop.permute.xlu0 %3478 }
 0xa13   : > { %5032 = vmatprep.subr.bf16.mxu1 %v3118_v9 }
 0xa14   : > { %4953 = vmatpush1.bf16.msra.mxu0 %v3188_v42  ;;  %5033 = vmatpush1.bf16.msra.mxu1 %v3117_v26 }
 0xa15   : > { %5034 = vmatprep.subr.bf16.mxu1 %v3191_v34  ;;  %v3256_v12 = vpop.permute.xlu1 %3255 }
 0xa16   : > { %v3262_v59 = vsel %vm531_vm0, %v13275_v21, %v3256_v12  ;;  %v3263_v16 = vsel %vm531_vm0, %v3256_v12, %v13281_v31  ;;  %v3337_v21 = vsel %vm890_vm4, %v13298_v61, %v3333_v60  ;;  %v3621_v1 = vpop.permute.xlu0 %3620 }
 0xa17   : > { %4954 = vmatprep.subr.bf16.mxu0 %v3262_v59 }
 0xa18   : > { %4955 = vmatpush1.bf16.msra.mxu0 %v3261_v27  ;;  %5035 = vmatpush1.bf16.msra.mxu1 %v3190_v55  ;;  %v10864_v27 = vld [vmem:[%s16647_s3 + $0x1c0] ss:$16 sps:$4 sm:$0xff]  }
 0xa19   : > { %4956 = vmatprep.subr.bf16.mxu0 %v3335_v43  ;;  %v3260_v22 = vpop.permute.xlu1 %3259  ;;  %v10866_v43 = vld [vmem:[%s16647_s3 + $0x1c8] ss:$16 sps:$4 sm:$0xff]  }
 0xa1a   : > { %v3264_v24 = vsel %vm531_vm0, %v13281_v31, %v3260_v22  ;;  %v3481_v31 = vsel %vm738_vm1, %v13302_v47, %v3475_v46  ;;  %v3625_v52 = vpop.permute.xlu0 %3624  ;;  %v3482_v47 = vsel %vm738_vm1, %v3475_v46, %v13306_v51  ;;  %v10868_v22 = vld [vmem:[%s16647_s3 + $0x1c4] ss:$16 sps:$4 sm:$0xff]  }
 0xa1b   : > { %5036 = vmatprep.subr.bf16.mxu1 %v3264_v24  ;;  %v10869_v24 = vld [vmem:[%s16647_s3 + $0x1cc] ss:$16 sps:$4 sm:$0xff]  }
 0xa1c   : > { %4957 = vmatpush1.bf16.msra.mxu0 %v3334_v7  ;;  %5037 = vmatpush1.bf16.msra.mxu1 %v3263_v16 }
 0xa1d   : > { %5038 = vmatprep.subr.bf16.mxu1 %v3337_v21  ;;  %v3402_v0 = vpop.permute.xlu1 %3401 }
 0xa1e   : > { %v3408_v39 = vsel %vm814_vm3, %v13288_v45, %v3402_v0  ;;  %v3409_v44 = vsel %vm814_vm3, %v3402_v0, %v13290_v57  ;;  %v3483_v45 = vsel %vm738_vm1, %v13306_v51, %v3479_v3  ;;  %v3767_v35 = vpop.permute.xlu0 %3766  ;;  %v3629_v51 = vsel %vm1366_vm14, %v13310_v53, %v3625_v52 }
 0xa1f   : > { %4958 = vmatprep.subr.bf16.mxu0 %v3408_v39 }
 0xa20   : > { %4959 = vmatpush1.bf16.msra.mxu0 %v3407_v36  ;;  %5039 = vmatpush1.bf16.msra.mxu1 %v3336_v19 }
 0xa21   : > { %4960 = vmatprep.subr.bf16.mxu0 %v3481_v31  ;;  %v3406_v63 = vpop.permute.xlu1 %3405 }
 0xa22   : > { %v3410_v58 = vsel %vm814_vm3, %v13290_v57, %v3406_v63  ;;  %v3627_v57 = vsel %vm1366_vm14, %v13308_v4, %v3621_v1  ;;  %v3628_v4 = vsel %vm1366_vm14, %v3621_v1, %v13310_v53  ;;  %v3771_v30 = vpop.permute.xlu0 %3770 }
 0xa23   : > { %5040 = vmatprep.subr.bf16.mxu1 %v3410_v58 }
 0xa24   : > { %4961 = vmatpush1.bf16.msra.mxu0 %v3480_v8  ;;  %5041 = vmatpush1.bf16.msra.mxu1 %v3409_v44 }
 0xa25   : > { %5042 = vmatprep.subr.bf16.mxu1 %v3483_v45  ;;  %v3548_v61 = vpop.permute.xlu1 %3547 }
 0xa26   : > { %v3554_v56 = vsel %vm662_vm2, %v13292_v48, %v3548_v61  ;;  %v3555_v48 = vsel %vm662_vm2, %v3548_v61, %v13296_v28  ;;  %v3812_v13 = vpop.permute.xlu0 %3811 }
 0xa27   : > { %4962 = vmatprep.subr.bf16.mxu0 %v3554_v56 }
 0xa28   : > { %4963 = vmatpush1.bf16.msra.mxu0 %v3553_v41  ;;  %5043 = vmatpush1.bf16.msra.mxu1 %v3482_v47  ;;  %v10870_v47 = vld [vmem:[%s16647_s3 + $0x1e4] ss:$16 sps:$4 sm:$0xff]  }
 0xa29   : > { %4964 = vmatprep.subr.bf16.mxu0 %v3627_v57  ;;  %v3552_v23 = vpop.permute.xlu1 %3551  ;;  %v10872_v57 = vld [vmem:[%s16647_s3 + $0x1e0] ss:$16 sps:$4 sm:$0xff]  }
 0xa2a   : > { %v3556_v62 = vsel %vm662_vm2, %v13296_v28, %v3552_v23  ;;  %v3773_v28 = vsel %vm16755_vm9, %v13312_v11, %v3767_v35  ;;  %v3816_v49 = vpop.permute.xlu0 %3815  ;;  %v10873_v23 = vld [vmem:[%s16647_s3 + $0x1ec] ss:$16 sps:$4 sm:$0xff]  }
 0xa2b   : > { %5044 = vmatprep.subr.bf16.mxu1 %v3556_v62  ;;  %v3829_v55 = vmul.bf16 %v3816_v49, %v13163_v10  ;;  %v10875_v62 = vld [vmem:[%s16647_s3 + $0x1e8] ss:$16 sps:$4 sm:$0xff]  }
 0xa2c   : > { %4965 = vmatpush1.bf16.msra.mxu0 %v3626_v14  ;;  %5045 = vmatpush1.bf16.msra.mxu1 %v3555_v48  ;;  %v10879_v14 = vld [vmem:[%s16647_s3 + $0x20c] ss:$16 sps:$4 sm:$0xff]   ;;  %v10881_v48 = vld [vmem:[%s16647_s3 + $0x208] ss:$16 sps:$4 sm:$0xff]  }
 0xa2d   : > { %5046 = vmatprep.subr.bf16.mxu1 %v3629_v51  ;;  %v3694_v2 = vpop.permute.xlu1 %3693  ;;  %v10882_v51 = vld [vmem:[%s16647_s3 + $0x224] ss:$16 sps:$4 sm:$0xff]  }
 0xa2e   : > { %v3700_v32 = vsel %vm1442_vm15, %v13300_v50, %v3694_v2  ;;  %v3701_v29 = vsel %vm1442_vm15, %v3694_v2, %v13304_v18  ;;  %v10884_v2 = vld [vmem:[%s16647_s3 + $0x220] ss:$16 sps:$4 sm:$0xff]  }
 0xa2f   : > { %4966 = vmatprep.subr.bf16.mxu0 %v3700_v32  ;;  %v10885_v32 = vld [vmem:[%s16647_s3 + $0x22c] ss:$16 sps:$4 sm:$0xff]  }
 0xa30   : > { %4967 = vmatpush1.bf16.msra.mxu0 %v3699_v17  ;;  %5047 = vmatpush1.bf16.msra.mxu1 %v3628_v4  ;;  %v10887_v17 = vld [vmem:[%s16647_s3 + $0x228] ss:$16 sps:$4 sm:$0xff]   ;;  %v10888_v4 = vld [vmem:[%s16647_s3 + $0x244] ss:$16 sps:$4 sm:$0xff]  }
 0xa31   : > { %4968 = vmatprep.subr.bf16.mxu0 %v3773_v28  ;;  %v3698_v60 = vpop.permute.xlu1 %3697  ;;  %v10890_v28 = vld [vmem:[%s16647_s3 + $0x240] ss:$16 sps:$4 sm:$0xff]  }
 0xa32   : > { %v3702_v33 = vsel %vm1442_vm15, %v13304_v18, %v3698_v60  ;;  %v10893_v60 = vld [vmem:[%s16647_s3 + $0x248] ss:$16 sps:$4 sm:$0xff]  }
 0xa33   : > { %5048 = vmatprep.subr.bf16.mxu1 %v3702_v33  ;;  %v10894_v33 = vld [vmem:[%s16647_s3 + $0x264] ss:$16 sps:$4 sm:$0xff]  }
 0xa34   : > { %4969 = vmatpush1.bf16.msra.mxu0 %v3772_v54  ;;  %5049 = vmatpush1.bf16.msra.mxu1 %v3701_v29  ;;  %v10896_v54 = vld [vmem:[%s16647_s3 + $0x260] ss:$16 sps:$4 sm:$0xff]   ;;  %v10897_v29 = vld [vmem:[%s16647_s3 + $0x26c] ss:$16 sps:$4 sm:$0xff]  }
 0xa35   : > { %v3769_v50 = vpop.permute.xlu1 %3768 }
 0xa36   : > { %v3775_v53 = vsel %vm16757_vm13, %v3769_v50, %v3771_v30  ;;  %v3774_v15 = vsel %vm16755_vm9, %v3767_v35, %v3769_v50  ;;  %vm16761_vm13 = vmmov %vm16758_vm5  ;;  %v10876_v35 = vld [vmem:[%s16647_s3 + $0x204] ss:$16 sps:$4 sm:$0xff]   ;;  %v10891_v30 = vld [vmem:[%s16647_s3 + $0x24c] ss:$16 sps:$4 sm:$0xff]  }
 0xa37   : > { %5050 = vmatprep.subr.bf16.mxu1 %v3775_v53  ;;  %v10899_v50 = vld [vmem:[%s16647_s3 + $0x268] ss:$16 sps:$4 sm:$0xff]   ;;  %v10900_v53 = vld [vmem:[%s16647_s3 + $0x284] ss:$16 sps:$4 sm:$0xff]  }
 0xa38   : > { %5051 = vmatpush1.bf16.msra.mxu1 %v3774_v15  ;;  %v10902_v15 = vld [vmem:[%s16647_s3 + $0x280] ss:$16 sps:$4 sm:$0xff]  }
 0xa39   : > { %v3810_v9 = vpop.permute.xlu1 %3809 }
 0xa3a   : > { %v3817_v42 = vsel %vm16758_vm5, %v3810_v9, %v3812_v13  ;;  %v3825_v26 = vmul.bf16 0, %v3810_v9  ;;  %vm16762_vm5 = vcmask 7168   ;;  %v10905_v9 = vld [vmem:[%s16647_s3 + $0x288] ss:$16 sps:$4 sm:$0xff]  }
 0xa3b   : > { %v3826_v34 = vmul.bf16 %v3817_v42, %v13028_v6  ;;  %vm16763_vm9 = vmmov %vm16762_vm5  ;;  %v10906_v42 = vld [vmem:[%s16647_s3 + $0x2a4] ss:$16 sps:$4 sm:$0xff]  }
 0xa3c   : > { %3835 = vrot.lane.b32.xlu1 %v3825_v26, %s16759_s0  ;;  %v10908_v26 = vld [vmem:[%s16647_s3 + $0x2a0] ss:$16 sps:$4 sm:$0xff]  }
 0xa3d   : > { %3837 = vrot.lane.b32.xlu0 %v3826_v34, %s16759_s0  ;;  %v3814_v18 = vpop.permute.xlu1 %3813  ;;  %v10909_v34 = vld [vmem:[%s16647_s3 + $0x2ac] ss:$16 sps:$4 sm:$0xff]  }
 0xa3e   : > { %v3818_v11 = vsel %vm16760_vm12, %v3812_v13, %v3814_v18  ;;  %v3819_v46 = vsel %vm16761_vm13, %v3814_v18, %v3816_v49  ;;  %vm16764_vm12 = vmmov %vm16762_vm5  ;;  %v10903_v13 = vld [vmem:[%s16647_s3 + $0x28c] ss:$16 sps:$4 sm:$0xff]   ;;  %v10911_v49 = vld [vmem:[%s16647_s3 + $0x2a8] ss:$16 sps:$4 sm:$0xff]  }
 0xa3f   : > { %v3827_v12 = vmul.bf16 %v3818_v11, %v13155_v38  ;;  %v3828_v59 = vmul.bf16 %v3819_v46, %v13040_v25  ;;  %vm16765_vm13 = vmmov %vm16762_vm5  ;;  %v10912_v18 = vld [vmem:[%s16647_s3 + $0x2c4] ss:$16 sps:$4 sm:$0xff]   ;;  %v10914_v11 = vld [vmem:[%s16647_s3 + $0x2c0] ss:$16 sps:$4 sm:$0xff]  }
 0xa40   : > { %v10915_v46 = vld [vmem:[%s16647_s3 + $0x2cc] ss:$16 sps:$4 sm:$0xff]  }
 0xa41   : > { %3841 = vrot.lane.b32.xlu0 %v3828_v59, %s16759_s0  ;;  %3839 = vrot.lane.b32.xlu1 %v3827_v12, %s16759_s0  ;;  %v10917_v12 = vld [vmem:[%s16647_s3 + $0x2c8] ss:$16 sps:$4 sm:$0xff]   ;;  %v10918_v59 = vld [vmem:[%s16647_s3 + $0x2e4] ss:$16 sps:$4 sm:$0xff]  }
 0xa45   : > { %3890 = vrot.lane.b32.xlu0 %v10864_v27, %s16759_s0  ;;  %3843 = vrot.lane.b32.xlu1 %v3829_v55, %s16759_s0  ;;  %v10920_v27 = vld [vmem:[%s16647_s3 + $0x2e0] ss:$16 sps:$4 sm:$0xff]   ;;  %v10921_v55 = vld [vmem:[%s16647_s3 + $0x2ec] ss:$16 sps:$4 sm:$0xff]  }
 0xa49   : > { %3894 = vrot.lane.b32.xlu0 %v10866_v43, %s16759_s0  ;;  %3892 = vrot.lane.b32.xlu1 %v10868_v22, %s16759_s0  ;;  %v10923_v43 = vld [vmem:[%s16647_s3 + $0x2e8] ss:$16 sps:$4 sm:$0xff]   ;;  %v10924_v22 = vld [vmem:[%s16647_s3 + $0x304] ss:$16 sps:$4 sm:$0xff]  }
 0xa4d   : > { %3896 = vrot.lane.b32.xlu1 %v10869_v24, %s16759_s0  ;;  %v10926_v24 = vld [vmem:[%s16647_s3 + $0x300] ss:$16 sps:$4 sm:$0xff]  }
 0xaae   : > { %v3836_v3 = vpop.permute.xlu1 %3835 }
 0xaaf   : > { %v3838_v7 = vpop.permute.xlu0 %3837 }
 0xab0   : > { %v3845_v39 = vsel %vm16763_vm9, %v3836_v3, %v3838_v7  ;;  %vm16766_vm9 = vmmov %vm16762_vm5  ;;  %v10927_v3 = vld [vmem:[%s16647_s3 + $0x30c] ss:$16 sps:$4 sm:$0xff]  }
 0xab3   : > { %v3842_v16 = vpop.permute.xlu0 %3841  ;;  %v3840_v21 = vpop.permute.xlu1 %3839 }
 0xab4   : > { %v3846_v0 = vsel %vm16762_vm5, %v3838_v7, %v3840_v21  ;;  %v3847_v63 = vsel %vm16765_vm13, %v3840_v21, %v3842_v16  ;;  %v10929_v7 = vld [vmem:[%s16647_s3 + $0x308] ss:$16 sps:$4 sm:$0xff]   ;;  %v10932_v21 = vld [vmem:[%s16647_s3 + $0x320] ss:$16 sps:$4 sm:$0xff]   ;;  %vm16768_vm13 = vcmask 1039360  }
 0xab5   : > { %4970 = vmatprep.subr.bf16.mxu0 %v3846_v0  ;;  %v10933_v0 = vld [vmem:[%s16647_s3 + $0x32c] ss:$16 sps:$4 sm:$0xff]  }
 0xab6   : > { %4971 = vmatpush1.bf16.msra.mxu0 %v3845_v39  ;;  %v10935_v39 = vld [vmem:[%s16647_s3 + $0x328] ss:$16 sps:$4 sm:$0xff]  }
 0xab7   : > { %v3891_v36 = vpop.permute.xlu0 %3890  ;;  %4972 = vmatprep.subr.bf16.mxu0 %v13155_v38  ;;  %v3844_v19 = vpop.permute.xlu1 %3843 }
 0xab8   : > { %v3906_v31 = vmul.bf16 %v3891_v36, %v13028_v6  ;;  %v3848_v1 = vsel %vm16764_vm12, %v3842_v16, %v3844_v19  ;;  %vm16767_vm12 = vmmov %vm16762_vm5  ;;  %v10930_v16 = vld [vmem:[%s16647_s3 + $0x324] ss:$16 sps:$4 sm:$0xff]   ;;  %v10938_v19 = vld [vmem:[%s16647_s3 + $0x340] ss:$16 sps:$4 sm:$0xff]  }
 0xab9   : > { %5052 = vmatprep.subr.bf16.mxu1 %v3848_v1  ;;  %v10941_v1 = vld [vmem:[%s16647_s3 + $0x348] ss:$16 sps:$4 sm:$0xff]  }
 0xaba   : > { %3916 = vrot.lane.b32.xlu0 %v3906_v31, %s16726_s15  ;;  %4973 = vmatpush1.bf16.msra.mxu0 %v13028_v6  ;;  %v10939_v31 = vld [vmem:[%s16647_s3 + $0x34c] ss:$16 sps:$4 sm:$0xff]  }
 0xabb   : > { %5053 = vmatpush1.bf16.msra.mxu1 %v3847_v63  ;;  %v3895_v58 = vpop.permute.xlu0 %3894  ;;  %v3893_v40 = vpop.permute.xlu1 %3892 }
 0xabc   : > { %5054 = vmatprep.subr.bf16.mxu1 %v13163_v10  ;;  %v3898_v8 = vsel %vm16762_vm5, %v3891_v36, %v3893_v40  ;;  %v3899_v44 = vsel %vm16766_vm9, %v3893_v40, %v3895_v58  ;;  %v10936_v36 = vld [vmem:[%s16647_s3 + $0x344] ss:$16 sps:$4 sm:$0xff]   ;;  %vm16769_vm5 = vmmov %vm16768_vm13 }
 0xabd   : > { %v3907_v45 = vmul.bf16 %v3898_v8, %v13155_v38  ;;  %v3908_v61 = vmul.bf16 %v3899_v44, %v13040_v25  ;;  %vm16770_vm9 = vmmov %vm16769_vm5 }
 0xabf   : > { %5055 = vmatpush1.bf16.msra.mxu1 %v13040_v25  ;;  %3920 = vrot.lane.b32.xlu0 %v3908_v61, %s16726_s15  ;;  %v3897_v56 = vpop.permute.xlu1 %3896 }
 0xac0   : > { %3918 = vrot.lane.b32.xlu1 %v3907_v45, %s16726_s15  ;;  %v3900_v52 = vsel %vm16767_vm12, %v3895_v58, %v3897_v56  ;;  %v3910_v37 = vmul.bf16 0, %v3897_v56  ;;  %vm16771_vm12 = vmmov %vm16769_vm5 }
 0xac1   : > { %v3909_v41 = vmul.bf16 %v3900_v52, %v13163_v10 }
 0xac3   : > { %3924 = vrot.lane.b32.xlu0 %v3910_v37, %s16726_s15 }
 0xac4   : > { %3922 = vrot.lane.b32.xlu1 %v3909_v41, %s16726_s15 }
 0xac7   : > { %3965 = vrot.lane.b32.xlu0 %v10870_v47, %s16724_s25 }
 0xac8   : > { %3963 = vrot.lane.b32.xlu1 %v10872_v57, %s16724_s25 }
 0xacb   : > { %3969 = vrot.lane.b32.xlu0 %v10873_v23, %s16724_s25 }
 0xacc   : > { %3967 = vrot.lane.b32.xlu1 %v10875_v62, %s16724_s25 }
 0xacf   : > { %4038 = vrot.lane.b32.xlu0 %v10876_v35, %s16725_s14 }
 0xad0   : > { %4036 = vrot.lane.b32.xlu1 %v10878_v20, %s16725_s14 }
 0xad3   : > { %4042 = vrot.lane.b32.xlu0 %v10879_v14, %s16725_s14 }
 0xad4   : > { %4040 = vrot.lane.b32.xlu1 %v10881_v48, %s16725_s14 }
 0xad7   : > { %4111 = vrot.lane.b32.xlu0 %v10882_v51, %s16723_s19  ;;  %v13660_v51 = vld [vmem:[%s16650_s6] sm:$0xff] }
 0xad8   : > { %4109 = vrot.lane.b32.xlu1 %v10884_v2, %s16723_s19 }
 0xadb   : > { %4115 = vrot.lane.b32.xlu0 %v10885_v32, %s16723_s19  ;;  %v10086_v32 = vcombine.high %v13660_v51, %v13660_v51 }
 0xadc   : > { %4113 = vrot.lane.b32.xlu1 %v10887_v17, %s16723_s19 }
 0xadd   : > { %5060 = vmatprep.mubr.bf16.mxu1 %v10086_v32  ;;  %4978 = vmatprep.mubr.bf16.mxu0 %v10086_v32 }
 0xadf   : > { %4184 = vrot.lane.b32.xlu0 %v10888_v4, %s16719_s28 }
 0xae0   : > { %4182 = vrot.lane.b32.xlu1 %v10890_v28, %s16719_s28 }
 0xae3   : > { %4188 = vrot.lane.b32.xlu0 %v10891_v30, %s16719_s28 }
 0xae4   : > { %4186 = vrot.lane.b32.xlu1 %v10893_v60, %s16719_s28 }
 0xae7   : > { %4257 = vrot.lane.b32.xlu0 %v10894_v33, %s16718_s23 }
 0xae8   : > { %4255 = vrot.lane.b32.xlu1 %v10896_v54, %s16718_s23 }
 0xaeb   : > { %4261 = vrot.lane.b32.xlu0 %v10897_v29, %s16718_s23 }
 0xaec   : > { %4259 = vrot.lane.b32.xlu1 %v10899_v50, %s16718_s23 }
 0xaef   : > { %4330 = vrot.lane.b32.xlu0 %v10900_v53, %s16717_s16 }
 0xaf0   : > { %4328 = vrot.lane.b32.xlu1 %v10902_v15, %s16717_s16 }
 0xaf3   : > { %4334 = vrot.lane.b32.xlu0 %v10903_v13, %s16717_s16 }
 0xaf4   : > { %4332 = vrot.lane.b32.xlu1 %v10905_v9, %s16717_s16 }
 0xaf7   : > { %4403 = vrot.lane.b32.xlu0 %v10906_v42, %s16721_s24 }
 0xaf8   : > { %4401 = vrot.lane.b32.xlu1 %v10908_v26, %s16721_s24 }
 0xafb   : > { %4407 = vrot.lane.b32.xlu0 %v10909_v34, %s16721_s24 }
 0xafc   : > { %4405 = vrot.lane.b32.xlu1 %v10911_v49, %s16721_s24 }
 0xaff   : > { %4476 = vrot.lane.b32.xlu0 %v10912_v18, %s16722_s29 }
 0xb00   : > { %4474 = vrot.lane.b32.xlu1 %v10914_v11, %s16722_s29 }
 0xb03   : > { %4480 = vrot.lane.b32.xlu0 %v10915_v46, %s16722_s29 }
 0xb04   : > { %4478 = vrot.lane.b32.xlu1 %v10917_v12, %s16722_s29 }
 0xb07   : > { %4549 = vrot.lane.b32.xlu0 %v10918_v59, %s16734_s11 }
 0xb08   : > { %4547 = vrot.lane.b32.xlu1 %v10920_v27, %s16734_s11 }
 0xb0b   : > { %4553 = vrot.lane.b32.xlu0 %v10921_v55, %s16734_s11 }
 0xb0c   : > { %4551 = vrot.lane.b32.xlu1 %v10923_v43, %s16734_s11 }
 0xb0f   : > { %4622 = vrot.lane.b32.xlu0 %v10924_v22, %s16733_s13 }
 0xb10   : > { %4620 = vrot.lane.b32.xlu1 %v10926_v24, %s16733_s13 }
 0xb13   : > { %4626 = vrot.lane.b32.xlu0 %v10927_v3, %s16733_s13 }
 0xb14   : > { %4624 = vrot.lane.b32.xlu1 %v10929_v7, %s16733_s13 }
 0xb17   : > { %4695 = vrot.lane.b32.xlu0 %v10930_v16, %s16732_s12 }
 0xb18   : > { %4693 = vrot.lane.b32.xlu1 %v10932_v21, %s16732_s12 }
 0xb1b   : > { %4699 = vrot.lane.b32.xlu0 %v10933_v0, %s16732_s12 }
 0xb1c   : > { %4697 = vrot.lane.b32.xlu1 %v10935_v39, %s16732_s12 }
 0xb1f   : > { %4768 = vrot.lane.b32.xlu0 %v10936_v36, %s16731_s20 }
 0xb20   : > { %4766 = vrot.lane.b32.xlu1 %v10938_v19, %s16731_s20 }
 0xb23   : > { %4772 = vrot.lane.b32.xlu0 %v10939_v31, %s16731_s20 }
 0xb24   : > { %4770 = vrot.lane.b32.xlu1 %v10941_v1, %s16731_s20 }
 0xb2c   : > { %v3917_v63 = vpop.permute.xlu0 %3916 }
 0xb31   : > { %v3921_v58 = vpop.permute.xlu0 %3920 }
 0xb32   : > { %v3919_v40 = vpop.permute.xlu1 %3918 }
 0xb33   : > { %v3927_v8 = vsel %vm16768_vm13, %v3919_v40, %v3921_v58  ;;  %v3926_v44 = vsel %vm16769_vm5, %v3917_v63, %v3919_v40  ;;  %vm16773_vm13 = vmmov %vm16772_vm10 }
 0xb34   : > { %4974 = vmatprep.subr.bf16.mxu0 %v3927_v8  ;;  %vm16774_vm5 = vmmov %vm16772_vm10 }
 0xb35   : > { %4975 = vmatpush1.bf16.msra.mxu0 %v3926_v44  ;;  %v3925_v45 = vpop.permute.xlu0 %3924 }
 0xb36   : > { %v3923_v61 = vpop.permute.xlu1 %3922 }
 0xb37   : > { %v3929_v56 = vsel %vm16770_vm9, %v3923_v61, %v3925_v45  ;;  %v3928_v52 = vsel %vm16771_vm12, %v3921_v58, %v3923_v61 }
 0xb38   : > { %5056 = vmatprep.subr.bf16.mxu1 %v3929_v56 }
 0xb39   : > { %5057 = vmatpush1.bf16.msra.mxu1 %v3928_v52  ;;  %v3966_v37 = vpop.permute.xlu0 %3965 }
 0xb3a   : > { %v3964_v41 = vpop.permute.xlu1 %3963 }
 0xb3b   : > { %v3971_v47 = vsel %vm16772_vm10, %v3964_v41, %v3966_v37  ;;  %v3979_v28 = vmul.bf16 %v3964_v41, %v13028_v6  ;;  %vm16775_vm10 = vcmask 531456  }
 0xb3c   : > { %v3980_v57 = vmul.bf16 %v3971_v47, %v13155_v38  ;;  %vm16776_vm9 = vmmov %vm16775_vm10 }
 0xb3d   : > { %v3970_v23 = vpop.permute.xlu0 %3969  ;;  %vm16777_vm12 = vmmov %vm16776_vm9 }
 0xb3e   : > { %3991 = vrot.lane.b32.xlu1 %v3980_v57, %s16727_s17  ;;  %v3968_v62 = vpop.permute.xlu1 %3967  ;;  %v3983_v17 = vmul.bf16 0, %v3970_v23 }
 0xb3f   : > { %v3972_v35 = vsel %vm16773_vm13, %v3966_v37, %v3968_v62  ;;  %v3973_v20 = vsel %vm16774_vm5, %v3968_v62, %v3970_v23  ;;  %vm16778_vm13 = vcmask 982016   ;;  %vm16779_vm5 = vcmask 392192  }
 0xb40   : > { %v3981_v14 = vmul.bf16 %v3972_v35, %v13040_v25  ;;  %v3982_v48 = vmul.bf16 %v3973_v20, %v13163_v10 }
 0xb41   : > { %v4039_v2 = vpop.permute.xlu0 %4038 }
 0xb42   : > { %3995 = vrot.lane.b32.xlu1 %v3982_v48, %s16727_s17  ;;  %3993 = vrot.lane.b32.xlu0 %v3981_v14, %s16727_s17  ;;  %v4037_v4 = vpop.permute.xlu1 %4036 }
 0xb43   : > { %v4044_v30 = vsel %vm1442_vm15, %v4037_v4, %v4039_v2  ;;  %v4052_v18 = vmul.bf16 %v4037_v4, %v13028_v6 }
 0xb44   : > { %v4053_v29 = vmul.bf16 %v4044_v30, %v13155_v38 }
 0xb45   : > { %v4043_v60 = vpop.permute.xlu0 %4042 }
 0xb46   : > { %3989 = vrot.lane.b32.xlu1 %v3979_v28, %s16727_s17  ;;  %3997 = vrot.lane.b32.xlu0 %v3983_v17, %s16727_s17  ;;  %v4041_v33 = vpop.permute.xlu1 %4040  ;;  %v4056_v13 = vmul.bf16 0, %v4043_v60 }
 0xb47   : > { %v4045_v54 = vsel %vm1442_vm15, %v4039_v2, %v4041_v33  ;;  %v4046_v53 = vsel %vm1442_vm15, %v4041_v33, %v4043_v60 }
 0xb48   : > { %v4054_v50 = vmul.bf16 %v4045_v54, %v13040_v25  ;;  %v4055_v42 = vmul.bf16 %v4046_v53, %v13163_v10 }
 0xb49   : > { %v4112_v15 = vpop.permute.xlu0 %4111 }
 0xb4a   : > { %4064 = vrot.lane.b32.xlu0 %v4053_v29, %s16729_s1  ;;  %4066 = vrot.lane.b32.xlu1 %v4054_v50, %s16729_s1  ;;  %v4110_v9 = vpop.permute.xlu1 %4109 }
 0xb4b   : > { %v4117_v26 = vsel %vm1366_vm14, %v4110_v9, %v4112_v15  ;;  %v4125_v7 = vmul.bf16 %v4110_v9, %v13028_v6 }
 0xb4c   : > { %v4126_v11 = vmul.bf16 %v4117_v26, %v13155_v38 }
 0xb4d   : > { %v4116_v34 = vpop.permute.xlu0 %4115 }
 0xb4e   : > { %4068 = vrot.lane.b32.xlu0 %v4055_v42, %s16729_s1  ;;  %4070 = vrot.lane.b32.xlu1 %v4056_v13, %s16729_s1  ;;  %v4114_v49 = vpop.permute.xlu1 %4113  ;;  %v4129_v24 = vmul.bf16 0, %v4116_v34 }
 0xb4f   : > { %v4118_v46 = vsel %vm1366_vm14, %v4112_v15, %v4114_v49  ;;  %v4119_v12 = vsel %vm1366_vm14, %v4114_v49, %v4116_v34 }
 0xb50   : > { %v4127_v55 = vmul.bf16 %v4118_v46, %v13040_v25  ;;  %v4128_v43 = vmul.bf16 %v4119_v12, %v13163_v10 }
 0xb51   : > { %v4185_v59 = vpop.permute.xlu0 %4184 }
 0xb52   : > { %4062 = vrot.lane.b32.xlu0 %v4052_v18, %s16729_s1  ;;  %4137 = vrot.lane.b32.xlu1 %v4126_v11, %s16730_s2  ;;  %v4183_v27 = vpop.permute.xlu1 %4182 }
 0xb53   : > { %v4190_v16 = vsel %vm662_vm2, %v4183_v27, %v4185_v59  ;;  %v4198_v61 = vmul.bf16 %v4183_v27, %v13028_v6 }
 0xb54   : > { %v4199_v36 = vmul.bf16 %v4190_v16, %v13155_v38 }
 0xb55   : > { %v4189_v22 = vpop.permute.xlu0 %4188 }
 0xb56   : > { %4141 = vrot.lane.b32.xlu1 %v4128_v43, %s16730_s2  ;;  %4139 = vrot.lane.b32.xlu0 %v4127_v55, %s16730_s2  ;;  %v4187_v3 = vpop.permute.xlu1 %4186  ;;  %v4202_v63 = vmul.bf16 0, %v4189_v22 }
 0xb57   : > { %v4191_v21 = vsel %vm662_vm2, %v4185_v59, %v4187_v3  ;;  %v4192_v31 = vsel %vm662_vm2, %v4187_v3, %v4189_v22 }
 0xb58   : > { %v4200_v19 = vmul.bf16 %v4191_v21, %v13040_v25  ;;  %v4201_v40 = vmul.bf16 %v4192_v31, %v13163_v10 }
 0xb59   : > { %v4258_v0 = vpop.permute.xlu0 %4257 }
 0xb5a   : > { %4135 = vrot.lane.b32.xlu1 %v4125_v7, %s16730_s2  ;;  %4143 = vrot.lane.b32.xlu0 %v4129_v24, %s16730_s2  ;;  %v4256_v39 = vpop.permute.xlu1 %4255 }
 0xb5b   : > { %v4263_v8 = vsel %vm738_vm1, %v4256_v39, %v4258_v0  ;;  %v4271_v14 = vmul.bf16 %v4256_v39, %v13028_v6 }
 0xb5c   : > { %v4272_v56 = vmul.bf16 %v4263_v8, %v13155_v38 }
 0xb5d   : > { %v4262_v1 = vpop.permute.xlu0 %4261 }
 0xb5e   : > { %4210 = vrot.lane.b32.xlu0 %v4199_v36, %s16731_s20  ;;  %4212 = vrot.lane.b32.xlu1 %v4200_v19, %s16731_s20  ;;  %v4260_v58 = vpop.permute.xlu1 %4259  ;;  %v4275_v35 = vmul.bf16 0, %v4262_v1 }
 0xb5f   : > { %v4264_v52 = vsel %vm738_vm1, %v4258_v0, %v4260_v58  ;;  %v4265_v37 = vsel %vm738_vm1, %v4260_v58, %v4262_v1 }
 0xb60   : > { %v4273_v57 = vmul.bf16 %v4264_v52, %v13040_v25  ;;  %v4274_v23 = vmul.bf16 %v4265_v37, %v13163_v10 }
 0xb61   : > { %v4331_v44 = vpop.permute.xlu0 %4330 }
 0xb62   : > { %4214 = vrot.lane.b32.xlu0 %v4201_v40, %s16731_s20  ;;  %4216 = vrot.lane.b32.xlu1 %v4202_v63, %s16731_s20  ;;  %v4329_v45 = vpop.permute.xlu1 %4328 }
 0xb63   : > { %v4336_v48 = vsel %vm814_vm3, %v4329_v45, %v4331_v44  ;;  %v4344_v15 = vmul.bf16 %v4329_v45, %v13028_v6 }
 0xb64   : > { %v4345_v4 = vmul.bf16 %v4336_v48, %v13155_v38 }
 0xb65   : > { %v4335_v41 = vpop.permute.xlu0 %4334 }
 0xb66   : > { %4208 = vrot.lane.b32.xlu0 %v4198_v61, %s16731_s20  ;;  %4283 = vrot.lane.b32.xlu1 %v4272_v56, %s16732_s12  ;;  %v4333_v47 = vpop.permute.xlu1 %4332  ;;  %v4348_v60 = vmul.bf16 0, %v4335_v41 }
 0xb67   : > { %v4337_v2 = vsel %vm814_vm3, %v4331_v44, %v4333_v47  ;;  %v4338_v30 = vsel %vm814_vm3, %v4333_v47, %v4335_v41 }
 0xb68   : > { %v4346_v28 = vmul.bf16 %v4337_v2, %v13040_v25  ;;  %v4347_v54 = vmul.bf16 %v4338_v30, %v13163_v10 }
 0xb69   : > { %v4404_v62 = vpop.permute.xlu0 %4403 }
 0xb6a   : > { %4287 = vrot.lane.b32.xlu1 %v4274_v23, %s16732_s12  ;;  %4285 = vrot.lane.b32.xlu0 %v4273_v57, %s16732_s12  ;;  %v4402_v20 = vpop.permute.xlu1 %4401 }
 0xb6b   : > { %v4409_v50 = vsel %vm890_vm4, %v4402_v20, %v4404_v62  ;;  %v4417_v46 = vmul.bf16 %v4402_v20, %v13028_v6 }
 0xb6c   : > { %v4418_v13 = vmul.bf16 %v4409_v50, %v13155_v38 }
 0xb6d   : > { %v4408_v32 = vpop.permute.xlu0 %4407 }
 0xb6e   : > { %4281 = vrot.lane.b32.xlu1 %v4271_v14, %s16732_s12  ;;  %4289 = vrot.lane.b32.xlu0 %v4275_v35, %s16732_s12  ;;  %v4406_v17 = vpop.permute.xlu1 %4405  ;;  %v4421_v11 = vmul.bf16 0, %v4408_v32 }
 0xb6f   : > { %v4410_v9 = vsel %vm890_vm4, %v4404_v62, %v4406_v17  ;;  %v4411_v42 = vsel %vm890_vm4, %v4406_v17, %v4408_v32 }
 0xb70   : > { %v4419_v34 = vmul.bf16 %v4410_v9, %v13040_v25  ;;  %v4420_v49 = vmul.bf16 %v4411_v42, %v13163_v10 }
 0xb71   : > { %v4477_v29 = vpop.permute.xlu0 %4476 }
 0xb72   : > { %4356 = vrot.lane.b32.xlu0 %v4345_v4, %s16733_s13  ;;  %4358 = vrot.lane.b32.xlu1 %v4346_v28, %s16733_s13  ;;  %v4475_v33 = vpop.permute.xlu1 %4474 }
 0xb73   : > { %v4482_v59 = vsel %vm531_vm0, %v4475_v33, %v4477_v29  ;;  %v4490_v39 = vmul.bf16 %v4475_v33, %v13028_v6 }
 0xb74   : > { %v4491_v43 = vmul.bf16 %v4482_v59, %v13155_v38 }
 0xb75   : > { %v4481_v26 = vpop.permute.xlu0 %4480 }
 0xb76   : > { %4360 = vrot.lane.b32.xlu0 %v4347_v54, %s16733_s13  ;;  %4362 = vrot.lane.b32.xlu1 %v4348_v60, %s16733_s13  ;;  %v4479_v53 = vpop.permute.xlu1 %4478  ;;  %v4494_v3 = vmul.bf16 0, %v4481_v26 }
 0xb77   : > { %v4483_v27 = vsel %vm531_vm0, %v4477_v29, %v4479_v53  ;;  %v4484_v24 = vsel %vm531_vm0, %v4479_v53, %v4481_v26 }
 0xb78   : > { %v4492_v22 = vmul.bf16 %v4483_v27, %v13040_v25  ;;  %v4493_v16 = vmul.bf16 %v4484_v24, %v13163_v10 }
 0xb79   : > { %v4550_v12 = vpop.permute.xlu0 %4549 }
 0xb7a   : > { %4354 = vrot.lane.b32.xlu0 %v4344_v15, %s16733_s13  ;;  %4429 = vrot.lane.b32.xlu1 %v4418_v13, %s16734_s11  ;;  %v4548_v18 = vpop.permute.xlu1 %4547 }
 0xb7b   : > { %v4555_v0 = vsel %vm16775_vm10, %v4548_v18, %v4550_v12  ;;  %v4563_v45 = vmul.bf16 %v4548_v18, %v13028_v6  ;;  %vm16780_vm10 = vmmov %vm16779_vm5 }
 0xb7c   : > { %v4564_v36 = vmul.bf16 %v4555_v0, %v13155_v38 }
 0xb7d   : > { %v4554_v7 = vpop.permute.xlu0 %4553 }
 0xb7e   : > { %4433 = vrot.lane.b32.xlu1 %v4420_v49, %s16734_s11  ;;  %4431 = vrot.lane.b32.xlu0 %v4419_v34, %s16734_s11  ;;  %v4552_v55 = vpop.permute.xlu1 %4551  ;;  %v4567_v8 = vmul.bf16 0, %v4554_v7 }
 0xb7f   : > { %v4556_v31 = vsel %vm16776_vm9, %v4550_v12, %v4552_v55  ;;  %v4557_v1 = vsel %vm16777_vm12, %v4552_v55, %v4554_v7  ;;  %v10946_v12 = vld [vmem:[%s16647_s3 + $0x4] ss:$16 sps:$4 sm:$0xff]   ;;  %v10947_v7 = vld [vmem:[%s16647_s3 + $0xc] ss:$16 sps:$4 sm:$0xff]   ;;  %vm16781_vm9 = vmmov %vm16778_vm13 }
 0xb80   : > { %v4565_v58 = vmul.bf16 %v4556_v31, %v13040_v25  ;;  %v4566_v40 = vmul.bf16 %v4557_v1, %v13163_v10  ;;  %vm16782_vm12 = vmmov %vm16781_vm9 }
 0xb81   : > { %v4623_v19 = vpop.permute.xlu0 %4622 }
 0xb82   : > { %4427 = vrot.lane.b32.xlu1 %v4417_v46, %s16734_s11  ;;  %4435 = vrot.lane.b32.xlu0 %v4421_v11, %s16734_s11  ;;  %v4621_v21 = vpop.permute.xlu1 %4620 }
 0xb83   : > { %v4628_v56 = vsel %vm843_vm6, %v4621_v21, %v4623_v19  ;;  %v4636_v48 = vmul.bf16 %v4621_v21, %v13028_v6 }
 0xb84   : > { %v4637_v37 = vmul.bf16 %v4628_v56, %v13155_v38 }
 0xb85   : > { %v4627_v44 = vpop.permute.xlu0 %4626 }
 0xb86   : > { %4502 = vrot.lane.b32.xlu0 %v4491_v43, %s16722_s29  ;;  %4504 = vrot.lane.b32.xlu1 %v4492_v22, %s16722_s29  ;;  %v4625_v63 = vpop.permute.xlu1 %4624  ;;  %v4640_v23 = vmul.bf16 0, %v4627_v44  ;;  %v13816_v43 = vld [vmem:[%s16650_s6 + $0x8] sm:$0xff] }
 0xb87   : > { %v4629_v52 = vsel %vm843_vm6, %v4623_v19, %v4625_v63  ;;  %v4630_v57 = vsel %vm843_vm6, %v4625_v63, %v4627_v44  ;;  %v10951_v22 = vld [vmem:[%s16647_s3 + $0x8] ss:$16 sps:$4 sm:$0xff]   ;;  %v10088_v0 = vcombine.high %v13816_v43, %v13816_v43 }
 0xb88   : > { %v4638_v41 = vmul.bf16 %v4629_v52, %v13040_v25  ;;  %v4639_v35 = vmul.bf16 %v4630_v57, %v13163_v10  ;;  %v10955_v63 = vld [vmem:[%s16647_s3 + $0x28] ss:$16 sps:$4 sm:$0xff]  }
 0xb89   : > { %v4696_v47 = vpop.permute.xlu0 %4695 }
 0xb8a   : > { %4506 = vrot.lane.b32.xlu0 %v4493_v16, %s16722_s29  ;;  %4508 = vrot.lane.b32.xlu1 %v4494_v3, %s16722_s29  ;;  %v4694_v61 = vpop.permute.xlu1 %4693  ;;  %v10085_v3 = vcombine.low %v13660_v51, %v13660_v51  ;;  %v10949_v51 = vld [vmem:[%s16647_s3 + $0x20] ss:$16 sps:$4 sm:$0xff]  }
 0xb8b   : > { %v4701_v20 = vsel %vm767_vm7, %v4694_v61, %v4696_v47  ;;  %v4709_v29 = vmul.bf16 %v4694_v61, %v13028_v6 }
 0xb8c   : > { %v4710_v2 = vmul.bf16 %v4701_v20, %v13155_v38 }
 0xb8d   : > { %v4700_v14 = vpop.permute.xlu0 %4699 }
 0xb8e   : > { %4500 = vrot.lane.b32.xlu0 %v4490_v39, %s16722_s29  ;;  %4575 = vrot.lane.b32.xlu1 %v4564_v36, %s16721_s24  ;;  %v4698_v62 = vpop.permute.xlu1 %4697  ;;  %v4713_v33 = vmul.bf16 0, %v4700_v14 }
 0xb8f   : > { %v4702_v17 = vsel %vm767_vm7, %v4696_v47, %v4698_v62  ;;  %v4703_v4 = vsel %vm767_vm7, %v4698_v62, %v4700_v14 }
 0xb90   : > { %v4711_v28 = vmul.bf16 %v4702_v17, %v13040_v25  ;;  %v4712_v30 = vmul.bf16 %v4703_v4, %v13163_v10 }
 0xb91   : > { %v4769_v60 = vpop.permute.xlu0 %4768 }
 0xb92   : > { %4579 = vrot.lane.b32.xlu1 %v4566_v40, %s16721_s24  ;;  %4577 = vrot.lane.b32.xlu0 %v4565_v58, %s16721_s24  ;;  %v4767_v32 = vpop.permute.xlu1 %4766 }
 0xb93   : > { %v4774_v50 = vsel %vm691_vm8, %v4767_v32, %v4769_v60 }
 0xb94   : > { %v4783_v13 = vmul.bf16 %v4774_v50, %v13155_v38  ;;  %v4924_v38 = vld [vmem:[%s16651_s7] sm:$0xff] }
 0xb95   : > { %v4773_v15 = vpop.permute.xlu0 %4772 }
 0xb96   : > { %4573 = vrot.lane.b32.xlu1 %v4563_v45, %s16721_s24  ;;  %4581 = vrot.lane.b32.xlu0 %v4567_v8, %s16721_s24  ;;  %v4771_v54 = vpop.permute.xlu1 %4770  ;;  %v4786_v26 = vmul.bf16 0, %v4773_v15 }
 0xb97   : > { %v4775_v53 = vsel %vm691_vm8, %v4769_v60, %v4771_v54  ;;  %v4776_v42 = vsel %vm691_vm8, %v4771_v54, %v4773_v15 }
 0xb98   : > { %v4784_v9 = vmul.bf16 %v4775_v53, %v13040_v25  ;;  %v4785_v34 = vmul.bf16 %v4776_v42, %v13163_v10  ;;  %v4782_v25 = vmul.bf16 %v4767_v32, %v13028_v6  ;;  %v10942_v10 = vld [vmem:[%s16647_s3] ss:$16 sps:$4 sm:$0xff]  }
 0xb9a   : > { %4648 = vrot.lane.b32.xlu0 %v4637_v37, %s16717_s16  ;;  %4650 = vrot.lane.b32.xlu1 %v4638_v41, %s16717_s16 }
 0xb9e   : > { %4652 = vrot.lane.b32.xlu0 %v4639_v35, %s16717_s16  ;;  %4654 = vrot.lane.b32.xlu1 %v4640_v23, %s16717_s16 }
 0xba2   : > { %4646 = vrot.lane.b32.xlu0 %v4636_v48, %s16717_s16  ;;  %4721 = vrot.lane.b32.xlu1 %v4710_v2, %s16718_s23 }
 0xba6   : > { %4725 = vrot.lane.b32.xlu1 %v4712_v30, %s16718_s23  ;;  %4723 = vrot.lane.b32.xlu0 %v4711_v28, %s16718_s23 }
 0xbaa   : > { %4719 = vrot.lane.b32.xlu1 %v4709_v29, %s16718_s23  ;;  %4727 = vrot.lane.b32.xlu0 %v4713_v33, %s16718_s23 }
 0xbae   : > { %4794 = vrot.lane.b32.xlu0 %v4783_v13, %s16719_s28  ;;  %4796 = vrot.lane.b32.xlu1 %v4784_v9, %s16719_s28 }
 0xbb0   : > { %v3992_v49 = vpop.permute.xlu1 %3991 }
 0xbb2   : > { %4798 = vrot.lane.b32.xlu0 %v4785_v34, %s16719_s28  ;;  %4800 = vrot.lane.b32.xlu1 %v4786_v26, %s16719_s28 }
 0xbb4   : > { %v3994_v18 = vpop.permute.xlu0 %3993  ;;  %v3996_v11 = vpop.permute.xlu1 %3995 }
 0xbb5   : > { %v4000_v46 = vsel %vm1489_vm11, %v3992_v49, %v3994_v18  ;;  %v4001_v24 = vsel %vm1489_vm11, %v3994_v18, %v3996_v11 }
 0xbb6   : > { %4792 = vrot.lane.b32.xlu0 %v4782_v25, %s16719_s28  ;;  %4927 = vperm.xlu1 %10599, %v4924_v38  }
 0xbb7   : > { %4976 = vmatprep.subr.bf16.mxu0 %v4000_v46 }
 0xbb8   : > { %v3998_v59 = vpop.permute.xlu0 %3997  ;;  %v3990_v27 = vpop.permute.xlu1 %3989 }
 0xbb9   : > { %v3999_v6 = vsel %vm1489_vm11, %v3990_v27, %v3992_v49  ;;  %v4002_v55 = vsel %vm1489_vm11, %v3996_v11, %v3998_v59 }
 0xbba   : > { %5151 = vrot.lane.b32.xlu0 %v10942_v10, %s16719_s28  ;;  %4977 = vmatpush1.bf16.msra.mxu0 %v3999_v6 }
 0xbbb   : > { %5058 = vmatprep.subr.bf16.mxu1 %v4002_v55  ;;  %5153 = vrot.lane.b32.xlu1 %v10946_v12, %s16719_s28 }
 0xbbc   : > { %5059 = vmatpush1.bf16.msra.mxu1 %v4001_v24  ;;  %v4065_v16 = vpop.permute.xlu0 %4064  ;;  %v4067_v21 = vpop.permute.xlu1 %4066 }
 0xbbd   : > { %v4073_v39 = vsel %vm16778_vm13, %v4065_v16, %v4067_v21  ;;  %4979 = vmatmul.mubr.bf16.vlgmr.msra.gmra.mrb[8].mxu0 %v10085_v3  ;;  %vm16783_vm13 = vmmov %vm16781_vm9 }
 0xbbe   : > { %4987 = vmatprep.subr.bf16.mxu0 %v4073_v39  ;;  %5155 = vrot.lane.b32.xlu0 %v10951_v22, %s16719_s28 }
 0xbbf   : > { %5061 = vmatmul.mubr.bf16.vlgmr.msra.gmra.mrb[8].mxu1 %v10085_v3  ;;  %5157 = vrot.lane.b32.xlu1 %v10947_v7, %s16719_s28 }
 0xbc0   : > { %v4069_v36 = vpop.permute.xlu0 %4068  ;;  %v4071_v19 = vpop.permute.xlu1 %4070  ;;  %10090 = vmatprep.mubr.msk.bf16.mxu1 %vm16779_vm5, %v10088_v0  ;;  %10089 = vmatprep.mubr.msk.bf16.mxu0 %vm16780_vm10, %v10088_v0  ;;  %vm16784_vm5 = vcmask 973824  }
 0xbc1   : > { %v4075_v31 = vsel %vm16781_vm9, %v4069_v36, %v4071_v19  ;;  %v4074_v1 = vsel %vm16782_vm12, %v4067_v21, %v4069_v36  ;;  %vm16785_vm10 = vmmov %vm16784_vm5 }
 0xbc2   : > { %5069 = vmatprep.subr.bf16.mxu1 %v4075_v31  ;;  %vm16786_vm9 = vmmov %vm16784_vm5 }
 0xbc3   : > { %5070 = vmatpush1.bf16.msra.mxu1 %v4074_v1  ;;  %5224 = vrot.lane.b32.xlu1 %v10949_v51, %s16718_s23  ;;  %vm16787_vm12 = vmmov %vm16784_vm5 }
 0xbc4   : > { %v4063_v58 = vpop.permute.xlu0 %4062  ;;  %v4138_v40 = vpop.permute.xlu1 %4137 }
 0xbc5   : > { %v4072_v8 = vsel %vm16783_vm13, %v4063_v58, %v4065_v16  ;;  %vm16788_vm13 = vcmask 531456  }
 0xbc6   : > { %4988 = vmatpush1.bf16.msra.mxu0 %v4072_v8 }
 0xbc7   : > { %5228 = vrot.lane.b32.xlu1 %v10955_v63, %s16718_s23 }
 0xbc8   : > { %v4140_v44 = vpop.permute.xlu0 %4139  ;;  %v4142_v45 = vpop.permute.xlu1 %4141 }
 0xbc9   : > { %v4146_v61 = vsel %vm16784_vm5, %v4138_v40, %v4140_v44  ;;  %v4147_v47 = vsel %vm16787_vm12, %v4140_v44, %v4142_v45  ;;  %vm16789_vm5 = vmmov %vm16788_vm13 }
 0xbca   : > { %4989 = vmatprep.subr.bf16.mxu0 %v4146_v61  ;;  %vm16797_vm12 = vmmov %vm16789_vm5 }
 0xbcc   : > { %v4144_v56 = vpop.permute.xlu0 %4143  ;;  %v4136_v52 = vpop.permute.xlu1 %4135 }
 0xbcd   : > { %v4145_v37 = vsel %vm16785_vm10, %v4136_v52, %v4138_v40  ;;  %v4148_v41 = vsel %vm16786_vm9, %v4142_v45, %v4144_v56  ;;  %vm16790_vm10 = vmmov %vm16789_vm5 }
 0xbce   : > { %4990 = vmatpush1.bf16.msra.mxu0 %v4145_v37  ;;  %5071 = vmatprep.subr.bf16.mxu1 %v4148_v41  ;;  %vm16791_vm9 = vmmov %vm16789_vm5 }
 0xbcf   : > { %5072 = vmatpush1.bf16.msra.mxu1 %v4147_v47 }
 0xbd0   : > { %v4211_v57 = vpop.permute.xlu0 %4210  ;;  %v4213_v23 = vpop.permute.xlu1 %4212 }
 0xbd1   : > { %v4219_v62 = vsel %vm691_vm8, %v4211_v57, %v4213_v23 }
 0xbd2   : > { %4991 = vmatprep.subr.bf16.mxu0 %v4219_v62 }
 0xbd4   : > { %v4215_v35 = vpop.permute.xlu0 %4214  ;;  %v4217_v20 = vpop.permute.xlu1 %4216 }
 0xbd5   : > { %v4221_v14 = vsel %vm691_vm8, %v4215_v35, %v4217_v20  ;;  %v4220_v48 = vsel %vm691_vm8, %v4213_v23, %v4215_v35 }
 0xbd6   : > { %5073 = vmatprep.subr.bf16.mxu1 %v4221_v14 }
 0xbd7   : > { %5074 = vmatpush1.bf16.msra.mxu1 %v4220_v48 }
 0xbd8   : > { %v4209_v2 = vpop.permute.xlu0 %4208  ;;  %v4284_v32 = vpop.permute.xlu1 %4283 }
 0xbd9   : > { %v4218_v17 = vsel %vm691_vm8, %v4209_v2, %v4211_v57 }
 0xbda   : > { %4992 = vmatpush1.bf16.msra.mxu0 %v4218_v17 }
 0xbdc   : > { %v4286_v4 = vpop.permute.xlu0 %4285  ;;  %v4288_v28 = vpop.permute.xlu1 %4287 }
 0xbdd   : > { %v4292_v30 = vsel %vm767_vm7, %v4284_v32, %v4286_v4  ;;  %v4293_v50 = vsel %vm767_vm7, %v4286_v4, %v4288_v28 }
 0xbde   : > { %4993 = vmatprep.subr.bf16.mxu0 %v4292_v30 }
 0xbe0   : > { %v4290_v60 = vpop.permute.xlu0 %4289  ;;  %v4282_v33 = vpop.permute.xlu1 %4281 }
 0xbe1   : > { %v4291_v54 = vsel %vm767_vm7, %v4282_v33, %v4284_v32  ;;  %v4294_v29 = vsel %vm767_vm7, %v4288_v28, %v4290_v60 }
 0xbe2   : > { %4994 = vmatpush1.bf16.msra.mxu0 %v4291_v54  ;;  %5075 = vmatprep.subr.bf16.mxu1 %v4294_v29 }
 0xbe3   : > { %5076 = vmatpush1.bf16.msra.mxu1 %v4293_v50  ;;  %v10087_v50 = vcombine.low %v13816_v43, %v13816_v43  ;;  %v10957_v43 = vld [vmem:[%s16647_s3 + $0x2c] ss:$16 sps:$4 sm:$0xff]  }
 0xbe4   : > { %v4357_v53 = vpop.permute.xlu0 %4356  ;;  %v4359_v15 = vpop.permute.xlu1 %4358 }
 0xbe5   : > { %v4365_v13 = vsel %vm843_vm6, %v4357_v53, %v4359_v15 }
 0xbe6   : > { %4995 = vmatprep.subr.bf16.mxu0 %v4365_v13 }
 0xbe8   : > { %v4361_v9 = vpop.permute.xlu0 %4360  ;;  %v4363_v42 = vpop.permute.xlu1 %4362 }
 0xbe9   : > { %v4367_v26 = vsel %vm843_vm6, %v4361_v9, %v4363_v42  ;;  %v4366_v34 = vsel %vm843_vm6, %v4359_v15, %v4361_v9  ;;  %v10954_v42 = vld [vmem:[%s16647_s3 + $0x24] ss:$16 sps:$4 sm:$0xff]  }
 0xbea   : > { %5077 = vmatprep.subr.bf16.mxu1 %v4367_v26 }
 0xbeb   : > { %5078 = vmatpush1.bf16.msra.mxu1 %v4366_v34  ;;  %v10958_v34 = vld [vmem:[%s16647_s3 + $0x40] ss:$16 sps:$4 sm:$0xff]  }
 0xbec   : > { %v4355_v49 = vpop.permute.xlu0 %4354  ;;  %v4430_v38 = vpop.permute.xlu1 %4429 }
 0xbed   : > { %v4364_v25 = vsel %vm843_vm6, %v4355_v49, %v4357_v53 }
 0xbee   : > { %4996 = vmatpush1.bf16.msra.mxu0 %v4364_v25 }
 0xbf0   : > { %v4432_v18 = vpop.permute.xlu0 %4431  ;;  %v4434_v11 = vpop.permute.xlu1 %4433 }
 0xbf1   : > { %v4438_v46 = vsel %vm16788_vm13, %v4430_v38, %v4432_v18  ;;  %v4439_v6 = vsel %vm16791_vm9, %v4432_v18, %v4434_v11  ;;  %vm16798_vm13 = vmmov %vm16789_vm5 }
 0xbf2   : > { %4997 = vmatprep.subr.bf16.mxu0 %v4438_v46  ;;  %v10960_v46 = vld [vmem:[%s16647_s3 + $0x44] ss:$16 sps:$4 sm:$0xff]  }
 0xbf4   : > { %v4436_v10 = vpop.permute.xlu0 %4435  ;;  %v4428_v12 = vpop.permute.xlu1 %4427 }
 0xbf5   : > { %v4437_v59 = vsel %vm16789_vm5, %v4428_v12, %v4430_v38  ;;  %v4440_v27 = vsel %vm16790_vm10, %v4434_v11, %v4436_v10  ;;  %v10965_v38 = vld [vmem:[%s16647_s3 + $0x48] ss:$16 sps:$4 sm:$0xff]   ;;  %v10961_v10 = vld [vmem:[%s16647_s3 + $0x4c] ss:$16 sps:$4 sm:$0xff]   ;;  %v10963_v12 = vld [vmem:[%s16647_s3 + $0x60] ss:$16 sps:$4 sm:$0xff]  }
 0xbf6   : > { %4998 = vmatpush1.bf16.msra.mxu0 %v4437_v59  ;;  %5079 = vmatprep.subr.bf16.mxu1 %v4440_v27  ;;  %v10967_v59 = vld [vmem:[%s16647_s3 + $0x68] ss:$16 sps:$4 sm:$0xff]   ;;  %vm16799_vm10 = vcmask 973824  }
 0xbf7   : > { %5080 = vmatpush1.bf16.msra.mxu1 %v4439_v6  ;;  %vm16800_vm9 = vmmov %vm16799_vm10 }
 0xbf8   : > { %v4503_v55 = vpop.permute.xlu0 %4502  ;;  %v4505_v22 = vpop.permute.xlu1 %4504 }
 0xbf9   : > { %v4511_v24 = vsel %vm531_vm0, %v4503_v55, %v4505_v22 }
 0xbfa   : > { %4999 = vmatprep.subr.bf16.mxu0 %v4511_v24 }
 0xbfc   : > { %v4507_v3 = vpop.permute.xlu0 %4506  ;;  %v4509_v7 = vpop.permute.xlu1 %4508 }
 0xbfd   : > { %v4513_v16 = vsel %vm531_vm0, %v4507_v3, %v4509_v7  ;;  %v4512_v21 = vsel %vm531_vm0, %v4505_v22, %v4507_v3  ;;  %v10966_v7 = vld [vmem:[%s16647_s3 + $0x64] ss:$16 sps:$4 sm:$0xff]  }
 0xbfe   : > { %5081 = vmatprep.subr.bf16.mxu1 %v4513_v16 }
 0xbff   : > { %5082 = vmatpush1.bf16.msra.mxu1 %v4512_v21  ;;  %v10969_v21 = vld [vmem:[%s16647_s3 + $0x6c] ss:$16 sps:$4 sm:$0xff]  }
 0xc00   : > { %v4501_v0 = vpop.permute.xlu0 %4500  ;;  %v4576_v39 = vpop.permute.xlu1 %4575 }
 0xc01   : > { %v4510_v51 = vsel %vm531_vm0, %v4501_v0, %v4503_v55 }
 0xc02   : > { %5000 = vmatpush1.bf16.msra.mxu0 %v4510_v51 }
 0xc04   : > { %v4578_v36 = vpop.permute.xlu0 %4577  ;;  %v4580_v19 = vpop.permute.xlu1 %4579 }
 0xc05   : > { %v4584_v31 = vsel %vm890_vm4, %v4576_v39, %v4578_v36  ;;  %v4585_v8 = vsel %vm890_vm4, %v4578_v36, %v4580_v19  ;;  %v10972_v36 = vld [vmem:[%s16647_s3 + $0x88] ss:$16 sps:$4 sm:$0xff]  }
 0xc06   : > { %5001 = vmatprep.subr.bf16.mxu0 %v4584_v31 }
 0xc08   : > { %v4582_v1 = vpop.permute.xlu0 %4581  ;;  %v4574_v63 = vpop.permute.xlu1 %4573 }
 0xc09   : > { %v4583_v58 = vsel %vm890_vm4, %v4574_v63, %v4576_v39  ;;  %v4586_v40 = vsel %vm890_vm4, %v4580_v19, %v4582_v1  ;;  %v10970_v39 = vld [vmem:[%s16647_s3 + $0x80] ss:$16 sps:$4 sm:$0xff]   ;;  %v10974_v63 = vld [vmem:[%s16647_s3 + $0x84] ss:$16 sps:$4 sm:$0xff]  }
 0xc0a   : > { %5002 = vmatpush1.bf16.msra.mxu0 %v4583_v58  ;;  %5083 = vmatprep.subr.bf16.mxu1 %v4586_v40  ;;  %v10975_v58 = vld [vmem:[%s16647_s3 + $0x8c] ss:$16 sps:$4 sm:$0xff]   ;;  %v10976_v40 = vld [vmem:[%s16647_s3 + $0xa0] ss:$16 sps:$4 sm:$0xff]  }
 0xc0b   : > { %5084 = vmatpush1.bf16.msra.mxu1 %v4585_v8  ;;  %v10979_v8 = vld [vmem:[%s16647_s3 + $0xa8] ss:$16 sps:$4 sm:$0xff]  }
 0xc0c   : > { %v4649_v44 = vpop.permute.xlu0 %4648  ;;  %v4651_v45 = vpop.permute.xlu1 %4650 }
 0xc0d   : > { %v4657_v61 = vsel %vm814_vm3, %v4649_v44, %v4651_v45 }
 0xc0e   : > { %5003 = vmatprep.subr.bf16.mxu0 %v4657_v61  ;;  %v16793_v61 = vld [vmem:[#allocation7_spill] sm:$0xff] }
 0xc10   : > { %v4653_v56 = vpop.permute.xlu0 %4652  ;;  %v4655_v52 = vpop.permute.xlu1 %4654 }
 0xc11   : > { %v4659_v37 = vsel %vm814_vm3, %v4653_v56, %v4655_v52  ;;  %v4658_v41 = vsel %vm814_vm3, %v4651_v45, %v4653_v56  ;;  %v16792_v45 = vld [vmem:[#allocation6_spill] sm:$0xff] }
 0xc12   : > { %5085 = vmatprep.subr.bf16.mxu1 %v4659_v37  ;;  %v10521_v56 = vadd.f32 %v16793_v61, %v16792_v45  ;;  %v10990_v61 = vld [vmem:[%s16647_s3 + $0xe4] ss:$16 sps:$4 sm:$0xff]  }
 0xc13   : > { %5086 = vmatpush1.bf16.msra.mxu1 %v4658_v41  ;;  %v16794_v41 = vld [vmem:[#allocation8_spill] sm:$0xff] }
 0xc14   : > { %v4647_v47 = vpop.permute.xlu0 %4646  ;;  %v4722_v57 = vpop.permute.xlu1 %4721 }
 0xc15   : > { %v4656_v23 = vsel %vm814_vm3, %v4647_v47, %v4649_v44  ;;  %v10522_v47 = vadd.f32 %v16794_v41, %v16792_v45  ;;  %v10994_v41 = vld [vmem:[%s16647_s3 + $0x100] ss:$16 sps:$4 sm:$0xff]  }
 0xc16   : > { %5004 = vmatpush1.bf16.msra.mxu0 %v4656_v23 }
 0xc18   : > { %v4724_v62 = vpop.permute.xlu0 %4723  ;;  %v4726_v35 = vpop.permute.xlu1 %4725 }
 0xc19   : > { %v4730_v20 = vsel %vm738_vm1, %v4722_v57, %v4724_v62  ;;  %v4731_v17 = vsel %vm738_vm1, %v4724_v62, %v4726_v35 }
 0xc1a   : > { %5005 = vmatprep.subr.bf16.mxu0 %v4730_v20 }
 0xc1c   : > { %v4728_v14 = vpop.permute.xlu0 %4727  ;;  %v4720_v48 = vpop.permute.xlu1 %4719 }
 0xc1d   : > { %v4729_v2 = vsel %vm738_vm1, %v4720_v48, %v4722_v57  ;;  %v4732_v32 = vsel %vm738_vm1, %v4726_v35, %v4728_v14  ;;  %v16795_v14 = vld [vmem:[#allocation9_spill] sm:$0xff] }
 0xc1e   : > { %5006 = vmatpush1.bf16.msra.mxu0 %v4729_v2  ;;  %5087 = vmatprep.subr.bf16.mxu1 %v4732_v32  ;;  %v10517_v48 = vadd.f32 %v16795_v14, %v16792_v45 }
 0xc1f   : > { %5088 = vmatpush1.bf16.msra.mxu1 %v4731_v17 }
 0xc20   : > { %v4795_v4 = vpop.permute.xlu0 %4794  ;;  %v4797_v28 = vpop.permute.xlu1 %4796 }
 0xc21   : > { %v4803_v30 = vsel %vm662_vm2, %v4795_v4, %v4797_v28 }
 0xc22   : > { %5007 = vmatprep.subr.bf16.mxu0 %v4803_v30 }
 0xc24   : > { %v4799_v60 = vpop.permute.xlu0 %4798  ;;  %v4801_v33 = vpop.permute.xlu1 %4800 }
 0xc25   : > { %v4805_v54 = vsel %vm662_vm2, %v4799_v60, %v4801_v33  ;;  %v4804_v29 = vsel %vm662_vm2, %v4797_v28, %v4799_v60 }
 0xc26   : > { %5089 = vmatprep.subr.bf16.mxu1 %v4805_v54 }
 0xc27   : > { %5090 = vmatpush1.bf16.msra.mxu1 %v4804_v29 }
 0xc28   : > { %v4793_v53 = vpop.permute.xlu0 %4792 }
 0xc29   : > { %v4802_v15 = vsel %vm662_vm2, %v4793_v53, %v4795_v4  ;;  %v16796_v4 = vld [vmem:[#allocation10_spill] sm:$0xff] }
 0xc2a   : > { %5008 = vmatpush1.bf16.msra.mxu0 %v4802_v15  ;;  %5102 = vmatmul.mubr.bf16.vlgmr.msra.gmra.mrb[8].mxu1 %v10087_v50  ;;  %v10518_v28 = vadd.f32 %v16796_v4, %v16792_v45  ;;  %v11005_v4 = vld [vmem:[%s16647_s3 + $0x10c] ss:$16 sps:$4 sm:$0xff]  }
 0xc2c   : > { %v13889_v13 = vpop.permute.xlu0 %5151 }
 0xc2d   : > { %v5167_v9 = vmul.bf16 0, %v13889_v13  ;;  %5020 = vmatmul.mubr.bf16.vlgmr.msra.gmra.mrb[8].mxu0 %v10087_v50 }
 0xc2f   : > { %5177 = vrot.lane.b32.xlu0 %v5167_v9, %s16731_s20 }
 0xc30   : > { %v13935_v27 = vpop.permute.xlu0 %5155 }
 0xc33   : > { %5226 = vrot.lane.b32.xlu0 %v10954_v42, %s16718_s23 }
 0xc35   : > { %v13900_v26 = vpop.permute.xlu1 %4927 }
 0xc37   : > { %5230 = vrot.lane.b32.xlu0 %v10957_v43, %s16718_s23 }
 0xc39   : > { %v13906_v49 = vpop.permute.xlu1 %5153 }
 0xc3b   : > { %5297 = vrot.lane.b32.xlu0 %v10958_v34, %s16717_s16 }
 0xc3d   : > { %v13912_v25 = vpop.permute.xlu1 %5157 }
 0xc3f   : > { %5301 = vrot.lane.b32.xlu0 %v10965_v38, %s16717_s16  ;;  %v10981_v38 = vld [vmem:[%s16647_s3 + $0xac] ss:$16 sps:$4 sm:$0xff]  }
 0xc41   : > { %v13915_v18 = vpop.permute.xlu1 %5224 }
 0xc42   : > { %v5240_v11 = vmul.bf16 0, %v13915_v18 }
 0xc44   : > { %5250 = vrot.lane.b32.xlu1 %v5240_v11, %s16732_s12 }
 0xc45   : > { %v13950_v16 = vpop.permute.xlu1 %5228 }
 0xc48   : > { %5299 = vrot.lane.b32.xlu1 %v10960_v46, %s16717_s16  ;;  %v10982_v46 = vld [vmem:[%s16647_s3 + $0xc0] ss:$16 sps:$4 sm:$0xff]  }
 0xc4c   : > { %5303 = vrot.lane.b32.xlu1 %v10961_v10, %s16717_s16 }
 0xc50   : > { %5370 = vrot.lane.b32.xlu1 %v10963_v12, %s16721_s24  ;;  %v10984_v12 = vld [vmem:[%s16647_s3 + $0xc8] ss:$16 sps:$4 sm:$0xff]  }
 0xc54   : > { %5374 = vrot.lane.b32.xlu1 %v10967_v59, %s16721_s24 }
 0xca1   : > { %v13937_v6 = vpop.permute.xlu0 %5177 }
 0xca5   : > { %v13939_v55 = vpop.permute.xlu0 %5226 }
 0xca9   : > { %v13941_v22 = vpop.permute.xlu0 %5230 }
 0xcad   : > { %v13943_v24 = vpop.permute.xlu0 %5297 }
 0xcae   : > { %v5313_v3 = vmul.bf16 0, %v13943_v24 }
 0xcb0   : > { %5323 = vrot.lane.b32.xlu0 %v5313_v3, %s16733_s13 }
 0xcb1   : > { %v14011_v50 = vpop.permute.xlu0 %5301 }
 0xcb4   : > { %5372 = vrot.lane.b32.xlu0 %v10966_v7, %s16721_s24 }
 0xcb6   : > { %v13956_v0 = vpop.permute.xlu1 %5250 }
 0xcb8   : > { %5376 = vrot.lane.b32.xlu0 %v10969_v21, %s16721_s24  ;;  %v10986_v21 = vld [vmem:[%s16647_s3 + $0xc4] ss:$16 sps:$4 sm:$0xff]  }
 0xcba   : > { %v13962_v51 = vpop.permute.xlu1 %5299 }
 0xcbc   : > { %5443 = vrot.lane.b32.xlu0 %v10970_v39, %s16722_s29  ;;  %v10987_v39 = vld [vmem:[%s16647_s3 + $0xcc] ss:$16 sps:$4 sm:$0xff]  }
 0xcbe   : > { %v13968_v19 = vpop.permute.xlu1 %5303 }
 0xcc0   : > { %5447 = vrot.lane.b32.xlu0 %v10972_v36, %s16722_s29  ;;  %v10988_v36 = vld [vmem:[%s16647_s3 + $0xe0] ss:$16 sps:$4 sm:$0xff]  }
 0xcc2   : > { %v13971_v31 = vpop.permute.xlu1 %5370 }
 0xcc3   : > { %v5386_v1 = vmul.bf16 0, %v13971_v31 }
 0xcc5   : > { %5396 = vrot.lane.b32.xlu1 %v5386_v1, %s16734_s11  ;;  %v10991_v1 = vld [vmem:[%s16647_s3 + $0xe8] ss:$16 sps:$4 sm:$0xff]  }
 0xcc6   : > { %v14026_v34 = vpop.permute.xlu1 %5374 }
 0xcc9   : > { %5445 = vrot.lane.b32.xlu1 %v10974_v63, %s16722_s29 }
 0xccd   : > { %5449 = vrot.lane.b32.xlu1 %v10975_v58, %s16722_s29 }
 0xcd1   : > { %5516 = vrot.lane.b32.xlu1 %v10976_v40, %s16734_s11 }
 0xcd5   : > { %5520 = vrot.lane.b32.xlu1 %v10979_v8, %s16734_s11 }
 0xcfd   : > { %v5103_v44 = vpop.f32.mrb[8].mxu1 }
 0xcfe   : > { %v10525_v52 = vadd.f32 %v5103_v44, %v13900_v26  ;;  %v5105_v37 = vpop.f32.mrb[9].mxu1 }
 0xcff   : > { %v10526_v57 = vadd.f32 %v5105_v37, %v13900_v26  ;;  %v5107_v23 = vpop.f32.mrb[10].mxu1 }
 0xd00   : > { %v13997_v62 = vadd.f32 %v10525_v52, %v10521_v56  ;;  %v5021_v35 = vpop.f32.mrb[8].mxu0  ;;  %v5108_v20 = vpop.f32.mrb[11].mxu1  ;;  %v10993_v52 = vld [vmem:[%s16647_s3 + $0xec] ss:$16 sps:$4 sm:$0xff]  }
 0xd01   : > { %v14001_v2 = vadd.f32 %v10526_v57, %v10522_v47  ;;  %v10523_v32 = vadd.f32 %v5021_v35, %v13900_v26  ;;  %v5023_v17 = vpop.f32.mrb[9].mxu0  ;;  %v10996_v57 = vld [vmem:[%s16647_s3 + $0x108] ss:$16 sps:$4 sm:$0xff]   ;;  %v10998_v35 = vld [vmem:[%s16647_s3 + $0x120] ss:$16 sps:$4 sm:$0xff]  }
 0xd02   : > { %v10524_v30 = vadd.f32 %v5023_v17, %v13900_v26  ;;  %v5025_v60 = vpop.f32.mrb[10].mxu0  ;;  %v10978_v26 = vld [vmem:[%s16647_s3 + $0xa4] ss:$16 sps:$4 sm:$0xff]   ;;  %v11003_v17 = vld [vmem:[%s16647_s3 + $0x140] ss:$16 sps:$4 sm:$0xff]  }
 0xd03   : > { %v14007_v33 = vadd.f32 %v10523_v32, %v10517_v48  ;;  %v5026_v54 = vpop.f32.mrb[11].mxu0  ;;  %v11000_v48 = vld [vmem:[%s16647_s3 + $0x128] ss:$16 sps:$4 sm:$0xff]   ;;  %v11002_v32 = vld [vmem:[%s16647_s3 + $0x104] ss:$16 sps:$4 sm:$0xff]  }
 0xd04   : > { %v14009_v29 = vadd.f32 %v10524_v30, %v10518_v28  ;;  %v11006_v28 = vld [vmem:[%s16647_s3 + $0x148] ss:$16 sps:$4 sm:$0xff]   ;;  %v11008_v30 = vld [vmem:[%s16647_s3 + $0x124] ss:$16 sps:$4 sm:$0xff]   ;;  %v11009_v60 = vld [vmem:[%s16647_s3 + $0x160] ss:$16 sps:$4 sm:$0xff]  }
 0xd05   : > { %v11011_v54 = vld [vmem:[%s16647_s3 + $0x12c] ss:$16 sps:$4 sm:$0xff]  }
 0xd22   : > { %v14013_v53 = vpop.permute.xlu0 %5323 }
 0xd26   : > { %v14015_v15 = vpop.permute.xlu0 %5372 }
 0xd2a   : > { %v14017_v9 = vpop.permute.xlu0 %5376 }
 0xd2e   : > { %v14019_v42 = vpop.permute.xlu0 %5443 }
 0xd2f   : > { %v5459_v43 = vmul.bf16 0, %v14019_v42 }
 0xd31   : > { %5469 = vrot.lane.b32.xlu0 %v5459_v43, %s16722_s29  ;;  %v11012_v43 = vld [vmem:[%s16647_s3 + $0x168] ss:$16 sps:$4 sm:$0xff]  }
 0xd32   : > { %v14067_v63 = vpop.permute.xlu0 %5447 }
 0xd35   : > { %5518 = vrot.lane.b32.xlu0 %v10978_v26, %s16734_s11  ;;  %v11014_v26 = vld [vmem:[%s16647_s3 + $0x144] ss:$16 sps:$4 sm:$0xff]  }
 0xd37   : > { %v14032_v11 = vpop.permute.xlu1 %5396 }
 0xd39   : > { %5522 = vrot.lane.b32.xlu0 %v10981_v38, %s16734_s11  ;;  %v11015_v38 = vld [vmem:[%s16647_s3 + $0x180] ss:$16 sps:$4 sm:$0xff]  }
 0xd3b   : > { %v14038_v10 = vpop.permute.xlu1 %5445 }
 0xd3d   : > { %5589 = vrot.lane.b32.xlu0 %v10982_v46, %s16733_s13  ;;  %v11017_v46 = vld [vmem:[%s16647_s3 + $0x14c] ss:$16 sps:$4 sm:$0xff]  }
 0xd3f   : > { %v14044_v59 = vpop.permute.xlu1 %5449 }
 0xd41   : > { %5593 = vrot.lane.b32.xlu0 %v10984_v12, %s16733_s13  ;;  %v11018_v12 = vld [vmem:[%s16647_s3 + $0x188] ss:$16 sps:$4 sm:$0xff]  }
 0xd43   : > { %v14047_v3 = vpop.permute.xlu1 %5516 }
 0xd44   : > { %v5532_v7 = vmul.bf16 0, %v14047_v3 }
 0xd46   : > { %5542 = vrot.lane.b32.xlu1 %v5532_v7, %s16721_s24  ;;  %v11020_v7 = vld [vmem:[%s16647_s3 + $0x164] ss:$16 sps:$4 sm:$0xff]  }
 0xd47   : > { %v14082_v56 = vpop.permute.xlu1 %5520 }
 0xd4a   : > { %5591 = vrot.lane.b32.xlu1 %v10986_v21, %s16733_s13  ;;  %v5114_v21 = vmax.f32 %v14007_v33, 0.0  ;;  %v5232_v33 = vsel %vm738_vm1, %v13915_v18, %v13939_v55  ;;  %v11025_v18 = vld [vmem:[%s16647_s3 + $0x18c] ss:$16 sps:$4 sm:$0xff]  }
 0xd4e   : > { %5595 = vrot.lane.b32.xlu1 %v10987_v39, %s16733_s13  ;;  %v11021_v39 = vld [vmem:[%s16647_s3 + $0x1c0] ss:$16 sps:$4 sm:$0xff]  }
 0xd52   : > { %5662 = vrot.lane.b32.xlu1 %v10988_v36, %s16732_s12  ;;  %v11023_v36 = vld [vmem:[%s16647_s3 + $0x16c] ss:$16 sps:$4 sm:$0xff]  }
 0xd56   : > { %5666 = vrot.lane.b32.xlu1 %v10991_v1, %s16732_s12  ;;  %v5116_v1 = vmax.f32 %v13997_v62, 0.0 }
 0xda3   : > { %v14069_v58 = vpop.permute.xlu0 %5469 }
 0xda7   : > { %v14071_v40 = vpop.permute.xlu0 %5518 }
 0xdab   : > { %v14073_v8 = vpop.permute.xlu0 %5522 }
 0xdaf   : > { %v14075_v44 = vpop.permute.xlu0 %5589 }
 0xdb0   : > { %v5605_v45 = vmul.bf16 0, %v14075_v44 }
 0xdb2   : > { %5615 = vrot.lane.b32.xlu0 %v5605_v45, %s16717_s16  ;;  %v14176_v45 = vpack.c.bf16 %v11294_v5, %v5114_v21 }
 0xdb4   : > { %v5241_v62 = vmul.bf16 %v5232_v33, %v14176_v45 }
 0xdb6   : > { %5664 = vrot.lane.b32.xlu0 %v10990_v61, %s16732_s12  ;;  %v11024_v61 = vld [vmem:[%s16647_s3 + $0x184] ss:$16 sps:$4 sm:$0xff]  }
 0xdb8   : > { %v14088_v37 = vpop.permute.xlu1 %5542 }
 0xdba   : > { %5668 = vrot.lane.b32.xlu0 %v10993_v52, %s16732_s12  ;;  %v14187_v52 = vpack.c.bf16 %v11294_v5, %v5116_v1 }
 0xdbc   : > { %v14094_v47 = vpop.permute.xlu1 %5591 }
 0xdbe   : > { %5735 = vrot.lane.b32.xlu0 %v10994_v41, %s16731_s20  ;;  %v5234_v41 = vsel %vm738_vm1, %v13950_v16, %v13941_v22 }
 0xdc0   : > { %v14100_v23 = vpop.permute.xlu1 %5595 }
 0xdc2   : > { %5739 = vrot.lane.b32.xlu0 %v10996_v57, %s16731_s20  ;;  %v5243_v57 = vmul.bf16 %v5234_v41, %v14187_v52 }
 0xdc4   : > { %v14106_v20 = vpop.permute.xlu1 %5662 }
 0xdc5   : > { %v5678_v14 = vmul.bf16 0, %v14106_v20 }
 0xdc6   : > { %5808 = vrot.lane.b32.xlu0 %v10998_v35, %s16730_s2  ;;  %v5378_v35 = vsel %vm890_vm4, %v13971_v31, %v14015_v15  ;;  %v5159_v31 = vsel %vm662_vm2, %v13889_v13, %v13906_v49  ;;  %v5526_v13 = vsel %vm16798_vm13, %v14082_v56, %v14073_v8  ;;  %vm16802_vm13 = vmmov %vm16800_vm9 }
 0xdc7   : > { %5688 = vrot.lane.b32.xlu1 %v5678_v14, %s16718_s23  ;;  %v11026_v14 = vld [vmem:[%s16647_s3 + $0x1c4] ss:$16 sps:$4 sm:$0xff]  }
 0xdca   : > { %5812 = vrot.lane.b32.xlu0 %v11000_v48, %s16730_s2  ;;  %v5387_v48 = vmul.bf16 %v5378_v35, %v14176_v45 }
 0xdcb   : > { %5737 = vrot.lane.b32.xlu1 %v11002_v32, %s16731_s20  ;;  %v5380_v32 = vsel %vm890_vm4, %v14026_v34, %v14017_v9 }
 0xdce   : > { %5881 = vrot.lane.b32.xlu0 %v11003_v17, %s16729_s1  ;;  %v5389_v17 = vmul.bf16 %v5380_v32, %v14187_v52 }
 0xdcf   : > { %5741 = vrot.lane.b32.xlu1 %v11005_v4, %s16731_s20  ;;  %v5524_v4 = vsel %vm16797_vm12, %v14047_v3, %v14071_v40  ;;  %v5305_v3 = vsel %vm814_vm3, %v13943_v24, %v13962_v51  ;;  %vm16801_vm12 = vcmask 982016  }
 0xdd2   : > { %5885 = vrot.lane.b32.xlu0 %v11006_v28, %s16729_s1  ;;  %v5168_v28 = vmul.bf16 %v5159_v31, %v14176_v45 }
 0xdd3   : > { %5810 = vrot.lane.b32.xlu1 %v11008_v30, %s16730_s2  ;;  %v5161_v30 = vsel %vm662_vm2, %v13935_v27, %v13912_v25 }
 0xdd6   : > { %5954 = vrot.lane.b32.xlu0 %v11009_v60, %s16727_s17  ;;  %v5533_v60 = vmul.bf16 %v5524_v4, %v14176_v45 }
 0xdd7   : > { %5814 = vrot.lane.b32.xlu1 %v11011_v54, %s16730_s2  ;;  %v5170_v54 = vmul.bf16 %v5161_v30, %v14187_v52  ;;  %v11027_v30 = vld [vmem:[%s16647_s3 + $0x1cc] ss:$16 sps:$4 sm:$0xff]  }
 0xdda   : > { %5958 = vrot.lane.b32.xlu0 %v11012_v43, %s16727_s17  ;;  %v5535_v43 = vmul.bf16 %v5526_v13, %v14187_v52 }
 0xddb   : > { %5883 = vrot.lane.b32.xlu1 %v11014_v26, %s16729_s1  ;;  %v5314_v26 = vmul.bf16 %v5305_v3, %v14176_v45 }
 0xdde   : > { %6027 = vrot.lane.b32.xlu0 %v11015_v38, %s16726_s15  ;;  %v5307_v38 = vsel %vm814_vm3, %v14011_v50, %v13968_v19 }
 0xddf   : > { %5887 = vrot.lane.b32.xlu1 %v11017_v46, %s16729_s1  ;;  %v5316_v46 = vmul.bf16 %v5307_v38, %v14187_v52 }
 0xde2   : > { %6031 = vrot.lane.b32.xlu0 %v11018_v12, %s16726_s15  ;;  %v5451_v12 = vsel %vm531_vm0, %v14019_v42, %v14038_v10  ;;  %v5115_v42 = vmax.f32 %v14009_v29, 0.0  ;;  %v5233_v29 = vsel %vm738_vm1, %v13939_v55, %v13950_v16  ;;  %v5525_v16 = vsel %vm16789_vm5, %v14071_v40, %v14082_v56 }
 0xde3   : > { %5956 = vrot.lane.b32.xlu1 %v11020_v7, %s16727_s17  ;;  %v5460_v24 = vmul.bf16 %v5451_v12, %v14176_v45  ;;  %v5453_v7 = vsel %vm531_vm0, %v14067_v63, %v14044_v59 }
 0xde4   : > { %v5462_v21 = vmul.bf16 %v5453_v7, %v14187_v52 }
 0xde6   : > { %6108 = vrot.lane.b32.xlu0 %v11021_v39, %s16759_s0  ;;  %v5597_v39 = vsel %vm843_vm6, %v14075_v44, %v14094_v47 }
 0xde7   : > { %5960 = vrot.lane.b32.xlu1 %v11023_v36, %s16727_s17  ;;  %v14259_v36 = vpop.permute.xlu0 %5593  ;;  %v5606_v1 = vmul.bf16 %v5597_v39, %v14176_v45 }
 0xde8   : > { %v5599_v33 = vsel %vm843_vm6, %v14259_v36, %v14100_v23  ;;  %v5598_v7 = vsel %vm843_vm6, %v14094_v47, %v14259_v36 }
 0xde9   : > { %v5608_v44 = vmul.bf16 %v5599_v33, %v14187_v52  ;;  %v11041_v33 = vld [vmem:[%s16647_s3 + $0x244] ss:$16 sps:$4 sm:$0xff]  }
 0xdea   : > { %5252 = vrot.lane.b32.xlu0 %v5241_v62, %s16732_s12  ;;  %v14268_v62 = vpack.c.bf16 %v11294_v5, %v5115_v42 }
 0xdeb   : > { %6029 = vrot.lane.b32.xlu1 %v11024_v61, %s16726_s15  ;;  %v5117_v61 = vmax.f32 %v14001_v2, 0.0 }
 0xdec   : > { %v5607_v42 = vmul.bf16 %v5598_v7, %v14268_v62  ;;  %v11071_v7 = vld [vmem:[%s16647_s3 + $0x2e4] ss:$16 sps:$4 sm:$0xff]  }
 0xded   : > { %v14276_v41 = vpack.c.bf16 %v11294_v5, %v5117_v61  ;;  %v11043_v61 = vld [vmem:[%s16647_s3 + $0x1c8] ss:$16 sps:$4 sm:$0xff]  }
 0xdee   : > { %5256 = vrot.lane.b32.xlu0 %v5243_v57, %s16732_s12  ;;  %v5379_v57 = vsel %vm890_vm4, %v14015_v15, %v14026_v34  ;;  %v5667_v15 = vpop.permute.xlu1 %5666 }
 0xdef   : > { %6033 = vrot.lane.b32.xlu1 %v11025_v18, %s16726_s15  ;;  %v5242_v18 = vmul.bf16 %v5233_v29, %v14268_v62  ;;  %v5244_v2 = vmul.bf16 %v13941_v22, %v14276_v41  ;;  %v5388_v35 = vmul.bf16 %v5379_v57, %v14268_v62  ;;  %v5390_v55 = vmul.bf16 %v14017_v9, %v14276_v41  ;;  %v11047_v57 = vld [vmem:[%s16647_s3 + $0x264] ss:$16 sps:$4 sm:$0xff]  }
 0xdf0   : > { %v5609_v36 = vmul.bf16 %v14100_v23, %v14276_v41  ;;  %v11044_v23 = vld [vmem:[%s16647_s3 + $0x24c] ss:$16 sps:$4 sm:$0xff]  }
 0xdf2   : > { %5398 = vrot.lane.b32.xlu0 %v5387_v48, %s16734_s11  ;;  %v5536_v48 = vmul.bf16 %v14073_v8, %v14276_v41  ;;  %v5160_v8 = vsel %vm662_vm2, %v13906_v49, %v13935_v27  ;;  %v11029_v49 = vld [vmem:[%s16647_s3 + $0x1e4] ss:$16 sps:$4 sm:$0xff]   ;;  %v5306_v27 = vsel %vm814_vm3, %v13962_v51, %v14011_v50  ;;  %v5452_v51 = vsel %vm531_vm0, %v14038_v10, %v14067_v63 }
 0xdf3   : > { %6110 = vrot.lane.b32.xlu1 %v11026_v14, %s16759_s0  ;;  %v5534_v14 = vmul.bf16 %v5525_v16, %v14268_v62  ;;  %v5315_v3 = vmul.bf16 %v5306_v27, %v14268_v62  ;;  %v11033_v50 = vld [vmem:[%s16647_s3 + $0x204] ss:$16 sps:$4 sm:$0xff]   ;;  %v5461_v12 = vmul.bf16 %v5452_v51, %v14268_v62  ;;  %v5463_v63 = vmul.bf16 %v14044_v59, %v14276_v41  ;;  %v11039_v59 = vld [vmem:[%s16647_s3 + $0x22c] ss:$16 sps:$4 sm:$0xff]  }
 0xdf6   : > { %5402 = vrot.lane.b32.xlu0 %v5389_v17, %s16734_s11 }
 0xdf7   : > { %5179 = vrot.lane.b32.xlu1 %v5168_v28, %s16731_s20  ;;  %v5169_v28 = vmul.bf16 %v5160_v8, %v14268_v62  ;;  %v11059_v8 = vld [vmem:[%s16647_s3 + $0x2a4] ss:$16 sps:$4 sm:$0xff]  }
 0xdfa   : > { %5544 = vrot.lane.b32.xlu0 %v5533_v60, %s16721_s24  ;;  %v5171_v60 = vmul.bf16 %v13912_v25, %v14276_v41  ;;  %v11031_v25 = vld [vmem:[%s16647_s3 + $0x1ec] ss:$16 sps:$4 sm:$0xff]  }
 0xdfb   : > { %5183 = vrot.lane.b32.xlu1 %v5170_v54, %s16731_s20 }
 0xdfe   : > { %5548 = vrot.lane.b32.xlu0 %v5535_v43, %s16721_s24 }
 0xdff   : > { %5325 = vrot.lane.b32.xlu1 %v5314_v26, %s16733_s13  ;;  %v5317_v26 = vmul.bf16 %v13968_v19, %v14276_v41  ;;  %v11035_v19 = vld [vmem:[%s16647_s3 + $0x20c] ss:$16 sps:$4 sm:$0xff]  }
 0xe03   : > { %5329 = vrot.lane.b32.xlu1 %v5316_v46, %s16733_s13 }
 0xe07   : > { %5471 = vrot.lane.b32.xlu1 %v5460_v24, %s16722_s29 }
 0xe0b   : > { %5475 = vrot.lane.b32.xlu1 %v5462_v21, %s16722_s29  ;;  %v11037_v21 = vld [vmem:[%s16647_s3 + $0x224] ss:$16 sps:$4 sm:$0xff]  }
 0xe0f   : > { %5617 = vrot.lane.b32.xlu1 %v5606_v1, %s16717_s16 }
 0xe13   : > { %5621 = vrot.lane.b32.xlu1 %v5608_v44, %s16717_s16 }
 0xe17   : > { %5254 = vrot.lane.b32.xlu1 %v5242_v18, %s16732_s12  ;;  %v11046_v18 = vld [vmem:[%s16647_s3 + $0x1e0] ss:$16 sps:$4 sm:$0xff]  }
 0xe1b   : > { %5258 = vrot.lane.b32.xlu1 %v5244_v2, %s16732_s12 }
 0xe1f   : > { %5400 = vrot.lane.b32.xlu1 %v5388_v35, %s16734_s11 }
 0xe23   : > { %5404 = vrot.lane.b32.xlu1 %v5390_v55, %s16734_s11  ;;  %v11049_v55 = vld [vmem:[%s16647_s3 + $0x1e8] ss:$16 sps:$4 sm:$0xff]  }
 0xe24   : > { %v14294_v22 = vpop.permute.xlu0 %5615 }
 0xe27   : > { %5546 = vrot.lane.b32.xlu1 %v5534_v14, %s16721_s24  ;;  %v11050_v14 = vld [vmem:[%s16647_s3 + $0x26c] ss:$16 sps:$4 sm:$0xff]  }
 0xe28   : > { %v5665_v34 = vpop.permute.xlu0 %5664 }
 0xe29   : > { %v5670_v9 = vsel %vm767_vm7, %v14106_v20, %v5665_v34  ;;  %v5671_v40 = vsel %vm767_vm7, %v5665_v34, %v5667_v15 }
 0xe2a   : > { %v5679_v32 = vmul.bf16 %v5670_v9, %v14176_v45  ;;  %v5680_v31 = vmul.bf16 %v5671_v40, %v14268_v62  ;;  %v11053_v9 = vld [vmem:[%s16647_s3 + $0x284] ss:$16 sps:$4 sm:$0xff]  }
 0xe2b   : > { %5550 = vrot.lane.b32.xlu1 %v5536_v48, %s16721_s24 }
 0xe2c   : > { %v5669_v56 = vpop.permute.xlu0 %5668  ;;  %5690 = vrot.lane.b32.xlu0 %v5679_v32, %s16718_s23  ;;  %v11055_v32 = vld [vmem:[%s16647_s3 + $0x208] ss:$16 sps:$4 sm:$0xff]  }
 0xe2d   : > { %v5672_v17 = vsel %vm767_vm7, %v5667_v15, %v5669_v56  ;;  %v5682_v20 = vmul.bf16 %v5669_v56, %v14276_v41  ;;  %v11052_v15 = vld [vmem:[%s16647_s3 + $0x200] ss:$16 sps:$4 sm:$0xff]   ;;  %v11056_v56 = vld [vmem:[%s16647_s3 + $0x28c] ss:$16 sps:$4 sm:$0xff]  }
 0xe2e   : > { %v5681_v4 = vmul.bf16 %v5672_v17, %v14187_v52  ;;  %v11058_v17 = vld [vmem:[%s16647_s3 + $0x220] ss:$16 sps:$4 sm:$0xff]  }
 0xe2f   : > { %5692 = vrot.lane.b32.xlu1 %v5680_v31, %s16718_s23 }
 0xe30   : > { %5694 = vrot.lane.b32.xlu0 %v5681_v4, %s16718_s23  ;;  %v14333_v54 = vpop.permute.xlu0 %5735 }
 0xe33   : > { %5696 = vrot.lane.b32.xlu1 %v5682_v20, %s16718_s23  ;;  %v11061_v20 = vld [vmem:[%s16647_s3 + $0x228] ss:$16 sps:$4 sm:$0xff]  }
 0xe34   : > { %5181 = vrot.lane.b32.xlu0 %v5169_v28, %s16731_s20  ;;  %v14352_v38 = vpop.permute.xlu0 %5739 }
 0xe37   : > { %6114 = vrot.lane.b32.xlu1 %v11027_v30, %s16759_s0 }
 0xe38   : > { %5185 = vrot.lane.b32.xlu0 %v5171_v60, %s16731_s20  ;;  %v14367_v24 = vpop.permute.xlu0 %5808  ;;  %v11062_v60 = vld [vmem:[%s16647_s3 + $0x2ac] ss:$16 sps:$4 sm:$0xff]  }
 0xe39   : > { %v14331_v13 = vpop.permute.xlu1 %5688 }
 0xe3b   : > { %6183 = vrot.lane.b32.xlu1 %v11029_v49, %s16724_s25  ;;  %v11064_v49 = vld [vmem:[%s16647_s3 + $0x240] ss:$16 sps:$4 sm:$0xff]  }
 0xe3c   : > { %5327 = vrot.lane.b32.xlu0 %v5315_v3, %s16733_s13  ;;  %v14384_v1 = vpop.permute.xlu0 %5812  ;;  %v11065_v3 = vld [vmem:[%s16647_s3 + $0x2c4] ss:$16 sps:$4 sm:$0xff]  }
 0xe3d   : > { %v14341_v43 = vpop.permute.xlu1 %5737 }
 0xe3f   : > { %6187 = vrot.lane.b32.xlu1 %v11031_v25, %s16724_s25 }
 0xe40   : > { %5331 = vrot.lane.b32.xlu0 %v5317_v26, %s16733_s13  ;;  %v14401_v29 = vpop.permute.xlu0 %5881  ;;  %v11067_v26 = vld [vmem:[%s16647_s3 + $0x248] ss:$16 sps:$4 sm:$0xff]  }
 0xe41   : > { %v14355_v46 = vpop.permute.xlu1 %5741 }
 0xe43   : > { %6256 = vrot.lane.b32.xlu1 %v11033_v50, %s16725_s14  ;;  %v11068_v50 = vld [vmem:[%s16647_s3 + $0x2cc] ss:$16 sps:$4 sm:$0xff]  }
 0xe44   : > { %5473 = vrot.lane.b32.xlu0 %v5461_v12, %s16722_s29  ;;  %v14417_v35 = vpop.permute.xlu0 %5885  ;;  %v11070_v12 = vld [vmem:[%s16647_s3 + $0x260] ss:$16 sps:$4 sm:$0xff]  }
 0xe45   : > { %v14363_v10 = vpop.permute.xlu1 %5810 }
 0xe47   : > { %6260 = vrot.lane.b32.xlu1 %v11035_v19, %s16725_s14 }
 0xe48   : > { %5477 = vrot.lane.b32.xlu0 %v5463_v63, %s16722_s29  ;;  %v14435_v48 = vpop.permute.xlu0 %5954 }
 0xe49   : > { %v14377_v39 = vpop.permute.xlu1 %5814 }
 0xe4b   : > { %6329 = vrot.lane.b32.xlu1 %v11037_v21, %s16723_s19  ;;  %v11073_v21 = vld [vmem:[%s16647_s3 + $0x268] ss:$16 sps:$4 sm:$0xff]  }
 0xe4c   : > { %5619 = vrot.lane.b32.xlu0 %v5607_v42, %s16717_s16  ;;  %v14451_v31 = vpop.permute.xlu0 %5958 }
 0xe4d   : > { %v14387_v47 = vpop.permute.xlu1 %5883 }
 0xe4f   : > { %6333 = vrot.lane.b32.xlu1 %v11039_v59, %s16723_s19  ;;  %v11074_v59 = vld [vmem:[%s16647_s3 + $0x2ec] ss:$16 sps:$4 sm:$0xff]  }
 0xe50   : > { %5623 = vrot.lane.b32.xlu0 %v5609_v36, %s16717_s16  ;;  %v14469_v30 = vpop.permute.xlu0 %6027 }
 0xe51   : > { %v14399_v44 = vpop.permute.xlu1 %5887 }
 0xe53   : > { %6402 = vrot.lane.b32.xlu1 %v11041_v33, %s16719_s28  ;;  %v11076_v33 = vld [vmem:[%s16647_s3 + $0x280] ss:$16 sps:$4 sm:$0xff]  }
 0xe54   : > { %6112 = vrot.lane.b32.xlu0 %v11043_v61, %s16759_s0  ;;  %v14485_v25 = vpop.permute.xlu0 %6031 }
 0xe55   : > { %v14411_v2 = vpop.permute.xlu1 %5956 }
 0xe57   : > { %6406 = vrot.lane.b32.xlu1 %v11044_v23, %s16719_s28  ;;  %v5744_v23 = vsel %vm691_vm8, %v14341_v43, %v14352_v38 }
 0xe58   : > { %6181 = vrot.lane.b32.xlu0 %v11046_v18, %s16724_s25  ;;  %v14503_v63 = vpop.permute.xlu0 %6108  ;;  %v11077_v18 = vld [vmem:[%s16647_s3 + $0x288] ss:$16 sps:$4 sm:$0xff]  }
 0xe59   : > { %v14423_v16 = vpop.permute.xlu1 %5960 }
 0xe5b   : > { %6475 = vrot.lane.b32.xlu1 %v11047_v57, %s16718_s23  ;;  %v5753_v57 = vmul.bf16 %v5744_v23, %v14268_v62  ;;  %v11086_v23 = vld [vmem:[%s16647_s3 + $0x2e0] ss:$16 sps:$4 sm:$0xff]  }
 0xe5c   : > { %6185 = vrot.lane.b32.xlu0 %v11049_v55, %s16724_s25  ;;  %v14519_v36 = vpop.permute.xlu0 %5252 }
 0xe5d   : > { %v14433_v34 = vpop.permute.xlu1 %6029 }
 0xe5f   : > { %6479 = vrot.lane.b32.xlu1 %v11050_v14, %s16718_s23 }
 0xe60   : > { %6254 = vrot.lane.b32.xlu0 %v11052_v15, %s16725_s14  ;;  %v14538_v14 = vpop.permute.xlu0 %5256  ;;  %v11078_v15 = vld [vmem:[%s16647_s3 + $0x2a0] ss:$16 sps:$4 sm:$0xff]  }
 0xe61   : > { %v14445_v40 = vpop.permute.xlu1 %6033 }
 0xe63   : > { %6548 = vrot.lane.b32.xlu1 %v11053_v9, %s16717_s16  ;;  %v5755_v9 = vmul.bf16 %v14355_v46, %v14276_v41 }
 0xe64   : > { %6258 = vrot.lane.b32.xlu0 %v11055_v32, %s16725_s14 }
 0xe65   : > { %v14457_v4 = vpop.permute.xlu1 %6110 }
 0xe67   : > { %6552 = vrot.lane.b32.xlu1 %v11056_v56, %s16717_s16  ;;  %v11079_v56 = vld [vmem:[%s16647_s3 + $0x300] ss:$16 sps:$4 sm:$0xff]  }
 0xe68   : > { %6327 = vrot.lane.b32.xlu0 %v11058_v17, %s16723_s19  ;;  %v14553_v17 = vpop.permute.xlu0 %5398 }
 0xe69   : > { %v14467_v28 = vpop.permute.xlu1 %5179 }
 0xe6b   : > { %6621 = vrot.lane.b32.xlu1 %v11059_v8, %s16721_s24  ;;  %v11081_v8 = vld [vmem:[%s16647_s3 + $0x2a8] ss:$16 sps:$4 sm:$0xff]  }
 0xe6c   : > { %6331 = vrot.lane.b32.xlu0 %v11061_v20, %s16723_s19 }
 0xe6d   : > { %v14479_v27 = vpop.permute.xlu1 %5183 }
 0xe6f   : > { %6625 = vrot.lane.b32.xlu1 %v11062_v60, %s16721_s24  ;;  %v11082_v60 = vld [vmem:[%s16647_s3 + $0x308] ss:$16 sps:$4 sm:$0xff]  }
 0xe70   : > { %6400 = vrot.lane.b32.xlu0 %v11064_v49, %s16719_s28  ;;  %v11084_v49 = vld [vmem:[%s16647_s3 + $0x2c0] ss:$16 sps:$4 sm:$0xff]  }
 0xe71   : > { %v14491_v51 = vpop.permute.xlu1 %5325 }
 0xe73   : > { %6694 = vrot.lane.b32.xlu1 %v11065_v3, %s16722_s29 }
 0xe74   : > { %6404 = vrot.lane.b32.xlu0 %v11067_v26, %s16719_s28  ;;  %v5816_v26 = vsel %vm16799_vm10, %v14367_v24, %v14363_v10  ;;  %vm16803_vm10 = vmmov %vm16789_vm5 }
 0xe75   : > { %v14501_v19 = vpop.permute.xlu1 %5329 }
 0xe77   : > { %6698 = vrot.lane.b32.xlu1 %v11068_v50, %s16722_s29  ;;  %v14574_v50 = vpop.permute.xlu0 %5402 }
 0xe78   : > { %6473 = vrot.lane.b32.xlu0 %v11070_v12, %s16718_s23  ;;  %v11085_v12 = vld [vmem:[%s16647_s3 + $0x2c8] ss:$16 sps:$4 sm:$0xff]  }
 0xe79   : > { %v14513_v42 = vpop.permute.xlu1 %5471 }
 0xe7b   : > { %6767 = vrot.lane.b32.xlu1 %v11071_v7, %s16734_s11  ;;  %v5825_v7 = vmul.bf16 %v5816_v26, %v14176_v45 }
 0xe7c   : > { %6477 = vrot.lane.b32.xlu0 %v11073_v21, %s16718_s23 }
 0xe7d   : > { %v14525_v61 = vpop.permute.xlu1 %5475 }
 0xe7f   : > { %6771 = vrot.lane.b32.xlu1 %v11074_v59, %s16734_s11  ;;  %v5818_v59 = vsel %vm16800_vm9, %v14384_v1, %v14377_v39  ;;  %vm16804_vm9 = vmmov %vm16789_vm5 }
 0xe80   : > { %6546 = vrot.lane.b32.xlu0 %v11076_v33, %s16717_s16  ;;  %v14588_v33 = vpop.permute.xlu0 %5544 }
 0xe81   : > { %v14536_v55 = vpop.permute.xlu1 %5617 }
 0xe83   : > { %5765 = vrot.lane.b32.xlu1 %v5753_v57, %s16719_s28 }
 0xe84   : > { %6550 = vrot.lane.b32.xlu0 %v11077_v18, %s16717_s16  ;;  %v5827_v18 = vmul.bf16 %v5818_v59, %v14187_v52 }
 0xe85   : > { %v14547_v32 = vpop.permute.xlu1 %5621 }
 0xe87   : > { %5769 = vrot.lane.b32.xlu1 %v5755_v9, %s16719_s28  ;;  %v5824_v9 = vmul.bf16 0, %v14367_v24 }
 0xe88   : > { %6619 = vrot.lane.b32.xlu0 %v11078_v15, %s16721_s24  ;;  %v11087_v15 = vld [vmem:[%s16647_s3 + $0x2e8] ss:$16 sps:$4 sm:$0xff]  }
 0xe89   : > { %v14559_v20 = vpop.permute.xlu1 %5254 }
 0xe8b   : > { %6838 = vrot.lane.b32.xlu1 %v11079_v56, %s16733_s13 }
 0xe8c   : > { %6623 = vrot.lane.b32.xlu0 %v11081_v8, %s16721_s24  ;;  %v14605_v8 = vpop.permute.xlu0 %5548 }
 0xe8d   : > { %v14569_v3 = vpop.permute.xlu1 %5258 }
 0xe8f   : > { %6842 = vrot.lane.b32.xlu1 %v11082_v60, %s16733_s13  ;;  %v5743_v60 = vsel %vm691_vm8, %v14333_v54, %v14341_v43  ;;  %v11090_v43 = vld [vmem:[%s16647_s3 + $0x32c] ss:$16 sps:$4 sm:$0xff]  }
 0xe90   : > { %6692 = vrot.lane.b32.xlu0 %v11084_v49, %s16722_s29  ;;  %v11088_v49 = vld [vmem:[%s16647_s3 + $0x324] ss:$16 sps:$4 sm:$0xff]   ;;  %v5752_v24 = vmul.bf16 %v5743_v60, %v14176_v45 }
 0xe91   : > { %v14582_v21 = vpop.permute.xlu1 %5400 }
 0xe93   : > { %5836 = vrot.lane.b32.xlu1 %v5825_v7, %s16723_s19  ;;  %v5745_v7 = vsel %vm691_vm8, %v14352_v38, %v14355_v46 }
 0xe94   : > { %6696 = vrot.lane.b32.xlu0 %v11085_v12, %s16722_s29 }
 0xe95   : > { %v14595_v57 = vpop.permute.xlu1 %5404 }
 0xe97   : > { %5840 = vrot.lane.b32.xlu1 %v5827_v18, %s16723_s19  ;;  %v5890_v18 = vsel %vm16801_vm12, %v14387_v47, %v14417_v35  ;;  %vm16805_vm12 = vmmov %vm16789_vm5 }
 0xe98   : > { %6765 = vrot.lane.b32.xlu0 %v11086_v23, %s16734_s11  ;;  %v5754_v23 = vmul.bf16 %v5745_v7, %v14187_v52  ;;  %v5899_v38 = vmul.bf16 %v5890_v18, %v14268_v62  ;;  %v11092_v7 = vld [vmem:[%s16647_s3 + $0x304] ss:$16 sps:$4 sm:$0xff]  }
 0xe99   : > { %v14603_v56 = vpop.permute.xlu1 %5546 }
 0xe9b   : > { %5834 = vrot.lane.b32.xlu1 %v5824_v9, %s16723_s19  ;;  %v5751_v9 = vmul.bf16 0, %v14333_v54  ;;  %v5901_v54 = vmul.bf16 %v14399_v44, %v14276_v41 }
 0xe9c   : > { %6769 = vrot.lane.b32.xlu0 %v11087_v15, %s16734_s11 }
 0xe9d   : > { %v14615_v26 = vpop.permute.xlu1 %5550 }
 0xe9e   : > { %v14618_v12 = vpop.permute.xlu0 %5690 }
 0xe9f   : > { %6913 = vrot.lane.b32.xlu1 %v11088_v49, %s16732_s12 }
 0xea0   : > { %5763 = vrot.lane.b32.xlu0 %v5752_v24, %s16719_s28  ;;  %v5187_v24 = vsel %vm691_vm8, %v13937_v6, %v14467_v28 }
 0xea1   : > { %v14628_v59 = vpop.permute.xlu1 %5692 }
 0xea2   : > { %v14634_v15 = vpop.permute.xlu0 %5694 }
 0xea3   : > { %6917 = vrot.lane.b32.xlu1 %v11090_v43, %s16732_s12 }
 0xea4   : > { %5767 = vrot.lane.b32.xlu0 %v5754_v23, %s16719_s28  ;;  %v5261_v23 = vsel %vm767_vm7, %v14519_v36, %v14559_v20 }
 0xea5   : > { %v14639_v46 = vpop.permute.xlu1 %5696 }
 0xea6   : > { %v5182_v60 = vpop.permute.xlu0 %5181 }
 0xea7   : > { %5911 = vrot.lane.b32.xlu1 %v5899_v38, %s16725_s14  ;;  %v5188_v49 = vsel %vm691_vm8, %v14467_v28, %v5182_v60  ;;  %v11093_v28 = vld [vmem:[%s16647_s3 + $0x340] ss:$16 sps:$4 sm:$0xff]   ;;  %v5260_v38 = vsel %vm767_vm7, %v13956_v0, %v14519_v36  ;;  %v5817_v0 = vsel %vm16802_vm13, %v14363_v10, %v14384_v1  ;;  %v11096_v36 = vld [vmem:[%s16647_s3 + $0x348] ss:$16 sps:$4 sm:$0xff]   ;;  %v5262_v10 = vsel %vm767_vm7, %v14559_v20, %v14538_v14 }
 0xea8   : > { %5761 = vrot.lane.b32.xlu0 %v5751_v9, %s16719_s28  ;;  %7178 = vmatprep.subr.bf16.mxu0 %v5188_v49  ;;  %v5189_v9 = vsel %vm691_vm8, %v5182_v60, %v14479_v27  ;;  %v11095_v49 = vld [vmem:[%s16647_s3 + $0x30c] ss:$16 sps:$4 sm:$0xff]   ;;  %v5407_v60 = vsel %vm16789_vm5, %v14553_v17, %v14582_v21  ;;  %vm16806_vm13 = vcmask 1039360   ;;  %vm16807_vm5 = vcmask 982016  }
 0xea9   : > { %7179 = vmatpush1.bf16.msra.mxu0 %v5187_v24  ;;  %v14654_v43 = vpop.permute.xlu1 %6114 }
 0xeaa   : > { %v5186_v18 = vpop.permute.xlu0 %5185  ;;  %7180 = vmatprep.subr.bf16.mxu0 %v5261_v23  ;;  %v5826_v23 = vmul.bf16 %v5817_v0, %v14268_v62  ;;  %v5553_v0 = vsel %vm890_vm4, %v14588_v33, %v14603_v56 }
 0xeab   : > { %5915 = vrot.lane.b32.xlu1 %v5901_v54, %s16725_s14  ;;  %v5190_v6 = vsel %vm691_vm8, %v14479_v27, %v5186_v18  ;;  %v5962_v18 = vsel %vm1489_vm11, %v14435_v48, %v14411_v2 }
 0xeac   : > { %6840 = vrot.lane.b32.xlu0 %v11092_v7, %s16733_s13  ;;  %7264 = vmatprep.subr.bf16.mxu1 %v5190_v6  ;;  %v5263_v7 = vsel %vm767_vm7, %v14538_v14, %v14569_v3  ;;  %v5333_v3 = vsel %vm843_vm6, %v14013_v53, %v14491_v51  ;;  %v5971_v20 = vmul.bf16 %v5962_v18, %v14176_v45 }
 0xead   : > { %7181 = vmatpush1.bf16.msra.mxu0 %v5260_v38  ;;  %7265 = vmatpush1.bf16.msra.mxu1 %v5189_v9  ;;  %v14674_v24 = vpop.permute.xlu1 %6183  ;;  %v5409_v38 = vsel %vm16804_vm9, %v14574_v50, %v14595_v57  ;;  %v5828_v9 = vmul.bf16 %v14377_v39, %v14276_v41  ;;  %v5479_v57 = vsel %vm531_vm0, %v14069_v58, %v14513_v42  ;;  %vm16809_vm9 = vcmask 7168  }
 0xeae   : > { %v5328_v54 = vpop.permute.xlu0 %5327  ;;  %7266 = vmatprep.subr.bf16.mxu1 %v5263_v7  ;;  %v5408_v39 = vsel %vm16805_vm12, %v14582_v21, %v14574_v50  ;;  %v11099_v21 = vld [vmem:[%s16647_s3 + $0x328] ss:$16 sps:$4 sm:$0xff]   ;;  %v5699_v18 = vsel %vm738_vm1, %v14618_v12, %v14628_v59  ;;  %vm16810_vm12 = vmmov %vm16809_vm9 }
 0xeaf   : > { %6984 = vrot.lane.b32.xlu1 %v11093_v28, %s16731_s20  ;;  %v5334_v27 = vsel %vm843_vm6, %v14491_v51, %v5328_v54  ;;  %v5406_v51 = vsel %vm16803_vm10, %v14032_v11, %v14553_v17  ;;  %v5335_v14 = vsel %vm843_vm6, %v5328_v54, %v14501_v19  ;;  %v5964_v11 = vsel %vm1489_vm11, %v14451_v31, %v14423_v16  ;;  %vm16808_vm10 = vmmov %vm16807_vm5 }
 0xeb0   : > { %6844 = vrot.lane.b32.xlu0 %v11095_v49, %s16733_s13  ;;  %7182 = vmatprep.subr.bf16.mxu0 %v5334_v27  ;;  %v11098_v49 = vld [vmem:[%s16647_s3 + $0x320] ss:$16 sps:$4 sm:$0xff]   ;;  %v5973_v7 = vmul.bf16 %v5964_v11, %v14187_v52 }
 0xeb1   : > { %7183 = vmatpush1.bf16.msra.mxu0 %v5333_v3  ;;  %7267 = vmatpush1.bf16.msra.mxu1 %v5262_v10  ;;  %v14695_v1 = vpop.permute.xlu1 %6187  ;;  %v5555_v10 = vsel %vm890_vm4, %v14605_v8, %v14615_v26  ;;  %v5625_v26 = vsel %vm814_vm3, %v14294_v22, %v14536_v55  ;;  %v5891_v22 = vsel %vm16808_vm10, %v14417_v35, %v14399_v44 }
 0xeb2   : > { %v5332_v6 = vpop.permute.xlu0 %5331  ;;  %7184 = vmatprep.subr.bf16.mxu0 %v5407_v60  ;;  %v5554_v60 = vsel %vm890_vm4, %v14603_v56, %v14605_v8  ;;  %v5698_v56 = vsel %vm738_vm1, %v14331_v13, %v14618_v12  ;;  %v5701_v35 = vsel %vm738_vm1, %v14634_v15, %v14639_v46  ;;  %v6116_v13 = vsel %vm16809_vm9, %v14503_v63, %v14457_v4 }
 0xeb3   : > { %6988 = vrot.lane.b32.xlu1 %v11096_v36, %s16731_s20  ;;  %v5336_v53 = vsel %vm843_vm6, %v14501_v19, %v5332_v6  ;;  %v5970_v36 = vmul.bf16 0, %v14435_v48 }
 0xeb4   : > { %5838 = vrot.lane.b32.xlu0 %v5826_v23, %s16723_s19  ;;  %7268 = vmatprep.subr.bf16.mxu1 %v5336_v53 }
 0xeb5   : > { %7185 = vmatpush1.bf16.msra.mxu0 %v5406_v51  ;;  %7269 = vmatpush1.bf16.msra.mxu1 %v5335_v14  ;;  %v14714_v28 = vpop.permute.xlu1 %6256  ;;  %v6047_v51 = vmul.bf16 %v14445_v40, %v14276_v41  ;;  %v5900_v14 = vmul.bf16 %v5891_v22, %v14187_v52 }
 0xeb6   : > { %v5474_v17 = vpop.permute.xlu0 %5473  ;;  %7270 = vmatprep.subr.bf16.mxu1 %v5409_v38  ;;  %v5897_v38 = vmul.bf16 0, %v14401_v29 }
 0xeb7   : > { %5982 = vrot.lane.b32.xlu1 %v5971_v20, %s16724_s25  ;;  %v5480_v19 = vsel %vm531_vm0, %v14513_v42, %v5474_v17  ;;  %v5552_v42 = vsel %vm890_vm4, %v14088_v37, %v14588_v33  ;;  %v5481_v50 = vsel %vm531_vm0, %v5474_v17, %v14525_v61  ;;  %v6036_v37 = vsel %vm16806_vm13, %v14433_v34, %v14485_v25 }
 0xeb8   : > { %5842 = vrot.lane.b32.xlu0 %v5828_v9, %s16723_s19  ;;  %7186 = vmatprep.subr.bf16.mxu0 %v5480_v19  ;;  %v6045_v23 = vmul.bf16 %v6036_v37, %v14268_v62  ;;  %v6125_v20 = vmul.bf16 %v6116_v13, %v14268_v62  ;;  %vm16811_vm13 = vcmask 56320  }
 0xeb9   : > { %7187 = vmatpush1.bf16.msra.mxu0 %v5479_v57  ;;  %7271 = vmatpush1.bf16.msra.mxu1 %v5408_v39  ;;  %v14738_v54 = vpop.permute.xlu1 %6260  ;;  %v6124_v57 = vmul.bf16 %v14503_v63, %v14176_v45 }
 0xeba   : > { %v5478_v27 = vpop.permute.xlu0 %5477  ;;  %7188 = vmatprep.subr.bf16.mxu0 %v5553_v0  ;;  %v5963_v0 = vsel %vm1489_vm11, %v14411_v2, %v14451_v31  ;;  %v5974_v2 = vmul.bf16 %v14423_v16, %v14276_v41 }
 0xebb   : > { %5986 = vrot.lane.b32.xlu1 %v5973_v7, %s16724_s25  ;;  %v5482_v58 = vsel %vm531_vm0, %v14525_v61, %v5478_v27  ;;  %v5889_v61 = vsel %vm16807_vm5, %v14401_v29, %v14387_v47  ;;  %v11101_v29 = vld [vmem:[%s16647_s3 + $0x34c] ss:$16 sps:$4 sm:$0xff]   ;;  %v5972_v63 = vmul.bf16 %v5963_v0, %v14268_v62  ;;  %vm16812_vm5 = vcmask 1039360  }
 0xebc   : > { %6911 = vrot.lane.b32.xlu0 %v11098_v49, %s16732_s12  ;;  %7272 = vmatprep.subr.bf16.mxu1 %v5482_v58  ;;  %v5898_v6 = vmul.bf16 %v5889_v61, %v14176_v45  ;;  %vm16813_vm10 = vmmov %vm16812_vm5 }
 0xebd   : > { %7189 = vmatpush1.bf16.msra.mxu0 %v5552_v42  ;;  %7273 = vmatpush1.bf16.msra.mxu1 %v5481_v50  ;;  %v14756_v3 = vpop.permute.xlu1 %6329  ;;  %v6201_v50 = vmul.bf16 0, %v14695_v1 }
 0xebe   : > { %v5620_v33 = vpop.permute.xlu0 %5619  ;;  %7274 = vmatprep.subr.bf16.mxu1 %v5555_v10  ;;  %v6035_v10 = vsel %vm16812_vm5, %v14469_v30, %v14433_v34  ;;  %v6037_v34 = vsel %vm16813_vm10, %v14485_v25, %v14445_v40  ;;  %v6043_v40 = vmul.bf16 0, %v14469_v30  ;;  %vm16816_vm5 = vcmask 531456  }
 0xebf   : > { %5980 = vrot.lane.b32.xlu1 %v5970_v36, %s16724_s25  ;;  %v5626_v48 = vsel %vm814_vm3, %v14536_v55, %v5620_v33  ;;  %v5627_v8 = vsel %vm814_vm3, %v5620_v33, %v14547_v32  ;;  %v6044_v61 = vmul.bf16 %v6035_v10, %v14176_v45  ;;  %vm16817_vm10 = vmmov %vm16816_vm5 }
 0xec0   : > { %6915 = vrot.lane.b32.xlu0 %v11099_v21, %s16732_s12  ;;  %7190 = vmatprep.subr.bf16.mxu0 %v5626_v48 }
 0xec1   : > { %7191 = vmatpush1.bf16.msra.mxu0 %v5625_v26  ;;  %7275 = vmatpush1.bf16.msra.mxu1 %v5554_v60  ;;  %v14778_v47 = vpop.permute.xlu1 %6333 }
 0xec2   : > { %v5624_v53 = vpop.permute.xlu0 %5623  ;;  %7192 = vmatprep.subr.bf16.mxu0 %v5699_v18 }
 0xec3   : > { %6057 = vrot.lane.b32.xlu1 %v6045_v23, %s16759_s0  ;;  %v5628_v55 = vsel %vm814_vm3, %v14547_v32, %v5624_v53  ;;  %v5700_v32 = vsel %vm738_vm1, %v14628_v59, %v14634_v15  ;;  %v11100_v59 = vld [vmem:[%s16647_s3 + $0x344] ss:$16 sps:$4 sm:$0xff]   ;;  %v6046_v23 = vmul.bf16 %v6037_v34, %v14187_v52 }
 0xec4   : > { %5909 = vrot.lane.b32.xlu0 %v5898_v6, %s16725_s14  ;;  %7276 = vmatprep.subr.bf16.mxu1 %v5628_v55 }
 0xec5   : > { %7193 = vmatpush1.bf16.msra.mxu0 %v5698_v56  ;;  %7277 = vmatpush1.bf16.msra.mxu1 %v5627_v8  ;;  %v14798_v44 = vpop.permute.xlu1 %6402 }
 0xec6   : > { %v6113_v12 = vpop.permute.xlu0 %6112  ;;  %7278 = vmatprep.subr.bf16.mxu1 %v5701_v35  ;;  %v6347_v35 = vmul.bf16 0, %v14778_v47 }
 0xec7   : > { %6061 = vrot.lane.b32.xlu1 %v6047_v51, %s16759_s0  ;;  %v6118_v9 = vsel %vm16810_vm12, %v6113_v12, %v14654_v43  ;;  %v6117_v55 = vsel %vm16809_vm9, %v14457_v4, %v6113_v12  ;;  %v6128_v4 = vmul.bf16 0, %v14654_v43  ;;  %vm16814_vm12 = vmmov %vm16811_vm13 }
 0xec8   : > { %5913 = vrot.lane.b32.xlu0 %v5900_v14, %s16725_s14  ;;  %v6127_v15 = vmul.bf16 %v6118_v9, %v14276_v41  ;;  %v6126_v51 = vmul.bf16 %v6117_v55, %v14187_v52  ;;  %vm16818_vm9 = vmmov %vm16816_vm5 }
 0xec9   : > { %7279 = vmatpush1.bf16.msra.mxu1 %v5700_v32  ;;  %v14813_v46 = vpop.permute.xlu1 %6406 }
 0xeca   : > { %v14818_v11 = vpop.permute.xlu0 %6181 }
 0xecb   : > { %6136 = vrot.lane.b32.xlu1 %v6125_v20, %s16726_s15  ;;  %v6189_v32 = vsel %vm16814_vm12, %v14818_v11, %v14674_v24  ;;  %v6197_v0 = vmul.bf16 %v14818_v11, %v14176_v45 }
 0xecc   : > { %5907 = vrot.lane.b32.xlu0 %v5897_v38, %s16725_s14  ;;  %v6198_v9 = vmul.bf16 %v6189_v32, %v14268_v62 }
 0xecd   : > { %v14826_v17 = vpop.permute.xlu1 %6475 }
 0xece   : > { %v14828_v19 = vpop.permute.xlu0 %6185 }
 0xecf   : > { %6140 = vrot.lane.b32.xlu1 %v6127_v15, %s16726_s15  ;;  %v6190_v49 = vsel %vm16811_vm13, %v14674_v24, %v14828_v19  ;;  %v11110_v15 = vld [vmem:[%s16652_s8 + $0x4] ss:$16 sps:$4 sm:$0xff]   ;;  %vm16815_vm13 = vmmov %vm16814_vm12 }
 0xed0   : > { %6986 = vrot.lane.b32.xlu0 %v11100_v59, %s16731_s20  ;;  %v6199_v27 = vmul.bf16 %v6190_v49, %v14187_v52  ;;  %v6191_v24 = vsel %vm16815_vm13, %v14828_v19, %v14695_v1  ;;  %7210 = vmatprep.mubr.bf16.mxu0 %v11110_v15  ;;  %vm16819_vm13 = vmmov %vm16814_vm12 }
 0xed1   : > { %v14837_v39 = vpop.permute.xlu1 %6479  ;;  %7296 = vmatprep.mubr.bf16.mxu1 %v11110_v15  ;;  %v6200_v49 = vmul.bf16 %v6191_v24, %v14276_v41 }
 0xed2   : > { %v6255_v7 = vpop.permute.xlu0 %6254 }
 0xed3   : > { %6134 = vrot.lane.b32.xlu1 %v6124_v57, %s16726_s15  ;;  %v6262_v31 = vsel %vm1442_vm15, %v6255_v7, %v14714_v28  ;;  %v6270_v6 = vmul.bf16 %v6255_v7, %v14176_v45 }
 0xed4   : > { %6990 = vrot.lane.b32.xlu0 %v11101_v29, %s16731_s20  ;;  %v6271_v37 = vmul.bf16 %v6262_v31, %v14268_v62 }
 0xed5   : > { %v14848_v58 = vpop.permute.xlu1 %6548 }
 0xed6   : > { %v14851_v42 = vpop.permute.xlu0 %6258 }
 0xed7   : > { %6211 = vrot.lane.b32.xlu1 %v6199_v27, %s16727_s17  ;;  %v6264_v16 = vsel %vm1442_vm15, %v14851_v42, %v14738_v54 }
 0xed8   : > { %5984 = vrot.lane.b32.xlu0 %v5972_v63, %s16724_s25  ;;  %v6273_v26 = vmul.bf16 %v6264_v16, %v14276_v41 }
 0xed9   : > { %v14856_v21 = vpop.permute.xlu1 %6552 }
 0xeda   : > { %v14862_v36 = vpop.permute.xlu0 %6327 }
 0xedb   : > { %6215 = vrot.lane.b32.xlu1 %v6201_v50, %s16727_s17  ;;  %v6263_v50 = vsel %vm1442_vm15, %v14714_v28, %v14851_v42  ;;  %v6274_v28 = vmul.bf16 0, %v14738_v54  ;;  %v6335_v34 = vsel %vm1366_vm14, %v14862_v36, %v14756_v3 }
 0xedc   : > { %5988 = vrot.lane.b32.xlu0 %v5974_v2, %s16724_s25  ;;  %v6272_v11 = vmul.bf16 %v6263_v50, %v14187_v52 }
 0xedd   : > { %v14870_v33 = vpop.permute.xlu1 %6621 }
 0xede   : > { %v14876_v48 = vpop.permute.xlu0 %6331 }
 0xedf   : > { %6282 = vrot.lane.b32.xlu1 %v6271_v37, %s16729_s1  ;;  %v6336_v25 = vsel %vm1366_vm14, %v14756_v3, %v14876_v48  ;;  %v6493_v37 = vmul.bf16 0, %v14837_v39  ;;  %v6337_v3 = vsel %vm1366_vm14, %v14876_v48, %v14778_v47  ;;  %v6343_v47 = vmul.bf16 %v14862_v36, %v14176_v45 }
 0xee0   : > { %6055 = vrot.lane.b32.xlu0 %v6044_v61, %s16759_s0  ;;  %v6345_v56 = vmul.bf16 %v6336_v25, %v14187_v52  ;;  %v6346_v55 = vmul.bf16 %v6337_v3, %v14276_v41 }
 0xee1   : > { %v14884_v60 = vpop.permute.xlu1 %6625 }
 0xee2   : > { %v6401_v18 = vpop.permute.xlu0 %6400 }
 0xee3   : > { %6286 = vrot.lane.b32.xlu1 %v6273_v26, %s16729_s1  ;;  %v6408_v13 = vsel %vm662_vm2, %v6401_v18, %v14798_v44  ;;  %v6416_v1 = vmul.bf16 %v6401_v18, %v14176_v45  ;;  %v6344_v18 = vmul.bf16 %v6335_v34, %v14268_v62 }
 0xee4   : > { %6059 = vrot.lane.b32.xlu0 %v6046_v23, %s16759_s0  ;;  %v6417_v20 = vmul.bf16 %v6408_v13, %v14268_v62 }
 0xee5   : > { %v14890_v53 = vpop.permute.xlu1 %6694 }
 0xee6   : > { %v14896_v22 = vpop.permute.xlu0 %6404 }
 0xee7   : > { %6280 = vrot.lane.b32.xlu1 %v6270_v6, %s16729_s1  ;;  %v6410_v43 = vsel %vm662_vm2, %v14896_v22, %v14813_v46  ;;  %v6409_v13 = vsel %vm662_vm2, %v14798_v44, %v14896_v22  ;;  %v6639_v44 = vmul.bf16 0, %v14884_v60 }
 0xee8   : > { %6053 = vrot.lane.b32.xlu0 %v6043_v40, %s16759_s0  ;;  %v6419_v29 = vmul.bf16 %v6410_v43, %v14276_v41  ;;  %v6418_v36 = vmul.bf16 %v6409_v13, %v14187_v52 }
 0xee9   : > { %v14903_v8 = vpop.permute.xlu1 %6698 }
 0xeea   : > { %v14906_v30 = vpop.permute.xlu0 %6473 }
 0xeeb   : > { %6357 = vrot.lane.b32.xlu1 %v6345_v56, %s16730_s2 }
 0xeec   : > { %6138 = vrot.lane.b32.xlu0 %v6126_v51, %s16726_s15 }
 0xeed   : > { %v14911_v14 = vpop.permute.xlu1 %6767 }
 0xeee   : > { %v14916_v12 = vpop.permute.xlu0 %6477 }
 0xeef   : > { %6361 = vrot.lane.b32.xlu1 %v6347_v35, %s16730_s2  ;;  %v6482_v27 = vsel %vm738_vm1, %v14826_v17, %v14916_v12 }
 0xef0   : > { %6142 = vrot.lane.b32.xlu0 %v6128_v4, %s16726_s15  ;;  %v6491_v2 = vmul.bf16 %v6482_v27, %v14187_v52 }
 0xef1   : > { %v14924_v38 = vpop.permute.xlu1 %6771 }
 0xef2   : > { %v6547_v59 = vpop.permute.xlu0 %6546 }
 0xef3   : > { %6428 = vrot.lane.b32.xlu1 %v6417_v20, %s16731_s20  ;;  %v6554_v42 = vsel %vm814_vm3, %v6547_v59, %v14848_v58  ;;  %v6562_v51 = vmul.bf16 %v6547_v59, %v14176_v45  ;;  %v6420_v59 = vmul.bf16 0, %v14813_v46 }
 0xef4   : > { %6209 = vrot.lane.b32.xlu0 %v6198_v9, %s16727_s17  ;;  %v6563_v26 = vmul.bf16 %v6554_v42, %v14268_v62  ;;  %v6489_v42 = vmul.bf16 %v14906_v30, %v14176_v45 }
 0xef5   : > { %v14939_v57 = vpop.permute.xlu1 %5765 }
 0xef6   : > { %v14942_v7 = vpop.permute.xlu0 %6550 }
 0xef7   : > { %6432 = vrot.lane.b32.xlu1 %v6419_v29, %s16731_s20  ;;  %v6556_v54 = vsel %vm814_vm3, %v14942_v7, %v14856_v21  ;;  %v6481_v29 = vsel %vm738_vm1, %v14906_v30, %v14826_v17 }
 0xef8   : > { %6213 = vrot.lane.b32.xlu0 %v6200_v49, %s16727_s17  ;;  %v6565_v40 = vmul.bf16 %v6556_v54, %v14276_v41  ;;  %v6490_v27 = vmul.bf16 %v6481_v29, %v14268_v62 }
 0xef9   : > { %v5770_v19 = vpop.permute.xlu1 %5769 }
 0xefa   : > { %v14952_v63 = vpop.permute.xlu0 %6619 }
 0xefb   : > { %6426 = vrot.lane.b32.xlu1 %v6416_v1, %s16731_s20  ;;  %v6627_v13 = vsel %vm890_vm4, %v14952_v63, %v14870_v33 }
 0xefc   : > { %6207 = vrot.lane.b32.xlu0 %v6197_v0, %s16727_s17 }
 0xefd   : > { %v14960_v31 = vpop.permute.xlu1 %6838 }
 0xefe   : > { %v14963_v10 = vpop.permute.xlu0 %6623 }
 0xeff   : > { %6503 = vrot.lane.b32.xlu1 %v6491_v2, %s16732_s12  ;;  %v6628_v48 = vsel %vm890_vm4, %v14870_v33, %v14963_v10 }
 0xf00   : > { %6284 = vrot.lane.b32.xlu0 %v6272_v11, %s16729_s1  ;;  %v6637_v32 = vmul.bf16 %v6628_v48, %v14187_v52 }
 0xf01   : > { %v14968_v61 = vpop.permute.xlu1 %6842 }
 0xf02   : > { %v14973_v16 = vpop.permute.xlu0 %6692 }
 0xf03   : > { %6507 = vrot.lane.b32.xlu1 %v6493_v37, %s16732_s12  ;;  %v6700_v15 = vsel %vm531_vm0, %v14973_v16, %v14890_v53 }
 0xf04   : > { %6288 = vrot.lane.b32.xlu0 %v6274_v28, %s16729_s1  ;;  %v6709_v46 = vmul.bf16 %v6700_v15, %v14268_v62 }
 0xf05   : > { %v14981_v23 = vpop.permute.xlu1 %5836 }
 0xf06   : > { %v14987_v6 = vpop.permute.xlu0 %6696 }
 0xf07   : > { %6574 = vrot.lane.b32.xlu1 %v6563_v26, %s16733_s13  ;;  %v6702_v17 = vsel %vm531_vm0, %v14987_v6, %v14903_v8 }
 0xf08   : > { %6355 = vrot.lane.b32.xlu0 %v6344_v18, %s16730_s2  ;;  %v6711_v2 = vmul.bf16 %v6702_v17, %v14276_v41  ;;  %v6555_v18 = vsel %vm814_vm3, %v14848_v58, %v14942_v7  ;;  %v6785_v58 = vmul.bf16 0, %v14924_v38 }
 0xf09   : > { %v14995_v25 = vpop.permute.xlu1 %5840  ;;  %v6564_v30 = vmul.bf16 %v6555_v18, %v14187_v52 }
 0xf0a   : > { %v14998_v56 = vpop.permute.xlu0 %6765 }
 0xf0b   : > { %6578 = vrot.lane.b32.xlu1 %v6565_v40, %s16733_s13 }
 0xf0c   : > { %6359 = vrot.lane.b32.xlu0 %v6346_v55, %s16730_s2 }
 0xf0d   : > { %v5835_v35 = vpop.permute.xlu1 %5834 }
 0xf0e   : > { %v15008_v4 = vpop.permute.xlu0 %6769  ;;  %v5844_v55 = vsel %vm1366_vm14, %v5835_v35, %v14981_v23 }
 0xf0f   : > { %6572 = vrot.lane.b32.xlu1 %v6562_v51, %s16733_s13  ;;  %v6774_v34 = vsel %vm16816_vm5, %v14911_v14, %v15008_v4  ;;  %v6566_v51 = vmul.bf16 0, %v14856_v21  ;;  %vm16820_vm5 = vmmov %vm16814_vm12 }
 0xf10   : > { %6353 = vrot.lane.b32.xlu0 %v6343_v47, %s16730_s2 }
 0xf11   : > { %v15016_v20 = vpop.permute.xlu1 %6913 }
 0xf12   : > { %v5764_v9 = vpop.permute.xlu0 %5763 }
 0xf13   : > { %6649 = vrot.lane.b32.xlu1 %v6637_v32, %s16734_s11  ;;  %v5772_v43 = vsel %vm662_vm2, %v5764_v9, %v14939_v57 }
 0xf14   : > { %6430 = vrot.lane.b32.xlu0 %v6418_v36, %s16731_s20  ;;  %7194 = vmatprep.subr.bf16.mxu0 %v5772_v43  ;;  %v6636_v36 = vmul.bf16 %v6627_v13, %v14268_v62  ;;  %v6629_v43 = vsel %vm890_vm4, %v14963_v10, %v14884_v60  ;;  %v6635_v60 = vmul.bf16 %v14952_v63, %v14176_v45 }
 0xf15   : > { %v15024_v22 = vpop.permute.xlu1 %6917 }
 0xf16   : > { %v5768_v24 = vpop.permute.xlu0 %5767 }
 0xf17   : > { %6653 = vrot.lane.b32.xlu1 %v6639_v44, %s16734_s11  ;;  %v5774_v49 = vsel %vm662_vm2, %v5768_v24, %v5770_v19  ;;  %v5773_v1 = vsel %vm662_vm2, %v14939_v57, %v5768_v24  ;;  %v6483_v19 = vsel %vm738_vm1, %v14916_v12, %v14837_v39  ;;  %v6708_v39 = vmul.bf16 %v14973_v16, %v14176_v45 }
 0xf18   : > { %6434 = vrot.lane.b32.xlu0 %v6420_v59, %s16731_s20  ;;  %7280 = vmatprep.subr.bf16.mxu1 %v5774_v49  ;;  %v6492_v37 = vmul.bf16 %v6483_v19, %v14276_v41  ;;  %v6783_v16 = vmul.bf16 %v6774_v34, %v14187_v52  ;;  %v6638_v59 = vmul.bf16 %v6629_v43, %v14276_v41 }
 0xf19   : > { %7281 = vmatpush1.bf16.msra.mxu1 %v5773_v1  ;;  %v15039_v0 = vpop.permute.xlu1 %5911  ;;  %v6854_v24 = vmul.bf16 %v14960_v31, %v14176_v45  ;;  %v6701_v1 = vsel %vm531_vm0, %v14890_v53, %v14987_v6 }
 0xf1a   : > { %v5762_v50 = vpop.permute.xlu0 %5761 }
 0xf1b   : > { %v5771_v57 = vsel %vm662_vm2, %v5762_v50, %v5764_v9  ;;  %6720 = vrot.lane.b32.xlu1 %v6709_v46, %s16722_s29  ;;  %v6931_v50 = vmul.bf16 0, %v15024_v22 }
 0xf1c   : > { %6501 = vrot.lane.b32.xlu0 %v6490_v27, %s16732_s12  ;;  %7195 = vmatpush1.bf16.msra.mxu0 %v5771_v57  ;;  %v6710_v27 = vmul.bf16 %v6701_v1, %v14187_v52  ;;  %v6712_v57 = vmul.bf16 0, %v14903_v8  ;;  %v6775_v8 = vsel %vm16818_vm9, %v15008_v4, %v14924_v38  ;;  %vm16824_vm9 = vcmask 7168  }
 0xf1d   : > { %v15052_v11 = vpop.permute.xlu1 %5915 }
 0xf1e   : > { %v15055_v28 = vpop.permute.xlu0 %6840 }
 0xf1f   : > { %6724 = vrot.lane.b32.xlu1 %v6711_v2, %s16722_s29  ;;  %v6846_v47 = vsel %vm843_vm6, %v14960_v31, %v15055_v28 }
 0xf20   : > { %6505 = vrot.lane.b32.xlu0 %v6492_v37, %s16732_s12  ;;  %v6855_v35 = vmul.bf16 %v6846_v47, %v14268_v62  ;;  %v6773_v37 = vsel %vm16817_vm10, %v14998_v56, %v14911_v14  ;;  %vm16823_vm10 = vmmov %vm16820_vm5 }
 0xf21   : > { %v15061_v12 = vpop.permute.xlu1 %6984 }
 0xf22   : > { %v15068_v26 = vpop.permute.xlu0 %6844  ;;  %v7000_v47 = vmul.bf16 %v15061_v12, %v14176_v45 }
 0xf23   : > { %6718 = vrot.lane.b32.xlu1 %v6708_v39, %s16722_s29  ;;  %v6848_v33 = vsel %vm843_vm6, %v14968_v61, %v15068_v26  ;;  %v6782_v39 = vmul.bf16 %v6773_v37, %v14268_v62 }
 0xf24   : > { %6499 = vrot.lane.b32.xlu0 %v6489_v42, %s16732_s12 }
 0xf25   : > { %v15076_v54 = vpop.permute.xlu1 %6988 }
 0xf26   : > { %v5839_v3 = vpop.permute.xlu0 %5838 }
 0xf27   : > { %6795 = vrot.lane.b32.xlu1 %v6783_v16, %s16721_s24  ;;  %v5845_v40 = vsel %vm1366_vm14, %v14981_v23, %v5839_v3  ;;  %v5846_v21 = vsel %vm1366_vm14, %v5839_v3, %v14995_v25  ;;  %v6784_v16 = vmul.bf16 %v6775_v8, %v14276_v41  ;;  %v11108_v8 = vld [vmem:[%s16652_s8] ss:$16 sps:$4 sm:$0xff]  }
 0xf28   : > { %6576 = vrot.lane.b32.xlu0 %v6564_v30, %s16733_s13  ;;  %7196 = vmatprep.subr.bf16.mxu0 %v5845_v40  ;;  %v6781_v40 = vmul.bf16 %v14998_v56, %v14176_v45 }
 0xf29   : > { %7197 = vmatpush1.bf16.msra.mxu0 %v5844_v55  ;;  %v15086_v7 = vpop.permute.xlu1 %5982 }
 0xf2a   : > { %v5843_v48 = vpop.permute.xlu0 %5842 }
 0xf2b   : > { %6799 = vrot.lane.b32.xlu1 %v6785_v58, %s16721_s24  ;;  %v5847_v23 = vsel %vm1366_vm14, %v14995_v25, %v5843_v48  ;;  %v6857_v25 = vmul.bf16 %v6848_v33, %v14276_v41  ;;  %v6847_v58 = vsel %vm843_vm6, %v15055_v28, %v14968_v61  ;;  %v7145_v28 = vld [vmem:[%s16821_s21 + $0x8] sm:$0xff] }
 0xf2c   : > { %6580 = vrot.lane.b32.xlu0 %v6566_v51, %s16733_s13  ;;  %7282 = vmatprep.subr.bf16.mxu1 %v5847_v23  ;;  %v6856_v13 = vmul.bf16 %v6847_v58, %v14187_v52 }
 0xf2d   : > { %7283 = vmatpush1.bf16.msra.mxu1 %v5846_v21  ;;  %v15102_v32 = vpop.permute.xlu1 %5986  ;;  %v6858_v21 = vmul.bf16 0, %v15068_v26 }
 0xf2e   : > { %v15108_v9 = vpop.permute.xlu0 %6911 }
 0xf2f   : > { %6866 = vrot.lane.b32.xlu1 %v6855_v35, %s16717_s16  ;;  %v6919_v33 = vsel %vm767_vm7, %v15108_v9, %v15016_v20 }
 0xf30   : > { %6647 = vrot.lane.b32.xlu0 %v6636_v36, %s16734_s11  ;;  %v11102_v36 = vld [vmem:[%s16647_s3 + $0x4] ss:$16 sps:$4 sm:$0xff]   ;;  %v6928_v26 = vmul.bf16 %v6919_v33, %v14268_v62 }
 0xf31   : > { %v5981_v44 = vpop.permute.xlu1 %5980 }
 0xf32   : > { %v15117_v15 = vpop.permute.xlu0 %6915  ;;  %v5990_v48 = vsel %vm16819_vm13, %v5981_v44, %v15086_v7  ;;  %v11104_v44 = vld [vmem:[%s16647_s3 + $0xc] ss:$16 sps:$4 sm:$0xff]   ;;  %vm16826_vm13 = vmmov %vm16824_vm9 }
 0xf33   : > { %6870 = vrot.lane.b32.xlu1 %v6857_v25, %s16717_s16  ;;  %v6920_v10 = vsel %vm767_vm7, %v15016_v20, %v15117_v15  ;;  %v6921_v20 = vsel %vm767_vm7, %v15117_v15, %v15024_v22  ;;  %v11106_v22 = vld [vmem:[%s16647_s3 + $0x20] ss:$16 sps:$4 sm:$0xff]  }
 0xf34   : > { %6651 = vrot.lane.b32.xlu0 %v6638_v59, %s16734_s11  ;;  %v6929_v31 = vmul.bf16 %v6920_v10, %v14187_v52  ;;  %v6930_v10 = vmul.bf16 %v6921_v20, %v14276_v41 }
 0xf35   : > { %v15123_v29 = vpop.permute.xlu1 %6057 }
 0xf36   : > { %v5910_v49 = vpop.permute.xlu0 %5909 }
 0xf37   : > { %6864 = vrot.lane.b32.xlu1 %v6854_v24, %s16717_s16  ;;  %v5918_v46 = vsel %vm1442_vm15, %v5910_v49, %v15039_v0 }
 0xf38   : > { %6645 = vrot.lane.b32.xlu0 %v6635_v60, %s16734_s11  ;;  %7198 = vmatprep.subr.bf16.mxu0 %v5918_v46  ;;  %v11115_v46 = vld [vmem:[%s16647_s3 + $0x28] ss:$16 sps:$4 sm:$0xff]  }
 0xf39   : > { %v15138_v63 = vpop.permute.xlu1 %6061 }
 0xf3a   : > { %v5914_v17 = vpop.permute.xlu0 %5913 }
 0xf3b   : > { %6941 = vrot.lane.b32.xlu1 %v6929_v31, %s16718_s23  ;;  %v5920_v53 = vsel %vm1442_vm15, %v5914_v17, %v15052_v11  ;;  %v5919_v6 = vsel %vm1442_vm15, %v15039_v0, %v5914_v17 }
 0xf3c   : > { %6722 = vrot.lane.b32.xlu0 %v6710_v27, %s16722_s29  ;;  %7284 = vmatprep.subr.bf16.mxu1 %v5920_v53 }
 0xf3d   : > { %7285 = vmatpush1.bf16.msra.mxu1 %v5919_v6  ;;  %v15148_v19 = vpop.permute.xlu1 %6136 }
 0xf3e   : > { %v5908_v2 = vpop.permute.xlu0 %5907 }
 0xf3f   : > { %v5917_v11 = vsel %vm1442_vm15, %v5908_v2, %v5910_v49  ;;  %6945 = vrot.lane.b32.xlu1 %v6931_v50, %s16718_s23 }
 0xf40   : > { %6726 = vrot.lane.b32.xlu0 %v6712_v57, %s16722_s29  ;;  %7199 = vmatpush1.bf16.msra.mxu0 %v5917_v11  ;;  %v7144_v57 = vld [vmem:[%s16822_s22] sm:$0xff] }
 0xf41   : > { %v15157_v0 = vpop.permute.xlu1 %6140 }
 0xf42   : > { %v15160_v42 = vpop.permute.xlu0 %6986 }
 0xf43   : > { %v6992_v14 = vsel %vm691_vm8, %v15061_v12, %v15160_v42  ;;  %v6993_v31 = vsel %vm691_vm8, %v15160_v42, %v15076_v54 }
 0xf44   : > { %v7001_v34 = vmul.bf16 %v6992_v14, %v14268_v62  ;;  %6793 = vrot.lane.b32.xlu0 %v6782_v39, %s16721_s24  ;;  %v11111_v39 = vld [vmem:[%s16647_s3] ss:$16 sps:$4 sm:$0xff]  }
 0xf45   : > { %v15170_v18 = vpop.permute.xlu1 %6134 }
 0xf46   : > { %v15173_v30 = vpop.permute.xlu0 %6990  ;;  %7012 = vrot.lane.b32.xlu1 %v7001_v34, %s16719_s28  ;;  %v11113_v34 = vld [vmem:[%s16652_s8 + $0xc] ss:$16 sps:$4 sm:$0xff]  }
 0xf47   : > { %v6994_v38 = vsel %vm691_vm8, %v15076_v54, %v15173_v30 }
 0xf48   : > { %v7003_v4 = vmul.bf16 %v6994_v38, %v14276_v41  ;;  %6797 = vrot.lane.b32.xlu0 %v6784_v16, %s16721_s24  ;;  %v11112_v16 = vld [vmem:[%s16647_s3 + $0x8] ss:$16 sps:$4 sm:$0xff]  }
 0xf49   : > { %v15181_v3 = vpop.permute.xlu1 %6211 }
 0xf4a   : > { %v5985_v55 = vpop.permute.xlu0 %5984  ;;  %7016 = vrot.lane.b32.xlu1 %v7003_v4, %s16719_s28 }
 0xf4b   : > { %v5991_v51 = vsel %vm16814_vm12, %v15086_v7, %v5985_v55  ;;  %v5992_v12 = vsel %vm16823_vm10, %v5985_v55, %v15102_v32  ;;  %vm16825_vm12 = vmmov %vm16824_vm9  ;;  %vm16828_vm10 = vcmask 1039360  }
 0xf4c   : > { %6791 = vrot.lane.b32.xlu0 %v6781_v40, %s16721_s24  ;;  %7200 = vmatprep.subr.bf16.mxu0 %v5991_v51 }
 0xf4d   : > { %7201 = vmatpush1.bf16.msra.mxu0 %v5990_v48  ;;  %v15196_v56 = vpop.permute.xlu1 %6215 }
 0xf4e   : > { %v5989_v23 = vpop.permute.xlu0 %5988  ;;  %7010 = vrot.lane.b32.xlu1 %v7000_v47, %s16719_s28 }
 0xf4f   : > { %v5993_v61 = vsel %vm16820_vm5, %v15102_v32, %v5989_v23  ;;  %vm16827_vm5 = vmmov %vm16824_vm9 }
 0xf50   : > { %6868 = vrot.lane.b32.xlu0 %v6856_v13, %s16717_s16  ;;  %7286 = vmatprep.subr.bf16.mxu1 %v5993_v61 }
 0xf51   : > { %7287 = vmatpush1.bf16.msra.mxu1 %v5992_v12  ;;  %v15208_v7 = vpop.permute.xlu1 %6282 }
 0xf52   : > { %v6056_v35 = vpop.permute.xlu0 %6055  ;;  %7153 = vperm.xlu1 %10599, %v7145_v28  }
 0xf53   : > { %v6064_v43 = vsel %vm16824_vm9, %v6056_v35, %v15123_v29  ;;  %vm16829_vm9 = vmmov %vm16828_vm10 }
 0xf54   : > { %6872 = vrot.lane.b32.xlu0 %v6858_v21, %s16717_s16  ;;  %7202 = vmatprep.subr.bf16.mxu0 %v6064_v43  ;;  %v6144_v17 = vsel %vm16829_vm9, %v15170_v18, %v15148_v19 }
 0xf55   : > { %v15220_v32 = vpop.permute.xlu1 %6286 }
 0xf56   : > { %v6060_v25 = vpop.permute.xlu0 %6059  ;;  %7389 = vrot.lane.b32.xlu1 %v11102_v36, %s16719_s28 }
 0xf57   : > { %v6066_v59 = vsel %vm16825_vm12, %v6060_v25, %v15138_v63  ;;  %v6065_v24 = vsel %vm16826_vm13, %v15123_v29, %v6060_v25  ;;  %v7002_v63 = vmul.bf16 %v6993_v31, %v14187_v52  ;;  %vm16830_vm12 = vmmov %vm16829_vm9 }
 0xf58   : > { %6939 = vrot.lane.b32.xlu0 %v6928_v26, %s16718_s23  ;;  %7288 = vmatprep.subr.bf16.mxu1 %v6066_v59  ;;  %vm16831_vm13 = vmmov %vm16829_vm9 }
 0xf59   : > { %7289 = vmatpush1.bf16.msra.mxu1 %v6065_v24  ;;  %v6281_v60 = vpop.permute.xlu1 %6280 }
 0xf5a   : > { %v6054_v49 = vpop.permute.xlu0 %6053  ;;  %7290 = vmatprep.subr.bf16.mxu1 %v14276_v41  ;;  %7393 = vrot.lane.b32.xlu1 %v11104_v44, %s16719_s28  ;;  %v6927_v41 = vmul.bf16 %v15108_v9, %v14176_v45 }
 0xf5b   : > { %v6063_v15 = vsel %vm16827_vm5, %v6054_v49, %v6056_v35  ;;  %vm16832_vm5 = vcmask 392192  }
 0xf5c   : > { %6943 = vrot.lane.b32.xlu0 %v6930_v10, %s16718_s23  ;;  %7203 = vmatpush1.bf16.msra.mxu0 %v6063_v15 }
 0xf5d   : > { %7204 = vmatprep.subr.bf16.mxu0 %v14268_v62  ;;  %7291 = vmatpush1.bf16.msra.mxu1 %v14187_v52  ;;  %v15245_v29 = vpop.permute.xlu1 %6357  ;;  %v7004_v52 = vmul.bf16 0, %v15173_v30 }
 0xf5e   : > { %v6139_v1 = vpop.permute.xlu0 %6138  ;;  %7460 = vrot.lane.b32.xlu1 %v11106_v22, %s16718_s23 }
 0xf5f   : > { %v6145_v62 = vsel %vm16828_vm10, %v15148_v19, %v6139_v1  ;;  %vm16833_vm10 = vcmask 982016  }
 0xf60   : > { %6937 = vrot.lane.b32.xlu0 %v6927_v41, %s16718_s23  ;;  %7205 = vmatpush1.bf16.msra.mxu0 %v14176_v45  ;;  %v6146_v45 = vsel %vm16831_vm13, %v6139_v1, %v15157_v0  ;;  %vm16834_vm9 = vmmov %vm16833_vm10 }
 0xf61   : > { %7206 = vmatprep.subr.bf16.mxu0 %v6145_v62  ;;  %v6362_v9 = vpop.permute.xlu1 %6361  ;;  %v6290_v4 = vsel %vm16834_vm9, %v6281_v60, %v15208_v7  ;;  %vm16836_vm13 = vmmov %vm16834_vm9 }
 0xf62   : > { %v6143_v27 = vpop.permute.xlu0 %6142  ;;  %7464 = vrot.lane.b32.xlu1 %v11115_v46, %s16718_s23 }
 0xf63   : > { %v6147_v54 = vsel %vm16830_vm12, %v15157_v0, %v6143_v27  ;;  %vm16835_vm12 = vmmov %vm16832_vm5 }
 0xf64   : > { %7014 = vrot.lane.b32.xlu0 %v7002_v63, %s16719_s28  ;;  %7207 = vmatpush1.bf16.msra.mxu0 %v6144_v17 }
 0xf65   : > { %7292 = vmatprep.subr.bf16.mxu1 %v6147_v54  ;;  %v6429_v53 = vpop.permute.xlu1 %6428 }
 0xf66   : > { %7293 = vmatpush1.bf16.msra.mxu1 %v6146_v45  ;;  %v6210_v6 = vpop.permute.xlu0 %6209 }
 0xf67   : > { %v6218_v50 = vsel %vm1489_vm11, %v6210_v6, %v15181_v3 }
 0xf68   : > { %7018 = vrot.lane.b32.xlu0 %v7004_v52, %s16719_s28  ;;  %7208 = vmatprep.subr.bf16.mxu0 %v6218_v50 }
 0xf69   : > { %v6433_v19 = vpop.permute.xlu1 %6432 }
 0xf6a   : > { %v6214_v2 = vpop.permute.xlu0 %6213 }
 0xf6b   : > { %v6220_v37 = vsel %vm1489_vm11, %v6214_v2, %v15196_v56  ;;  %v6219_v11 = vsel %vm1489_vm11, %v15181_v3, %v6214_v2 }
 0xf6c   : > { %7148 = vperm.xlu0 %10598, %v7144_v57   ;;  %7294 = vmatprep.subr.bf16.mxu1 %v6220_v37 }
 0xf6d   : > { %7295 = vmatpush1.bf16.msra.mxu1 %v6219_v11  ;;  %v6427_v0 = vpop.permute.xlu1 %6426 }
 0xf6e   : > { %v6208_v42 = vpop.permute.xlu0 %6207  ;;  %v6436_v33 = vsel %vm691_vm8, %v6427_v0, %v6429_v53 }
 0xf6f   : > { %v6217_v14 = vsel %vm1489_vm11, %v6208_v42, %v6210_v6 }
 0xf70   : > { %7209 = vmatpush1.bf16.msra.mxu0 %v6217_v14  ;;  %7297 = vmatmul.mubr.bf16.vlgmr.msra.gmra.mrb[12].mxu1 %v11108_v8 }
 0xf71   : > { %v6504_v18 = vpop.permute.xlu1 %6503  ;;  %7387 = vrot.lane.b32.xlu0 %v11111_v39, %s16719_s28  ;;  %10300 = vmatprep.mubr.msk.bf16.mxu1 %vm16832_vm5, %v11113_v34  ;;  %vm16837_vm5 = vmmov %vm16834_vm9 }
 0xf72   : > { %v6285_v30 = vpop.permute.xlu0 %6284 }
 0xf73   : > { %v6291_v38 = vsel %vm16833_vm10, %v15208_v7, %v6285_v30  ;;  %7211 = vmatmul.mubr.bf16.vlgmr.msra.gmra.mrb[12].mxu0 %v11108_v8  ;;  %v6292_v58 = vsel %vm16837_vm5, %v6285_v30, %v15220_v32  ;;  %vm16838_vm10 = vcmask 973824   ;;  %vm16842_vm5 = vcmask 531456  }
 0xf74   : > { %7221 = vmatprep.subr.bf16.mxu0 %v6291_v38  ;;  %10299 = vmatprep.mubr.msk.bf16.mxu0 %vm16835_vm12, %v11113_v34  ;;  %vm16839_vm9 = vmmov %vm16838_vm10 }
 0xf75   : > { %7222 = vmatpush1.bf16.msra.mxu0 %v6290_v4  ;;  %v6508_v3 = vpop.permute.xlu1 %6507  ;;  %7391 = vrot.lane.b32.xlu0 %v11112_v16, %s16719_s28  ;;  %vm16840_vm12 = vmmov %vm16839_vm9 }
 0xf76   : > { %v6289_v40 = vpop.permute.xlu0 %6288 }
 0xf77   : > { %v6293_v55 = vsel %vm16836_vm13, %v15220_v32, %v6289_v40  ;;  %vm16841_vm13 = vmmov %vm16839_vm9 }
 0xf78   : > { %7307 = vmatprep.subr.bf16.mxu1 %v6293_v55 }
 0xf79   : > { %7308 = vmatpush1.bf16.msra.mxu1 %v6292_v58  ;;  %v6575_v51 = vpop.permute.xlu1 %6574 }
 0xf7a   : > { %v6356_v47 = vpop.permute.xlu0 %6355 }
 0xf7b   : > { %v6364_v48 = vsel %vm16838_vm10, %v6356_v47, %v15245_v29  ;;  %vm16843_vm10 = vmmov %vm16842_vm5 }
 0xf7c   : > { %7223 = vmatprep.subr.bf16.mxu0 %v6364_v48 }
 0xf7d   : > { %v6579_v56 = vpop.permute.xlu1 %6578 }
 0xf7e   : > { %v6360_v13 = vpop.permute.xlu0 %6359 }
 0xf7f   : > { %v6366_v23 = vsel %vm16839_vm9, %v6360_v13, %v6362_v9  ;;  %v6365_v61 = vsel %vm16840_vm12, %v15245_v29, %v6360_v13  ;;  %vm16844_vm9 = vmmov %vm16842_vm5 }
 0xf80   : > { %7309 = vmatprep.subr.bf16.mxu1 %v6366_v23  ;;  %vm16845_vm12 = vmmov %vm16842_vm5 }
 0xf81   : > { %7310 = vmatpush1.bf16.msra.mxu1 %v6365_v61  ;;  %v6573_v28 = vpop.permute.xlu1 %6572 }
 0xf82   : > { %v6354_v12 = vpop.permute.xlu0 %6353  ;;  %v6582_v31 = vsel %vm843_vm6, %v6573_v28, %v6575_v51 }
 0xf83   : > { %v6363_v7 = vsel %vm16841_vm13, %v6354_v12, %v6356_v47  ;;  %vm16846_vm13 = vmmov %vm16842_vm5 }
 0xf84   : > { %7224 = vmatpush1.bf16.msra.mxu0 %v6363_v7 }
 0xf85   : > { %v6650_v21 = vpop.permute.xlu1 %6649 }
 0xf86   : > { %v6431_v35 = vpop.permute.xlu0 %6430 }
 0xf87   : > { %v6437_v36 = vsel %vm691_vm8, %v6429_v53, %v6431_v35  ;;  %v6438_v25 = vsel %vm691_vm8, %v6431_v35, %v6433_v19 }
 0xf88   : > { %7225 = vmatprep.subr.bf16.mxu0 %v6437_v36 }
 0xf89   : > { %7226 = vmatpush1.bf16.msra.mxu0 %v6436_v33  ;;  %v6654_v43 = vpop.permute.xlu1 %6653 }
 0xf8a   : > { %v6435_v32 = vpop.permute.xlu0 %6434 }
 0xf8b   : > { %v6439_v26 = vsel %vm691_vm8, %v6433_v19, %v6435_v32 }
 0xf8c   : > { %7311 = vmatprep.subr.bf16.mxu1 %v6439_v26 }
 0xf8d   : > { %7312 = vmatpush1.bf16.msra.mxu1 %v6438_v25  ;;  %v6721_v44 = vpop.permute.xlu1 %6720 }
 0xf8e   : > { %v6502_v20 = vpop.permute.xlu0 %6501 }
 0xf8f   : > { %v6510_v59 = vsel %vm767_vm7, %v6502_v20, %v6504_v18 }
 0xf90   : > { %7227 = vmatprep.subr.bf16.mxu0 %v6510_v59 }
 0xf91   : > { %v6725_v24 = vpop.permute.xlu1 %6724 }
 0xf92   : > { %v6506_v60 = vpop.permute.xlu0 %6505 }
 0xf93   : > { %v6512_v10 = vsel %vm767_vm7, %v6506_v60, %v6508_v3  ;;  %v6511_v49 = vsel %vm767_vm7, %v6504_v18, %v6506_v60 }
 0xf94   : > { %7313 = vmatprep.subr.bf16.mxu1 %v6512_v10 }
 0xf95   : > { %7314 = vmatpush1.bf16.msra.mxu1 %v6511_v49  ;;  %v6719_v22 = vpop.permute.xlu1 %6718 }
 0xf96   : > { %v6500_v15 = vpop.permute.xlu0 %6499  ;;  %v6728_v11 = vsel %vm531_vm0, %v6719_v22, %v6721_v44 }
 0xf97   : > { %v6509_v29 = vsel %vm767_vm7, %v6500_v15, %v6502_v20  ;;  %v11117_v20 = vld [vmem:[%s16652_s8 + $0x8] ss:$16 sps:$4 sm:$0xff]   ;;  %v11118_v15 = vld [vmem:[%s16647_s3 + $0x40] ss:$16 sps:$4 sm:$0xff]  }
 0xf98   : > { %7228 = vmatpush1.bf16.msra.mxu0 %v6509_v29  ;;  %v11120_v29 = vld [vmem:[%s16647_s3 + $0x48] ss:$16 sps:$4 sm:$0xff]  }
 0xf99   : > { %v6796_v41 = vpop.permute.xlu1 %6795 }
 0xf9a   : > { %v6577_v1 = vpop.permute.xlu0 %6576 }
 0xf9b   : > { %v6583_v46 = vsel %vm843_vm6, %v6575_v51, %v6577_v1  ;;  %v6584_v27 = vsel %vm843_vm6, %v6577_v1, %v6579_v56 }
 0xf9c   : > { %7229 = vmatprep.subr.bf16.mxu0 %v6583_v46  ;;  %v11124_v46 = vld [vmem:[%s16647_s3 + $0x68] ss:$16 sps:$4 sm:$0xff]  }
 0xf9d   : > { %7230 = vmatpush1.bf16.msra.mxu0 %v6582_v31  ;;  %v6800_v9 = vpop.permute.xlu1 %6799 }
 0xf9e   : > { %v6581_v62 = vpop.permute.xlu0 %6580 }
 0xf9f   : > { %v6585_v63 = vsel %vm843_vm6, %v6579_v56, %v6581_v62 }
 0xfa0   : > { %7315 = vmatprep.subr.bf16.mxu1 %v6585_v63  ;;  %v11128_v63 = vld [vmem:[%s16647_s3 + $0x24] ss:$16 sps:$4 sm:$0xff]  }
 0xfa1   : > { %7316 = vmatpush1.bf16.msra.mxu1 %v6584_v27  ;;  %v6867_v45 = vpop.permute.xlu1 %6866  ;;  %v11129_v27 = vld [vmem:[%s16647_s3 + $0x88] ss:$16 sps:$4 sm:$0xff]  }
 0xfa2   : > { %v6648_v17 = vpop.permute.xlu0 %6647 }
 0xfa3   : > { %v6656_v54 = vsel %vm16842_vm5, %v6648_v17, %v6650_v21 }
 0xfa4   : > { %7231 = vmatprep.subr.bf16.mxu0 %v6656_v54  ;;  %v11132_v54 = vld [vmem:[%s16647_s3 + $0xa0] ss:$16 sps:$4 sm:$0xff]  }
 0xfa5   : > { %v6871_v19 = vpop.permute.xlu1 %6870 }
 0xfa6   : > { %v6652_v53 = vpop.permute.xlu0 %6651 }
 0xfa7   : > { %v6658_v52 = vsel %vm16843_vm10, %v6652_v53, %v6654_v43  ;;  %v6657_v6 = vsel %vm16844_vm9, %v6650_v21, %v6652_v53  ;;  %v11135_v53 = vld [vmem:[%s16647_s3 + $0xa8] ss:$16 sps:$4 sm:$0xff]   ;;  %vm16847_vm10 = vmmov %vm16842_vm5  ;;  %vm16848_vm9 = vcmask 973824  }
 0xfa8   : > { %7317 = vmatprep.subr.bf16.mxu1 %v6658_v52  ;;  %v11137_v52 = vld [vmem:[%s16647_s3 + $0x4c] ss:$16 sps:$4 sm:$0xff]  }
 0xfa9   : > { %7318 = vmatpush1.bf16.msra.mxu1 %v6657_v6  ;;  %v6865_v0 = vpop.permute.xlu1 %6864  ;;  %v11138_v6 = vld [vmem:[%s16647_s3 + $0xc0] ss:$16 sps:$4 sm:$0xff]  }
 0xfaa   : > { %v6646_v50 = vpop.permute.xlu0 %6645  ;;  %v6874_v47 = vsel %vm814_vm3, %v6865_v0, %v6867_v45  ;;  %v11149_v0 = vld [vmem:[%s16647_s3 + $0x8c] ss:$16 sps:$4 sm:$0xff]  }
 0xfab   : > { %v6655_v57 = vsel %vm16845_vm12, %v6646_v50, %v6648_v17  ;;  %v11131_v17 = vld [vmem:[%s16647_s3 + $0x2c] ss:$16 sps:$4 sm:$0xff]   ;;  %v11140_v50 = vld [vmem:[%s16647_s3 + $0x64] ss:$16 sps:$4 sm:$0xff]   ;;  %vm16849_vm12 = vmmov %vm16848_vm9 }
 0xfac   : > { %7232 = vmatpush1.bf16.msra.mxu0 %v6655_v57  ;;  %v11143_v57 = vld [vmem:[%s16647_s3 + $0x6c] ss:$16 sps:$4 sm:$0xff]  }
 0xfad   : > { %v6942_v34 = vpop.permute.xlu1 %6941 }
 0xfae   : > { %v6723_v2 = vpop.permute.xlu0 %6722 }
 0xfaf   : > { %v6729_v37 = vsel %vm531_vm0, %v6721_v44, %v6723_v2  ;;  %v6730_v8 = vsel %vm531_vm0, %v6723_v2, %v6725_v24  ;;  %v11144_v2 = vld [vmem:[%s16647_s3 + $0xe0] ss:$16 sps:$4 sm:$0xff]  }
 0xfb0   : > { %7233 = vmatprep.subr.bf16.mxu0 %v6729_v37  ;;  %v11146_v37 = vld [vmem:[%s16647_s3 + $0x84] ss:$16 sps:$4 sm:$0xff]  }
 0xfb1   : > { %7234 = vmatpush1.bf16.msra.mxu0 %v6728_v11  ;;  %v6946_v4 = vpop.permute.xlu1 %6945  ;;  %v11147_v11 = vld [vmem:[%s16647_s3 + $0xe8] ss:$16 sps:$4 sm:$0xff]  }
 0xfb2   : > { %v6727_v39 = vpop.permute.xlu0 %6726 }
 0xfb3   : > { %v6731_v42 = vsel %vm531_vm0, %v6725_v24, %v6727_v39  ;;  %v11150_v39 = vld [vmem:[%s16647_s3 + $0x100] ss:$16 sps:$4 sm:$0xff]  }
 0xfb4   : > { %7319 = vmatprep.subr.bf16.mxu1 %v6731_v42  ;;  %v11152_v42 = vld [vmem:[%s16647_s3 + $0xa4] ss:$16 sps:$4 sm:$0xff]  }
 0xfb5   : > { %7320 = vmatpush1.bf16.msra.mxu1 %v6730_v8  ;;  %v11153_v8 = vld [vmem:[%s16647_s3 + $0x108] ss:$16 sps:$4 sm:$0xff]  }
 0xfb6   : > { %v6794_v14 = vpop.permute.xlu0 %6793 }
 0xfb7   : > { %v6802_v18 = vsel %vm890_vm4, %v6794_v14, %v6796_v41 }
 0xfb8   : > { %7235 = vmatprep.subr.bf16.mxu0 %v6802_v18  ;;  %v7013_v55 = vpop.permute.xlu1 %7012  ;;  %v11158_v18 = vld [vmem:[%s16647_s3 + $0xc4] ss:$16 sps:$4 sm:$0xff]  }
 0xfba   : > { %v6798_v16 = vpop.permute.xlu0 %6797 }
 0xfbb   : > { %v6804_v30 = vsel %vm890_vm4, %v6798_v16, %v6800_v9  ;;  %v6803_v38 = vsel %vm890_vm4, %v6796_v41, %v6798_v16  ;;  %v11122_v41 = vld [vmem:[%s16647_s3 + $0x60] ss:$16 sps:$4 sm:$0xff]   ;;  %v11159_v16 = vld [vmem:[%s16647_s3 + $0x128] ss:$16 sps:$4 sm:$0xff]  }
 0xfbc   : > { %7321 = vmatprep.subr.bf16.mxu1 %v6804_v30  ;;  %v7017_v56 = vpop.permute.xlu1 %7016  ;;  %v11126_v9 = vld [vmem:[%s16647_s3 + $0x80] ss:$16 sps:$4 sm:$0xff]   ;;  %v11161_v30 = vld [vmem:[%s16647_s3 + $0xcc] ss:$16 sps:$4 sm:$0xff]  }
 0xfbd   : > { %7322 = vmatpush1.bf16.msra.mxu1 %v6803_v38  ;;  %v11162_v38 = vld [vmem:[%s16647_s3 + $0x140] ss:$16 sps:$4 sm:$0xff]  }
 0xfbe   : > { %v6792_v3 = vpop.permute.xlu0 %6791 }
 0xfbf   : > { %v6801_v40 = vsel %vm890_vm4, %v6792_v3, %v6794_v14  ;;  %v11155_v14 = vld [vmem:[%s16647_s3 + $0xac] ss:$16 sps:$4 sm:$0xff]   ;;  %v11165_v3 = vld [vmem:[%s16647_s3 + $0x148] ss:$16 sps:$4 sm:$0xff]  }
 0xfc0   : > { %7236 = vmatpush1.bf16.msra.mxu0 %v6801_v40  ;;  %v7011_v12 = vpop.permute.xlu1 %7010  ;;  %v11167_v40 = vld [vmem:[%s16647_s3 + $0xec] ss:$16 sps:$4 sm:$0xff]  }
 0xfc1   : > { %v7020_v44 = vsel %vm662_vm2, %v7011_v12, %v7013_v55  ;;  %v11183_v12 = vld [vmem:[%s16647_s3 + $0x1c8] ss:$16 sps:$4 sm:$0xff]  }
 0xfc2   : > { %v6869_v58 = vpop.permute.xlu0 %6868 }
 0xfc3   : > { %v6875_v51 = vsel %vm814_vm3, %v6867_v45, %v6869_v58  ;;  %v6876_v23 = vsel %vm814_vm3, %v6869_v58, %v6871_v19  ;;  %v11134_v45 = vld [vmem:[%s16647_s3 + $0x44] ss:$16 sps:$4 sm:$0xff]  }
 0xfc4   : > { %7237 = vmatprep.subr.bf16.mxu0 %v6875_v51  ;;  %v11170_v58 = vld [vmem:[%s16647_s3 + $0x104] ss:$16 sps:$4 sm:$0xff]   ;;  %v11171_v51 = vld [vmem:[%s16647_s3 + $0x168] ss:$16 sps:$4 sm:$0xff]  }
 0xfc5   : > { %7238 = vmatpush1.bf16.msra.mxu0 %v6874_v47  ;;  %v11173_v47 = vld [vmem:[%s16647_s3 + $0x10c] ss:$16 sps:$4 sm:$0xff]  }
 0xfc6   : > { %v6873_v48 = vpop.permute.xlu0 %6872 }
 0xfc7   : > { %v6877_v13 = vsel %vm814_vm3, %v6871_v19, %v6873_v48  ;;  %v11141_v19 = vld [vmem:[%s16647_s3 + $0xc8] ss:$16 sps:$4 sm:$0xff]   ;;  %v11174_v48 = vld [vmem:[%s16647_s3 + $0x180] ss:$16 sps:$4 sm:$0xff]  }
 0xfc8   : > { %7323 = vmatprep.subr.bf16.mxu1 %v6877_v13  ;;  %v11177_v13 = vld [vmem:[%s16647_s3 + $0x188] ss:$16 sps:$4 sm:$0xff]  }
 0xfc9   : > { %7324 = vmatpush1.bf16.msra.mxu1 %v6876_v23  ;;  %v11179_v23 = vld [vmem:[%s16647_s3 + $0x12c] ss:$16 sps:$4 sm:$0xff]  }
 0xfca   : > { %v6940_v61 = vpop.permute.xlu0 %6939 }
 0xfcb   : > { %v6948_v28 = vsel %vm738_vm1, %v6940_v61, %v6942_v34 }
 0xfcc   : > { %7239 = vmatprep.subr.bf16.mxu0 %v6948_v28  ;;  %v11182_v28 = vld [vmem:[%s16647_s3 + $0x144] ss:$16 sps:$4 sm:$0xff]  }
 0xfce   : > { %v6944_v7 = vpop.permute.xlu0 %6943 }
 0xfcf   : > { %v6950_v21 = vsel %vm738_vm1, %v6944_v7, %v6946_v4  ;;  %v6949_v35 = vsel %vm738_vm1, %v6942_v34, %v6944_v7  ;;  %v11156_v34 = vld [vmem:[%s16647_s3 + $0x120] ss:$16 sps:$4 sm:$0xff]   ;;  %v11164_v4 = vld [vmem:[%s16647_s3 + $0xe4] ss:$16 sps:$4 sm:$0xff]   ;;  %v11185_v7 = vld [vmem:[%s16647_s3 + $0x14c] ss:$16 sps:$4 sm:$0xff]  }
 0xfd0   : > { %7325 = vmatprep.subr.bf16.mxu1 %v6950_v21  ;;  %v11186_v21 = vld [vmem:[%s16647_s3 + $0x1e0] ss:$16 sps:$4 sm:$0xff]  }
 0xfd1   : > { %7326 = vmatpush1.bf16.msra.mxu1 %v6949_v35  ;;  %v15343_v36 = vpop.permute.xlu1 %7153  ;;  %v11188_v35 = vld [vmem:[%s16647_s3 + $0x164] ss:$16 sps:$4 sm:$0xff]  }
 0xfd2   : > { %v6938_v33 = vpop.permute.xlu0 %6937 }
 0xfd3   : > { %v6947_v43 = vsel %vm738_vm1, %v6938_v33, %v6940_v61  ;;  %v11180_v61 = vld [vmem:[%s16647_s3 + $0x1c0] ss:$16 sps:$4 sm:$0xff]   ;;  %v11189_v33 = vld [vmem:[%s16647_s3 + $0x1e8] ss:$16 sps:$4 sm:$0xff]  }
 0xfd4   : > { %7240 = vmatpush1.bf16.msra.mxu0 %v6947_v43  ;;  %v11191_v43 = vld [vmem:[%s16647_s3 + $0x16c] ss:$16 sps:$4 sm:$0xff]  }
 0xfd5   : > { %v15346_v32 = vpop.permute.xlu1 %7389 }
 0xfd6   : > { %v7015_v26 = vpop.permute.xlu0 %7014 }
 0xfd7   : > { %v7021_v25 = vsel %vm662_vm2, %v7013_v55, %v7015_v26  ;;  %v7022_v10 = vsel %vm662_vm2, %v7015_v26, %v7017_v56  ;;  %v11168_v55 = vld [vmem:[%s16647_s3 + $0x160] ss:$16 sps:$4 sm:$0xff]  }
 0xfd8   : > { %7241 = vmatprep.subr.bf16.mxu0 %v7021_v25  ;;  %v11192_v26 = vld [vmem:[%s16647_s3 + $0x200] ss:$16 sps:$4 sm:$0xff]   ;;  %v11194_v25 = vld [vmem:[%s16647_s3 + $0x184] ss:$16 sps:$4 sm:$0xff]  }
 0xfd9   : > { %7242 = vmatpush1.bf16.msra.mxu0 %v7020_v44  ;;  %v15353_v59 = vpop.permute.xlu1 %7393  ;;  %v11201_v44 = vld [vmem:[%s16647_s3 + $0x208] ss:$16 sps:$4 sm:$0xff]  }
 0xfda   : > { %v7019_v24 = vpop.permute.xlu0 %7018 }
 0xfdb   : > { %v7023_v60 = vsel %vm662_vm2, %v7017_v56, %v7019_v24  ;;  %v11176_v56 = vld [vmem:[%s16647_s3 + $0x124] ss:$16 sps:$4 sm:$0xff]  }
 0xfdc   : > { %7254 = vmatmul.mubr.bf16.vlgmr.msra.gmra.mrb[12].mxu0 %v11117_v20  ;;  %7327 = vmatprep.subr.bf16.mxu1 %v7023_v60  ;;  %v11206_v24 = vld [vmem:[%s16647_s3 + $0x224] ss:$16 sps:$4 sm:$0xff]  }
 0xfdd   : > { %7328 = vmatpush1.bf16.msra.mxu1 %v7022_v10  ;;  %v15357_v49 = vpop.permute.xlu1 %7460  ;;  %v11196_v60 = vld [vmem:[%s16647_s3 + $0x1c4] ss:$16 sps:$4 sm:$0xff]   ;;  %v11209_v10 = vld [vmem:[%s16647_s3 + $0x22c] ss:$16 sps:$4 sm:$0xff]  }
 0xfde   : > { %v7476_v22 = vmul.bf16 0, %v15357_v49 }
 0xfe0   : > { %7340 = vmatmul.mubr.bf16.vlgmr.msra.gmra.mrb[12].mxu1 %v11117_v20  ;;  %7486 = vrot.lane.b32.xlu1 %v7476_v22, %s16732_s12  ;;  %v11195_v20 = vld [vmem:[%s16647_s3 + $0x18c] ss:$16 sps:$4 sm:$0xff]  }
 0xfe1   : > { %v11197_v22 = vld [vmem:[%s16647_s3 + $0x1cc] ss:$16 sps:$4 sm:$0xff]  }
 0xfe4   : > { %7533 = vrot.lane.b32.xlu1 %v11118_v15, %s16717_s16  ;;  %v11198_v15 = vld [vmem:[%s16647_s3 + $0x1e4] ss:$16 sps:$4 sm:$0xff]  }
 0xfe8   : > { %7537 = vrot.lane.b32.xlu1 %v11120_v29, %s16717_s16  ;;  %v11199_v29 = vld [vmem:[%s16647_s3 + $0x1ec] ss:$16 sps:$4 sm:$0xff]  }
 0xfeb   : > { %v15372_v1 = vpop.permute.xlu0 %7148 }
 0xfec   : > { %7606 = vrot.lane.b32.xlu1 %v11122_v41, %s16721_s24  ;;  %v11200_v41 = vld [vmem:[%s16647_s3 + $0x204] ss:$16 sps:$4 sm:$0xff]  }
 0xfef   : > { %v15378_v31 = vpop.permute.xlu0 %7387 }
 0xff0   : > { %v7403_v62 = vmul.bf16 0, %v15378_v31  ;;  %7610 = vrot.lane.b32.xlu1 %v11124_v46, %s16721_s24 }
 0xff2   : > { %7413 = vrot.lane.b32.xlu0 %v7403_v62, %s16731_s20  ;;  %v11203_v62 = vld [vmem:[%s16647_s3 + $0x20c] ss:$16 sps:$4 sm:$0xff]  }
 0xff3   : > { %v15602_v46 = vpop.permute.xlu0 %7391 }
 0xff4   : > { %7679 = vrot.lane.b32.xlu1 %v11126_v9, %s16722_s29 }
 0xff6   : > { %7462 = vrot.lane.b32.xlu0 %v11128_v63, %s16718_s23  ;;  %v11204_v63 = vld [vmem:[%s16647_s3 + $0x220] ss:$16 sps:$4 sm:$0xff]  }
 0xff8   : > { %7683 = vrot.lane.b32.xlu1 %v11129_v27, %s16722_s29 }
 0xffa   : > { %7466 = vrot.lane.b32.xlu0 %v11131_v17, %s16718_s23  ;;  %v11207_v17 = vld [vmem:[%s16647_s3 + $0x228] ss:$16 sps:$4 sm:$0xff]  }
 0xffc   : > { %7752 = vrot.lane.b32.xlu1 %v11132_v54, %s16734_s11  ;;  %v7465_v54 = vpop.permute.xlu1 %7464 }
 0xffe   : > { %7535 = vrot.lane.b32.xlu0 %v11134_v45, %s16717_s16 }
0x1000   : > { %7756 = vrot.lane.b32.xlu1 %v11135_v53, %s16734_s11 }
0x1002   : > { %7539 = vrot.lane.b32.xlu0 %v11137_v52, %s16717_s16 }
0x1004   : > { %7825 = vrot.lane.b32.xlu1 %v11138_v6, %s16733_s13 }
0x1006   : > { %7608 = vrot.lane.b32.xlu0 %v11140_v50, %s16721_s24 }
0x1008   : > { %7829 = vrot.lane.b32.xlu1 %v11141_v19, %s16733_s13 }
0x100a   : > { %7612 = vrot.lane.b32.xlu0 %v11143_v57, %s16721_s24 }
0x100c   : > { %7898 = vrot.lane.b32.xlu1 %v11144_v2, %s16732_s12 }
0x100e   : > { %7681 = vrot.lane.b32.xlu0 %v11146_v37, %s16722_s29 }
0x1010   : > { %7902 = vrot.lane.b32.xlu1 %v11147_v11, %s16732_s12 }
0x1012   : > { %7685 = vrot.lane.b32.xlu0 %v11149_v0, %s16722_s29 }
0x1014   : > { %7971 = vrot.lane.b32.xlu1 %v11150_v39, %s16731_s20 }
0x1016   : > { %7754 = vrot.lane.b32.xlu0 %v11152_v42, %s16734_s11 }
0x1018   : > { %7975 = vrot.lane.b32.xlu1 %v11153_v8, %s16731_s20 }
0x101a   : > { %7758 = vrot.lane.b32.xlu0 %v11155_v14, %s16734_s11 }
0x101c   : > { %8044 = vrot.lane.b32.xlu1 %v11156_v34, %s16730_s2 }
0x101e   : > { %7827 = vrot.lane.b32.xlu0 %v11158_v18, %s16733_s13 }
0x1020   : > { %8048 = vrot.lane.b32.xlu1 %v11159_v16, %s16730_s2 }
0x1022   : > { %7831 = vrot.lane.b32.xlu0 %v11161_v30, %s16733_s13 }
0x1024   : > { %8117 = vrot.lane.b32.xlu1 %v11162_v38, %s16729_s1 }
0x1026   : > { %7900 = vrot.lane.b32.xlu0 %v11164_v4, %s16732_s12 }
0x1028   : > { %8121 = vrot.lane.b32.xlu1 %v11165_v3, %s16729_s1 }
0x102a   : > { %7904 = vrot.lane.b32.xlu0 %v11167_v40, %s16732_s12 }
0x102c   : > { %8190 = vrot.lane.b32.xlu1 %v11168_v55, %s16727_s17 }
0x102e   : > { %7973 = vrot.lane.b32.xlu0 %v11170_v58, %s16731_s20 }
0x1030   : > { %8194 = vrot.lane.b32.xlu1 %v11171_v51, %s16727_s17 }
0x1032   : > { %7977 = vrot.lane.b32.xlu0 %v11173_v47, %s16731_s20 }
0x1034   : > { %8263 = vrot.lane.b32.xlu1 %v11174_v48, %s16726_s15 }
0x1036   : > { %8046 = vrot.lane.b32.xlu0 %v11176_v56, %s16730_s2 }
0x1038   : > { %8267 = vrot.lane.b32.xlu1 %v11177_v13, %s16726_s15 }
0x103a   : > { %8050 = vrot.lane.b32.xlu0 %v11179_v23, %s16730_s2 }
0x103c   : > { %8344 = vrot.lane.b32.xlu1 %v11180_v61, %s16759_s0 }
0x103e   : > { %8119 = vrot.lane.b32.xlu0 %v11182_v28, %s16729_s1 }
0x1040   : > { %8348 = vrot.lane.b32.xlu1 %v11183_v12, %s16759_s0  ;;  %v7395_v12 = vsel %vm662_vm2, %v15378_v31, %v15346_v32 }
0x1042   : > { %8123 = vrot.lane.b32.xlu0 %v11185_v7, %s16729_s1 }
0x1044   : > { %8417 = vrot.lane.b32.xlu1 %v11186_v21, %s16724_s25 }
0x1046   : > { %8192 = vrot.lane.b32.xlu0 %v11188_v35, %s16727_s17 }
0x1048   : > { %8421 = vrot.lane.b32.xlu1 %v11189_v33, %s16724_s25 }
0x104a   : > { %8196 = vrot.lane.b32.xlu0 %v11191_v43, %s16727_s17 }
0x104c   : > { %8490 = vrot.lane.b32.xlu1 %v11192_v26, %s16725_s14 }
0x104e   : > { %8265 = vrot.lane.b32.xlu0 %v11194_v25, %s16726_s15 }
0x1050   : > { %8494 = vrot.lane.b32.xlu1 %v11201_v44, %s16725_s14 }
0x1052   : > { %8269 = vrot.lane.b32.xlu0 %v11195_v20, %s16726_s15  ;;  %v15621_v53 = vpop.permute.xlu1 %7486 }
0x1054   : > { %8565 = vrot.lane.b32.xlu1 %v11206_v24, %s16723_s19 }
0x1056   : > { %8346 = vrot.lane.b32.xlu0 %v11196_v60, %s16759_s0  ;;  %v15625_v6 = vpop.permute.xlu1 %7533 }
0x1058   : > { %8569 = vrot.lane.b32.xlu1 %v11209_v10, %s16723_s19 }
0x105a   : > { %8350 = vrot.lane.b32.xlu0 %v11197_v22, %s16759_s0  ;;  %v15629_v19 = vpop.permute.xlu1 %7537 }
0x105e   : > { %8419 = vrot.lane.b32.xlu0 %v11198_v15, %s16724_s25  ;;  %v15633_v2 = vpop.permute.xlu1 %7606 }
0x1062   : > { %8423 = vrot.lane.b32.xlu0 %v11199_v29, %s16724_s25  ;;  %v15637_v11 = vpop.permute.xlu1 %7610 }
0x1064   : > { %v15608_v9 = vpop.permute.xlu0 %7413 }
0x1066   : > { %8492 = vrot.lane.b32.xlu0 %v11200_v41, %s16725_s14  ;;  %v15641_v39 = vpop.permute.xlu1 %7679 }
0x1068   : > { %v7463_v27 = vpop.permute.xlu0 %7462 }
0x1069   : > { %v7468_v7 = vsel %vm738_vm1, %v15357_v49, %v7463_v27  ;;  %v7397_v49 = vsel %vm662_vm2, %v15602_v46, %v15353_v59  ;;  %v7469_v41 = vsel %vm738_vm1, %v7463_v27, %v7465_v54  ;;  %v7396_v27 = vsel %vm662_vm2, %v15346_v32, %v15602_v46 }
0x106a   : > { %8496 = vrot.lane.b32.xlu0 %v11203_v62, %s16725_s14  ;;  %v15645_v8 = vpop.permute.xlu1 %7683 }
0x106c   : > { %v15619_v45 = vpop.permute.xlu0 %7466 }
0x106e   : > { %8563 = vrot.lane.b32.xlu0 %v11204_v63, %s16723_s19  ;;  %v15649_v34 = vpop.permute.xlu1 %7752 }
0x1070   : > { %v15623_v52 = vpop.permute.xlu0 %7535 }
0x1071   : > { %v7541_v62 = vsel %vm814_vm3, %v15625_v6, %v15623_v52 }
0x1072   : > { %8567 = vrot.lane.b32.xlu0 %v11207_v17, %s16723_s19  ;;  %v15653_v16 = vpop.permute.xlu1 %7756 }
0x1074   : > { %v15627_v50 = vpop.permute.xlu0 %7539 }
0x1075   : > { %v7543_v46 = vsel %vm814_vm3, %v15629_v19, %v15627_v50 }
0x1076   : > { %v15657_v38 = vpop.permute.xlu1 %7825 }
0x1078   : > { %v15631_v57 = vpop.permute.xlu0 %7608 }
0x107a   : > { %v15664_v51 = vpop.permute.xlu1 %7829 }
0x107c   : > { %v15635_v37 = vpop.permute.xlu0 %7612 }
0x107e   : > { %v15687_v24 = vpop.permute.xlu1 %7898 }
0x1080   : > { %v15639_v0 = vpop.permute.xlu0 %7681 }
0x1082   : > { %v15712_v63 = vpop.permute.xlu1 %7902 }
0x1084   : > { %v15643_v42 = vpop.permute.xlu0 %7685 }
0x1088   : > { %v15647_v14 = vpop.permute.xlu0 %7754 }
0x108c   : > { %v15651_v18 = vpop.permute.xlu0 %7758 }
0x1090   : > { %v15655_v30 = vpop.permute.xlu0 %7827 }
0x1094   : > { %v15659_v4 = vpop.permute.xlu0 %7831 }
0x1098   : > { %v15678_v21 = vpop.permute.xlu0 %7900 }
0x109c   : > { %v15703_v15 = vpop.permute.xlu0 %7904 }
0x10af   : > { %v7255_v3 = vpop.f32.mrb[12].mxu0 }
0x10b0   : > { %v10527_v40 = vadd.f32 %v7255_v3, %v15372_v1  ;;  %v7257_v55 = vpop.f32.mrb[13].mxu0 }
0x10b1   : > { %v15662_v58 = vpop.f32.mrb[14].mxu0  ;;  %v10528_v48 = vadd.f32 %v7257_v55, %v15372_v1  ;;  %v15720_v55 = vpop.permute.xlu0 %7973 }
0x10b2   : > { %v7350_v47 = vmax.f32 %v10527_v40, 0.0  ;;  %v15667_v56 = vpop.f32.mrb[15].mxu0 }
0x10b3   : > { %v7341_v13 = vpop.f32.mrb[12].mxu1  ;;  %v7351_v33 = vmax.f32 %v10528_v48, 0.0  ;;  %v7542_v48 = vsel %vm814_vm3, %v15623_v52, %v15629_v19 }
0x10b4   : > { %v15670_v23 = vpack.c.bf16 %v11294_v5, %v7350_v47  ;;  %v10531_v61 = vadd.f32 %v7341_v13, %v15372_v1  ;;  %v7343_v28 = vpop.f32.mrb[13].mxu1  ;;  %v15729_v47 = vpop.permute.xlu1 %7971 }
0x10b5   : > { %v15680_v35 = vpop.f32.mrb[14].mxu1  ;;  %v10532_v26 = vadd.f32 %v7343_v28, %v15372_v1  ;;  %v7470_v1 = vsel %vm738_vm1, %v7465_v54, %v15619_v45  ;;  %v15700_v60 = vpack.c.bf16 %v11294_v5, %v7351_v33  ;;  %v11212_v33 = vld [vmem:[%s16647_s3 + $0x244] ss:$16 sps:$4 sm:$0xff]  }
0x10b6   : > { %v7352_v43 = vmax.f32 %v10531_v61, 0.0  ;;  %v15683_v25 = vpop.f32.mrb[15].mxu1  ;;  %v7404_v44 = vmul.bf16 %v7395_v12, %v15670_v23  ;;  %v7477_v20 = vmul.bf16 %v7468_v7, %v15670_v23  ;;  %v7550_v40 = vmul.bf16 %v7541_v62, %v15670_v23  ;;  %v15737_v61 = vpop.permute.xlu0 %7977 }
0x10b7   : > { %v7353_v10 = vmax.f32 %v10532_v26, 0.0  ;;  %v7478_v3 = vmul.bf16 %v7469_v41, %v15700_v60  ;;  %v7551_v13 = vmul.bf16 %v7542_v48, %v15700_v60  ;;  %v7549_v7 = vmul.bf16 0, %v15625_v6  ;;  %v11215_v6 = vld [vmem:[%s16647_s3 + $0x24c] ss:$16 sps:$4 sm:$0xff]  }
0x10b8   : > { %v15690_v31 = vpack.c.bf16 %v11294_v5, %v7352_v43  ;;  %7415 = vrot.lane.b32.xlu1 %v7404_v44, %s16731_s20  ;;  %7488 = vrot.lane.b32.xlu0 %v7477_v20, %s16732_s12  ;;  %v7614_v43 = vsel %vm890_vm4, %v15633_v2, %v15631_v57  ;;  %v7622_v62 = vmul.bf16 0, %v15633_v2  ;;  %v11219_v2 = vld [vmem:[%s16647_s3 + $0x26c] ss:$16 sps:$4 sm:$0xff]   ;;  %v7687_v48 = vsel %vm531_vm0, %v15641_v39, %v15639_v0 }
0x10b9   : > { %v15715_v17 = vpack.c.bf16 %v11294_v5, %v7353_v10  ;;  %v7405_v5 = vmul.bf16 %v7396_v27, %v15700_v60  ;;  %v7623_v20 = vmul.bf16 %v7614_v43, %v15670_v23 }
0x10ba   : > { %v7406_v22 = vmul.bf16 %v7397_v49, %v15690_v31  ;;  %v7479_v29 = vmul.bf16 %v7470_v1, %v15690_v31  ;;  %v7552_v28 = vmul.bf16 %v7543_v46, %v15690_v31  ;;  %v15755_v12 = vpop.permute.xlu0 %8046  ;;  %v7616_v49 = vsel %vm890_vm4, %v15637_v11, %v15635_v37 }
0x10bb   : > { %v7480_v54 = vmul.bf16 %v15619_v45, %v15715_v17  ;;  %v7407_v32 = vmul.bf16 %v15353_v59, %v15715_v17  ;;  %v15746_v45 = vpop.permute.xlu1 %7975  ;;  %v7553_v52 = vmul.bf16 %v15627_v50, %v15715_v17  ;;  %v11210_v59 = vld [vmem:[%s16647_s3 + $0x240] ss:$16 sps:$4 sm:$0xff]   ;;  %v11213_v50 = vld [vmem:[%s16647_s3 + $0x248] ss:$16 sps:$4 sm:$0xff]   ;;  %v7615_v1 = vsel %vm890_vm4, %v15631_v57, %v15637_v11  ;;  %v11216_v11 = vld [vmem:[%s16647_s3 + $0x264] ss:$16 sps:$4 sm:$0xff]  }
0x10bc   : > { %7419 = vrot.lane.b32.xlu1 %v7406_v22, %s16731_s20  ;;  %7492 = vrot.lane.b32.xlu0 %v7479_v29, %s16732_s12  ;;  %v7625_v22 = vmul.bf16 %v7616_v49, %v15690_v31  ;;  %v7624_v29 = vmul.bf16 %v7615_v1, %v15700_v60  ;;  %v7626_v57 = vmul.bf16 %v15635_v37, %v15715_v17 }
0x10be   : > { %v15772_v26 = vpop.permute.xlu0 %8050 }
0x10bf   : > { %v15759_v19 = vpop.permute.xlu1 %8044 }
0x10c0   : > { %7490 = vrot.lane.b32.xlu1 %v7478_v3, %s16732_s12  ;;  %7561 = vrot.lane.b32.xlu0 %v7550_v40, %s16733_s13  ;;  %v11218_v40 = vld [vmem:[%s16647_s3 + $0x260] ss:$16 sps:$4 sm:$0xff]  }
0x10c2   : > { %v15789_v10 = vpop.permute.xlu0 %8119 }
0x10c3   : > { %v15779_v44 = vpop.permute.xlu1 %8048 }
0x10c4   : > { %7494 = vrot.lane.b32.xlu1 %v7480_v54, %s16732_s12  ;;  %7417 = vrot.lane.b32.xlu0 %v7405_v5, %s16731_s20  ;;  %v11221_v54 = vld [vmem:[%s16647_s3 + $0x268] ss:$16 sps:$4 sm:$0xff]   ;;  %v7688_v5 = vsel %vm531_vm0, %v15639_v0, %v15645_v8 }
0x10c6   : > { %v15799_v3 = vpop.permute.xlu0 %8123 }
0x10c7   : > { %v15794_v41 = vpop.permute.xlu1 %8117 }
0x10c8   : > { %7563 = vrot.lane.b32.xlu1 %v7551_v13, %s16733_s13  ;;  %7421 = vrot.lane.b32.xlu0 %v7407_v32, %s16731_s20  ;;  %v7697_v32 = vmul.bf16 %v7688_v5, %v15700_v60 }
0x10ca   : > { %v15817_v37 = vpop.permute.xlu0 %8192 }
0x10cb   : > { %v15811_v27 = vpop.permute.xlu1 %8121 }
0x10cc   : > { %7567 = vrot.lane.b32.xlu1 %v7553_v52, %s16733_s13  ;;  %7565 = vrot.lane.b32.xlu0 %v7552_v28, %s16733_s13  ;;  %v7696_v52 = vmul.bf16 %v7687_v48, %v15670_v23  ;;  %v7689_v28 = vsel %vm531_vm0, %v15645_v8, %v15643_v42  ;;  %v7695_v8 = vmul.bf16 0, %v15641_v39  ;;  %v11227_v39 = vld [vmem:[%s16647_s3 + $0x28c] ss:$16 sps:$4 sm:$0xff]   ;;  %v11230_v48 = vld [vmem:[%s16647_s3 + $0x2a0] ss:$16 sps:$4 sm:$0xff]  }
0x10ce   : > { %v15834_v46 = vpop.permute.xlu0 %8196 }
0x10cf   : > { %v15829_v13 = vpop.permute.xlu1 %8190 }
0x10d0   : > { %8636 = vrot.lane.b32.xlu1 %v11210_v59, %s16719_s28  ;;  %7559 = vrot.lane.b32.xlu0 %v7549_v7, %s16733_s13  ;;  %v7699_v59 = vmul.bf16 %v15643_v42, %v15715_v17  ;;  %v7698_v7 = vmul.bf16 %v7689_v28, %v15690_v31  ;;  %v11225_v42 = vld [vmem:[%s16647_s3 + $0x288] ss:$16 sps:$4 sm:$0xff]   ;;  %v7834_v28 = vsel %vm843_vm6, %v15655_v30, %v15664_v51 }
0x10d3   : > { %v15842_v0 = vpop.permute.xlu1 %8194 }
0x10d4   : > { %8640 = vrot.lane.b32.xlu1 %v11213_v50, %s16719_s28  ;;  %8638 = vrot.lane.b32.xlu0 %v11212_v33, %s16719_s28  ;;  %v11222_v50 = vld [vmem:[%s16647_s3 + $0x280] ss:$16 sps:$4 sm:$0xff]   ;;  %v15851_v33 = vpop.permute.xlu0 %8265 }
0x10d7   : > { %v15855_v43 = vpop.permute.xlu1 %8263 }
0x10d8   : > { %7634 = vrot.lane.b32.xlu1 %v7623_v20, %s16734_s11  ;;  %8642 = vrot.lane.b32.xlu0 %v11215_v6, %s16719_s28  ;;  %v11224_v6 = vld [vmem:[%s16647_s3 + $0x284] ss:$16 sps:$4 sm:$0xff]   ;;  %v7760_v20 = vsel %vm16846_vm13, %v15649_v34, %v15647_v14  ;;  %v15868_v49 = vpop.permute.xlu0 %8269  ;;  %vm16850_vm13 = vmmov %vm16848_vm9 }
0x10db   : > { %v15875_v1 = vpop.permute.xlu1 %8267 }
0x10dc   : > { %7638 = vrot.lane.b32.xlu1 %v7625_v22, %s16734_s11  ;;  %7636 = vrot.lane.b32.xlu0 %v7624_v29, %s16734_s11  ;;  %v7769_v22 = vmul.bf16 %v7760_v20, %v15670_v23  ;;  %v7762_v29 = vsel %vm16842_vm5, %v15653_v16, %v15651_v18  ;;  %v7845_v20 = vmul.bf16 %v15659_v4, %v15715_v17 }
0x10e0   : > { %7632 = vrot.lane.b32.xlu1 %v7622_v62, %s16734_s11  ;;  %7640 = vrot.lane.b32.xlu0 %v7626_v57, %s16734_s11  ;;  %v7761_v62 = vsel %vm16847_vm10, %v15647_v14, %v15653_v16  ;;  %v15885_v57 = vpop.permute.xlu0 %8346  ;;  %v7772_v14 = vmul.bf16 %v15651_v18, %v15715_v17  ;;  %v11228_v16 = vld [vmem:[%s16647_s3 + $0x2a4] ss:$16 sps:$4 sm:$0xff]   ;;  %vm16851_vm10 = vcmask 982016  }
0x10e4   : > { %8711 = vrot.lane.b32.xlu1 %v11216_v11, %s16718_s23  ;;  %8709 = vrot.lane.b32.xlu0 %v11218_v40, %s16718_s23  ;;  %v7771_v11 = vmul.bf16 %v7762_v29, %v15690_v31  ;;  %v7770_v40 = vmul.bf16 %v7761_v62, %v15700_v60  ;;  %v15895_v5 = vpop.permute.xlu0 %8350 }
0x10e8   : > { %8715 = vrot.lane.b32.xlu1 %v11219_v2, %s16718_s23  ;;  %8713 = vrot.lane.b32.xlu0 %v11221_v54, %s16718_s23  ;;  %v15890_v2 = vpop.permute.xlu1 %8344  ;;  %v7768_v54 = vmul.bf16 0, %v15649_v34  ;;  %v11231_v34 = vld [vmem:[%s16647_s3 + $0x2ac] ss:$16 sps:$4 sm:$0xff]   ;;  %v15913_v18 = vpop.permute.xlu0 %8419 }
0x10ec   : > { %7709 = vrot.lane.b32.xlu1 %v7697_v32, %s16722_s29  ;;  %7707 = vrot.lane.b32.xlu0 %v7696_v52, %s16722_s29  ;;  %v15907_v32 = vpop.permute.xlu1 %8348  ;;  %v11233_v52 = vld [vmem:[%s16647_s3 + $0x2a8] ss:$16 sps:$4 sm:$0xff]  }
0x10f0   : > { %7713 = vrot.lane.b32.xlu1 %v7699_v59, %s16722_s29  ;;  %7711 = vrot.lane.b32.xlu0 %v7698_v7, %s16722_s29  ;;  %v7833_v59 = vsel %vm843_vm6, %v15657_v38, %v15655_v30  ;;  %v15925_v7 = vpop.permute.xlu1 %8417 }
0x10f4   : > { %8782 = vrot.lane.b32.xlu1 %v11222_v50, %s16717_s16  ;;  %7705 = vrot.lane.b32.xlu0 %v7695_v8, %s16722_s29  ;;  %v7843_v50 = vmul.bf16 %v7834_v28, %v15700_v60  ;;  %v15930_v8 = vpop.permute.xlu0 %8423  ;;  %v15938_v30 = vpop.permute.xlu1 %8421 }
0x10f8   : > { %8786 = vrot.lane.b32.xlu1 %v11225_v42, %s16717_s16  ;;  %8784 = vrot.lane.b32.xlu0 %v11224_v6, %s16717_s16  ;;  %v7842_v42 = vmul.bf16 %v7833_v59, %v15670_v23  ;;  %v7835_v6 = vsel %vm843_vm6, %v15664_v51, %v15659_v4  ;;  %v15947_v29 = vpop.permute.xlu0 %8492  ;;  %v7841_v51 = vmul.bf16 0, %v15657_v38  ;;  %v15951_v62 = vpop.permute.xlu1 %8490  ;;  %v11237_v4 = vld [vmem:[%s16647_s3 + $0x2c8] ss:$16 sps:$4 sm:$0xff]  }
0x10fc   : > { %7780 = vrot.lane.b32.xlu1 %v7769_v22, %s16721_s24  ;;  %8788 = vrot.lane.b32.xlu0 %v11227_v39, %s16717_s16  ;;  %v7844_v39 = vmul.bf16 %v7835_v6, %v15690_v31  ;;  %v11234_v22 = vld [vmem:[%s16647_s3 + $0x2c0] ss:$16 sps:$4 sm:$0xff]   ;;  %v15966_v38 = vpop.permute.xlu1 %8494 }
0x1100   : > { %7784 = vrot.lane.b32.xlu1 %v7771_v11, %s16721_s24  ;;  %7782 = vrot.lane.b32.xlu0 %v7770_v40, %s16721_s24  ;;  %v11236_v11 = vld [vmem:[%s16647_s3 + $0x2c4] ss:$16 sps:$4 sm:$0xff]   ;;  %v7906_v40 = vsel %vm767_vm7, %v15687_v24, %v15678_v21 }
0x1104   : > { %7778 = vrot.lane.b32.xlu1 %v7768_v54, %s16721_s24  ;;  %7786 = vrot.lane.b32.xlu0 %v7772_v14, %s16721_s24  ;;  %v15964_v54 = vpop.permute.xlu0 %8496  ;;  %v11239_v14 = vld [vmem:[%s16647_s3 + $0x2cc] ss:$16 sps:$4 sm:$0xff]  }
0x1108   : > { %8857 = vrot.lane.b32.xlu1 %v11228_v16, %s16721_s24  ;;  %8855 = vrot.lane.b32.xlu0 %v11230_v48, %s16721_s24  ;;  %v7915_v16 = vmul.bf16 %v7906_v40, %v15670_v23  ;;  %v7908_v48 = vsel %vm767_vm7, %v15712_v63, %v15703_v15  ;;  %v15983_v28 = vpop.permute.xlu0 %8563 }
0x1109   : > { %v7917_v59 = vmul.bf16 %v7908_v48, %v15690_v31 }
0x110c   : > { %8861 = vrot.lane.b32.xlu1 %v11231_v34, %s16721_s24  ;;  %8859 = vrot.lane.b32.xlu0 %v11233_v52, %s16721_s24  ;;  %v7907_v34 = vsel %vm767_vm7, %v15678_v21, %v15712_v63  ;;  %v15980_v52 = vpop.permute.xlu1 %8565  ;;  %v15993_v21 = vpop.permute.xlu0 %8567  ;;  %v7918_v63 = vmul.bf16 %v15703_v15, %v15715_v17  ;;  %v11243_v15 = vld [vmem:[%s16647_s3 + $0x2ec] ss:$16 sps:$4 sm:$0xff]  }
0x1110   : > { %7855 = vrot.lane.b32.xlu1 %v7843_v50, %s16717_s16  ;;  %7853 = vrot.lane.b32.xlu0 %v7842_v42, %s16717_s16  ;;  %v7916_v50 = vmul.bf16 %v7907_v34, %v15700_v60  ;;  %v7914_v42 = vmul.bf16 0, %v15687_v24  ;;  %v15991_v6 = vpop.permute.xlu1 %8569 }
0x1114   : > { %7859 = vrot.lane.b32.xlu1 %v7845_v20, %s16717_s16  ;;  %7857 = vrot.lane.b32.xlu0 %v7844_v39, %s16717_s16  ;;  %v11240_v20 = vld [vmem:[%s16647_s3 + $0x2e4] ss:$16 sps:$4 sm:$0xff]   ;;  %v11242_v39 = vld [vmem:[%s16647_s3 + $0x2e0] ss:$16 sps:$4 sm:$0xff]  }
0x1118   : > { %8928 = vrot.lane.b32.xlu1 %v11234_v22, %s16722_s29  ;;  %7851 = vrot.lane.b32.xlu0 %v7841_v51, %s16717_s16  ;;  %v11245_v51 = vld [vmem:[%s16647_s3 + $0x2e8] ss:$16 sps:$4 sm:$0xff]  }
0x111c   : > { %8932 = vrot.lane.b32.xlu1 %v11237_v4, %s16722_s29  ;;  %8930 = vrot.lane.b32.xlu0 %v11236_v11, %s16722_s29  ;;  %v7980_v11 = vsel %vm691_vm8, %v15720_v55, %v15746_v45 }
0x111d   : > { %v7989_v48 = vmul.bf16 %v7980_v11, %v15700_v60  ;;  %v7987_v11 = vmul.bf16 0, %v15729_v47 }
0x1120   : > { %7926 = vrot.lane.b32.xlu1 %v7915_v16, %s16718_s23  ;;  %8934 = vrot.lane.b32.xlu0 %v11239_v14, %s16722_s29  ;;  %v7979_v14 = vsel %vm691_vm8, %v15729_v47, %v15720_v55  ;;  %v7991_v55 = vmul.bf16 %v15737_v61, %v15715_v17  ;;  %v11248_v47 = vld [vmem:[%s16647_s3 + $0x304] ss:$16 sps:$4 sm:$0xff]  }
0x1124   : > { %7930 = vrot.lane.b32.xlu1 %v7917_v59, %s16718_s23  ;;  %7928 = vrot.lane.b32.xlu0 %v7916_v50, %s16718_s23  ;;  %v7988_v59 = vmul.bf16 %v7979_v14, %v15670_v23  ;;  %v7981_v50 = vsel %vm691_vm8, %v15746_v45, %v15737_v61 }
0x1128   : > { %7924 = vrot.lane.b32.xlu1 %v7914_v42, %s16718_s23  ;;  %7932 = vrot.lane.b32.xlu0 %v7918_v63, %s16718_s23 }
0x112a   : > { %v7416_v24 = vpop.permute.xlu1 %7415  ;;  %v7489_v22 = vpop.permute.xlu0 %7488 }
0x112b   : > { %v7423_v45 = vsel %vm691_vm8, %v15608_v9, %v7416_v24  ;;  %v7496_v9 = vsel %vm767_vm7, %v15621_v53, %v7489_v22 }
0x112c   : > { %9003 = vrot.lane.b32.xlu1 %v11240_v20, %s16734_s11  ;;  %9001 = vrot.lane.b32.xlu0 %v11242_v39, %s16734_s11  ;;  %v7990_v20 = vmul.bf16 %v7981_v50, %v15690_v31 }
0x112e   : > { %v7420_v4 = vpop.permute.xlu1 %7419  ;;  %v7493_v40 = vpop.permute.xlu0 %7492 }
0x1130   : > { %9007 = vrot.lane.b32.xlu1 %v11243_v15, %s16734_s11  ;;  %9005 = vrot.lane.b32.xlu0 %v11245_v51, %s16734_s11  ;;  %v11246_v15 = vld [vmem:[%s16647_s3 + $0x300] ss:$16 sps:$4 sm:$0xff]  }
0x1132   : > { %v7491_v16 = vpop.permute.xlu1 %7490  ;;  %v7562_v34 = vpop.permute.xlu0 %7561 }
0x1133   : > { %v7497_v61 = vsel %vm767_vm7, %v7489_v22, %v7491_v16  ;;  %v7498_v53 = vsel %vm767_vm7, %v7491_v16, %v7493_v40  ;;  %v11251_v22 = vld [vmem:[%s16647_s3 + $0x30c] ss:$16 sps:$4 sm:$0xff]  }
0x1134   : > { %8001 = vrot.lane.b32.xlu1 %v7989_v48, %s16719_s28  ;;  %7999 = vrot.lane.b32.xlu0 %v7988_v59, %s16719_s28  ;;  %v11249_v59 = vld [vmem:[%s16647_s3 + $0x308] ss:$16 sps:$4 sm:$0xff]  }
0x1136   : > { %v7495_v42 = vpop.permute.xlu1 %7494  ;;  %v7418_v63 = vpop.permute.xlu0 %7417 }
0x1137   : > { %v7424_v39 = vsel %vm691_vm8, %v7416_v24, %v7418_v63  ;;  %v7425_v24 = vsel %vm691_vm8, %v7418_v63, %v7420_v4 }
0x1138   : > { %8005 = vrot.lane.b32.xlu1 %v7991_v55, %s16719_s28  ;;  %8003 = vrot.lane.b32.xlu0 %v7990_v20, %s16719_s28  ;;  %v7499_v55 = vsel %vm767_vm7, %v7493_v40, %v7495_v42  ;;  %v8053_v40 = vsel %vm16850_vm13, %v15755_v12, %v15779_v44  ;;  %vm16854_vm13 = vmmov %vm16842_vm5 }
0x1139   : > { %9400 = vmatprep.subr.bf16.mxu0 %v7424_v39  ;;  %v8052_v39 = vsel %vm16848_vm9, %v15759_v19, %v15755_v12  ;;  %v8060_v12 = vmul.bf16 0, %v15759_v19  ;;  %vm16852_vm9 = vmmov %vm16842_vm5 }
0x113a   : > { %9401 = vmatpush1.bf16.msra.mxu0 %v7423_v45  ;;  %v7564_v51 = vpop.permute.xlu1 %7563  ;;  %v7422_v14 = vpop.permute.xlu0 %7421  ;;  %v8061_v63 = vmul.bf16 %v8052_v39, %v15670_v23  ;;  %v8054_v45 = vsel %vm16849_vm12, %v15779_v44, %v15772_v26  ;;  %vm16853_vm12 = vmmov %vm16851_vm10 }
0x113b   : > { %9402 = vmatprep.subr.bf16.mxu0 %v7497_v61  ;;  %v7426_v48 = vsel %vm691_vm8, %v7420_v4, %v7422_v14  ;;  %v7570_v50 = vsel %vm843_vm6, %v7562_v34, %v7564_v51 }
0x113c   : > { %9074 = vrot.lane.b32.xlu1 %v11246_v15, %s16733_s13  ;;  %7997 = vrot.lane.b32.xlu0 %v7987_v11, %s16719_s28 }
0x113d   : > { %9482 = vmatprep.subr.bf16.mxu1 %v7426_v48  ;;  %v8063_v48 = vmul.bf16 %v8054_v45, %v15690_v31 }
0x113e   : > { %9403 = vmatpush1.bf16.msra.mxu0 %v7496_v9  ;;  %9483 = vmatpush1.bf16.msra.mxu1 %v7425_v24  ;;  %v7568_v20 = vpop.permute.xlu1 %7567  ;;  %v7566_v15 = vpop.permute.xlu0 %7565  ;;  %v8062_v9 = vmul.bf16 %v8053_v40, %v15700_v60  ;;  %v11254_v24 = vld [vmem:[%s16647_s3 + $0x324] ss:$16 sps:$4 sm:$0xff]  }
0x113f   : > { %9404 = vmatprep.subr.bf16.mxu0 %v7570_v50  ;;  %9484 = vmatprep.subr.bf16.mxu1 %v7499_v55  ;;  %v7572_v4 = vsel %vm843_vm6, %v7566_v15, %v7568_v20  ;;  %v7571_v11 = vsel %vm843_vm6, %v7564_v51, %v7566_v15  ;;  %v8064_v51 = vmul.bf16 %v15772_v26, %v15715_v17  ;;  %v11257_v26 = vld [vmem:[%s16647_s3 + $0x32c] ss:$16 sps:$4 sm:$0xff]   ;;  %v11255_v20 = vld [vmem:[%s16647_s3 + $0x328] ss:$16 sps:$4 sm:$0xff]  }
0x1140   : > { %9078 = vrot.lane.b32.xlu1 %v11249_v59, %s16733_s13  ;;  %9076 = vrot.lane.b32.xlu0 %v11248_v47, %s16733_s13  ;;  %v11252_v47 = vld [vmem:[%s16647_s3 + $0x320] ss:$16 sps:$4 sm:$0xff]   ;;  %v8126_v15 = vsel %vm16851_vm10, %v15789_v10, %v15811_v27 }
0x1141   : > { %v8135_v40 = vmul.bf16 %v8126_v15, %v15700_v60  ;;  %v11263_v15 = vld [vmem:[%s16647_s3 + $0x34c] ss:$16 sps:$4 sm:$0xff]  }
0x1142   : > { %9485 = vmatpush1.bf16.msra.mxu1 %v7498_v53  ;;  %v16065_v42 = vpop.permute.xlu1 %8636  ;;  %v7560_v61 = vpop.permute.xlu0 %7559 }
0x1143   : > { %9486 = vmatprep.subr.bf16.mxu1 %v7572_v4  ;;  %v7569_v16 = vsel %vm843_vm6, %v7560_v61, %v7562_v34  ;;  %v8125_v4 = vsel %vm16853_vm12, %v15794_v41, %v15789_v10  ;;  %v8127_v10 = vsel %vm16851_vm10, %v15811_v27, %v15799_v3 }
0x1144   : > { %8072 = vrot.lane.b32.xlu1 %v8061_v63, %s16723_s19  ;;  %9080 = vrot.lane.b32.xlu0 %v11251_v22, %s16733_s13 }
0x1145   : > { %9405 = vmatpush1.bf16.msra.mxu0 %v7569_v16  ;;  %v8134_v16 = vmul.bf16 %v8125_v4, %v15670_v23  ;;  %v8200_v4 = vsel %vm1489_vm11, %v15842_v0, %v15834_v46 }
0x1146   : > { %9487 = vmatpush1.bf16.msra.mxu1 %v7571_v11  ;;  %v16078_v14 = vpop.permute.xlu1 %8640  ;;  %v16081_v59 = vpop.permute.xlu0 %8638 }
0x1148   : > { %8076 = vrot.lane.b32.xlu1 %v8063_v48, %s16723_s19  ;;  %8074 = vrot.lane.b32.xlu0 %v8062_v9, %s16723_s19  ;;  %v8137_v9 = vmul.bf16 %v15799_v3, %v15715_v17 }
0x114a   : > { %v7635_v44 = vpop.permute.xlu1 %7634  ;;  %v16087_v34 = vpop.permute.xlu0 %8642 }
0x114c   : > { %8070 = vrot.lane.b32.xlu1 %v8060_v12, %s16723_s19  ;;  %8078 = vrot.lane.b32.xlu0 %v8064_v51, %s16723_s19  ;;  %v8136_v12 = vmul.bf16 %v8127_v10, %v15690_v31  ;;  %v11258_v51 = vld [vmem:[%s16647_s3 + $0x340] ss:$16 sps:$4 sm:$0xff]  }
0x114e   : > { %v7639_v50 = vpop.permute.xlu1 %7638  ;;  %v7637_v19 = vpop.permute.xlu0 %7636 }
0x114f   : > { %v7643_v55 = vsel %vm16842_vm5, %v7635_v44, %v7637_v19  ;;  %v7644_v45 = vsel %vm16842_vm5, %v7637_v19, %v7639_v50  ;;  %v11260_v19 = vld [vmem:[%s16647_s3 + $0x344] ss:$16 sps:$4 sm:$0xff]   ;;  %vm16858_vm5 = vcmask 7168  }
0x1150   : > { %9149 = vrot.lane.b32.xlu1 %v11254_v24, %s16732_s12  ;;  %9147 = vrot.lane.b32.xlu0 %v11252_v47, %s16732_s12  ;;  %v8133_v24 = vmul.bf16 0, %v15794_v41  ;;  %v8198_v41 = vsel %vm1489_vm11, %v15829_v13, %v15817_v37  ;;  %vm16859_vm10 = vmmov %vm16858_vm5 }
0x1151   : > { %9406 = vmatprep.subr.bf16.mxu0 %v7643_v55 }
0x1152   : > { %v7633_v39 = vpop.permute.xlu1 %7632  ;;  %v7641_v53 = vpop.permute.xlu0 %7640 }
0x1153   : > { %v7642_v22 = vsel %vm16852_vm9, %v7633_v39, %v7635_v44  ;;  %v7645_v63 = vsel %vm16854_vm13, %v7639_v50, %v7641_v53  ;;  %v11261_v50 = vld [vmem:[%s16647_s3 + $0x348] ss:$16 sps:$4 sm:$0xff]   ;;  %v8207_v53 = vmul.bf16 %v8198_v41, %v15670_v23  ;;  %vm16855_vm9 = vcmask 1039360  }
0x1154   : > { %9153 = vrot.lane.b32.xlu1 %v11257_v26, %s16732_s12  ;;  %9407 = vmatpush1.bf16.msra.mxu0 %v7642_v22  ;;  %vm16856_vm12 = vmmov %vm16855_vm9 }
0x1155   : > { %9151 = vrot.lane.b32.xlu0 %v11255_v20, %s16732_s12  ;;  %9488 = vmatprep.subr.bf16.mxu1 %v7645_v63  ;;  %vm16857_vm13 = vmmov %vm16855_vm9 }
0x1156   : > { %9489 = vmatpush1.bf16.msra.mxu1 %v7644_v45  ;;  %v16119_v61 = vpop.permute.xlu1 %8711  ;;  %v16123_v11 = vpop.permute.xlu0 %8709  ;;  %v8199_v45 = vsel %vm1489_vm11, %v15817_v37, %v15842_v0  ;;  %v8206_v37 = vmul.bf16 0, %v15829_v13 }
0x1158   : > { %8147 = vrot.lane.b32.xlu1 %v8135_v40, %s16725_s14 }
0x1159   : > { %8145 = vrot.lane.b32.xlu0 %v8134_v16, %s16725_s14  ;;  %v8209_v16 = vmul.bf16 %v8200_v4, %v15690_v31 }
0x115a   : > { %v16130_v48 = vpop.permute.xlu1 %8715  ;;  %v16135_v44 = vpop.permute.xlu0 %8713 }
0x115c   : > { %8151 = vrot.lane.b32.xlu1 %v8137_v9, %s16725_s14  ;;  %v8208_v9 = vmul.bf16 %v8199_v45, %v15700_v60  ;;  %v8354_v45 = vsel %vm16859_vm10, %v15907_v32, %v15895_v5 }
0x115d   : > { %8149 = vrot.lane.b32.xlu0 %v8136_v12, %s16725_s14 }
0x115e   : > { %v7710_v27 = vpop.permute.xlu1 %7709  ;;  %v7708_v47 = vpop.permute.xlu0 %7707 }
0x115f   : > { %v7716_v3 = vsel %vm531_vm0, %v7708_v47, %v7710_v27 }
0x1160   : > { %9220 = vrot.lane.b32.xlu1 %v11258_v51, %s16731_s20  ;;  %9408 = vmatprep.subr.bf16.mxu0 %v7716_v3  ;;  %v8210_v51 = vmul.bf16 %v15834_v46, %v15715_v17 }
0x1161   : > { %8143 = vrot.lane.b32.xlu0 %v8133_v24, %s16725_s14 }
0x1162   : > { %v7714_v55 = vpop.permute.xlu1 %7713  ;;  %v7712_v26 = vpop.permute.xlu0 %7711 }
0x1163   : > { %v7718_v20 = vsel %vm531_vm0, %v7712_v26, %v7714_v55  ;;  %v7717_v39 = vsel %vm531_vm0, %v7710_v27, %v7712_v26  ;;  %v8272_v27 = vsel %vm16855_vm9, %v15851_v33, %v15875_v1  ;;  %vm16860_vm9 = vmmov %vm16858_vm5 }
0x1164   : > { %9224 = vrot.lane.b32.xlu1 %v11261_v50, %s16731_s20  ;;  %9490 = vmatprep.subr.bf16.mxu1 %v7718_v20  ;;  %v8281_v13 = vmul.bf16 %v8272_v27, %v15700_v60  ;;  %v8352_v20 = vsel %vm16858_vm5, %v15890_v2, %v15885_v57 }
0x1165   : > { %9222 = vrot.lane.b32.xlu0 %v11260_v19, %s16731_s20  ;;  %9491 = vmatpush1.bf16.msra.mxu1 %v7717_v39  ;;  %v8273_v19 = vsel %vm16857_vm13, %v15875_v1, %v15868_v49 }
0x1166   : > { %v16163_v22 = vpop.permute.xlu1 %8782  ;;  %v7706_v63 = vpop.permute.xlu0 %7705  ;;  %v8282_v26 = vmul.bf16 %v8273_v19, %v15690_v31 }
0x1167   : > { %v7715_v40 = vsel %vm531_vm0, %v7706_v63, %v7708_v47  ;;  %v8271_v47 = vsel %vm16856_vm12, %v15855_v43, %v15851_v33  ;;  %v8283_v33 = vmul.bf16 %v15868_v49, %v15715_v17  ;;  %v8279_v63 = vmul.bf16 0, %v15855_v43 }
0x1168   : > { %8218 = vrot.lane.b32.xlu1 %v8207_v53, %s16724_s25  ;;  %9409 = vmatpush1.bf16.msra.mxu0 %v7715_v40  ;;  %v8280_v50 = vmul.bf16 %v8271_v47, %v15670_v23  ;;  %v8361_v53 = vmul.bf16 %v8352_v20, %v15700_v60  ;;  %vm16861_vm12 = vcmask 56320  }
0x1169   : > { %9226 = vrot.lane.b32.xlu0 %v11263_v15, %s16731_s20  ;;  %v8426_v27 = vsel %vm16861_vm12, %v15913_v18, %v15938_v30  ;;  %vm16862_vm13 = vmmov %vm16861_vm12 }
0x116a   : > { %v16175_v10 = vpop.permute.xlu1 %8786  ;;  %v16178_v12 = vpop.permute.xlu0 %8784  ;;  %vm16863_vm5 = vmmov %vm16861_vm12 }
0x116b   : > { %v8427_v19 = vsel %vm16863_vm5, %v15938_v30, %v15930_v8  ;;  %v8498_v30 = vsel %vm1442_vm15, %v15951_v62, %v15947_v29  ;;  %vm16869_vm12 = vmmov %vm16863_vm5 }
0x116c   : > { %8222 = vrot.lane.b32.xlu1 %v8209_v16, %s16724_s25  ;;  %v8353_v16 = vsel %vm16860_vm9, %v15885_v57, %v15907_v32  ;;  %v8360_v57 = vmul.bf16 %v15890_v2, %v15670_v23  ;;  %v8364_v32 = vmul.bf16 0, %v15895_v5  ;;  %v8435_v2 = vmul.bf16 %v8426_v27, %v15690_v31 }
0x116d   : > { %8220 = vrot.lane.b32.xlu0 %v8208_v9, %s16724_s25  ;;  %v8363_v9 = vmul.bf16 %v8354_v45, %v15715_v17  ;;  %v8362_v43 = vmul.bf16 %v8353_v16, %v15690_v31  ;;  %v8499_v16 = vsel %vm1442_vm15, %v15947_v29, %v15966_v38  ;;  %v8510_v29 = vmul.bf16 0, %v15964_v54 }
0x116e   : > { %v7781_v0 = vpop.permute.xlu1 %7780  ;;  %v16188_v24 = vpop.permute.xlu0 %8788 }
0x1170   : > { %8216 = vrot.lane.b32.xlu1 %v8206_v37, %s16724_s25 }
0x1171   : > { %8224 = vrot.lane.b32.xlu0 %v8210_v51, %s16724_s25 }
0x1172   : > { %v7785_v3 = vpop.permute.xlu1 %7784  ;;  %v7783_v46 = vpop.permute.xlu0 %7782 }
0x1173   : > { %v7789_v55 = vsel %vm890_vm4, %v7781_v0, %v7783_v46  ;;  %v7790_v49 = vsel %vm890_vm4, %v7783_v46, %v7785_v3 }
0x1174   : > { %8293 = vrot.lane.b32.xlu1 %v8281_v13, %s16759_s0  ;;  %9410 = vmatprep.subr.bf16.mxu0 %v7789_v55  ;;  %v8425_v13 = vsel %vm16862_vm13, %v15925_v7, %v15913_v18  ;;  %vm16870_vm13 = vmmov %vm16863_vm5 }
0x1175   : > { %8291 = vrot.lane.b32.xlu0 %v8280_v50, %s16759_s0  ;;  %v8434_v5 = vmul.bf16 %v8425_v13, %v15700_v60 }
0x1176   : > { %v7779_v41 = vpop.permute.xlu1 %7778  ;;  %v7787_v39 = vpop.permute.xlu0 %7786 }
0x1177   : > { %v7788_v1 = vsel %vm890_vm4, %v7779_v41, %v7781_v0  ;;  %v7791_v15 = vsel %vm890_vm4, %v7785_v3, %v7787_v39 }
0x1178   : > { %8297 = vrot.lane.b32.xlu1 %v8283_v33, %s16759_s0  ;;  %9411 = vmatpush1.bf16.msra.mxu0 %v7788_v1  ;;  %v8437_v33 = vmul.bf16 0, %v15930_v8 }
0x1179   : > { %8295 = vrot.lane.b32.xlu0 %v8282_v26, %s16759_s0  ;;  %9492 = vmatprep.subr.bf16.mxu1 %v7791_v15  ;;  %v8436_v26 = vmul.bf16 %v8427_v19, %v15715_v17  ;;  %v8507_v15 = vmul.bf16 %v8498_v30, %v15700_v60  ;;  %v8583_v19 = vmul.bf16 0, %v15991_v6 }
0x117a   : > { %9493 = vmatpush1.bf16.msra.mxu1 %v7790_v49  ;;  %v16215_v4 = vpop.permute.xlu1 %8857  ;;  %v16221_v40 = vpop.permute.xlu0 %8855 }
0x117c   : > { %8372 = vrot.lane.b32.xlu1 %v8361_v53, %s16726_s15  ;;  %v8433_v53 = vmul.bf16 %v15925_v7, %v15670_v23 }
0x117d   : > { %8289 = vrot.lane.b32.xlu0 %v8279_v63, %s16759_s0  ;;  %s16864_s0 = sld [smem:[#allocation19_spill]]  ;;  %v8500_v63 = vsel %vm1442_vm15, %v15966_v38, %v15964_v54  ;;  %v8572_v38 = vsel %vm1366_vm14, %v15980_v52, %v15993_v21 }
0x117e   : > { %v16229_v37 = vpop.permute.xlu1 %8861  ;;  %v16232_v0 = vpop.permute.xlu0 %8859 }
0x1180   : > { %8376 = vrot.lane.b32.xlu1 %v8363_v9, %s16726_s15  ;;  %v8509_v9 = vmul.bf16 %v8500_v63, %v15715_v17 }
0x1181   : > { %8374 = vrot.lane.b32.xlu0 %v8362_v43, %s16726_s15 }
0x1182   : > { %v7856_v51 = vpop.permute.xlu1 %7855  ;;  %v7854_v47 = vpop.permute.xlu0 %7853 }
0x1183   : > { %v7862_v3 = vsel %vm814_vm3, %v7854_v47, %v7856_v51  ;;  %v16267_v39 = vld [vmem:[%s16864_s0] sm:$0xff] }
0x1184   : > { %8370 = vrot.lane.b32.xlu1 %v8360_v57, %s16726_s15  ;;  %9412 = vmatprep.subr.bf16.mxu0 %v7862_v3  ;;  %v10506_v8 = vcombine.high %v16267_v39, %v16267_v39  ;;  %v8506_v57 = vmul.bf16 %v15951_v62, %v15670_v23  ;;  %v8581_v62 = vmul.bf16 %v8572_v38, %v15690_v31 }
0x1185   : > { %8378 = vrot.lane.b32.xlu0 %v8364_v32, %s16726_s15 }
0x1186   : > { %v7860_v50 = vpop.permute.xlu1 %7859  ;;  %v7858_v46 = vpop.permute.xlu0 %7857  ;;  %9432 = vmatprep.mubr.bf16.mxu0 %v10506_v8  ;;  %9514 = vmatprep.mubr.bf16.mxu1 %v10506_v8  ;;  %v8645_v8 = vsel %vm662_vm2, %v16081_v59, %v16078_v14 }
0x1187   : > { %v7864_v18 = vsel %vm814_vm3, %v7858_v46, %v7860_v50  ;;  %v7863_v55 = vsel %vm814_vm3, %v7856_v51, %v7858_v46  ;;  %v8508_v51 = vmul.bf16 %v8499_v16, %v15690_v31  ;;  %v8654_v63 = vmul.bf16 %v8645_v8, %v15690_v31 }
0x1188   : > { %8447 = vrot.lane.b32.xlu1 %v8435_v2, %s16727_s17  ;;  %9494 = vmatprep.subr.bf16.mxu1 %v7864_v18 }
0x1189   : > { %8445 = vrot.lane.b32.xlu0 %v8434_v5, %s16727_s17  ;;  %9495 = vmatpush1.bf16.msra.mxu1 %v7863_v55  ;;  %v8573_v5 = vsel %vm1366_vm14, %v15993_v21, %v15991_v6  ;;  %v8644_v21 = vsel %vm662_vm2, %v16065_v42, %v16081_v59  ;;  %v8579_v6 = vmul.bf16 %v15983_v28, %v15670_v23 }
0x118a   : > { %v16258_v41 = vpop.permute.xlu1 %8928  ;;  %v7852_v20 = vpop.permute.xlu0 %7851  ;;  %v8582_v55 = vmul.bf16 %v8573_v5, %v15715_v17  ;;  %v8792_v5 = vsel %vm814_vm3, %v16175_v10, %v16188_v24 }
0x118b   : > { %v7861_v1 = vsel %vm814_vm3, %v7852_v20, %v7854_v47  ;;  %v8571_v47 = vsel %vm1366_vm14, %v15983_v28, %v15980_v52  ;;  %v8646_v20 = vsel %vm662_vm2, %v16078_v14, %v16087_v34  ;;  %v8652_v14 = vmul.bf16 %v16065_v42, %v15670_v23 }
0x118c   : > { %8451 = vrot.lane.b32.xlu1 %v8437_v33, %s16727_s17  ;;  %9413 = vmatpush1.bf16.msra.mxu0 %v7861_v1  ;;  %v8580_v54 = vmul.bf16 %v8571_v47, %v15700_v60 }
0x118d   : > { %8449 = vrot.lane.b32.xlu0 %v8436_v26, %s16727_s17  ;;  %v8653_v26 = vmul.bf16 %v8644_v21, %v15700_v60 }
0x118e   : > { %v16275_v49 = vpop.permute.xlu1 %8932  ;;  %v16282_v45 = vpop.permute.xlu0 %8930 }
0x1190   : > { %8518 = vrot.lane.b32.xlu1 %v8507_v15, %s16729_s1  ;;  %v8655_v15 = vmul.bf16 %v8646_v20, %v15715_v17  ;;  %v8864_v20 = vsel %vm890_vm4, %v16215_v4, %v16232_v0 }
0x1191   : > { %8443 = vrot.lane.b32.xlu0 %v8433_v53, %s16727_s17 }
0x1192   : > { %v7927_v43 = vpop.permute.xlu1 %7926  ;;  %v16291_v7 = vpop.permute.xlu0 %8934 }
0x1194   : > { %8522 = vrot.lane.b32.xlu1 %v8509_v9, %s16729_s1  ;;  %v8656_v9 = vmul.bf16 0, %v16087_v34 }
0x1195   : > { %8520 = vrot.lane.b32.xlu0 %v8508_v51, %s16729_s1 }
0x1196   : > { %v7931_v32 = vpop.permute.xlu1 %7930  ;;  %v7929_v27 = vpop.permute.xlu0 %7928 }
0x1197   : > { %v7935_v13 = vsel %vm738_vm1, %v7927_v43, %v7929_v27  ;;  %v7936_v46 = vsel %vm738_vm1, %v7929_v27, %v7931_v32 }
0x1198   : > { %8516 = vrot.lane.b32.xlu1 %v8506_v57, %s16729_s1  ;;  %9414 = vmatprep.subr.bf16.mxu0 %v7935_v13  ;;  %v8717_v57 = vsel %vm738_vm1, %v16123_v11, %v16119_v61  ;;  %v8729_v13 = vmul.bf16 0, %v16130_v48 }
0x1199   : > { %8524 = vrot.lane.b32.xlu0 %v8510_v29, %s16729_s1  ;;  %v8726_v38 = vmul.bf16 %v8717_v57, %v15700_v60 }
0x119a   : > { %v7925_v3 = vpop.permute.xlu1 %7924  ;;  %v7933_v2 = vpop.permute.xlu0 %7932 }
0x119b   : > { %v7934_v50 = vsel %vm738_vm1, %v7925_v3, %v7927_v43  ;;  %v7937_v52 = vsel %vm738_vm1, %v7931_v32, %v7933_v2  ;;  %v8718_v43 = vsel %vm738_vm1, %v16119_v61, %v16135_v44  ;;  %v8719_v61 = vsel %vm738_vm1, %v16135_v44, %v16130_v48 }
0x119c   : > { %8593 = vrot.lane.b32.xlu1 %v8581_v62, %s16730_s2  ;;  %9415 = vmatpush1.bf16.msra.mxu0 %v7934_v50  ;;  %v8727_v42 = vmul.bf16 %v8718_v43, %v15690_v31  ;;  %v8728_v3 = vmul.bf16 %v8719_v61, %v15715_v17  ;;  %v8725_v48 = vmul.bf16 %v16123_v11, %v15670_v23 }
0x119d   : > { %8591 = vrot.lane.b32.xlu0 %v8580_v54, %s16730_s2  ;;  %9496 = vmatprep.subr.bf16.mxu1 %v7937_v52  ;;  %v8790_v54 = vsel %vm814_vm3, %v16163_v22, %v16178_v12 }
0x119e   : > { %9497 = vmatpush1.bf16.msra.mxu1 %v7936_v46  ;;  %v16318_v18 = vpop.permute.xlu1 %9003  ;;  %v16324_v33 = vpop.permute.xlu0 %9001  ;;  %v8799_v44 = vmul.bf16 %v8790_v54, %v15700_v60  ;;  %v8791_v46 = vsel %vm814_vm3, %v16178_v12, %v16175_v10  ;;  %v8798_v10 = vmul.bf16 %v16163_v22, %v15670_v23 }
0x119f   : > { %v8800_v21 = vmul.bf16 %v8791_v46, %v15690_v31 }
0x11a0   : > { %8597 = vrot.lane.b32.xlu1 %v8583_v19, %s16730_s2  ;;  %v8801_v19 = vmul.bf16 %v8792_v5, %v15715_v17 }
0x11a1   : > { %8595 = vrot.lane.b32.xlu0 %v8582_v55, %s16730_s2 }
0x11a2   : > { %v16329_v30 = vpop.permute.xlu1 %9007  ;;  %v16336_v1 = vpop.permute.xlu0 %9005 }
0x11a4   : > { %8664 = vrot.lane.b32.xlu1 %v8653_v26, %s16731_s20 }
0x11a5   : > { %8589 = vrot.lane.b32.xlu0 %v8579_v6, %s16730_s2  ;;  %v8802_v6 = vmul.bf16 0, %v16188_v24  ;;  %v8873_v24 = vmul.bf16 %v8864_v20, %v15690_v31  ;;  %v9017_v20 = vmul.bf16 %v16324_v33, %v15670_v23 }
0x11a6   : > { %v8002_v53 = vpop.permute.xlu1 %8001  ;;  %v8000_v28 = vpop.permute.xlu0 %7999 }
0x11a7   : > { %v8008_v16 = vsel %vm662_vm2, %v8000_v28, %v8002_v53 }
0x11a8   : > { %8668 = vrot.lane.b32.xlu1 %v8655_v15, %s16731_s20  ;;  %9416 = vmatprep.subr.bf16.mxu0 %v8008_v16 }
0x11a9   : > { %8666 = vrot.lane.b32.xlu0 %v8654_v63, %s16731_s20 }
0x11aa   : > { %v8006_v59 = vpop.permute.xlu1 %8005  ;;  %v8004_v51 = vpop.permute.xlu0 %8003 }
0x11ab   : > { %v8010_v32 = vsel %vm662_vm2, %v8004_v51, %v8006_v59  ;;  %v8009_v29 = vsel %vm662_vm2, %v8002_v53, %v8004_v51  ;;  %v8863_v53 = vsel %vm890_vm4, %v16221_v40, %v16215_v4  ;;  %v8865_v4 = vsel %vm890_vm4, %v16232_v0, %v16229_v37 }
0x11ac   : > { %8662 = vrot.lane.b32.xlu1 %v8652_v14, %s16731_s20  ;;  %9498 = vmatprep.subr.bf16.mxu1 %v8010_v32  ;;  %v8872_v16 = vmul.bf16 %v8863_v53, %v15700_v60  ;;  %v8875_v59 = vmul.bf16 0, %v16229_v37  ;;  %v8874_v43 = vmul.bf16 %v8865_v4, %v15715_v17  ;;  %v8936_v51 = vsel %vm531_vm0, %v16258_v41, %v16282_v45 }
0x11ad   : > { %8670 = vrot.lane.b32.xlu0 %v8656_v9, %s16731_s20  ;;  %9499 = vmatpush1.bf16.msra.mxu1 %v8009_v29  ;;  %v8945_v0 = vmul.bf16 %v8936_v51, %v15700_v60  ;;  %v8871_v37 = vmul.bf16 %v16221_v40, %v15670_v23  ;;  %v8938_v29 = vsel %vm531_vm0, %v16275_v49, %v16291_v7 }
0x11ae   : > { %v16362_v34 = vpop.permute.xlu1 %9074  ;;  %v7998_v27 = vpop.permute.xlu0 %7997  ;;  %v8947_v61 = vmul.bf16 %v8938_v29, %v15715_v17 }
0x11af   : > { %v8007_v47 = vsel %vm662_vm2, %v7998_v27, %v8000_v28  ;;  %v9090_v4 = vmul.bf16 %v16362_v34, %v15670_v23 }
0x11b0   : > { %8739 = vrot.lane.b32.xlu1 %v8727_v42, %s16732_s12  ;;  %9417 = vmatpush1.bf16.msra.mxu0 %v8007_v47 }
0x11b1   : > { %8737 = vrot.lane.b32.xlu0 %v8726_v38, %s16732_s12  ;;  %v8937_v38 = vsel %vm531_vm0, %v16282_v45, %v16275_v49  ;;  %v8944_v49 = vmul.bf16 %v16258_v41, %v15670_v23 }
0x11b2   : > { %v16372_v62 = vpop.permute.xlu1 %9078  ;;  %v16378_v2 = vpop.permute.xlu0 %9076  ;;  %v8946_v40 = vmul.bf16 %v8937_v38, %v15690_v31 }
0x11b4   : > { %8743 = vrot.lane.b32.xlu1 %v8729_v13, %s16732_s12 }
0x11b5   : > { %8741 = vrot.lane.b32.xlu0 %v8728_v3, %s16732_s12 }
0x11b6   : > { %v8073_v50 = vpop.permute.xlu1 %8072  ;;  %v16388_v52 = vpop.permute.xlu0 %9080 }
0x11b8   : > { %8810 = vrot.lane.b32.xlu1 %v8799_v44, %s16733_s13  ;;  %v8948_v44 = vmul.bf16 0, %v16291_v7 }
0x11b9   : > { %8735 = vrot.lane.b32.xlu0 %v8725_v48, %s16732_s12  ;;  %s16896_s12 = sld [smem:[#allocation21_spill]] }
0x11ba   : > { %v8077_v55 = vpop.permute.xlu1 %8076  ;;  %v8075_v11 = vpop.permute.xlu0 %8074 }
0x11bb   : > { %v8081_v26 = vsel %vm1366_vm14, %v8073_v50, %v8075_v11  ;;  %v8082_v22 = vsel %vm1366_vm14, %v8075_v11, %v8077_v55 }
0x11bc   : > { %8814 = vrot.lane.b32.xlu1 %v8801_v19, %s16733_s13  ;;  %9418 = vmatprep.subr.bf16.mxu0 %v8081_v26 }
0x11bd   : > { %8812 = vrot.lane.b32.xlu0 %v8800_v21, %s16733_s13 }
0x11be   : > { %v8071_v12 = vpop.permute.xlu1 %8070  ;;  %v8079_v8 = vpop.permute.xlu0 %8078 }
0x11bf   : > { %v8080_v15 = vsel %vm1366_vm14, %v8071_v12, %v8073_v50  ;;  %v8083_v63 = vsel %vm1366_vm14, %v8077_v55, %v8079_v8  ;;  %vm16865_vm14 = vcmask 531456  }
0x11c0   : > { %8808 = vrot.lane.b32.xlu1 %v8798_v10, %s16733_s13  ;;  %9419 = vmatpush1.bf16.msra.mxu0 %v8080_v15  ;;  %v9010_v50 = vsel %vm16865_vm14, %v16318_v18, %v16336_v1  ;;  %vm16866_vm10 = vmmov %vm16865_vm14  ;;  %v9082_v10 = vsel %vm843_vm6, %v16362_v34, %v16378_v2  ;;  %v9083_v15 = vsel %vm843_vm6, %v16378_v2, %v16372_v62  ;;  %vm16871_vm14 = vcmask 7168  }
0x11c1   : > { %8816 = vrot.lane.b32.xlu0 %v8802_v6, %s16733_s13  ;;  %9500 = vmatprep.subr.bf16.mxu1 %v8083_v63  ;;  %v9009_v5 = vsel %vm16866_vm10, %v16324_v33, %v16318_v18  ;;  %v9019_v41 = vmul.bf16 %v9010_v50, %v15690_v31  ;;  %vm16867_vm9 = vmmov %vm16866_vm10  ;;  %v9021_v18 = vmul.bf16 0, %v16329_v30  ;;  %v9092_v33 = vmul.bf16 %v9083_v15, %v15690_v31 }
0x11c2   : > { %9501 = vmatpush1.bf16.msra.mxu1 %v8082_v22  ;;  %v16415_v28 = vpop.permute.xlu1 %9149  ;;  %v16418_v14 = vpop.permute.xlu0 %9147  ;;  %v9018_v7 = vmul.bf16 %v9009_v5, %v15700_v60  ;;  %v9011_v21 = vsel %vm16867_vm9, %v16336_v1, %v16329_v30  ;;  %v9091_v1 = vmul.bf16 %v9082_v10, %v15700_v60  ;;  %v9084_v30 = vsel %vm843_vm6, %v16372_v62, %v16388_v52  ;;  %vm16872_vm10 = vmmov %vm16871_vm14  ;;  %v16571_v10 = vld [vmem:[%s16864_s0 + $0x8] sm:$0xff] }
0x11c3   : > { %v9020_v26 = vmul.bf16 %v9011_v21, %v15715_v17  ;;  %v9093_v63 = vmul.bf16 %v9084_v30, %v15715_v17  ;;  %vm16873_vm9 = vmmov %vm16872_vm10  ;;  %v10508_v30 = vcombine.high %v16571_v10, %v16571_v10 }
0x11c4   : > { %8885 = vrot.lane.b32.xlu1 %v8873_v24, %s16734_s11 }
0x11c5   : > { %8883 = vrot.lane.b32.xlu0 %v8872_v16, %s16734_s11 }
0x11c6   : > { %v16426_v9 = vpop.permute.xlu1 %9153 }
0x11c7   : > { %v16432_v57 = vpop.permute.xlu0 %9151 }
0x11c8   : > { %8889 = vrot.lane.b32.xlu1 %v8875_v59, %s16734_s11  ;;  %v9156_v51 = vsel %vm767_vm7, %v16415_v28, %v16432_v57  ;;  %v9157_v38 = vsel %vm767_vm7, %v16432_v57, %v16426_v9 }
0x11c9   : > { %8887 = vrot.lane.b32.xlu0 %v8874_v43, %s16734_s11  ;;  %v9094_v43 = vmul.bf16 0, %v16388_v52  ;;  %v9165_v34 = vmul.bf16 %v9156_v51, %v15690_v31 }
0x11ca   : > { %v8148_v32 = vpop.permute.xlu1 %8147 }
0x11cb   : > { %v8146_v42 = vpop.permute.xlu0 %8145 }
0x11cc   : > { %8956 = vrot.lane.b32.xlu1 %v8945_v0, %s16722_s29  ;;  %v8154_v27 = vsel %vm1442_vm15, %v8146_v42, %v8148_v32 }
0x11cd   : > { %8881 = vrot.lane.b32.xlu0 %v8871_v37, %s16734_s11  ;;  %9420 = vmatprep.subr.bf16.mxu0 %v8154_v27 }
0x11ce   : > { %v8152_v47 = vpop.permute.xlu1 %8151 }
0x11cf   : > { %v8150_v13 = vpop.permute.xlu0 %8149 }
0x11d0   : > { %v8155_v3 = vsel %vm1442_vm15, %v8148_v32, %v8150_v13  ;;  %8960 = vrot.lane.b32.xlu1 %v8947_v61, %s16722_s29  ;;  %v8156_v54 = vsel %vm1442_vm15, %v8150_v13, %v8152_v47  ;;  %v9155_v32 = vsel %vm767_vm7, %v16418_v14, %v16415_v28  ;;  %v9167_v61 = vmul.bf16 0, %v16426_v9 }
0x11d1   : > { %8958 = vrot.lane.b32.xlu0 %v8946_v40, %s16722_s29  ;;  %9502 = vmatprep.subr.bf16.mxu1 %v8156_v54  ;;  %v9164_v52 = vmul.bf16 %v9155_v32, %v15700_v60  ;;  %v9166_v40 = vmul.bf16 %v9157_v38, %v15715_v17 }
0x11d2   : > { %9503 = vmatpush1.bf16.msra.mxu1 %v8155_v3  ;;  %v16456_v45 = vpop.permute.xlu1 %9220 }
0x11d3   : > { %v8144_v48 = vpop.permute.xlu0 %8143 }
0x11d4   : > { %v8153_v46 = vsel %vm1442_vm15, %v8144_v48, %v8146_v42  ;;  %8954 = vrot.lane.b32.xlu1 %v8944_v49, %s16722_s29  ;;  %vm16868_vm15 = vmmov %vm16863_vm5  ;;  %v9163_v49 = vmul.bf16 %v16418_v14, %v15670_v23 }
0x11d5   : > { %8962 = vrot.lane.b32.xlu0 %v8948_v44, %s16722_s29  ;;  %9421 = vmatpush1.bf16.msra.mxu0 %v8153_v46 }
0x11d6   : > { %v16469_v19 = vpop.permute.xlu1 %9224 }
0x11d7   : > { %v16472_v55 = vpop.permute.xlu0 %9222 }
0x11d8   : > { %9031 = vrot.lane.b32.xlu1 %v9019_v41, %s16721_s24  ;;  %v9228_v13 = vsel %vm691_vm8, %v16456_v45, %v16472_v55  ;;  %v9229_v48 = vsel %vm691_vm8, %v16472_v55, %v16469_v19  ;;  %v9236_v55 = vmul.bf16 %v16456_v45, %v15670_v23 }
0x11d9   : > { %9029 = vrot.lane.b32.xlu0 %v9018_v7, %s16721_s24  ;;  %v9237_v9 = vmul.bf16 %v9228_v13, %v15700_v60  ;;  %v9238_v46 = vmul.bf16 %v9229_v48, %v15690_v31 }
0x11da   : > { %v8219_v11 = vpop.permute.xlu1 %8218 }
0x11db   : > { %v16484_v12 = vpop.permute.xlu0 %9226 }
0x11dc   : > { %9035 = vrot.lane.b32.xlu1 %v9021_v18, %s16721_s24  ;;  %v9230_v44 = vsel %vm691_vm8, %v16469_v19, %v16484_v12  ;;  %v9240_v18 = vmul.bf16 0, %v16484_v12 }
0x11dd   : > { %9033 = vrot.lane.b32.xlu0 %v9020_v26, %s16721_s24 }
0x11de   : > { %v8223_v6 = vpop.permute.xlu1 %8222 }
0x11df   : > { %v8221_v8 = vpop.permute.xlu0 %8220 }
0x11e0   : > { %9102 = vrot.lane.b32.xlu1 %v9091_v1, %s16717_s16  ;;  %v8227_v53 = vsel %vm16868_vm15, %v8219_v11, %v8221_v8  ;;  %v8228_v2 = vsel %vm16863_vm5, %v8221_v8, %v8223_v6  ;;  %vm16874_vm15 = vmmov %vm16873_vm9 }
0x11e1   : > { %9027 = vrot.lane.b32.xlu0 %v9017_v20, %s16721_s24  ;;  %9422 = vmatprep.subr.bf16.mxu0 %v8227_v53  ;;  %s16879_s24 = sld [smem:[#allocation20_spill]] }
0x11e2   : > { %v8217_v22 = vpop.permute.xlu1 %8216 }
0x11e3   : > { %v8225_v24 = vpop.permute.xlu0 %8224  ;;  %v8226_v16 = vsel %vm16869_vm12, %v8217_v22, %v8219_v11  ;;  %vm16875_vm12 = vcmask 1039360  }
0x11e4   : > { %9106 = vrot.lane.b32.xlu1 %v9093_v63, %s16717_s16  ;;  %9423 = vmatpush1.bf16.msra.mxu0 %v8226_v16  ;;  %v8229_v62 = vsel %vm16870_vm13, %v8223_v6, %v8225_v24  ;;  %vm16876_vm13 = vmmov %vm16875_vm12  ;;  %v10505_v6 = vcombine.low %v16267_v39, %v16267_v39 }
0x11e5   : > { %9104 = vrot.lane.b32.xlu0 %v9092_v33, %s16717_s16  ;;  %9504 = vmatprep.subr.bf16.mxu1 %v8229_v62  ;;  %vm16877_vm5 = vmmov %vm16875_vm12 }
0x11e6   : > { %9505 = vmatpush1.bf16.msra.mxu1 %v8228_v2  ;;  %v8294_v59 = vpop.permute.xlu1 %8293 }
0x11e7   : > { %v8292_v0 = vpop.permute.xlu0 %8291 }
0x11e8   : > { %9100 = vrot.lane.b32.xlu1 %v9090_v4, %s16717_s16  ;;  %v8300_v37 = vsel %vm16871_vm14, %v8292_v0, %v8294_v59  ;;  %vm16878_vm14 = vmmov %vm16877_vm5 }
0x11e9   : > { %9108 = vrot.lane.b32.xlu0 %v9094_v43, %s16717_s16  ;;  %9424 = vmatprep.subr.bf16.mxu0 %v8300_v37 }
0x11ea   : > { %v8298_v29 = vpop.permute.xlu1 %8297 }
0x11eb   : > { %v8296_v42 = vpop.permute.xlu0 %8295 }
0x11ec   : > { %v8301_v27 = vsel %vm16872_vm10, %v8294_v59, %v8296_v42  ;;  %9177 = vrot.lane.b32.xlu1 %v9165_v34, %s16718_s23  ;;  %v8302_v28 = vsel %vm16873_vm9, %v8296_v42, %v8298_v29  ;;  %vm16880_vm10 = vcmask 392192   ;;  %vm16881_vm9 = vcmask 982016  }
0x11ed   : > { %9175 = vrot.lane.b32.xlu0 %v9164_v52, %s16718_s23  ;;  %9506 = vmatprep.subr.bf16.mxu1 %v8302_v28 }
0x11ee   : > { %9507 = vmatpush1.bf16.msra.mxu1 %v8301_v27  ;;  %v8373_v47 = vpop.permute.xlu1 %8372 }
0x11ef   : > { %v8290_v57 = vpop.permute.xlu0 %8289  ;;  %9508 = vmatprep.subr.bf16.mxu1 %v15715_v17 }
0x11f0   : > { %v8299_v3 = vsel %vm16874_vm15, %v8290_v57, %v8292_v0  ;;  %9181 = vrot.lane.b32.xlu1 %v9167_v61, %s16718_s23  ;;  %vm16882_vm15 = vmmov %vm16880_vm10 }
0x11f1   : > { %9179 = vrot.lane.b32.xlu0 %v9166_v40, %s16718_s23  ;;  %9425 = vmatpush1.bf16.msra.mxu0 %v8299_v3 }
0x11f2   : > { %9426 = vmatprep.subr.bf16.mxu0 %v15700_v60  ;;  %9509 = vmatpush1.bf16.msra.mxu1 %v15690_v31  ;;  %v8377_v54 = vpop.permute.xlu1 %8376  ;;  %v9239_v60 = vmul.bf16 %v9230_v44, %v15715_v17 }
0x11f3   : > { %v8375_v50 = vpop.permute.xlu0 %8374 }
0x11f4   : > { %9248 = vrot.lane.b32.xlu1 %v9237_v9, %s16719_s28  ;;  %v8381_v5 = vsel %vm16875_vm12, %v8373_v47, %v8375_v50  ;;  %v8382_v21 = vsel %vm16878_vm14, %v8375_v50, %v8377_v54  ;;  %vm16883_vm12 = vmmov %vm16881_vm9 }
0x11f5   : > { %9173 = vrot.lane.b32.xlu0 %v9163_v49, %s16718_s23  ;;  %9427 = vmatpush1.bf16.msra.mxu0 %v15670_v23  ;;  %v9378_v23 = vld [vmem:[%s16879_s24] sm:$0xff] }
0x11f6   : > { %9428 = vmatprep.subr.bf16.mxu0 %v8381_v5  ;;  %v8371_v14 = vpop.permute.xlu1 %8370 }
0x11f7   : > { %v8379_v41 = vpop.permute.xlu0 %8378  ;;  %v8380_v7 = vsel %vm16876_vm13, %v8371_v14, %v8373_v47  ;;  %vm16884_vm13 = vmmov %vm16881_vm9 }
0x11f8   : > { %9252 = vrot.lane.b32.xlu1 %v9239_v60, %s16719_s28  ;;  %v8383_v19 = vsel %vm16877_vm5, %v8377_v54, %v8379_v41  ;;  %vm16886_vm5 = vcmask 973824  }
0x11f9   : > { %9250 = vrot.lane.b32.xlu0 %v9238_v46, %s16719_s28  ;;  %9429 = vmatpush1.bf16.msra.mxu0 %v8380_v7  ;;  %vm16887_vm14 = vmmov %vm16886_vm5 }
0x11fa   : > { %9510 = vmatprep.subr.bf16.mxu1 %v8383_v19  ;;  %v8448_v17 = vpop.permute.xlu1 %8447 }
0x11fb   : > { %9511 = vmatpush1.bf16.msra.mxu1 %v8382_v21  ;;  %v8446_v31 = vpop.permute.xlu0 %8445 }
0x11fc   : > { %9246 = vrot.lane.b32.xlu1 %v9236_v55, %s16719_s28  ;;  %v8454_v11 = vsel %vm1489_vm11, %v8446_v31, %v8448_v17 }
0x11fd   : > { %9254 = vrot.lane.b32.xlu0 %v9240_v18, %s16719_s28  ;;  %9430 = vmatprep.subr.bf16.mxu0 %v8454_v11  ;;  %s16894_s28 = sld [smem:[#allocation5_spill]] }
0x11fe   : > { %v8452_v26 = vpop.permute.xlu1 %8451 }
0x11ff   : > { %v8450_v45 = vpop.permute.xlu0 %8449 }
0x1200   : > { %v8455_v12 = vsel %vm1489_vm11, %v8448_v17, %v8450_v45  ;;  %v8456_v1 = vsel %vm1489_vm11, %v8450_v45, %v8452_v26 }
0x1201   : > { %9381 = vperm.xlu0 %10598, %v9378_v23   ;;  %9512 = vmatprep.subr.bf16.mxu1 %v8456_v1 }
0x1202   : > { %9513 = vmatpush1.bf16.msra.mxu1 %v8455_v12  ;;  %v8519_v20 = vpop.permute.xlu1 %8518 }
0x1203   : > { %v8444_v8 = vpop.permute.xlu0 %8443  ;;  %s16895_s1 = sshll.u32 %s16894_s28, 5 }
0x1204   : > { %v8453_v15 = vsel %vm1489_vm11, %v8444_v8, %v8446_v31  ;;  %vm16885_vm11 = vmmov %vm16881_vm9  ;;  %s430_s13 = scalar_lea.vmem %s16896_s12, %s16895_s1 }
0x1205   : > { %9431 = vmatpush1.bf16.msra.mxu0 %v8453_v15  ;;  %9515 = vmatmul.mubr.bf16.vlgmr.msra.gmra.mrb[16].mxu1 %v10505_v6 }
0x1206   : > { %v8523_v53 = vpop.permute.xlu1 %8522  ;;  %10510 = vmatprep.mubr.msk.bf16.mxu1 %vm16880_vm10, %v10508_v30  ;;  %vm16888_vm10 = vmmov %vm16886_vm5 }
0x1207   : > { %v8521_v63 = vpop.permute.xlu0 %8520 }
0x1208   : > { %v8527_v22 = vsel %vm16881_vm9, %v8519_v20, %v8521_v63  ;;  %9433 = vmatmul.mubr.bf16.vlgmr.msra.gmra.mrb[16].mxu0 %v10505_v6  ;;  %v8528_v62 = vsel %vm16885_vm11, %v8521_v63, %v8523_v53  ;;  %vm16889_vm9 = vmmov %vm16886_vm5 }
0x1209   : > { %9441 = vmatprep.subr.bf16.mxu0 %v8527_v22  ;;  %10509 = vmatprep.mubr.msk.bf16.mxu0 %vm16882_vm15, %v10508_v30 }
0x120a   : > { %v8517_v39 = vpop.permute.xlu1 %8516 }
0x120b   : > { %v8525_v33 = vpop.permute.xlu0 %8524  ;;  %v8526_v24 = vsel %vm16883_vm12, %v8517_v39, %v8519_v20 }
0x120c   : > { %9442 = vmatpush1.bf16.msra.mxu0 %v8526_v24  ;;  %v8529_v16 = vsel %vm16884_vm13, %v8523_v53, %v8525_v33 }
0x120d   : > { %9523 = vmatprep.subr.bf16.mxu1 %v8529_v16 }
0x120e   : > { %9524 = vmatpush1.bf16.msra.mxu1 %v8528_v62  ;;  %v8594_v2 = vpop.permute.xlu1 %8593 }
0x120f   : > { %v8592_v4 = vpop.permute.xlu0 %8591 }
0x1210   : > { %v8600_v59 = vsel %vm16886_vm5, %v8592_v4, %v8594_v2 }
0x1211   : > { %9443 = vmatprep.subr.bf16.mxu0 %v8600_v59 }
0x1212   : > { %v8598_v43 = vpop.permute.xlu1 %8597 }
0x1213   : > { %v8596_v51 = vpop.permute.xlu0 %8595 }
0x1214   : > { %v8601_v0 = vsel %vm16887_vm14, %v8594_v2, %v8596_v51  ;;  %v8602_v32 = vsel %vm16888_vm10, %v8596_v51, %v8598_v43 }
0x1215   : > { %9525 = vmatprep.subr.bf16.mxu1 %v8602_v32 }
0x1216   : > { %9526 = vmatpush1.bf16.msra.mxu1 %v8601_v0  ;;  %v8665_v37 = vpop.permute.xlu1 %8664 }
0x1217   : > { %v8590_v34 = vpop.permute.xlu0 %8589 }
0x1218   : > { %v8599_v29 = vsel %vm16889_vm9, %v8590_v34, %v8592_v4 }
0x1219   : > { %9444 = vmatpush1.bf16.msra.mxu0 %v8599_v29 }
0x121a   : > { %v8669_v52 = vpop.permute.xlu1 %8668 }
0x121b   : > { %v8667_v42 = vpop.permute.xlu0 %8666 }
0x121c   : > { %v8673_v38 = vsel %vm691_vm8, %v8665_v37, %v8667_v42  ;;  %v8674_v40 = vsel %vm691_vm8, %v8667_v42, %v8669_v52 }
0x121d   : > { %9445 = vmatprep.subr.bf16.mxu0 %v8673_v38 }
0x121e   : > { %v8663_v27 = vpop.permute.xlu1 %8662 }
0x121f   : > { %v8671_v28 = vpop.permute.xlu0 %8670  ;;  %v8672_v61 = vsel %vm691_vm8, %v8663_v27, %v8665_v37 }
0x1220   : > { %9446 = vmatpush1.bf16.msra.mxu0 %v8672_v61  ;;  %v8675_v47 = vsel %vm691_vm8, %v8669_v52, %v8671_v28 }
0x1221   : > { %9527 = vmatprep.subr.bf16.mxu1 %v8675_v47 }
0x1222   : > { %9528 = vmatpush1.bf16.msra.mxu1 %v8674_v40  ;;  %v8740_v13 = vpop.permute.xlu1 %8739 }
0x1223   : > { %v8738_v57 = vpop.permute.xlu0 %8737 }
0x1224   : > { %v8746_v3 = vsel %vm767_vm7, %v8738_v57, %v8740_v13 }
0x1225   : > { %9447 = vmatprep.subr.bf16.mxu0 %v8746_v3 }
0x1226   : > { %v8744_v9 = vpop.permute.xlu1 %8743 }
0x1227   : > { %v8742_v54 = vpop.permute.xlu0 %8741 }
0x1228   : > { %v8747_v49 = vsel %vm767_vm7, %v8740_v13, %v8742_v54  ;;  %v8748_v44 = vsel %vm767_vm7, %v8742_v54, %v8744_v9 }
0x1229   : > { %9529 = vmatprep.subr.bf16.mxu1 %v8748_v44 }
0x122a   : > { %9530 = vmatpush1.bf16.msra.mxu1 %v8747_v49  ;;  %v8811_v50 = vpop.permute.xlu1 %8810 }
0x122b   : > { %v8736_v48 = vpop.permute.xlu0 %8735 }
0x122c   : > { %v8745_v5 = vsel %vm767_vm7, %v8736_v48, %v8738_v57  ;;  %vm16890_vm7 = vcmask 531456  }
0x122d   : > { %9448 = vmatpush1.bf16.msra.mxu0 %v8745_v5  ;;  %vm16891_vm8 = vmmov %vm16890_vm7 }
0x122e   : > { %v8815_v60 = vpop.permute.xlu1 %8814  ;;  %vm16892_vm15 = vmmov %vm16890_vm7 }
0x122f   : > { %v8813_v14 = vpop.permute.xlu0 %8812  ;;  %vm16893_vm12 = vmmov %vm16890_vm7 }
0x1230   : > { %v8819_v46 = vsel %vm843_vm6, %v8811_v50, %v8813_v14  ;;  %v8820_v21 = vsel %vm843_vm6, %v8813_v14, %v8815_v60 }
0x1231   : > { %9449 = vmatprep.subr.bf16.mxu0 %v8819_v46  ;;  %v10507_v46 = vcombine.low %v16571_v10, %v16571_v10  ;;  %v10530_v10 = vadd.f32 %v15667_v56, %v15343_v36 }
0x1232   : > { %v8809_v41 = vpop.permute.xlu1 %8808 }
0x1233   : > { %v8817_v7 = vpop.permute.xlu0 %8816  ;;  %v8818_v19 = vsel %vm843_vm6, %v8809_v41, %v8811_v50 }
0x1234   : > { %9450 = vmatpush1.bf16.msra.mxu0 %v8818_v19  ;;  %v8821_v55 = vsel %vm843_vm6, %v8815_v60, %v8817_v7 }
0x1235   : > { %9531 = vmatprep.subr.bf16.mxu1 %v8821_v55 }
0x1236   : > { %9532 = vmatpush1.bf16.msra.mxu1 %v8820_v21  ;;  %v8886_v17 = vpop.permute.xlu1 %8885  ;;  %v10529_v21 = vadd.f32 %v15662_v58, %v15343_v36  ;;  %v10534_v58 = vadd.f32 %v15683_v25, %v15343_v36 }
0x1237   : > { %v8884_v18 = vpop.permute.xlu0 %8883 }
0x1238   : > { %v8892_v31 = vsel %vm16890_vm7, %v8884_v18, %v8886_v17 }
0x1239   : > { %9451 = vmatprep.subr.bf16.mxu0 %v8892_v31 }
0x123a   : > { %v8890_v11 = vpop.permute.xlu1 %8889 }
0x123b   : > { %v8888_v26 = vpop.permute.xlu0 %8887 }
0x123c   : > { %v8893_v23 = vsel %vm16891_vm8, %v8886_v17, %v8888_v26  ;;  %v8894_v45 = vsel %vm16892_vm15, %v8888_v26, %v8890_v11 }
0x123d   : > { %9533 = vmatprep.subr.bf16.mxu1 %v8894_v45 }
0x123e   : > { %9534 = vmatpush1.bf16.msra.mxu1 %v8893_v23  ;;  %v8957_v12 = vpop.permute.xlu1 %8956  ;;  %v10533_v23 = vadd.f32 %v15680_v35, %v15343_v36 }
0x123f   : > { %v8882_v1 = vpop.permute.xlu0 %8881 }
0x1240   : > { %v8891_v6 = vsel %vm16893_vm12, %v8882_v1, %v8884_v18 }
0x1241   : > { %9452 = vmatpush1.bf16.msra.mxu0 %v8891_v6 }
0x1242   : > { %v8961_v20 = vpop.permute.xlu1 %8960 }
0x1243   : > { %v8959_v30 = vpop.permute.xlu0 %8958 }
0x1244   : > { %v8965_v8 = vsel %vm531_vm0, %v8957_v12, %v8959_v30  ;;  %v8966_v39 = vsel %vm531_vm0, %v8959_v30, %v8961_v20 }
0x1245   : > { %9453 = vmatprep.subr.bf16.mxu0 %v8965_v8 }
0x1246   : > { %v8955_v15 = vpop.permute.xlu1 %8954 }
0x1247   : > { %v8963_v53 = vpop.permute.xlu0 %8962  ;;  %v8964_v63 = vsel %vm531_vm0, %v8955_v15, %v8957_v12 }
0x1248   : > { %9454 = vmatpush1.bf16.msra.mxu0 %v8964_v63  ;;  %v8967_v22 = vsel %vm531_vm0, %v8961_v20, %v8963_v53 }
0x1249   : > { %9535 = vmatprep.subr.bf16.mxu1 %v8967_v22 }
0x124a   : > { %9536 = vmatpush1.bf16.msra.mxu1 %v8966_v39  ;;  %v9032_v33 = vpop.permute.xlu1 %9031 }
0x124b   : > { %v9030_v24 = vpop.permute.xlu0 %9029 }
0x124c   : > { %v9038_v16 = vsel %vm890_vm4, %v9030_v24, %v9032_v33 }
0x124d   : > { %9455 = vmatprep.subr.bf16.mxu0 %v9038_v16 }
0x124e   : > { %v9036_v62 = vpop.permute.xlu1 %9035 }
0x124f   : > { %v9034_v2 = vpop.permute.xlu0 %9033 }
0x1250   : > { %v9039_v4 = vsel %vm890_vm4, %v9032_v33, %v9034_v2  ;;  %v9040_v59 = vsel %vm890_vm4, %v9034_v2, %v9036_v62 }
0x1251   : > { %9537 = vmatprep.subr.bf16.mxu1 %v9040_v59 }
0x1252   : > { %9538 = vmatpush1.bf16.msra.mxu1 %v9039_v4  ;;  %v9103_v43 = vpop.permute.xlu1 %9102 }
0x1253   : > { %v9028_v51 = vpop.permute.xlu0 %9027 }
0x1254   : > { %v9037_v0 = vsel %vm890_vm4, %v9028_v51, %v9030_v24 }
0x1255   : > { %9456 = vmatpush1.bf16.msra.mxu0 %v9037_v0 }
0x1256   : > { %v9107_v32 = vpop.permute.xlu1 %9106 }
0x1257   : > { %v9105_v37 = vpop.permute.xlu0 %9104 }
0x1258   : > { %v9111_v34 = vsel %vm814_vm3, %v9103_v43, %v9105_v37  ;;  %v9112_v27 = vsel %vm814_vm3, %v9105_v37, %v9107_v32 }
0x1259   : > { %9457 = vmatprep.subr.bf16.mxu0 %v9111_v34 }
0x125a   : > { %v9101_v29 = vpop.permute.xlu1 %9100 }
0x125b   : > { %v9109_v52 = vpop.permute.xlu0 %9108  ;;  %v9110_v42 = vsel %vm814_vm3, %v9101_v29, %v9103_v43 }
0x125c   : > { %9458 = vmatpush1.bf16.msra.mxu0 %v9110_v42  ;;  %v9113_v38 = vsel %vm814_vm3, %v9107_v32, %v9109_v52 }
0x125d   : > { %9539 = vmatprep.subr.bf16.mxu1 %v9113_v38 }
0x125e   : > { %9540 = vmatpush1.bf16.msra.mxu1 %v9112_v27  ;;  %v9178_v28 = vpop.permute.xlu1 %9177 }
0x125f   : > { %v9176_v61 = vpop.permute.xlu0 %9175 }
0x1260   : > { %v9184_v47 = vsel %vm738_vm1, %v9176_v61, %v9178_v28 }
0x1261   : > { %9459 = vmatprep.subr.bf16.mxu0 %v9184_v47 }
0x1262   : > { %v9182_v40 = vpop.permute.xlu1 %9181 }
0x1263   : > { %v9180_v13 = vpop.permute.xlu0 %9179 }
0x1264   : > { %v9185_v57 = vsel %vm738_vm1, %v9178_v28, %v9180_v13  ;;  %v9186_v3 = vsel %vm738_vm1, %v9180_v13, %v9182_v40 }
0x1265   : > { %9541 = vmatprep.subr.bf16.mxu1 %v9186_v3 }
0x1266   : > { %9542 = vmatpush1.bf16.msra.mxu1 %v9185_v57  ;;  %v9249_v9 = vpop.permute.xlu1 %9248 }
0x1267   : > { %v9174_v54 = vpop.permute.xlu0 %9173 }
0x1268   : > { %v9183_v49 = vsel %vm738_vm1, %v9174_v54, %v9176_v61 }
0x1269   : > { %9460 = vmatpush1.bf16.msra.mxu0 %v9183_v49 }
0x126a   : > { %v9253_v44 = vpop.permute.xlu1 %9252 }
0x126b   : > { %v9251_v50 = vpop.permute.xlu0 %9250 }
0x126c   : > { %v9257_v48 = vsel %vm662_vm2, %v9249_v9, %v9251_v50  ;;  %v9258_v7 = vsel %vm662_vm2, %v9251_v50, %v9253_v44 }
0x126d   : > { %9461 = vmatprep.subr.bf16.mxu0 %v9257_v48 }
0x126e   : > { %v9247_v5 = vpop.permute.xlu1 %9246 }
0x126f   : > { %v9255_v60 = vpop.permute.xlu0 %9254  ;;  %v9256_v14 = vsel %vm662_vm2, %v9247_v5, %v9249_v9 }
0x1270   : > { %9462 = vmatpush1.bf16.msra.mxu0 %v9256_v14  ;;  %v9259_v41 = vsel %vm662_vm2, %v9253_v44, %v9255_v60 }
0x1271   : > { %9543 = vmatprep.subr.bf16.mxu1 %v9259_v41 }
0x1272   : > { %9544 = vmatpush1.bf16.msra.mxu1 %v9258_v7 }
0x1273   : > { %9474 = vmatmul.mubr.bf16.vlgmr.msra.gmra.mrb[16].mxu0 %v10507_v46 }
0x1275   : > { %9556 = vmatmul.mubr.bf16.vlgmr.msra.gmra.mrb[16].mxu1 %v10507_v46 }
0x1280   : > { %v9382_v19 = vpop.permute.xlu0 %9381 }
0x1346   : > { %v9475_v55 = vpop.f32.mrb[16].mxu0 }
0x1347   : > { %v10535_v17 = vadd.f32 %v9475_v55, %v9382_v19  ;;  %v9477_v18 = vpop.f32.mrb[17].mxu0 }
0x1348   : > { %v10536_v31 = vadd.f32 %v9477_v18, %v9382_v19  ;;  %v9557_v11 = vpop.f32.mrb[16].mxu1  ;;  %v9479_v26 = vpop.f32.mrb[18].mxu0 }
0x1349   : > { %v9564_v45 = vadd.f32 %v10535_v17, %v10529_v21  ;;  %v10537_v12 = vadd.f32 %v9557_v11, %v9382_v19  ;;  %v9559_v1 = vpop.f32.mrb[17].mxu1  ;;  %v9480_v6 = vpop.f32.mrb[19].mxu0 }
0x134a   : > { %v9565_v20 = vadd.f32 %v10536_v31, %v10530_v10  ;;  %v10538_v56 = vadd.f32 %v9559_v1, %v9382_v19  ;;  %v9561_v30 = vpop.f32.mrb[18].mxu1 }
0x134b   : > { %v9568_v8 = vmax.f32 %v9564_v45, 0.0  ;;  %v9566_v15 = vadd.f32 %v10537_v12, %v10533_v23  ;;  %v9562_v53 = vpop.f32.mrb[19].mxu1 }
0x134c   : > { %v9569_v63 = vmax.f32 %v9565_v20, 0.0  ;;  %v9567_v35 = vadd.f32 %v10538_v56, %v10534_v58 }
0x134d   : > { %9572 = vst [vmem:[%s430_s13] sm:$0xff] %v9568_v8  ;;  %v9570_v22 = vmax.f32 %v9566_v15, 0.0 }
0x134e   : > { %9573 = vst [vmem:[%s430_s13 + $0x8] sm:$0xff] %v9569_v63  ;;  %v9571_v39 = vmax.f32 %v9567_v35, 0.0 }
0x134f   : > { %9574 = vst [vmem:[%s430_s13 + $0x10] sm:$0xff] %v9570_v22 }
0x1350   : > { %9575 = vst [vmem:[%s430_s13 + $0x18] sm:$0xff] %v9571_v39 }
0x1351 PF: > { %s16897_s11 = sld [smem:[#allocation4_spill]] }
0x1357   : > { %s22_s21 = sadd.s32 1, %s16897_s11  }
0x1358   : > { %p19_p4 = scmp.ge.s32.totalorder %s22_s21, 4  }
0x135a   :  { %21 = sbr.rel (!%p19_p4) target bundleno = 9 (0x9), region = 126 }

</bundles_post_ra>
